<compile_context>
chip_gen: v7x
topology: tpu7x:2x2x1
jax: 0.10.0
libtpu: 0.0.40
codegen_flags: <defaults>
</compile_context>

<pallas_src>
import numpy as np
import jax
import jax.numpy as jnp
from jax.experimental import pallas as pl
from jax.experimental.pallas import tpu as pltpu

_LN_EPS = 1e-5  # nn.LayerNorm default. TODO(synk): LayerNorm2d source not given (ConvNeXt often uses 1e-6).


def _vmem_limit_bytes():
    """Generation-aware VMEM budget (~96 MiB on v5e/v6e, ~48 MiB on v7x)."""
    cap = None
    try:
        cap = getattr(pltpu.get_tpu_info(), "vmem_capacity_bytes", None)
    except Exception:
        cap = None
    if not cap:
        cap = 64 * 1024 * 1024
    return int(cap) * 3 // 4


_VMEM_LIMIT = _vmem_limit_bytes()


def _erf_gelu(x):
    # PyTorch nn.GELU() default (exact erf form; tanh approx would hit the EUP
    # but changes numerics vs. the reference module).
    return 0.5 * x * (1.0 + jax.lax.erf(x * 0.7071067811865476))


# ------------------------- fused DownsampleConvNextBlock ---------------------

def _block_kernel(x_ref, wt_ref, wb_ref, db_ref, dww_ref, dwb_ref,
                  g_ref, be_ref, w1_ref, b1_ref, w2_ref, b2_ref,
                  o_ref, xt_s, xb_s, ypad_s, hn_s):
    """One DownsampleConvNextBlock for a single image, fully fused in VMEM."""
    _, Ho, _, Wo, _ = x_ref.shape
    HW, Cout = o_ref.shape[1], o_ref.shape[2]

    # ---- 2x2 stride-2 conv as two bf16 MXU matmuls --------------------------
    # x_ref views the raw NHWC input as (Ho, 2, Wo, 2*Cin): the W-parity /
    # channel merge is a free bitcast done in the wrapper; the H-parity split
    # and spatial flatten happen here via static VMEM row stores (no reshape
    # relayouts, no HBM transpose).
    x = x_ref[0]                                          # (Ho, 2, Wo, 2*Cin)
    for oh in range(Ho):
        xt_s[oh * Wo:(oh + 1) * Wo, :] = x[oh, 0]
        xb_s[oh * Wo:(oh + 1) * Wo, :] = x[oh, 1]
    y = (jnp.dot(xt_s[...].astype(jnp.bfloat16), wt_ref[...],
                 preferred_element_type=jnp.float32)
         + jnp.dot(xb_s[...].astype(jnp.bfloat16), wb_ref[...],
                   preferred_element_type=jnp.float32)
         + db_ref[...])                                   # (HW, Cout) f32

    # ---- depthwise 7x7 (padding=3); halo lives only in VMEM scratch ----------
    ypad_s[...] = jnp.zeros(ypad_s.shape, jnp.float32)
    for oh in range(Ho):
        # y placed at sublane offset 8 (aligned), row offset 3.
        ypad_s[3 + oh, 8:8 + Wo, :] = y[oh * Wo:(oh + 1) * Wo, :]
    ypad = ypad_s[...]                                    # (Ho+6, Wo+16, Cout)
    wdw = dww_ref[...]                                    # (7, 7, Cout)
    acc = jnp.zeros((Ho, Wo, Cout), jnp.float32)
    for dw in range(7):                                   # 7 width-shifted views,
        xw = ypad[:, 5 + dw:5 + dw + Wo, :]               # reused across 7 dh taps
        for dh in range(7):
            acc = acc + xw[dh:dh + Ho] * wdw[dh, dw]
    h = acc + dwb_ref[...]                                # (Ho, Wo, Cout)

    # ---- LayerNorm (f32, single-pass stats) ----------------------------------
    mu = jnp.mean(h, axis=-1, keepdims=True)
    var = jnp.maximum(jnp.mean(h * h, axis=-1, keepdims=True) - mu * mu, 0.0)
    hn = (h - mu) * jax.lax.rsqrt(var + _LN_EPS) * g_ref[...] + be_ref[...]
    for oh in range(Ho):                                  # flatten rows for the MXU
        hn_s[oh * Wo:(oh + 1) * Wo, :] = hn[oh]

    # ---- MLP (bf16 MXU, f32 accumulate) + residual ---------------------------
    u = jnp.dot(hn_s[...].astype(jnp.bfloat16), w1_ref[...],
                preferred_element_type=jnp.float32) + b1_ref[...]
    u = _erf_gelu(u)
    out = (jnp.dot(u.astype(jnp.bfloat16), w2_ref[...],
                   preferred_element_type=jnp.float32)
           + b2_ref[...] + y)
    o_ref[0] = out


def downsample_convnext_block(x, p):
    """DownsampleConvNextBlock: 2x2 s2 conv + ConvNeXt block, one fused kernel per image."""
    B, H, W, Cin = x.shape
    Cout = p["down_b"].shape[-1]
    Ho, Wo = H // 2, W // 2
    HW = Ho * Wo
    C2 = 2 * Cin
    x5 = x.reshape(B, Ho, 2, Wo, C2)      # free (contiguous) bitcast, no HBM reshuffle
    out = pl.pallas_call(
        _block_kernel,
        out_shape=jax.ShapeDtypeStruct((B, HW, Cout), jnp.float32),
        grid=(B,),
        in_specs=[
            pl.BlockSpec((1, Ho, 2, Wo, C2), lambda b: (b, 0, 0, 0, 0)),
            pl.BlockSpec((C2, Cout), lambda b: (0, 0)),        # down conv w (top rows)  bf16
            pl.BlockSpec((C2, Cout), lambda b: (0, 0)),        # down conv w (bottom)    bf16
            pl.BlockSpec((1, Cout), lambda b: (0, 0)),         # down conv bias
            pl.BlockSpec((7, 7, Cout), lambda b: (0, 0, 0)),   # depthwise w (f32)
            pl.BlockSpec((1, 1, Cout), lambda b: (0, 0, 0)),   # depthwise bias
            pl.BlockSpec((1, 1, Cout), lambda b: (0, 0, 0)),   # LN gamma
            pl.BlockSpec((1, 1, Cout), lambda b: (0, 0, 0)),   # LN beta
            pl.BlockSpec((Cout, 4 * Cout), lambda b: (0, 0)),  # MLP w1 bf16
            pl.BlockSpec((1, 4 * Cout), lambda b: (0, 0)),     # MLP b1
            pl.BlockSpec((4 * Cout, Cout), lambda b: (0, 0)),  # MLP w2 bf16
            pl.BlockSpec((1, Cout), lambda b: (0, 0)),         # MLP b2
        ],
        out_specs=pl.BlockSpec((1, HW, Cout), lambda b: (b, 0, 0)),
        scratch_shapes=[
            pltpu.VMEM((HW, C2), jnp.float32),                 # flattened even rows
            pltpu.VMEM((HW, C2), jnp.float32),                 # flattened odd rows
            pltpu.VMEM((Ho + 6, Wo + 16, Cout), jnp.float32),  # padded depthwise input
            pltpu.VMEM((HW, Cout), jnp.float32),               # flattened normalized h
        ],
        compiler_params=pltpu.CompilerParams(
            dimension_semantics=("parallel",),                 # megacore on v7x
            vmem_limit_bytes=_VMEM_LIMIT),
    )(x5, p["down_w_top"], p["down_w_bot"], p["down_b"],
      p["dw_w"], p["dw_b"], p["ln_g"], p["ln_b"],
      p["w1"], p["b1"], p["w2"], p["b2"])
    return out.reshape(B, Ho, Wo, Cout)


# ---------------------------------- decoder ----------------------------------

def _decoder_kernel(x_ref, w1_ref, b1_ref, g_ref, be_ref, w2_ref, b2_ref, o_ref):
    h = (jnp.dot(x_ref[...].astype(jnp.bfloat16), w1_ref[...],
                 preferred_element_type=jnp.float32) + b1_ref[...])
    mu = jnp.mean(h, axis=-1, keepdims=True)
    var = jnp.maximum(jnp.mean(h * h, axis=-1, keepdims=True) - mu * mu, 0.0)
    h = (h - mu) * jax.lax.rsqrt(var + _LN_EPS) * g_ref[...] + be_ref[...]
    h = jnp.maximum(h, 0.0)
    o_ref[...] = (jnp.dot(h.astype(jnp.bfloat16), w2_ref[...],
                          preferred_element_type=jnp.float32) + b2_ref[...])


def decoder_apply(x_rows, p, tm_max=512):
    """Fused 1x1 conv -> LayerNorm2d -> ReLU -> 1x1 conv, row-tiled over pixels."""
    M, C = x_rows.shape
    Npad = p["w2"].shape[1]
    out_dim = p["out_dim"]
    if M <= tm_max:
        tm, Mp = M, M
    else:
        tm = tm_max
        Mp = ((M + tm - 1) // tm) * tm
    xp = x_rows if Mp == M else jnp.pad(x_rows, ((0, Mp - M), (0, 0)))
    out = pl.pallas_call(
        _decoder_kernel,
        out_shape=jax.ShapeDtypeStruct((Mp, Npad), jnp.float32),
        grid=(Mp // tm,),
        in_specs=[
            pl.BlockSpec((tm, C), lambda i: (i, 0)),      # pixel rows (double-buffered)
            pl.BlockSpec((C, C), lambda i: (0, 0)),       # resident bf16 w1
            pl.BlockSpec((1, C), lambda i: (0, 0)),
            pl.BlockSpec((1, C), lambda i: (0, 0)),
            pl.BlockSpec((1, C), lambda i: (0, 0)),
            pl.BlockSpec((C, Npad), lambda i: (0, 0)),    # resident bf16 w2 (lane-padded)
            pl.BlockSpec((1, Npad), lambda i: (0, 0)),
        ],
        out_specs=pl.BlockSpec((tm, Npad), lambda i: (i, 0)),  # lane-dense (Npad % 128 == 0)
        compiler_params=pltpu.CompilerParams(
            dimension_semantics=("parallel",),
            vmem_limit_bytes=_VMEM_LIMIT),
    )(xp, p["w1"], p["b1"], p["ln_g"], p["ln_b"], p["w2"], p["b2"])
    return out[:M, :out_dim]


# ---------------------------------- helpers ----------------------------------

def get_grid(ht, wd):
    gy, gx = jnp.meshgrid(jnp.arange(ht, dtype=jnp.float32),
                          jnp.arange(wd, dtype=jnp.float32), indexing="ij")
    return jnp.stack([gx, gy], axis=-1) / max(ht, wd)


# ---------------------------------- params -----------------------------------

def _init_block(key, cin, cout):
    ks = jax.random.split(key, 4)
    w_down = 0.02 * jax.random.normal(ks[0], (2, 2, cin, cout), jnp.float32)  # (kh, kw, cin, cout)
    return {
        "down_w_top": w_down[0].reshape(2 * cin, cout).astype(jnp.bfloat16),  # kh=0, rows = (kw, cin)
        "down_w_bot": w_down[1].reshape(2 * cin, cout).astype(jnp.bfloat16),  # kh=1
        "down_b": jnp.zeros((1, cout), jnp.float32),
        "dw_w": 0.02 * jax.random.normal(ks[1], (7, 7, cout), jnp.float32),
        "dw_b": jnp.zeros((1, 1, cout), jnp.float32),
        "ln_g": jnp.ones((1, 1, cout), jnp.float32),
        "ln_b": jnp.zeros((1, 1, cout), jnp.float32),
        "w1": (0.02 * jax.random.normal(ks[2], (cout, 4 * cout), jnp.float32)).astype(jnp.bfloat16),
        "b1": jnp.zeros((1, 4 * cout), jnp.float32),
        "w2": (0.02 * jax.random.normal(ks[3], (4 * cout, cout), jnp.float32)).astype(jnp.bfloat16),
        "b2": jnp.zeros((1, cout), jnp.float32),
    }


def _init_decoder(key, c, out_dim):
    ks = jax.random.split(key, 2)
    npad = max(128, ((out_dim + 127) // 128) * 128)
    w2 = 0.02 * jax.random.normal(ks[1], (c, out_dim), jnp.float32)
    w2 = jnp.pad(w2, ((0, 0), (0, npad - out_dim)))       # lane-dense output, sliced in wrapper
    return {
        "w1": (0.02 * jax.random.normal(ks[0], (c, c), jnp.float32)).astype(jnp.bfloat16),
        "b1": jnp.zeros((1, c), jnp.float32),
        "ln_g": jnp.ones((1, c), jnp.float32),
        "ln_b": jnp.zeros((1, c), jnp.float32),
        "w2": w2.astype(jnp.bfloat16),
        "b2": jnp.zeros((1, npad), jnp.float32),
        "out_dim": out_dim,
    }


def init_detection_head(key, input_dim, output_split, hidden_dim=512, num_slots=4):
    ks = jax.random.split(key, 7)
    out_dim = sum(output_split) * num_slots
    c2 = 2 * hidden_dim
    return {
        "enc1a": _init_block(ks[0], input_dim, hidden_dim),
        "enc1b": _init_block(ks[1], hidden_dim, c2),
        "enc2": _init_block(ks[2], c2, c2),
        "enc3": _init_block(ks[3], c2, c2),
        "decoders": [_init_decoder(ks[4 + i], c2, out_dim) for i in range(3)],
    }


# ---------------------------------- forward ----------------------------------

def detection_head_forward(params, px_feats_nchw, K, output_split, num_slots=4,
                           depth_adj=128, pooling=8, return_feats=False):
    # PyTorch NCHW -> NHWC (channels on the 128-lane axis); boundary op only.
    x = jnp.transpose(px_feats_nchw, (0, 2, 3, 1)).astype(jnp.float32)
    ht, wd = x.shape[1], x.shape[2]
    rescale = max(ht, wd) * pooling
    calib_adj = K[:, 0, 0][:, None, None]                          # (B, 1, 1)

    x1 = downsample_convnext_block(downsample_convnext_block(x, params["enc1a"]),
                                   params["enc1b"])
    x2 = downsample_convnext_block(x1, params["enc2"])
    x3 = downsample_convnext_block(x2, params["enc3"])
    feat_pyramid = [x1, x2, x3]

    fx = K[:, 0, 0][:, None, None]
    fy = K[:, 1, 1][:, None, None]
    cx = K[:, 0, 2][:, None, None]
    cy = K[:, 1, 2][:, None, None]

    c_total = sum(output_split)
    split_pts = np.cumsum(output_split)[:-1].tolist()
    pred_state = []
    for pyr_idx, feats in enumerate(feat_pyramid):
        B, fh, fw, C = feats.shape
        ref_xy = (get_grid(fh, fw) + 0.5 / max(fh, fw)) * rescale            # (fh, fw, 2)
        ref_xy_slots = jnp.repeat(ref_xy.reshape(fh * fw, 1, 2), num_slots, axis=1)
        ref_xy_slots = ref_xy_slots.reshape(fh * fw * num_slots, 2)

        pred = decoder_apply(feats.reshape(B * fh * fw, C),
                             params["decoders"][pyr_idx])                    # (B*h*w, n*c)
        # 'b (n c) h w -> b (h w n) c'
        pred = pred.reshape(B, fh * fw * num_slots, c_total)

        (init_betas, init_pose, init_rot, init_xy, init_z,
         _unused, conf) = jnp.split(pred, split_pts, axis=-1)

        # TODO(synk): final per-candidate trans/depth elementwise math kept in
        # plain JAX glue (negligible FLOPs vs. the Pallas conv/matmul kernels).
        default_depth = calib_adj / (depth_adj * (2 ** pyr_idx))
        init_z = default_depth / (jnp.exp(init_z) + 0.05)
        init_xy = init_xy + ref_xy_slots
        world_x = (init_xy[..., 0:1] - cx) / fx
        world_y = (init_xy[..., 1:2] - cy) / fy
        world_xy = jnp.concatenate([world_x, world_y], axis=-1) * init_z
        init_trans = jnp.concatenate([world_xy, init_z], axis=-1)

        pred_state.append({
            "betas": init_betas,
            "delta_root_orient": init_rot,
            "pose_embedding": init_pose,
            "trans": init_trans,
            "conf": conf,
        })

    detections = {k: jnp.concatenate([p[k] for p in pred_state], axis=1)
                     .astype(jnp.float32)
                  for k in pred_state[0]}
    if return_feats:
        return detections, feat_pyramid
    return detections


# ------------------------------------ main ------------------------------------

if __name__ == "__main__":
    key = jax.random.PRNGKey(0)
    B, input_dim, H, W = 2, 4, 16, 16
    hidden_dim = 32
    num_slots = 4
    depth_adj = 128
    pooling = 8
    # (betas, pose_embedding, rot, xy=2, z=1, unused, conf=1)
    output_split = (8, 16, 6, 2, 1, 2, 1)

    kp, kx = jax.random.split(key)
    params = init_detection_head(kp, input_dim, output_split, hidden_dim, num_slots)
    px_feats = jax.random.normal(kx, (B, input_dim, H, W), jnp.float32)   # NCHW
    K = jnp.broadcast_to(jnp.array([[200.0, 0.0, 64.0],
                                    [0.0, 200.0, 64.0],
                                    [0.0, 0.0, 1.0]], jnp.float32), (B, 3, 3))

    detections = detection_head_forward(params, px_feats, K, output_split,
                                        num_slots=num_slots, depth_adj=depth_adj,
                                        pooling=pooling)
    detections = jax.block_until_ready(detections)

    # candidates = (4*4 + 2*2 + 1*1) * num_slots = 84
    n_cand = (16 + 4 + 1) * num_slots
    assert detections["trans"].shape == (B, n_cand, 3)
    assert detections["conf"].shape == (B, n_cand, 1)
    assert detections["betas"].shape == (B, n_cand, output_split[0])
    assert detections["pose_embedding"].shape == (B, n_cand, output_split[1])
    assert detections["delta_root_orient"].shape == (B, n_cand, output_split[2])
    print("KERNEL_OK")
</pallas_src>

<mosaic_0001>
module attributes {stable_mosaic.version = 11 : i64} {
  func.func @_block_kernel(%arg0: i32, %arg1: memref<1x8x2x8x8xf32, #tpu.memory_space<vmem>>, %arg2: memref<8x32xbf16, #tpu.memory_space<vmem>>, %arg3: memref<8x32xbf16, #tpu.memory_space<vmem>>, %arg4: memref<1x32xf32, #tpu.memory_space<vmem>>, %arg5: memref<7x7x32xf32, #tpu.memory_space<vmem>>, %arg6: memref<1x1x32xf32, #tpu.memory_space<vmem>>, %arg7: memref<1x1x32xf32, #tpu.memory_space<vmem>>, %arg8: memref<1x1x32xf32, #tpu.memory_space<vmem>>, %arg9: memref<32x128xbf16, #tpu.memory_space<vmem>>, %arg10: memref<1x128xf32, #tpu.memory_space<vmem>>, %arg11: memref<128x32xbf16, #tpu.memory_space<vmem>>, %arg12: memref<1x32xf32, #tpu.memory_space<vmem>>, %arg13: memref<1x64x32xf32, #tpu.memory_space<vmem>>, %arg14: memref<64x8xf32, #tpu.memory_space<vmem>>, %arg15: memref<64x8xf32, #tpu.memory_space<vmem>>, %arg16: memref<14x24x32xf32, #tpu.memory_space<vmem>>, %arg17: memref<64x32xf32, #tpu.memory_space<vmem>>) attributes {dimension_semantics = [#tpu.dimension_semantics<parallel>], iteration_bounds = array<i64: 2>, scalar_prefetch = 0 : i64, scratch_operands = 4 : i64, tpu.core_type = #tpu.core_type<tc>, window_params = [{transform_indices = @transform_0, window_bounds = array<i64: 1, 8, 2, 8, 8>}, {pipeline_mode = #tpu.pipeline_mode<synchronous>, transform_indices = @transform_1, window_bounds = array<i64: 8, 32>}, {pipeline_mode = #tpu.pipeline_mode<synchronous>, transform_indices = @transform_2, window_bounds = array<i64: 8, 32>}, {pipeline_mode = #tpu.pipeline_mode<synchronous>, transform_indices = @transform_3, window_bounds = array<i64: 1, 32>}, {pipeline_mode = #tpu.pipeline_mode<synchronous>, transform_indices = @transform_4, window_bounds = array<i64: 7, 7, 32>}, {pipeline_mode = #tpu.pipeline_mode<synchronous>, transform_indices = @transform_5, window_bounds = array<i64: 1, 1, 32>}, {pipeline_mode = #tpu.pipeline_mode<synchronous>, transform_indices = @transform_6, window_bounds = array<i64: 1, 1, 32>}, {pipeline_mode = #tpu.pipeline_mode<synchronous>, transform_indices = @transform_7, window_bounds = array<i64: 1, 1, 32>}, {pipeline_mode = #tpu.pipeline_mode<synchronous>, transform_indices = @transform_8, window_bounds = array<i64: 32, 128>}, {pipeline_mode = #tpu.pipeline_mode<synchronous>, transform_indices = @transform_9, window_bounds = array<i64: 1, 128>}, {pipeline_mode = #tpu.pipeline_mode<synchronous>, transform_indices = @transform_10, window_bounds = array<i64: 128, 32>}, {pipeline_mode = #tpu.pipeline_mode<synchronous>, transform_indices = @transform_11, window_bounds = array<i64: 1, 32>}, {transform_indices = @transform_12, window_bounds = array<i64: 1, 64, 32>}]} {
    %c0 = arith.constant 0 : index
    %c0_0 = arith.constant 0 : index
    %c0_1 = arith.constant 0 : index
    %c0_2 = arith.constant 0 : index
    %c0_3 = arith.constant 0 : index
    %0 = vector.load %arg1[%c0, %c0_0, %c0_1, %c0_2, %c0_3] : memref<1x8x2x8x8xf32, #tpu.memory_space<vmem>>, vector<1x8x2x8x8xf32>
    %1 = vector.shape_cast %0 : vector<1x8x2x8x8xf32> to vector<8x2x8x8xf32>
    %2 = vector.extract_strided_slice %1 {offsets = [0, 0, 0, 0], sizes = [1, 1, 8, 8], strides = [1, 1, 1, 1]} : vector<8x2x8x8xf32> to vector<1x1x8x8xf32>
    %3 = vector.shape_cast %2 : vector<1x1x8x8xf32> to vector<8x8xf32>
    %c0_4 = arith.constant 0 : index
    %c0_5 = arith.constant 0 : index
    %4 = vector.load %arg14[%c0_4, %c0_5] : memref<64x8xf32, #tpu.memory_space<vmem>>, vector<8x8xf32>
    tpu.vector_store %arg14[%c0_4, %c0_5], %3 {strides = array<i32>} : memref<64x8xf32, #tpu.memory_space<vmem>>, vector<8x8xf32>,
    %5 = vector.extract_strided_slice %1 {offsets = [0, 1, 0, 0], sizes = [1, 1, 8, 8], strides = [1, 1, 1, 1]} : vector<8x2x8x8xf32> to vector<1x1x8x8xf32>
    %6 = vector.shape_cast %5 : vector<1x1x8x8xf32> to vector<8x8xf32>
    %c0_6 = arith.constant 0 : index
    %c0_7 = arith.constant 0 : index
    %7 = vector.load %arg15[%c0_6, %c0_7] : memref<64x8xf32, #tpu.memory_space<vmem>>, vector<8x8xf32>
    tpu.vector_store %arg15[%c0_6, %c0_7], %6 {strides = array<i32>} : memref<64x8xf32, #tpu.memory_space<vmem>>, vector<8x8xf32>,
    %8 = vector.extract_strided_slice %1 {offsets = [1, 0, 0, 0], sizes = [1, 1, 8, 8], strides = [1, 1, 1, 1]} : vector<8x2x8x8xf32> to vector<1x1x8x8xf32>
    %9 = vector.shape_cast %8 : vector<1x1x8x8xf32> to vector<8x8xf32>
    %c8 = arith.constant 8 : index
    %c0_8 = arith.constant 0 : index
    %10 = vector.load %arg14[%c8, %c0_8] : memref<64x8xf32, #tpu.memory_space<vmem>>, vector<8x8xf32>
    tpu.vector_store %arg14[%c8, %c0_8], %9 {strides = array<i32>} : memref<64x8xf32, #tpu.memory_space<vmem>>, vector<8x8xf32>,
    %11 = vector.extract_strided_slice %1 {offsets = [1, 1, 0, 0], sizes = [1, 1, 8, 8], strides = [1, 1, 1, 1]} : vector<8x2x8x8xf32> to vector<1x1x8x8xf32>
    %12 = vector.shape_cast %11 : vector<1x1x8x8xf32> to vector<8x8xf32>
    %c8_9 = arith.constant 8 : index
    %c0_10 = arith.constant 0 : index
    %13 = vector.load %arg15[%c8_9, %c0_10] : memref<64x8xf32, #tpu.memory_space<vmem>>, vector<8x8xf32>
    tpu.vector_store %arg15[%c8_9, %c0_10], %12 {strides = array<i32>} : memref<64x8xf32, #tpu.memory_space<vmem>>, vector<8x8xf32>,
    %14 = vector.extract_strided_slice %1 {offsets = [2, 0, 0, 0], sizes = [1, 1, 8, 8], strides = [1, 1, 1, 1]} : vector<8x2x8x8xf32> to vector<1x1x8x8xf32>
    %15 = vector.shape_cast %14 : vector<1x1x8x8xf32> to vector<8x8xf32>
    %c16 = arith.constant 16 : index
    %c0_11 = arith.constant 0 : index
    %16 = vector.load %arg14[%c16, %c0_11] : memref<64x8xf32, #tpu.memory_space<vmem>>, vector<8x8xf32>
    tpu.vector_store %arg14[%c16, %c0_11], %15 {strides = array<i32>} : memref<64x8xf32, #tpu.memory_space<vmem>>, vector<8x8xf32>,
    %17 = vector.extract_strided_slice %1 {offsets = [2, 1, 0, 0], sizes = [1, 1, 8, 8], strides = [1, 1, 1, 1]} : vector<8x2x8x8xf32> to vector<1x1x8x8xf32>
    %18 = vector.shape_cast %17 : vector<1x1x8x8xf32> to vector<8x8xf32>
    %c16_12 = arith.constant 16 : index
    %c0_13 = arith.constant 0 : index
    %19 = vector.load %arg15[%c16_12, %c0_13] : memref<64x8xf32, #tpu.memory_space<vmem>>, vector<8x8xf32>
    tpu.vector_store %arg15[%c16_12, %c0_13], %18 {strides = array<i32>} : memref<64x8xf32, #tpu.memory_space<vmem>>, vector<8x8xf32>,
    %20 = vector.extract_strided_slice %1 {offsets = [3, 0, 0, 0], sizes = [1, 1, 8, 8], strides = [1, 1, 1, 1]} : vector<8x2x8x8xf32> to vector<1x1x8x8xf32>
    %21 = vector.shape_cast %20 : vector<1x1x8x8xf32> to vector<8x8xf32>
    %c24 = arith.constant 24 : index
    %c0_14 = arith.constant 0 : index
    %22 = vector.load %arg14[%c24, %c0_14] : memref<64x8xf32, #tpu.memory_space<vmem>>, vector<8x8xf32>
    tpu.vector_store %arg14[%c24, %c0_14], %21 {strides = array<i32>} : memref<64x8xf32, #tpu.memory_space<vmem>>, vector<8x8xf32>,
    %23 = vector.extract_strided_slice %1 {offsets = [3, 1, 0, 0], sizes = [1, 1, 8, 8], strides = [1, 1, 1, 1]} : vector<8x2x8x8xf32> to vector<1x1x8x8xf32>
    %24 = vector.shape_cast %23 : vector<1x1x8x8xf32> to vector<8x8xf32>
    %c24_15 = arith.constant 24 : index
    %c0_16 = arith.constant 0 : index
    %25 = vector.load %arg15[%c24_15, %c0_16] : memref<64x8xf32, #tpu.memory_space<vmem>>, vector<8x8xf32>
    tpu.vector_store %arg15[%c24_15, %c0_16], %24 {strides = array<i32>} : memref<64x8xf32, #tpu.memory_space<vmem>>, vector<8x8xf32>,
    %26 = vector.extract_strided_slice %1 {offsets = [4, 0, 0, 0], sizes = [1, 1, 8, 8], strides = [1, 1, 1, 1]} : vector<8x2x8x8xf32> to vector<1x1x8x8xf32>
    %27 = vector.shape_cast %26 : vector<1x1x8x8xf32> to vector<8x8xf32>
    %c32 = arith.constant 32 : index
    %c0_17 = arith.constant 0 : index
    %28 = vector.load %arg14[%c32, %c0_17] : memref<64x8xf32, #tpu.memory_space<vmem>>, vector<8x8xf32>
    tpu.vector_store %arg14[%c32, %c0_17], %27 {strides = array<i32>} : memref<64x8xf32, #tpu.memory_space<vmem>>, vector<8x8xf32>,
    %29 = vector.extract_strided_slice %1 {offsets = [4, 1, 0, 0], sizes = [1, 1, 8, 8], strides = [1, 1, 1, 1]} : vector<8x2x8x8xf32> to vector<1x1x8x8xf32>
    %30 = vector.shape_cast %29 : vector<1x1x8x8xf32> to vector<8x8xf32>
    %c32_18 = arith.constant 32 : index
    %c0_19 = arith.constant 0 : index
    %31 = vector.load %arg15[%c32_18, %c0_19] : memref<64x8xf32, #tpu.memory_space<vmem>>, vector<8x8xf32>
    tpu.vector_store %arg15[%c32_18, %c0_19], %30 {strides = array<i32>} : memref<64x8xf32, #tpu.memory_space<vmem>>, vector<8x8xf32>,
    %32 = vector.extract_strided_slice %1 {offsets = [5, 0, 0, 0], sizes = [1, 1, 8, 8], strides = [1, 1, 1, 1]} : vector<8x2x8x8xf32> to vector<1x1x8x8xf32>
    %33 = vector.shape_cast %32 : vector<1x1x8x8xf32> to vector<8x8xf32>
    %c40 = arith.constant 40 : index
    %c0_20 = arith.constant 0 : index
    %34 = vector.load %arg14[%c40, %c0_20] : memref<64x8xf32, #tpu.memory_space<vmem>>, vector<8x8xf32>
    tpu.vector_store %arg14[%c40, %c0_20], %33 {strides = array<i32>} : memref<64x8xf32, #tpu.memory_space<vmem>>, vector<8x8xf32>,
    %35 = vector.extract_strided_slice %1 {offsets = [5, 1, 0, 0], sizes = [1, 1, 8, 8], strides = [1, 1, 1, 1]} : vector<8x2x8x8xf32> to vector<1x1x8x8xf32>
    %36 = vector.shape_cast %35 : vector<1x1x8x8xf32> to vector<8x8xf32>
    %c40_21 = arith.constant 40 : index
    %c0_22 = arith.constant 0 : index
    %37 = vector.load %arg15[%c40_21, %c0_22] : memref<64x8xf32, #tpu.memory_space<vmem>>, vector<8x8xf32>
    tpu.vector_store %arg15[%c40_21, %c0_22], %36 {strides = array<i32>} : memref<64x8xf32, #tpu.memory_space<vmem>>, vector<8x8xf32>,
    %38 = vector.extract_strided_slice %1 {offsets = [6, 0, 0, 0], sizes = [1, 1, 8, 8], strides = [1, 1, 1, 1]} : vector<8x2x8x8xf32> to vector<1x1x8x8xf32>
    %39 = vector.shape_cast %38 : vector<1x1x8x8xf32> to vector<8x8xf32>
    %c48 = arith.constant 48 : index
    %c0_23 = arith.constant 0 : index
    %40 = vector.load %arg14[%c48, %c0_23] : memref<64x8xf32, #tpu.memory_space<vmem>>, vector<8x8xf32>
    tpu.vector_store %arg14[%c48, %c0_23], %39 {strides = array<i32>} : memref<64x8xf32, #tpu.memory_space<vmem>>, vector<8x8xf32>,
    %41 = vector.extract_strided_slice %1 {offsets = [6, 1, 0, 0], sizes = [1, 1, 8, 8], strides = [1, 1, 1, 1]} : vector<8x2x8x8xf32> to vector<1x1x8x8xf32>
    %42 = vector.shape_cast %41 : vector<1x1x8x8xf32> to vector<8x8xf32>
    %c48_24 = arith.constant 48 : index
    %c0_25 = arith.constant 0 : index
    %43 = vector.load %arg15[%c48_24, %c0_25] : memref<64x8xf32, #tpu.memory_space<vmem>>, vector<8x8xf32>
    tpu.vector_store %arg15[%c48_24, %c0_25], %42 {strides = array<i32>} : memref<64x8xf32, #tpu.memory_space<vmem>>, vector<8x8xf32>,
    %44 = vector.extract_strided_slice %1 {offsets = [7, 0, 0, 0], sizes = [1, 1, 8, 8], strides = [1, 1, 1, 1]} : vector<8x2x8x8xf32> to vector<1x1x8x8xf32>
    %45 = vector.shape_cast %44 : vector<1x1x8x8xf32> to vector<8x8xf32>
    %c56 = arith.constant 56 : index
    %c0_26 = arith.constant 0 : index
    %46 = vector.load %arg14[%c56, %c0_26] : memref<64x8xf32, #tpu.memory_space<vmem>>, vector<8x8xf32>
    tpu.vector_store %arg14[%c56, %c0_26], %45 {strides = array<i32>} : memref<64x8xf32, #tpu.memory_space<vmem>>, vector<8x8xf32>,
    %47 = vector.extract_strided_slice %1 {offsets = [7, 1, 0, 0], sizes = [1, 1, 8, 8], strides = [1, 1, 1, 1]} : vector<8x2x8x8xf32> to vector<1x1x8x8xf32>
    %48 = vector.shape_cast %47 : vector<1x1x8x8xf32> to vector<8x8xf32>
    %c56_27 = arith.constant 56 : index
    %c0_28 = arith.constant 0 : index
    %49 = vector.load %arg15[%c56_27, %c0_28] : memref<64x8xf32, #tpu.memory_space<vmem>>, vector<8x8xf32>
    tpu.vector_store %arg15[%c56_27, %c0_28], %48 {strides = array<i32>} : memref<64x8xf32, #tpu.memory_space<vmem>>, vector<8x8xf32>,
    %c0_29 = arith.constant 0 : index
    %c0_30 = arith.constant 0 : index
    %50 = vector.load %arg14[%c0_29, %c0_30] : memref<64x8xf32, #tpu.memory_space<vmem>>, vector<64x8xf32>
    %51 = arith.truncf %50 : vector<64x8xf32> to vector<64x8xbf16>
    %c0_31 = arith.constant 0 : index
    %c0_32 = arith.constant 0 : index
    %52 = vector.load %arg2[%c0_31, %c0_32] : memref<8x32xbf16, #tpu.memory_space<vmem>>, vector<8x32xbf16>
    %cst = arith.constant dense<0.000000e+00> : vector<64x32xf32>
    %53 = tpu.matmul %51, %52, %cst {dimension_numbers = #tpu.dot_dimension_numbers<[1], [0], [0], [1], [0, 0, 1, 1], [], []>} : vector<64x8xbf16>, vector<8x32xbf16>, vector<64x32xf32> -> vector<64x32xf32>
    %c0_33 = arith.constant 0 : index
    %c0_34 = arith.constant 0 : index
    %54 = vector.load %arg15[%c0_33, %c0_34] : memref<64x8xf32, #tpu.memory_space<vmem>>, vector<64x8xf32>
    %55 = arith.truncf %54 : vector<64x8xf32> to vector<64x8xbf16>
    %c0_35 = arith.constant 0 : index
    %c0_36 = arith.constant 0 : index
    %56 = vector.load %arg3[%c0_35, %c0_36] : memref<8x32xbf16, #tpu.memory_space<vmem>>, vector<8x32xbf16>
    %cst_37 = arith.constant dense<0.000000e+00> : vector<64x32xf32>
    %57 = tpu.matmul %55, %56, %cst_37 {dimension_numbers = #tpu.dot_dimension_numbers<[1], [0], [0], [1], [0, 0, 1, 1], [], []>} : vector<64x8xbf16>, vector<8x32xbf16>, vector<64x32xf32> -> vector<64x32xf32>
    %58 = arith.addf %53, %57 : vector<64x32xf32>
    %c0_38 = arith.constant 0 : index
    %c0_39 = arith.constant 0 : index
    %59 = vector.load %arg4[%c0_38, %c0_39] : memref<1x32xf32, #tpu.memory_space<vmem>>, vector<1x32xf32>
    %60 = vector.broadcast %59 : vector<1x32xf32> to vector<64x32xf32>
    %61 = arith.addf %58, %60 : vector<64x32xf32>
    %cst_40 = arith.constant 0.000000e+00 : f32
    %62 = vector.broadcast %cst_40 : f32 to vector<14x24x32xf32>
    %c0_41 = arith.constant 0 : index
    %c0_42 = arith.constant 0 : index
    %c0_43 = arith.constant 0 : index
    %63 = vector.load %arg16[%c0_41, %c0_42, %c0_43] : memref<14x24x32xf32, #tpu.memory_space<vmem>>, vector<14x24x32xf32>
    tpu.vector_store %arg16[%c0_41, %c0_42, %c0_43], %62 {strides = array<i32>} : memref<14x24x32xf32, #tpu.memory_space<vmem>>, vector<14x24x32xf32>,
    %64 = vector.extract_strided_slice %61 {offsets = [0, 0], sizes = [8, 32], strides = [1, 1]} : vector<64x32xf32> to vector<8x32xf32>
    %c3 = arith.constant 3 : index
    %c8_44 = arith.constant 8 : index
    %c0_45 = arith.constant 0 : index
    %65 = vector.load %arg16[%c3, %c8_44, %c0_45] : memref<14x24x32xf32, #tpu.memory_space<vmem>>, vector<1x8x32xf32>
    %66 = vector.shape_cast %65 : vector<1x8x32xf32> to vector<8x32xf32>
    %67 = vector.shape_cast %64 : vector<8x32xf32> to vector<1x8x32xf32>
    tpu.vector_store %arg16[%c3, %c8_44, %c0_45], %67 {strides = array<i32>} : memref<14x24x32xf32, #tpu.memory_space<vmem>>, vector<1x8x32xf32>,
    %68 = vector.extract_strided_slice %61 {offsets = [8, 0], sizes = [8, 32], strides = [1, 1]} : vector<64x32xf32> to vector<8x32xf32>
    %c4 = arith.constant 4 : index
    %c8_46 = arith.constant 8 : index
    %c0_47 = arith.constant 0 : index
    %69 = vector.load %arg16[%c4, %c8_46, %c0_47] : memref<14x24x32xf32, #tpu.memory_space<vmem>>, vector<1x8x32xf32>
    %70 = vector.shape_cast %69 : vector<1x8x32xf32> to vector<8x32xf32>
    %71 = vector.shape_cast %68 : vector<8x32xf32> to vector<1x8x32xf32>
    tpu.vector_store %arg16[%c4, %c8_46, %c0_47], %71 {strides = array<i32>} : memref<14x24x32xf32, #tpu.memory_space<vmem>>, vector<1x8x32xf32>,
    %72 = vector.extract_strided_slice %61 {offsets = [16, 0], sizes = [8, 32], strides = [1, 1]} : vector<64x32xf32> to vector<8x32xf32>
    %c5 = arith.constant 5 : index
    %c8_48 = arith.constant 8 : index
    %c0_49 = arith.constant 0 : index
    %73 = vector.load %arg16[%c5, %c8_48, %c0_49] : memref<14x24x32xf32, #tpu.memory_space<vmem>>, vector<1x8x32xf32>
    %74 = vector.shape_cast %73 : vector<1x8x32xf32> to vector<8x32xf32>
    %75 = vector.shape_cast %72 : vector<8x32xf32> to vector<1x8x32xf32>
    tpu.vector_store %arg16[%c5, %c8_48, %c0_49], %75 {strides = array<i32>} : memref<14x24x32xf32, #tpu.memory_space<vmem>>, vector<1x8x32xf32>,
    %76 = vector.extract_strided_slice %61 {offsets = [24, 0], sizes = [8, 32], strides = [1, 1]} : vector<64x32xf32> to vector<8x32xf32>
    %c6 = arith.constant 6 : index
    %c8_50 = arith.constant 8 : index
    %c0_51 = arith.constant 0 : index
    %77 = vector.load %arg16[%c6, %c8_50, %c0_51] : memref<14x24x32xf32, #tpu.memory_space<vmem>>, vector<1x8x32xf32>
    %78 = vector.shape_cast %77 : vector<1x8x32xf32> to vector<8x32xf32>
    %79 = vector.shape_cast %76 : vector<8x32xf32> to vector<1x8x32xf32>
    tpu.vector_store %arg16[%c6, %c8_50, %c0_51], %79 {strides = array<i32>} : memref<14x24x32xf32, #tpu.memory_space<vmem>>, vector<1x8x32xf32>,
    %80 = vector.extract_strided_slice %61 {offsets = [32, 0], sizes = [8, 32], strides = [1, 1]} : vector<64x32xf32> to vector<8x32xf32>
    %c7 = arith.constant 7 : index
    %c8_52 = arith.constant 8 : index
    %c0_53 = arith.constant 0 : index
    %81 = vector.load %arg16[%c7, %c8_52, %c0_53] : memref<14x24x32xf32, #tpu.memory_space<vmem>>, vector<1x8x32xf32>
    %82 = vector.shape_cast %81 : vector<1x8x32xf32> to vector<8x32xf32>
    %83 = vector.shape_cast %80 : vector<8x32xf32> to vector<1x8x32xf32>
    tpu.vector_store %arg16[%c7, %c8_52, %c0_53], %83 {strides = array<i32>} : memref<14x24x32xf32, #tpu.memory_space<vmem>>, vector<1x8x32xf32>,
    %84 = vector.extract_strided_slice %61 {offsets = [40, 0], sizes = [8, 32], strides = [1, 1]} : vector<64x32xf32> to vector<8x32xf32>
    %c8_54 = arith.constant 8 : index
    %c8_55 = arith.constant 8 : index
    %c0_56 = arith.constant 0 : index
    %85 = vector.load %arg16[%c8_54, %c8_55, %c0_56] : memref<14x24x32xf32, #tpu.memory_space<vmem>>, vector<1x8x32xf32>
    %86 = vector.shape_cast %85 : vector<1x8x32xf32> to vector<8x32xf32>
    %87 = vector.shape_cast %84 : vector<8x32xf32> to vector<1x8x32xf32>
    tpu.vector_store %arg16[%c8_54, %c8_55, %c0_56], %87 {strides = array<i32>} : memref<14x24x32xf32, #tpu.memory_space<vmem>>, vector<1x8x32xf32>,
    %88 = vector.extract_strided_slice %61 {offsets = [48, 0], sizes = [8, 32], strides = [1, 1]} : vector<64x32xf32> to vector<8x32xf32>
    %c9 = arith.constant 9 : index
    %c8_57 = arith.constant 8 : index
    %c0_58 = arith.constant 0 : index
    %89 = vector.load %arg16[%c9, %c8_57, %c0_58] : memref<14x24x32xf32, #tpu.memory_space<vmem>>, vector<1x8x32xf32>
    %90 = vector.shape_cast %89 : vector<1x8x32xf32> to vector<8x32xf32>
    %91 = vector.shape_cast %88 : vector<8x32xf32> to vector<1x8x32xf32>
    tpu.vector_store %arg16[%c9, %c8_57, %c0_58], %91 {strides = array<i32>} : memref<14x24x32xf32, #tpu.memory_space<vmem>>, vector<1x8x32xf32>,
    %92 = vector.extract_strided_slice %61 {offsets = [56, 0], sizes = [8, 32], strides = [1, 1]} : vector<64x32xf32> to vector<8x32xf32>
    %c10 = arith.constant 10 : index
    %c8_59 = arith.constant 8 : index
    %c0_60 = arith.constant 0 : index
    %93 = vector.load %arg16[%c10, %c8_59, %c0_60] : memref<14x24x32xf32, #tpu.memory_space<vmem>>, vector<1x8x32xf32>
    %94 = vector.shape_cast %93 : vector<1x8x32xf32> to vector<8x32xf32>
    %95 = vector.shape_cast %92 : vector<8x32xf32> to vector<1x8x32xf32>
    tpu.vector_store %arg16[%c10, %c8_59, %c0_60], %95 {strides = array<i32>} : memref<14x24x32xf32, #tpu.memory_space<vmem>>, vector<1x8x32xf32>,
    %c0_61 = arith.constant 0 : index
    %c0_62 = arith.constant 0 : index
    %c0_63 = arith.constant 0 : index
    %96 = vector.load %arg16[%c0_61, %c0_62, %c0_63] : memref<14x24x32xf32, #tpu.memory_space<vmem>>, vector<14x24x32xf32>
    %c0_64 = arith.constant 0 : index
    %c0_65 = arith.constant 0 : index
    %c0_66 = arith.constant 0 : index
    %97 = vector.load %arg5[%c0_64, %c0_65, %c0_66] : memref<7x7x32xf32, #tpu.memory_space<vmem>>, vector<7x7x32xf32>
    %cst_67 = arith.constant 0.000000e+00 : f32
    %98 = vector.broadcast %cst_67 : f32 to vector<8x8x32xf32>
    %99 = vector.extract_strided_slice %96 {offsets = [0, 5, 0], sizes = [14, 8, 32], strides = [1, 1, 1]} : vector<14x24x32xf32> to vector<14x8x32xf32>
    %100 = vector.extract_strided_slice %99 {offsets = [0, 0, 0], sizes = [8, 8, 32], strides = [1, 1, 1]} : vector<14x8x32xf32> to vector<8x8x32xf32>
    %101 = vector.extract_strided_slice %97 {offsets = [0, 0, 0], sizes = [1, 1, 32], strides = [1, 1, 1]} : vector<7x7x32xf32> to vector<1x1x32xf32>
    %102 = vector.shape_cast %101 : vector<1x1x32xf32> to vector<32xf32>
    %103 = vector.shape_cast %102 : vector<32xf32> to vector<1x1x32xf32>
    %104 = vector.broadcast %103 : vector<1x1x32xf32> to vector<8x8x32xf32>
    %105 = arith.mulf %100, %104 : vector<8x8x32xf32>
    %106 = arith.addf %98, %105 : vector<8x8x32xf32>
    %107 = vector.extract_strided_slice %99 {offsets = [1, 0, 0], sizes = [8, 8, 32], strides = [1, 1, 1]} : vector<14x8x32xf32> to vector<8x8x32xf32>
    %108 = vector.extract_strided_slice %97 {offsets = [1, 0, 0], sizes = [1, 1, 32], strides = [1, 1, 1]} : vector<7x7x32xf32> to vector<1x1x32xf32>
    %109 = vector.shape_cast %108 : vector<1x1x32xf32> to vector<32xf32>
    %110 = vector.shape_cast %109 : vector<32xf32> to vector<1x1x32xf32>
    %111 = vector.broadcast %110 : vector<1x1x32xf32> to vector<8x8x32xf32>
    %112 = arith.mulf %107, %111 : vector<8x8x32xf32>
    %113 = arith.addf %106, %112 : vector<8x8x32xf32>
    %114 = vector.extract_strided_slice %99 {offsets = [2, 0, 0], sizes = [8, 8, 32], strides = [1, 1, 1]} : vector<14x8x32xf32> to vector<8x8x32xf32>
    %115 = vector.extract_strided_slice %97 {offsets = [2, 0, 0], sizes = [1, 1, 32], strides = [1, 1, 1]} : vector<7x7x32xf32> to vector<1x1x32xf32>
    %116 = vector.shape_cast %115 : vector<1x1x32xf32> to vector<32xf32>
    %117 = vector.shape_cast %116 : vector<32xf32> to vector<1x1x32xf32>
    %118 = vector.broadcast %117 : vector<1x1x32xf32> to vector<8x8x32xf32>
    %119 = arith.mulf %114, %118 : vector<8x8x32xf32>
    %120 = arith.addf %113, %119 : vector<8x8x32xf32>
    %121 = vector.extract_strided_slice %99 {offsets = [3, 0, 0], sizes = [8, 8, 32], strides = [1, 1, 1]} : vector<14x8x32xf32> to vector<8x8x32xf32>
    %122 = vector.extract_strided_slice %97 {offsets = [3, 0, 0], sizes = [1, 1, 32], strides = [1, 1, 1]} : vector<7x7x32xf32> to vector<1x1x32xf32>
    %123 = vector.shape_cast %122 : vector<1x1x32xf32> to vector<32xf32>
    %124 = vector.shape_cast %123 : vector<32xf32> to vector<1x1x32xf32>
    %125 = vector.broadcast %124 : vector<1x1x32xf32> to vector<8x8x32xf32>
    %126 = arith.mulf %121, %125 : vector<8x8x32xf32>
    %127 = arith.addf %120, %126 : vector<8x8x32xf32>
    %128 = vector.extract_strided_slice %99 {offsets = [4, 0, 0], sizes = [8, 8, 32], strides = [1, 1, 1]} : vector<14x8x32xf32> to vector<8x8x32xf32>
    %129 = vector.extract_strided_slice %97 {offsets = [4, 0, 0], sizes = [1, 1, 32], strides = [1, 1, 1]} : vector<7x7x32xf32> to vector<1x1x32xf32>
    %130 = vector.shape_cast %129 : vector<1x1x32xf32> to vector<32xf32>
    %131 = vector.shape_cast %130 : vector<32xf32> to vector<1x1x32xf32>
    %132 = vector.broadcast %131 : vector<1x1x32xf32> to vector<8x8x32xf32>
    %133 = arith.mulf %128, %132 : vector<8x8x32xf32>
    %134 = arith.addf %127, %133 : vector<8x8x32xf32>
    %135 = vector.extract_strided_slice %99 {offsets = [5, 0, 0], sizes = [8, 8, 32], strides = [1, 1, 1]} : vector<14x8x32xf32> to vector<8x8x32xf32>
    %136 = vector.extract_strided_slice %97 {offsets = [5, 0, 0], sizes = [1, 1, 32], strides = [1, 1, 1]} : vector<7x7x32xf32> to vector<1x1x32xf32>
    %137 = vector.shape_cast %136 : vector<1x1x32xf32> to vector<32xf32>
    %138 = vector.shape_cast %137 : vector<32xf32> to vector<1x1x32xf32>
    %139 = vector.broadcast %138 : vector<1x1x32xf32> to vector<8x8x32xf32>
    %140 = arith.mulf %135, %139 : vector<8x8x32xf32>
    %141 = arith.addf %134, %140 : vector<8x8x32xf32>
    %142 = vector.extract_strided_slice %99 {offsets = [6, 0, 0], sizes = [8, 8, 32], strides = [1, 1, 1]} : vector<14x8x32xf32> to vector<8x8x32xf32>
    %143 = vector.extract_strided_slice %97 {offsets = [6, 0, 0], sizes = [1, 1, 32], strides = [1, 1, 1]} : vector<7x7x32xf32> to vector<1x1x32xf32>
    %144 = vector.shape_cast %143 : vector<1x1x32xf32> to vector<32xf32>
    %145 = vector.shape_cast %144 : vector<32xf32> to vector<1x1x32xf32>
    %146 = vector.broadcast %145 : vector<1x1x32xf32> to vector<8x8x32xf32>
    %147 = arith.mulf %142, %146 : vector<8x8x32xf32>
    %148 = arith.addf %141, %147 : vector<8x8x32xf32>
    %149 = vector.extract_strided_slice %96 {offsets = [0, 6, 0], sizes = [14, 8, 32], strides = [1, 1, 1]} : vector<14x24x32xf32> to vector<14x8x32xf32>
    %150 = vector.extract_strided_slice %149 {offsets = [0, 0, 0], sizes = [8, 8, 32], strides = [1, 1, 1]} : vector<14x8x32xf32> to vector<8x8x32xf32>
    %151 = vector.extract_strided_slice %97 {offsets = [0, 1, 0], sizes = [1, 1, 32], strides = [1, 1, 1]} : vector<7x7x32xf32> to vector<1x1x32xf32>
    %152 = vector.shape_cast %151 : vector<1x1x32xf32> to vector<32xf32>
    %153 = vector.shape_cast %152 : vector<32xf32> to vector<1x1x32xf32>
    %154 = vector.broadcast %153 : vector<1x1x32xf32> to vector<8x8x32xf32>
    %155 = arith.mulf %150, %154 : vector<8x8x32xf32>
    %156 = arith.addf %148, %155 : vector<8x8x32xf32>
    %157 = vector.extract_strided_slice %149 {offsets = [1, 0, 0], sizes = [8, 8, 32], strides = [1, 1, 1]} : vector<14x8x32xf32> to vector<8x8x32xf32>
    %158 = vector.extract_strided_slice %97 {offsets = [1, 1, 0], sizes = [1, 1, 32], strides = [1, 1, 1]} : vector<7x7x32xf32> to vector<1x1x32xf32>
    %159 = vector.shape_cast %158 : vector<1x1x32xf32> to vector<32xf32>
    %160 = vector.shape_cast %159 : vector<32xf32> to vector<1x1x32xf32>
    %161 = vector.broadcast %160 : vector<1x1x32xf32> to vector<8x8x32xf32>
    %162 = arith.mulf %157, %161 : vector<8x8x32xf32>
    %163 = arith.addf %156, %162 : vector<8x8x32xf32>
    %164 = vector.extract_strided_slice %149 {offsets = [2, 0, 0], sizes = [8, 8, 32], strides = [1, 1, 1]} : vector<14x8x32xf32> to vector<8x8x32xf32>
    %165 = vector.extract_strided_slice %97 {offsets = [2, 1, 0], sizes = [1, 1, 32], strides = [1, 1, 1]} : vector<7x7x32xf32> to vector<1x1x32xf32>
    %166 = vector.shape_cast %165 : vector<1x1x32xf32> to vector<32xf32>
    %167 = vector.shape_cast %166 : vector<32xf32> to vector<1x1x32xf32>
    %168 = vector.broadcast %167 : vector<1x1x32xf32> to vector<8x8x32xf32>
    %169 = arith.mulf %164, %168 : vector<8x8x32xf32>
    %170 = arith.addf %163, %169 : vector<8x8x32xf32>
    %171 = vector.extract_strided_slice %149 {offsets = [3, 0, 0], sizes = [8, 8, 32], strides = [1, 1, 1]} : vector<14x8x32xf32> to vector<8x8x32xf32>
    %172 = vector.extract_strided_slice %97 {offsets = [3, 1, 0], sizes = [1, 1, 32], strides = [1, 1, 1]} : vector<7x7x32xf32> to vector<1x1x32xf32>
    %173 = vector.shape_cast %172 : vector<1x1x32xf32> to vector<32xf32>
    %174 = vector.shape_cast %173 : vector<32xf32> to vector<1x1x32xf32>
    %175 = vector.broadcast %174 : vector<1x1x32xf32> to vector<8x8x32xf32>
    %176 = arith.mulf %171, %175 : vector<8x8x32xf32>
    %177 = arith.addf %170, %176 : vector<8x8x32xf32>
    %178 = vector.extract_strided_slice %149 {offsets = [4, 0, 0], sizes = [8, 8, 32], strides = [1, 1, 1]} : vector<14x8x32xf32> to vector<8x8x32xf32>
    %179 = vector.extract_strided_slice %97 {offsets = [4, 1, 0], sizes = [1, 1, 32], strides = [1, 1, 1]} : vector<7x7x32xf32> to vector<1x1x32xf32>
    %180 = vector.shape_cast %179 : vector<1x1x32xf32> to vector<32xf32>
    %181 = vector.shape_cast %180 : vector<32xf32> to vector<1x1x32xf32>
    %182 = vector.broadcast %181 : vector<1x1x32xf32> to vector<8x8x32xf32>
    %183 = arith.mulf %178, %182 : vector<8x8x32xf32>
    %184 = arith.addf %177, %183 : vector<8x8x32xf32>
    %185 = vector.extract_strided_slice %149 {offsets = [5, 0, 0], sizes = [8, 8, 32], strides = [1, 1, 1]} : vector<14x8x32xf32> to vector<8x8x32xf32>
    %186 = vector.extract_strided_slice %97 {offsets = [5, 1, 0], sizes = [1, 1, 32], strides = [1, 1, 1]} : vector<7x7x32xf32> to vector<1x1x32xf32>
    %187 = vector.shape_cast %186 : vector<1x1x32xf32> to vector<32xf32>
    %188 = vector.shape_cast %187 : vector<32xf32> to vector<1x1x32xf32>
    %189 = vector.broadcast %188 : vector<1x1x32xf32> to vector<8x8x32xf32>
    %190 = arith.mulf %185, %189 : vector<8x8x32xf32>
    %191 = arith.addf %184, %190 : vector<8x8x32xf32>
    %192 = vector.extract_strided_slice %149 {offsets = [6, 0, 0], sizes = [8, 8, 32], strides = [1, 1, 1]} : vector<14x8x32xf32> to vector<8x8x32xf32>
    %193 = vector.extract_strided_slice %97 {offsets = [6, 1, 0], sizes = [1, 1, 32], strides = [1, 1, 1]} : vector<7x7x32xf32> to vector<1x1x32xf32>
    %194 = vector.shape_cast %193 : vector<1x1x32xf32> to vector<32xf32>
    %195 = vector.shape_cast %194 : vector<32xf32> to vector<1x1x32xf32>
    %196 = vector.broadcast %195 : vector<1x1x32xf32> to vector<8x8x32xf32>
    %197 = arith.mulf %192, %196 : vector<8x8x32xf32>
    %198 = arith.addf %191, %197 : vector<8x8x32xf32>
    %199 = vector.extract_strided_slice %96 {offsets = [0, 7, 0], sizes = [14, 8, 32], strides = [1, 1, 1]} : vector<14x24x32xf32> to vector<14x8x32xf32>
    %200 = vector.extract_strided_slice %199 {offsets = [0, 0, 0], sizes = [8, 8, 32], strides = [1, 1, 1]} : vector<14x8x32xf32> to vector<8x8x32xf32>
    %201 = vector.extract_strided_slice %97 {offsets = [0, 2, 0], sizes = [1, 1, 32], strides = [1, 1, 1]} : vector<7x7x32xf32> to vector<1x1x32xf32>
    %202 = vector.shape_cast %201 : vector<1x1x32xf32> to vector<32xf32>
    %203 = vector.shape_cast %202 : vector<32xf32> to vector<1x1x32xf32>
    %204 = vector.broadcast %203 : vector<1x1x32xf32> to vector<8x8x32xf32>
    %205 = arith.mulf %200, %204 : vector<8x8x32xf32>
    %206 = arith.addf %198, %205 : vector<8x8x32xf32>
    %207 = vector.extract_strided_slice %199 {offsets = [1, 0, 0], sizes = [8, 8, 32], strides = [1, 1, 1]} : vector<14x8x32xf32> to vector<8x8x32xf32>
    %208 = vector.extract_strided_slice %97 {offsets = [1, 2, 0], sizes = [1, 1, 32], strides = [1, 1, 1]} : vector<7x7x32xf32> to vector<1x1x32xf32>
    %209 = vector.shape_cast %208 : vector<1x1x32xf32> to vector<32xf32>
    %210 = vector.shape_cast %209 : vector<32xf32> to vector<1x1x32xf32>
    %211 = vector.broadcast %210 : vector<1x1x32xf32> to vector<8x8x32xf32>
    %212 = arith.mulf %207, %211 : vector<8x8x32xf32>
    %213 = arith.addf %206, %212 : vector<8x8x32xf32>
    %214 = vector.extract_strided_slice %199 {offsets = [2, 0, 0], sizes = [8, 8, 32], strides = [1, 1, 1]} : vector<14x8x32xf32> to vector<8x8x32xf32>
    %215 = vector.extract_strided_slice %97 {offsets = [2, 2, 0], sizes = [1, 1, 32], strides = [1, 1, 1]} : vector<7x7x32xf32> to vector<1x1x32xf32>
    %216 = vector.shape_cast %215 : vector<1x1x32xf32> to vector<32xf32>
    %217 = vector.shape_cast %216 : vector<32xf32> to vector<1x1x32xf32>
    %218 = vector.broadcast %217 : vector<1x1x32xf32> to vector<8x8x32xf32>
    %219 = arith.mulf %214, %218 : vector<8x8x32xf32>
    %220 = arith.addf %213, %219 : vector<8x8x32xf32>
    %221 = vector.extract_strided_slice %199 {offsets = [3, 0, 0], sizes = [8, 8, 32], strides = [1, 1, 1]} : vector<14x8x32xf32> to vector<8x8x32xf32>
    %222 = vector.extract_strided_slice %97 {offsets = [3, 2, 0], sizes = [1, 1, 32], strides = [1, 1, 1]} : vector<7x7x32xf32> to vector<1x1x32xf32>
    %223 = vector.shape_cast %222 : vector<1x1x32xf32> to vector<32xf32>
    %224 = vector.shape_cast %223 : vector<32xf32> to vector<1x1x32xf32>
    %225 = vector.broadcast %224 : vector<1x1x32xf32> to vector<8x8x32xf32>
    %226 = arith.mulf %221, %225 : vector<8x8x32xf32>
    %227 = arith.addf %220, %226 : vector<8x8x32xf32>
    %228 = vector.extract_strided_slice %199 {offsets = [4, 0, 0], sizes = [8, 8, 32], strides = [1, 1, 1]} : vector<14x8x32xf32> to vector<8x8x32xf32>
    %229 = vector.extract_strided_slice %97 {offsets = [4, 2, 0], sizes = [1, 1, 32], strides = [1, 1, 1]} : vector<7x7x32xf32> to vector<1x1x32xf32>
    %230 = vector.shape_cast %229 : vector<1x1x32xf32> to vector<32xf32>
    %231 = vector.shape_cast %230 : vector<32xf32> to vector<1x1x32xf32>
    %232 = vector.broadcast %231 : vector<1x1x32xf32> to vector<8x8x32xf32>
    %233 = arith.mulf %228, %232 : vector<8x8x32xf32>
    %234 = arith.addf %227, %233 : vector<8x8x32xf32>
    %235 = vector.extract_strided_slice %199 {offsets = [5, 0, 0], sizes = [8, 8, 32], strides = [1, 1, 1]} : vector<14x8x32xf32> to vector<8x8x32xf32>
    %236 = vector.extract_strided_slice %97 {offsets = [5, 2, 0], sizes = [1, 1, 32], strides = [1, 1, 1]} : vector<7x7x32xf32> to vector<1x1x32xf32>
    %237 = vector.shape_cast %236 : vector<1x1x32xf32> to vector<32xf32>
    %238 = vector.shape_cast %237 : vector<32xf32> to vector<1x1x32xf32>
    %239 = vector.broadcast %238 : vector<1x1x32xf32> to vector<8x8x32xf32>
    %240 = arith.mulf %235, %239 : vector<8x8x32xf32>
    %241 = arith.addf %234, %240 : vector<8x8x32xf32>
    %242 = vector.extract_strided_slice %199 {offsets = [6, 0, 0], sizes = [8, 8, 32], strides = [1, 1, 1]} : vector<14x8x32xf32> to vector<8x8x32xf32>
    %243 = vector.extract_strided_slice %97 {offsets = [6, 2, 0], sizes = [1, 1, 32], strides = [1, 1, 1]} : vector<7x7x32xf32> to vector<1x1x32xf32>
    %244 = vector.shape_cast %243 : vector<1x1x32xf32> to vector<32xf32>
    %245 = vector.shape_cast %244 : vector<32xf32> to vector<1x1x32xf32>
    %246 = vector.broadcast %245 : vector<1x1x32xf32> to vector<8x8x32xf32>
    %247 = arith.mulf %242, %246 : vector<8x8x32xf32>
    %248 = arith.addf %241, %247 : vector<8x8x32xf32>
    %249 = vector.extract_strided_slice %96 {offsets = [0, 8, 0], sizes = [14, 8, 32], strides = [1, 1, 1]} : vector<14x24x32xf32> to vector<14x8x32xf32>
    %250 = vector.extract_strided_slice %249 {offsets = [0, 0, 0], sizes = [8, 8, 32], strides = [1, 1, 1]} : vector<14x8x32xf32> to vector<8x8x32xf32>
    %251 = vector.extract_strided_slice %97 {offsets = [0, 3, 0], sizes = [1, 1, 32], strides = [1, 1, 1]} : vector<7x7x32xf32> to vector<1x1x32xf32>
    %252 = vector.shape_cast %251 : vector<1x1x32xf32> to vector<32xf32>
    %253 = vector.shape_cast %252 : vector<32xf32> to vector<1x1x32xf32>
    %254 = vector.broadcast %253 : vector<1x1x32xf32> to vector<8x8x32xf32>
    %255 = arith.mulf %250, %254 : vector<8x8x32xf32>
    %256 = arith.addf %248, %255 : vector<8x8x32xf32>
    %257 = vector.extract_strided_slice %249 {offsets = [1, 0, 0], sizes = [8, 8, 32], strides = [1, 1, 1]} : vector<14x8x32xf32> to vector<8x8x32xf32>
    %258 = vector.extract_strided_slice %97 {offsets = [1, 3, 0], sizes = [1, 1, 32], strides = [1, 1, 1]} : vector<7x7x32xf32> to vector<1x1x32xf32>
    %259 = vector.shape_cast %258 : vector<1x1x32xf32> to vector<32xf32>
    %260 = vector.shape_cast %259 : vector<32xf32> to vector<1x1x32xf32>
    %261 = vector.broadcast %260 : vector<1x1x32xf32> to vector<8x8x32xf32>
    %262 = arith.mulf %257, %261 : vector<8x8x32xf32>
    %263 = arith.addf %256, %262 : vector<8x8x32xf32>
    %264 = vector.extract_strided_slice %249 {offsets = [2, 0, 0], sizes = [8, 8, 32], strides = [1, 1, 1]} : vector<14x8x32xf32> to vector<8x8x32xf32>
    %265 = vector.extract_strided_slice %97 {offsets = [2, 3, 0], sizes = [1, 1, 32], strides = [1, 1, 1]} : vector<7x7x32xf32> to vector<1x1x32xf32>
    %266 = vector.shape_cast %265 : vector<1x1x32xf32> to vector<32xf32>
    %267 = vector.shape_cast %266 : vector<32xf32> to vector<1x1x32xf32>
    %268 = vector.broadcast %267 : vector<1x1x32xf32> to vector<8x8x32xf32>
    %269 = arith.mulf %264, %268 : vector<8x8x32xf32>
    %270 = arith.addf %263, %269 : vector<8x8x32xf32>
    %271 = vector.extract_strided_slice %249 {offsets = [3, 0, 0], sizes = [8, 8, 32], strides = [1, 1, 1]} : vector<14x8x32xf32> to vector<8x8x32xf32>
    %272 = vector.extract_strided_slice %97 {offsets = [3, 3, 0], sizes = [1, 1, 32], strides = [1, 1, 1]} : vector<7x7x32xf32> to vector<1x1x32xf32>
    %273 = vector.shape_cast %272 : vector<1x1x32xf32> to vector<32xf32>
    %274 = vector.shape_cast %273 : vector<32xf32> to vector<1x1x32xf32>
    %275 = vector.broadcast %274 : vector<1x1x32xf32> to vector<8x8x32xf32>
    %276 = arith.mulf %271, %275 : vector<8x8x32xf32>
    %277 = arith.addf %270, %276 : vector<8x8x32xf32>
    %278 = vector.extract_strided_slice %249 {offsets = [4, 0, 0], sizes = [8, 8, 32], strides = [1, 1, 1]} : vector<14x8x32xf32> to vector<8x8x32xf32>
    %279 = vector.extract_strided_slice %97 {offsets = [4, 3, 0], sizes = [1, 1, 32], strides = [1, 1, 1]} : vector<7x7x32xf32> to vector<1x1x32xf32>
    %280 = vector.shape_cast %279 : vector<1x1x32xf32> to vector<32xf32>
    %281 = vector.shape_cast %280 : vector<32xf32> to vector<1x1x32xf32>
    %282 = vector.broadcast %281 : vector<1x1x32xf32> to vector<8x8x32xf32>
    %283 = arith.mulf %278, %282 : vector<8x8x32xf32>
    %284 = arith.addf %277, %283 : vector<8x8x32xf32>
    %285 = vector.extract_strided_slice %249 {offsets = [5, 0, 0], sizes = [8, 8, 32], strides = [1, 1, 1]} : vector<14x8x32xf32> to vector<8x8x32xf32>
    %286 = vector.extract_strided_slice %97 {offsets = [5, 3, 0], sizes = [1, 1, 32], strides = [1, 1, 1]} : vector<7x7x32xf32> to vector<1x1x32xf32>
    %287 = vector.shape_cast %286 : vector<1x1x32xf32> to vector<32xf32>
    %288 = vector.shape_cast %287 : vector<32xf32> to vector<1x1x32xf32>
    %289 = vector.broadcast %288 : vector<1x1x32xf32> to vector<8x8x32xf32>
    %290 = arith.mulf %285, %289 : vector<8x8x32xf32>
    %291 = arith.addf %284, %290 : vector<8x8x32xf32>
    %292 = vector.extract_strided_slice %249 {offsets = [6, 0, 0], sizes = [8, 8, 32], strides = [1, 1, 1]} : vector<14x8x32xf32> to vector<8x8x32xf32>
    %293 = vector.extract_strided_slice %97 {offsets = [6, 3, 0], sizes = [1, 1, 32], strides = [1, 1, 1]} : vector<7x7x32xf32> to vector<1x1x32xf32>
    %294 = vector.shape_cast %293 : vector<1x1x32xf32> to vector<32xf32>
    %295 = vector.shape_cast %294 : vector<32xf32> to vector<1x1x32xf32>
    %296 = vector.broadcast %295 : vector<1x1x32xf32> to vector<8x8x32xf32>
    %297 = arith.mulf %292, %296 : vector<8x8x32xf32>
    %298 = arith.addf %291, %297 : vector<8x8x32xf32>
    %299 = vector.extract_strided_slice %96 {offsets = [0, 9, 0], sizes = [14, 8, 32], strides = [1, 1, 1]} : vector<14x24x32xf32> to vector<14x8x32xf32>
    %300 = vector.extract_strided_slice %299 {offsets = [0, 0, 0], sizes = [8, 8, 32], strides = [1, 1, 1]} : vector<14x8x32xf32> to vector<8x8x32xf32>
    %301 = vector.extract_strided_slice %97 {offsets = [0, 4, 0], sizes = [1, 1, 32], strides = [1, 1, 1]} : vector<7x7x32xf32> to vector<1x1x32xf32>
    %302 = vector.shape_cast %301 : vector<1x1x32xf32> to vector<32xf32>
    %303 = vector.shape_cast %302 : vector<32xf32> to vector<1x1x32xf32>
    %304 = vector.broadcast %303 : vector<1x1x32xf32> to vector<8x8x32xf32>
    %305 = arith.mulf %300, %304 : vector<8x8x32xf32>
    %306 = arith.addf %298, %305 : vector<8x8x32xf32>
    %307 = vector.extract_strided_slice %299 {offsets = [1, 0, 0], sizes = [8, 8, 32], strides = [1, 1, 1]} : vector<14x8x32xf32> to vector<8x8x32xf32>
    %308 = vector.extract_strided_slice %97 {offsets = [1, 4, 0], sizes = [1, 1, 32], strides = [1, 1, 1]} : vector<7x7x32xf32> to vector<1x1x32xf32>
    %309 = vector.shape_cast %308 : vector<1x1x32xf32> to vector<32xf32>
    %310 = vector.shape_cast %309 : vector<32xf32> to vector<1x1x32xf32>
    %311 = vector.broadcast %310 : vector<1x1x32xf32> to vector<8x8x32xf32>
    %312 = arith.mulf %307, %311 : vector<8x8x32xf32>
    %313 = arith.addf %306, %312 : vector<8x8x32xf32>
    %314 = vector.extract_strided_slice %299 {offsets = [2, 0, 0], sizes = [8, 8, 32], strides = [1, 1, 1]} : vector<14x8x32xf32> to vector<8x8x32xf32>
    %315 = vector.extract_strided_slice %97 {offsets = [2, 4, 0], sizes = [1, 1, 32], strides = [1, 1, 1]} : vector<7x7x32xf32> to vector<1x1x32xf32>
    %316 = vector.shape_cast %315 : vector<1x1x32xf32> to vector<32xf32>
    %317 = vector.shape_cast %316 : vector<32xf32> to vector<1x1x32xf32>
    %318 = vector.broadcast %317 : vector<1x1x32xf32> to vector<8x8x32xf32>
    %319 = arith.mulf %314, %318 : vector<8x8x32xf32>
    %320 = arith.addf %313, %319 : vector<8x8x32xf32>
    %321 = vector.extract_strided_slice %299 {offsets = [3, 0, 0], sizes = [8, 8, 32], strides = [1, 1, 1]} : vector<14x8x32xf32> to vector<8x8x32xf32>
    %322 = vector.extract_strided_slice %97 {offsets = [3, 4, 0], sizes = [1, 1, 32], strides = [1, 1, 1]} : vector<7x7x32xf32> to vector<1x1x32xf32>
    %323 = vector.shape_cast %322 : vector<1x1x32xf32> to vector<32xf32>
    %324 = vector.shape_cast %323 : vector<32xf32> to vector<1x1x32xf32>
    %325 = vector.broadcast %324 : vector<1x1x32xf32> to vector<8x8x32xf32>
    %326 = arith.mulf %321, %325 : vector<8x8x32xf32>
    %327 = arith.addf %320, %326 : vector<8x8x32xf32>
    %328 = vector.extract_strided_slice %299 {offsets = [4, 0, 0], sizes = [8, 8, 32], strides = [1, 1, 1]} : vector<14x8x32xf32> to vector<8x8x32xf32>
    %329 = vector.extract_strided_slice %97 {offsets = [4, 4, 0], sizes = [1, 1, 32], strides = [1, 1, 1]} : vector<7x7x32xf32> to vector<1x1x32xf32>
    %330 = vector.shape_cast %329 : vector<1x1x32xf32> to vector<32xf32>
    %331 = vector.shape_cast %330 : vector<32xf32> to vector<1x1x32xf32>
    %332 = vector.broadcast %331 : vector<1x1x32xf32> to vector<8x8x32xf32>
    %333 = arith.mulf %328, %332 : vector<8x8x32xf32>
    %334 = arith.addf %327, %333 : vector<8x8x32xf32>
    %335 = vector.extract_strided_slice %299 {offsets = [5, 0, 0], sizes = [8, 8, 32], strides = [1, 1, 1]} : vector<14x8x32xf32> to vector<8x8x32xf32>
    %336 = vector.extract_strided_slice %97 {offsets = [5, 4, 0], sizes = [1, 1, 32], strides = [1, 1, 1]} : vector<7x7x32xf32> to vector<1x1x32xf32>
    %337 = vector.shape_cast %336 : vector<1x1x32xf32> to vector<32xf32>
    %338 = vector.shape_cast %337 : vector<32xf32> to vector<1x1x32xf32>
    %339 = vector.broadcast %338 : vector<1x1x32xf32> to vector<8x8x32xf32>
    %340 = arith.mulf %335, %339 : vector<8x8x32xf32>
    %341 = arith.addf %334, %340 : vector<8x8x32xf32>
    %342 = vector.extract_strided_slice %299 {offsets = [6, 0, 0], sizes = [8, 8, 32], strides = [1, 1, 1]} : vector<14x8x32xf32> to vector<8x8x32xf32>
    %343 = vector.extract_strided_slice %97 {offsets = [6, 4, 0], sizes = [1, 1, 32], strides = [1, 1, 1]} : vector<7x7x32xf32> to vector<1x1x32xf32>
    %344 = vector.shape_cast %343 : vector<1x1x32xf32> to vector<32xf32>
    %345 = vector.shape_cast %344 : vector<32xf32> to vector<1x1x32xf32>
    %346 = vector.broadcast %345 : vector<1x1x32xf32> to vector<8x8x32xf32>
    %347 = arith.mulf %342, %346 : vector<8x8x32xf32>
    %348 = arith.addf %341, %347 : vector<8x8x32xf32>
    %349 = vector.extract_strided_slice %96 {offsets = [0, 10, 0], sizes = [14, 8, 32], strides = [1, 1, 1]} : vector<14x24x32xf32> to vector<14x8x32xf32>
    %350 = vector.extract_strided_slice %349 {offsets = [0, 0, 0], sizes = [8, 8, 32], strides = [1, 1, 1]} : vector<14x8x32xf32> to vector<8x8x32xf32>
    %351 = vector.extract_strided_slice %97 {offsets = [0, 5, 0], sizes = [1, 1, 32], strides = [1, 1, 1]} : vector<7x7x32xf32> to vector<1x1x32xf32>
    %352 = vector.shape_cast %351 : vector<1x1x32xf32> to vector<32xf32>
    %353 = vector.shape_cast %352 : vector<32xf32> to vector<1x1x32xf32>
    %354 = vector.broadcast %353 : vector<1x1x32xf32> to vector<8x8x32xf32>
    %355 = arith.mulf %350, %354 : vector<8x8x32xf32>
    %356 = arith.addf %348, %355 : vector<8x8x32xf32>
    %357 = vector.extract_strided_slice %349 {offsets = [1, 0, 0], sizes = [8, 8, 32], strides = [1, 1, 1]} : vector<14x8x32xf32> to vector<8x8x32xf32>
    %358 = vector.extract_strided_slice %97 {offsets = [1, 5, 0], sizes = [1, 1, 32], strides = [1, 1, 1]} : vector<7x7x32xf32> to vector<1x1x32xf32>
    %359 = vector.shape_cast %358 : vector<1x1x32xf32> to vector<32xf32>
    %360 = vector.shape_cast %359 : vector<32xf32> to vector<1x1x32xf32>
    %361 = vector.broadcast %360 : vector<1x1x32xf32> to vector<8x8x32xf32>
    %362 = arith.mulf %357, %361 : vector<8x8x32xf32>
    %363 = arith.addf %356, %362 : vector<8x8x32xf32>
    %364 = vector.extract_strided_slice %349 {offsets = [2, 0, 0], sizes = [8, 8, 32], strides = [1, 1, 1]} : vector<14x8x32xf32> to vector<8x8x32xf32>
    %365 = vector.extract_strided_slice %97 {offsets = [2, 5, 0], sizes = [1, 1, 32], strides = [1, 1, 1]} : vector<7x7x32xf32> to vector<1x1x32xf32>
    %366 = vector.shape_cast %365 : vector<1x1x32xf32> to vector<32xf32>
    %367 = vector.shape_cast %366 : vector<32xf32> to vector<1x1x32xf32>
    %368 = vector.broadcast %367 : vector<1x1x32xf32> to vector<8x8x32xf32>
    %369 = arith.mulf %364, %368 : vector<8x8x32xf32>
    %370 = arith.addf %363, %369 : vector<8x8x32xf32>
    %371 = vector.extract_strided_slice %349 {offsets = [3, 0, 0], sizes = [8, 8, 32], strides = [1, 1, 1]} : vector<14x8x32xf32> to vector<8x8x32xf32>
    %372 = vector.extract_strided_slice %97 {offsets = [3, 5, 0], sizes = [1, 1, 32], strides = [1, 1, 1]} : vector<7x7x32xf32> to vector<1x1x32xf32>
    %373 = vector.shape_cast %372 : vector<1x1x32xf32> to vector<32xf32>
    %374 = vector.shape_cast %373 : vector<32xf32> to vector<1x1x32xf32>
    %375 = vector.broadcast %374 : vector<1x1x32xf32> to vector<8x8x32xf32>
    %376 = arith.mulf %371, %375 : vector<8x8x32xf32>
    %377 = arith.addf %370, %376 : vector<8x8x32xf32>
    %378 = vector.extract_strided_slice %349 {offsets = [4, 0, 0], sizes = [8, 8, 32], strides = [1, 1, 1]} : vector<14x8x32xf32> to vector<8x8x32xf32>
    %379 = vector.extract_strided_slice %97 {offsets = [4, 5, 0], sizes = [1, 1, 32], strides = [1, 1, 1]} : vector<7x7x32xf32> to vector<1x1x32xf32>
    %380 = vector.shape_cast %379 : vector<1x1x32xf32> to vector<32xf32>
    %381 = vector.shape_cast %380 : vector<32xf32> to vector<1x1x32xf32>
    %382 = vector.broadcast %381 : vector<1x1x32xf32> to vector<8x8x32xf32>
    %383 = arith.mulf %378, %382 : vector<8x8x32xf32>
    %384 = arith.addf %377, %383 : vector<8x8x32xf32>
    %385 = vector.extract_strided_slice %349 {offsets = [5, 0, 0], sizes = [8, 8, 32], strides = [1, 1, 1]} : vector<14x8x32xf32> to vector<8x8x32xf32>
    %386 = vector.extract_strided_slice %97 {offsets = [5, 5, 0], sizes = [1, 1, 32], strides = [1, 1, 1]} : vector<7x7x32xf32> to vector<1x1x32xf32>
    %387 = vector.shape_cast %386 : vector<1x1x32xf32> to vector<32xf32>
    %388 = vector.shape_cast %387 : vector<32xf32> to vector<1x1x32xf32>
    %389 = vector.broadcast %388 : vector<1x1x32xf32> to vector<8x8x32xf32>
    %390 = arith.mulf %385, %389 : vector<8x8x32xf32>
    %391 = arith.addf %384, %390 : vector<8x8x32xf32>
    %392 = vector.extract_strided_slice %349 {offsets = [6, 0, 0], sizes = [8, 8, 32], strides = [1, 1, 1]} : vector<14x8x32xf32> to vector<8x8x32xf32>
    %393 = vector.extract_strided_slice %97 {offsets = [6, 5, 0], sizes = [1, 1, 32], strides = [1, 1, 1]} : vector<7x7x32xf32> to vector<1x1x32xf32>
    %394 = vector.shape_cast %393 : vector<1x1x32xf32> to vector<32xf32>
    %395 = vector.shape_cast %394 : vector<32xf32> to vector<1x1x32xf32>
    %396 = vector.broadcast %395 : vector<1x1x32xf32> to vector<8x8x32xf32>
    %397 = arith.mulf %392, %396 : vector<8x8x32xf32>
    %398 = arith.addf %391, %397 : vector<8x8x32xf32>
    %399 = vector.extract_strided_slice %96 {offsets = [0, 11, 0], sizes = [14, 8, 32], strides = [1, 1, 1]} : vector<14x24x32xf32> to vector<14x8x32xf32>
    %400 = vector.extract_strided_slice %399 {offsets = [0, 0, 0], sizes = [8, 8, 32], strides = [1, 1, 1]} : vector<14x8x32xf32> to vector<8x8x32xf32>
    %401 = vector.extract_strided_slice %97 {offsets = [0, 6, 0], sizes = [1, 1, 32], strides = [1, 1, 1]} : vector<7x7x32xf32> to vector<1x1x32xf32>
    %402 = vector.shape_cast %401 : vector<1x1x32xf32> to vector<32xf32>
    %403 = vector.shape_cast %402 : vector<32xf32> to vector<1x1x32xf32>
    %404 = vector.broadcast %403 : vector<1x1x32xf32> to vector<8x8x32xf32>
    %405 = arith.mulf %400, %404 : vector<8x8x32xf32>
    %406 = arith.addf %398, %405 : vector<8x8x32xf32>
    %407 = vector.extract_strided_slice %399 {offsets = [1, 0, 0], sizes = [8, 8, 32], strides = [1, 1, 1]} : vector<14x8x32xf32> to vector<8x8x32xf32>
    %408 = vector.extract_strided_slice %97 {offsets = [1, 6, 0], sizes = [1, 1, 32], strides = [1, 1, 1]} : vector<7x7x32xf32> to vector<1x1x32xf32>
    %409 = vector.shape_cast %408 : vector<1x1x32xf32> to vector<32xf32>
    %410 = vector.shape_cast %409 : vector<32xf32> to vector<1x1x32xf32>
    %411 = vector.broadcast %410 : vector<1x1x32xf32> to vector<8x8x32xf32>
    %412 = arith.mulf %407, %411 : vector<8x8x32xf32>
    %413 = arith.addf %406, %412 : vector<8x8x32xf32>
    %414 = vector.extract_strided_slice %399 {offsets = [2, 0, 0], sizes = [8, 8, 32], strides = [1, 1, 1]} : vector<14x8x32xf32> to vector<8x8x32xf32>
    %415 = vector.extract_strided_slice %97 {offsets = [2, 6, 0], sizes = [1, 1, 32], strides = [1, 1, 1]} : vector<7x7x32xf32> to vector<1x1x32xf32>
    %416 = vector.shape_cast %415 : vector<1x1x32xf32> to vector<32xf32>
    %417 = vector.shape_cast %416 : vector<32xf32> to vector<1x1x32xf32>
    %418 = vector.broadcast %417 : vector<1x1x32xf32> to vector<8x8x32xf32>
    %419 = arith.mulf %414, %418 : vector<8x8x32xf32>
    %420 = arith.addf %413, %419 : vector<8x8x32xf32>
    %421 = vector.extract_strided_slice %399 {offsets = [3, 0, 0], sizes = [8, 8, 32], strides = [1, 1, 1]} : vector<14x8x32xf32> to vector<8x8x32xf32>
    %422 = vector.extract_strided_slice %97 {offsets = [3, 6, 0], sizes = [1, 1, 32], strides = [1, 1, 1]} : vector<7x7x32xf32> to vector<1x1x32xf32>
    %423 = vector.shape_cast %422 : vector<1x1x32xf32> to vector<32xf32>
    %424 = vector.shape_cast %423 : vector<32xf32> to vector<1x1x32xf32>
    %425 = vector.broadcast %424 : vector<1x1x32xf32> to vector<8x8x32xf32>
    %426 = arith.mulf %421, %425 : vector<8x8x32xf32>
    %427 = arith.addf %420, %426 : vector<8x8x32xf32>
    %428 = vector.extract_strided_slice %399 {offsets = [4, 0, 0], sizes = [8, 8, 32], strides = [1, 1, 1]} : vector<14x8x32xf32> to vector<8x8x32xf32>
    %429 = vector.extract_strided_slice %97 {offsets = [4, 6, 0], sizes = [1, 1, 32], strides = [1, 1, 1]} : vector<7x7x32xf32> to vector<1x1x32xf32>
    %430 = vector.shape_cast %429 : vector<1x1x32xf32> to vector<32xf32>
    %431 = vector.shape_cast %430 : vector<32xf32> to vector<1x1x32xf32>
    %432 = vector.broadcast %431 : vector<1x1x32xf32> to vector<8x8x32xf32>
    %433 = arith.mulf %428, %432 : vector<8x8x32xf32>
    %434 = arith.addf %427, %433 : vector<8x8x32xf32>
    %435 = vector.extract_strided_slice %399 {offsets = [5, 0, 0], sizes = [8, 8, 32], strides = [1, 1, 1]} : vector<14x8x32xf32> to vector<8x8x32xf32>
    %436 = vector.extract_strided_slice %97 {offsets = [5, 6, 0], sizes = [1, 1, 32], strides = [1, 1, 1]} : vector<7x7x32xf32> to vector<1x1x32xf32>
    %437 = vector.shape_cast %436 : vector<1x1x32xf32> to vector<32xf32>
    %438 = vector.shape_cast %437 : vector<32xf32> to vector<1x1x32xf32>
    %439 = vector.broadcast %438 : vector<1x1x32xf32> to vector<8x8x32xf32>
    %440 = arith.mulf %435, %439 : vector<8x8x32xf32>
    %441 = arith.addf %434, %440 : vector<8x8x32xf32>
    %442 = vector.extract_strided_slice %399 {offsets = [6, 0, 0], sizes = [8, 8, 32], strides = [1, 1, 1]} : vector<14x8x32xf32> to vector<8x8x32xf32>
    %443 = vector.extract_strided_slice %97 {offsets = [6, 6, 0], sizes = [1, 1, 32], strides = [1, 1, 1]} : vector<7x7x32xf32> to vector<1x1x32xf32>
    %444 = vector.shape_cast %443 : vector<1x1x32xf32> to vector<32xf32>
    %445 = vector.shape_cast %444 : vector<32xf32> to vector<1x1x32xf32>
    %446 = vector.broadcast %445 : vector<1x1x32xf32> to vector<8x8x32xf32>
    %447 = arith.mulf %442, %446 : vector<8x8x32xf32>
    %448 = arith.addf %441, %447 : vector<8x8x32xf32>
    %c0_68 = arith.constant 0 : index
    %c0_69 = arith.constant 0 : index
    %c0_70 = arith.constant 0 : index
    %449 = vector.load %arg6[%c0_68, %c0_69, %c0_70] : memref<1x1x32xf32, #tpu.memory_space<vmem>>, vector<1x1x32xf32>
    %450 = vector.broadcast %449 : vector<1x1x32xf32> to vector<8x8x32xf32>
    %451 = arith.addf %448, %450 : vector<8x8x32xf32>
    %cst_71 = arith.constant dense<0.000000e+00> : vector<8x8xf32>
    %452 = vector.multi_reduction <add>, %451, %cst_71 [2] : vector<8x8x32xf32> to vector<8x8xf32>
    %453 = vector.shape_cast %452 : vector<8x8xf32> to vector<8x8x1xf32>
    %cst_72 = arith.constant 3.200000e+01 : f32
    %454 = vector.broadcast %cst_72 : f32 to vector<8x8x1xf32>
    %455 = arith.divf %453, %454 : vector<8x8x1xf32>
    %456 = arith.mulf %451, %451 : vector<8x8x32xf32>
    %cst_73 = arith.constant dense<0.000000e+00> : vector<8x8xf32>
    %457 = vector.multi_reduction <add>, %456, %cst_73 [2] : vector<8x8x32xf32> to vector<8x8xf32>
    %458 = vector.shape_cast %457 : vector<8x8xf32> to vector<8x8x1xf32>
    %cst_74 = arith.constant 3.200000e+01 : f32
    %459 = vector.broadcast %cst_74 : f32 to vector<8x8x1xf32>
    %460 = arith.divf %458, %459 : vector<8x8x1xf32>
    %461 = arith.mulf %455, %455 : vector<8x8x1xf32>
    %462 = arith.subf %460, %461 : vector<8x8x1xf32>
    %cst_75 = arith.constant 0.000000e+00 : f32
    %463 = vector.broadcast %cst_75 : f32 to vector<8x8x1xf32>
    %464 = arith.maximumf %462, %463 : vector<8x8x1xf32>
    %465 = vector.broadcast %455 : vector<8x8x1xf32> to vector<8x8x32xf32>
    %466 = arith.subf %451, %465 : vector<8x8x32xf32>
    %cst_76 = arith.constant 9.99999974E-6 : f32
    %467 = vector.broadcast %cst_76 : f32 to vector<8x8x1xf32>
    %468 = arith.addf %464, %467 : vector<8x8x1xf32>
    %469 = math.rsqrt %468 : vector<8x8x1xf32>
    %470 = vector.broadcast %469 : vector<8x8x1xf32> to vector<8x8x32xf32>
    %471 = arith.mulf %466, %470 : vector<8x8x32xf32>
    %c0_77 = arith.constant 0 : index
    %c0_78 = arith.constant 0 : index
    %c0_79 = arith.constant 0 : index
    %472 = vector.load %arg7[%c0_77, %c0_78, %c0_79] : memref<1x1x32xf32, #tpu.memory_space<vmem>>, vector<1x1x32xf32>
    %473 = vector.broadcast %472 : vector<1x1x32xf32> to vector<8x8x32xf32>
    %474 = arith.mulf %471, %473 : vector<8x8x32xf32>
    %c0_80 = arith.constant 0 : index
    %c0_81 = arith.constant 0 : index
    %c0_82 = arith.constant 0 : index
    %475 = vector.load %arg8[%c0_80, %c0_81, %c0_82] : memref<1x1x32xf32, #tpu.memory_space<vmem>>, vector<1x1x32xf32>
    %476 = vector.broadcast %475 : vector<1x1x32xf32> to vector<8x8x32xf32>
    %477 = arith.addf %474, %476 : vector<8x8x32xf32>
    %478 = vector.extract_strided_slice %477 {offsets = [0, 0, 0], sizes = [1, 8, 32], strides = [1, 1, 1]} : vector<8x8x32xf32> to vector<1x8x32xf32>
    %479 = vector.shape_cast %478 : vector<1x8x32xf32> to vector<8x32xf32>
    %c0_83 = arith.constant 0 : index
    %c0_84 = arith.constant 0 : index
    %480 = vector.load %arg17[%c0_83, %c0_84] : memref<64x32xf32, #tpu.memory_space<vmem>>, vector<8x32xf32>
    tpu.vector_store %arg17[%c0_83, %c0_84], %479 {strides = array<i32>} : memref<64x32xf32, #tpu.memory_space<vmem>>, vector<8x32xf32>,
    %481 = vector.extract_strided_slice %477 {offsets = [1, 0, 0], sizes = [1, 8, 32], strides = [1, 1, 1]} : vector<8x8x32xf32> to vector<1x8x32xf32>
    %482 = vector.shape_cast %481 : vector<1x8x32xf32> to vector<8x32xf32>
    %c8_85 = arith.constant 8 : index
    %c0_86 = arith.constant 0 : index
    %483 = vector.load %arg17[%c8_85, %c0_86] : memref<64x32xf32, #tpu.memory_space<vmem>>, vector<8x32xf32>
    tpu.vector_store %arg17[%c8_85, %c0_86], %482 {strides = array<i32>} : memref<64x32xf32, #tpu.memory_space<vmem>>, vector<8x32xf32>,
    %484 = vector.extract_strided_slice %477 {offsets = [2, 0, 0], sizes = [1, 8, 32], strides = [1, 1, 1]} : vector<8x8x32xf32> to vector<1x8x32xf32>
    %485 = vector.shape_cast %484 : vector<1x8x32xf32> to vector<8x32xf32>
    %c16_87 = arith.constant 16 : index
    %c0_88 = arith.constant 0 : index
    %486 = vector.load %arg17[%c16_87, %c0_88] : memref<64x32xf32, #tpu.memory_space<vmem>>, vector<8x32xf32>
    tpu.vector_store %arg17[%c16_87, %c0_88], %485 {strides = array<i32>} : memref<64x32xf32, #tpu.memory_space<vmem>>, vector<8x32xf32>,
    %487 = vector.extract_strided_slice %477 {offsets = [3, 0, 0], sizes = [1, 8, 32], strides = [1, 1, 1]} : vector<8x8x32xf32> to vector<1x8x32xf32>
    %488 = vector.shape_cast %487 : vector<1x8x32xf32> to vector<8x32xf32>
    %c24_89 = arith.constant 24 : index
    %c0_90 = arith.constant 0 : index
    %489 = vector.load %arg17[%c24_89, %c0_90] : memref<64x32xf32, #tpu.memory_space<vmem>>, vector<8x32xf32>
    tpu.vector_store %arg17[%c24_89, %c0_90], %488 {strides = array<i32>} : memref<64x32xf32, #tpu.memory_space<vmem>>, vector<8x32xf32>,
    %490 = vector.extract_strided_slice %477 {offsets = [4, 0, 0], sizes = [1, 8, 32], strides = [1, 1, 1]} : vector<8x8x32xf32> to vector<1x8x32xf32>
    %491 = vector.shape_cast %490 : vector<1x8x32xf32> to vector<8x32xf32>
    %c32_91 = arith.constant 32 : index
    %c0_92 = arith.constant 0 : index
    %492 = vector.load %arg17[%c32_91, %c0_92] : memref<64x32xf32, #tpu.memory_space<vmem>>, vector<8x32xf32>
    tpu.vector_store %arg17[%c32_91, %c0_92], %491 {strides = array<i32>} : memref<64x32xf32, #tpu.memory_space<vmem>>, vector<8x32xf32>,
    %493 = vector.extract_strided_slice %477 {offsets = [5, 0, 0], sizes = [1, 8, 32], strides = [1, 1, 1]} : vector<8x8x32xf32> to vector<1x8x32xf32>
    %494 = vector.shape_cast %493 : vector<1x8x32xf32> to vector<8x32xf32>
    %c40_93 = arith.constant 40 : index
    %c0_94 = arith.constant 0 : index
    %495 = vector.load %arg17[%c40_93, %c0_94] : memref<64x32xf32, #tpu.memory_space<vmem>>, vector<8x32xf32>
    tpu.vector_store %arg17[%c40_93, %c0_94], %494 {strides = array<i32>} : memref<64x32xf32, #tpu.memory_space<vmem>>, vector<8x32xf32>,
    %496 = vector.extract_strided_slice %477 {offsets = [6, 0, 0], sizes = [1, 8, 32], strides = [1, 1, 1]} : vector<8x8x32xf32> to vector<1x8x32xf32>
    %497 = vector.shape_cast %496 : vector<1x8x32xf32> to vector<8x32xf32>
    %c48_95 = arith.constant 48 : index
    %c0_96 = arith.constant 0 : index
    %498 = vector.load %arg17[%c48_95, %c0_96] : memref<64x32xf32, #tpu.memory_space<vmem>>, vector<8x32xf32>
    tpu.vector_store %arg17[%c48_95, %c0_96], %497 {strides = array<i32>} : memref<64x32xf32, #tpu.memory_space<vmem>>, vector<8x32xf32>,
    %499 = vector.extract_strided_slice %477 {offsets = [7, 0, 0], sizes = [1, 8, 32], strides = [1, 1, 1]} : vector<8x8x32xf32> to vector<1x8x32xf32>
    %500 = vector.shape_cast %499 : vector<1x8x32xf32> to vector<8x32xf32>
    %c56_97 = arith.constant 56 : index
    %c0_98 = arith.constant 0 : index
    %501 = vector.load %arg17[%c56_97, %c0_98] : memref<64x32xf32, #tpu.memory_space<vmem>>, vector<8x32xf32>
    tpu.vector_store %arg17[%c56_97, %c0_98], %500 {strides = array<i32>} : memref<64x32xf32, #tpu.memory_space<vmem>>, vector<8x32xf32>,
    %c0_99 = arith.constant 0 : index
    %c0_100 = arith.constant 0 : index
    %502 = vector.load %arg17[%c0_99, %c0_100] : memref<64x32xf32, #tpu.memory_space<vmem>>, vector<64x32xf32>
    %503 = arith.truncf %502 : vector<64x32xf32> to vector<64x32xbf16>
    %c0_101 = arith.constant 0 : index
    %c0_102 = arith.constant 0 : index
    %504 = vector.load %arg9[%c0_101, %c0_102] : memref<32x128xbf16, #tpu.memory_space<vmem>>, vector<32x128xbf16>
    %cst_103 = arith.constant dense<0.000000e+00> : vector<64x128xf32>
    %505 = tpu.matmul %503, %504, %cst_103 {dimension_numbers = #tpu.dot_dimension_numbers<[1], [0], [0], [1], [0, 0, 1, 1], [], []>} : vector<64x32xbf16>, vector<32x128xbf16>, vector<64x128xf32> -> vector<64x128xf32>
    %c0_104 = arith.constant 0 : index
    %c0_105 = arith.constant 0 : index
    %506 = vector.load %arg10[%c0_104, %c0_105] : memref<1x128xf32, #tpu.memory_space<vmem>>, vector<1x128xf32>
    %507 = vector.broadcast %506 : vector<1x128xf32> to vector<64x128xf32>
    %508 = arith.addf %505, %507 : vector<64x128xf32>
    %cst_106 = arith.constant 5.000000e-01 : f32
    %509 = vector.broadcast %cst_106 : f32 to vector<64x128xf32>
    %510 = arith.mulf %509, %508 : vector<64x128xf32>
    %cst_107 = arith.constant 0.707106769 : f32
    %511 = vector.broadcast %cst_107 : f32 to vector<64x128xf32>
    %512 = arith.mulf %508, %511 : vector<64x128xf32>
    %513 = math.erf %512 : vector<64x128xf32>
    %cst_108 = arith.constant 1.000000e+00 : f32
    %514 = vector.broadcast %cst_108 : f32 to vector<64x128xf32>
    %515 = arith.addf %514, %513 : vector<64x128xf32>
    %516 = arith.mulf %510, %515 : vector<64x128xf32>
    %517 = arith.truncf %516 : vector<64x128xf32> to vector<64x128xbf16>
    %c0_109 = arith.constant 0 : index
    %c0_110 = arith.constant 0 : index
    %518 = vector.load %arg11[%c0_109, %c0_110] : memref<128x32xbf16, #tpu.memory_space<vmem>>, vector<128x32xbf16>
    %cst_111 = arith.constant dense<0.000000e+00> : vector<64x32xf32>
    %519 = tpu.matmul %517, %518, %cst_111 {dimension_numbers = #tpu.dot_dimension_numbers<[1], [0], [0], [1], [0, 0, 1, 1], [], []>} : vector<64x128xbf16>, vector<128x32xbf16>, vector<64x32xf32> -> vector<64x32xf32>
    %c0_112 = arith.constant 0 : index
    %c0_113 = arith.constant 0 : index
    %520 = vector.load %arg12[%c0_112, %c0_113] : memref<1x32xf32, #tpu.memory_space<vmem>>, vector<1x32xf32>
    %521 = vector.broadcast %520 : vector<1x32xf32> to vector<64x32xf32>
    %522 = arith.addf %519, %521 : vector<64x32xf32>
    %523 = arith.addf %522, %61 : vector<64x32xf32>
    %c0_114 = arith.constant 0 : index
    %c0_115 = arith.constant 0 : index
    %c0_116 = arith.constant 0 : index
    %524 = vector.load %arg13[%c0_114, %c0_115, %c0_116] : memref<1x64x32xf32, #tpu.memory_space<vmem>>, vector<1x64x32xf32>
    %525 = vector.shape_cast %524 : vector<1x64x32xf32> to vector<64x32xf32>
    %526 = vector.shape_cast %523 : vector<64x32xf32> to vector<1x64x32xf32>
    tpu.vector_store %arg13[%c0_114, %c0_115, %c0_116], %526 {strides = array<i32>} : memref<1x64x32xf32, #tpu.memory_space<vmem>>, vector<1x64x32xf32>,
    return
  }
  func.func @transform_0(%arg0: i32) -> (i32, i32, i32, i32, i32) {
    %c0_i32 = arith.constant 0 : i32
    %c0_i32_0 = arith.constant 0 : i32
    %c0_i32_1 = arith.constant 0 : i32
    %c0_i32_2 = arith.constant 0 : i32
    %c0_i32_3 = arith.constant 0 : i32
    return %arg0, %c0_i32, %c0_i32_0, %c0_i32_1, %c0_i32_2 : i32, i32, i32, i32, i32
  }
  func.func @transform_1(%arg0: i32) -> (i32, i32) {
    %c0_i32 = arith.constant 0 : i32
    %c0_i32_0 = arith.constant 0 : i32
    %c0_i32_1 = arith.constant 0 : i32
    return %c0_i32, %c0_i32_0 : i32, i32
  }
  func.func @transform_2(%arg0: i32) -> (i32, i32) {
    %c0_i32 = arith.constant 0 : i32
    %c0_i32_0 = arith.constant 0 : i32
    %c0_i32_1 = arith.constant 0 : i32
    return %c0_i32, %c0_i32_0 : i32, i32
  }
  func.func @transform_3(%arg0: i32) -> (i32, i32) {
    %c0_i32 = arith.constant 0 : i32
    %c0_i32_0 = arith.constant 0 : i32
    %c0_i32_1 = arith.constant 0 : i32
    return %c0_i32, %c0_i32_0 : i32, i32
  }
  func.func @transform_4(%arg0: i32) -> (i32, i32, i32) {
    %c0_i32 = arith.constant 0 : i32
    %c0_i32_0 = arith.constant 0 : i32
    %c0_i32_1 = arith.constant 0 : i32
    %c0_i32_2 = arith.constant 0 : i32
    return %c0_i32, %c0_i32_0, %c0_i32_1 : i32, i32, i32
  }
  func.func @transform_5(%arg0: i32) -> (i32, i32, i32) {
    %c0_i32 = arith.constant 0 : i32
    %c0_i32_0 = arith.constant 0 : i32
    %c0_i32_1 = arith.constant 0 : i32
    %c0_i32_2 = arith.constant 0 : i32
    return %c0_i32, %c0_i32_0, %c0_i32_1 : i32, i32, i32
  }
  func.func @transform_6(%arg0: i32) -> (i32, i32, i32) {
    %c0_i32 = arith.constant 0 : i32
    %c0_i32_0 = arith.constant 0 : i32
    %c0_i32_1 = arith.constant 0 : i32
    %c0_i32_2 = arith.constant 0 : i32
    return %c0_i32, %c0_i32_0, %c0_i32_1 : i32, i32, i32
  }
  func.func @transform_7(%arg0: i32) -> (i32, i32, i32) {
    %c0_i32 = arith.constant 0 : i32
    %c0_i32_0 = arith.constant 0 : i32
    %c0_i32_1 = arith.constant 0 : i32
    %c0_i32_2 = arith.constant 0 : i32
    return %c0_i32, %c0_i32_0, %c0_i32_1 : i32, i32, i32
  }
  func.func @transform_8(%arg0: i32) -> (i32, i32) {
    %c0_i32 = arith.constant 0 : i32
    %c0_i32_0 = arith.constant 0 : i32
    %c0_i32_1 = arith.constant 0 : i32
    return %c0_i32, %c0_i32_0 : i32, i32
  }
  func.func @transform_9(%arg0: i32) -> (i32, i32) {
    %c0_i32 = arith.constant 0 : i32
    %c0_i32_0 = arith.constant 0 : i32
    %c0_i32_1 = arith.constant 0 : i32
    return %c0_i32, %c0_i32_0 : i32, i32
  }
  func.func @transform_10(%arg0: i32) -> (i32, i32) {
    %c0_i32 = arith.constant 0 : i32
    %c0_i32_0 = arith.constant 0 : i32
    %c0_i32_1 = arith.constant 0 : i32
    return %c0_i32, %c0_i32_0 : i32, i32
  }
  func.func @transform_11(%arg0: i32) -> (i32, i32) {
    %c0_i32 = arith.constant 0 : i32
    %c0_i32_0 = arith.constant 0 : i32
    %c0_i32_1 = arith.constant 0 : i32
    return %c0_i32, %c0_i32_0 : i32, i32
  }
  func.func @transform_12(%arg0: i32) -> (i32, i32, i32) {
    %c0_i32 = arith.constant 0 : i32
    %c0_i32_0 = arith.constant 0 : i32
    %c0_i32_1 = arith.constant 0 : i32
    return %arg0, %c0_i32, %c0_i32_0 : i32, i32, i32
  }
}

</mosaic_0001>

<bundles_post_ra>
// kernel: tpu_custom_call.1
= control target key start
LH: loop header
LB: loop body
LE: loop exit
PB: predicated region body
PF: predicated region fallthrough
CT: control target
= control target key end

     0   :  { %17 = vsyncpa [#allocation7], 0  ;;  %s11667_s0 = inlined_call_operand.hbm [shape: f32[2,8,2,8,8], index: 0, kind: input, shape index: {}]   ;;  %s11668_s1 = inlined_call_operand.vmem [shape: bf16[8,32], index: 1, kind: input, shape index: {}]   ;;  %s11669_s2 = inlined_call_operand.vmem [shape: bf16[8,32], index: 2, kind: input, shape index: {}]   ;;  %s11670_s3 = inlined_call_operand.vmem [shape: f32[1,32], index: 3, kind: input, shape index: {}]   ;;  %s11671_s4 = inlined_call_operand.vmem [shape: f32[7,7,32], index: 4, kind: input, shape index: {}]   ;;  %s11672_s5 = inlined_call_operand.vmem [shape: f32[1,1,32], index: 5, kind: input, shape index: {}]   ;;  %s11673_s6 = inlined_call_operand.vmem [shape: f32[1,1,32], index: 6, kind: input, shape index: {}]   ;;  %s11674_s7 = inlined_call_operand.vmem [shape: f32[1,1,32], index: 7, kind: input, shape index: {}]   ;;  %s11675_s8 = inlined_call_operand.vmem [shape: bf16[32,128], index: 8, kind: input, shape index: {}]   ;;  %s11676_s9 = inlined_call_operand.vmem [shape: f32[1,128], index: 9, kind: input, shape index: {}]   ;;  %s11677_s10 = inlined_call_operand.vmem [shape: bf16[128,32], index: 10, kind: input, shape index: {}]   ;;  %s11678_s11 = inlined_call_operand.vmem [shape: f32[1,32], index: 11, kind: input, shape index: {}]   ;;  %s11679_s12 = inlined_call_operand.vmem [shape: f32[2,64,32], index: 12, kind: output, shape index: {}]  }
   0x1   :  { %19 = vsyncpa [#allocation7 + $0x1], 0  ;;  %s5761_s21 = smov 0   ;;  %s5763_s22 = smov 0  }
   0x2   :  { %s5765_s23 = smov 0   ;;  %s5767_s24 = smov 0  }
   0x3 LB: > { %s5780_s25 = sadd.s32 4294967295, %s5690_s24   ;;  %s5783_s26 = sadd.s32 1, %s5690_s24   ;;  %s5690_s24 = sphi %s5767_s24, %s14549_s24   ;;  %s5686_s23 = sphi %s5765_s23, %s14548_s23   ;;  %s5682_s22 = sphi %s5763_s22, %s14547_s22   ;;  %s5678_s21 = sphi %s5761_s21, %s14546_s21  }
   0x4   : > { %s29_s27 = ssub.s32 %s5690_s24, %s5783_s26  ;;  %s32_s28 = sadd.s32 1, %s5686_s23 }
   0x5   : > { %p30_p0 = scmp.eq.s32.totalorder %s29_s27, 0  ;;  %p39_p1 = scmp.ne.s32.totalorder %s5686_s23, %s5682_s22 }
   0x6   : > { %p40_p2 = scmp.eq.s32.totalorder %s5690_s24, 0  ;;  %p45_p3 = scmp.ne.s32.totalorder %s5682_s22, %s5678_s21 }
   0x7   : > { %s5793_s29 = scalar_select %p30_p0, %s5686_s23, %s32_s28  }
   0x8   : > { %p41_p4 = por %p40_p2, %p39_p1  ;;  %p46_p5 = scmp.eq.s32.totalorder %s5780_s25, 0 }
   0x9   : > { %p5479_p6 = scmp.lt.s32.totalorder %s5690_s24, 2  ;;  %s359_s13 = sand.u32 1, %s5686_s23  }
   0xa   : > { %p5797_p7 = por %p46_p5, %p45_p3  ;;  %s5340_s14 = sshll.u32 %s359_s13, 7 }
   0xb   : > { %s5377_s15 = sshll.u32 %s5690_s24, 11  ;;  %s363_s19 = scalar_lea.vmem [#allocation6], %s5340_s14 }
   0xc   : > { %s5806_s18 = scalar_lea.hbm %s11667_s0, %s5377_s15  ;;  %s370_s20 = sshll.u32 %s363_s19, 4  ;;  %s5808_s20 = int_to_ptr.vmem [resolvable:$true] %s370_s20 }
   0xd   : > { %p5810_p8 = pnand %p5479_p6, %p41_p4  ;;  %s5815_s27 = scalar_lea.sflag [#allocation7], %s359_s13 }
   0xe   : > { %s5626_s28 = scalar_lea.hbm %s5806_s18, 2048  ;;  %s5631_s16 = scalar_lea.hbm %s11667_s0, 4096 }
   0xf   : > { %p5627_p10 = scmp.ne.s32.totalorder %s5806_s18, %s5626_s28  ;;  %p5628_p11 = pneg %p5810_p8 }
  0x10   : > { %p5632_p0 = scmp.lt.u32.totalorder %s5806_s18, %s11667_s0  ;;  %p5633_p1 = scmp.lt.u32.totalorder %s5631_s16, %s5626_s28 }
  0x11   : > { %p5629_p12 = pnand %p5628_p11, %p5627_p10  ;;  %p5635_p3 = scmp.lt.u32.totalorder %s5626_s28, %s5806_s18 }
  0x12   : > { %p5634_p2 = por %p5633_p1, %p5632_p0 }
  0x13   : > { %p5630_p13 = pneg %p5629_p12 }
  0x14   : > { %p5636_p4 = por %p5635_p3, %p5634_p2 }
  0x16   : > { %p5637_p5 = pnand %p5636_p4, %p5630_p13 }
  0x18   : > { %5640 = shalt.err (!%p5637_p5)
}
  0x19   : > { %s5641_s13 = scalar_lea.vmem %s5808_s20, 2048  ;;  %s5692_s14 = smov [#allocation6]  }
  0x1a   : > { %p5642_p6 = scmp.ne.s32.totalorder %s5808_s20, %s5641_s13  ;;  %s5646_s15 = sshll.u32 %s5692_s14, 4  ;;  %s5647_s15 = int_to_ptr.vmem [resolvable:$false] %s5646_s15 }
  0x1b   : > { %s5648_s17 = scalar_lea.vmem %s5647_s15, 4096  ;;  %p5649_p9 = scmp.lt.s32.totalorder %s5808_s20, %s5647_s15 }
  0x1c   : > { %p5644_p10 = pnand %p5642_p6, %p5628_p11  ;;  %p5650_p0 = scmp.lt.s32.totalorder %s5648_s17, %s5641_s13 }
  0x1e   : > { %p5645_p12 = pneg %p5644_p10  ;;  %p5651_p1 = por %p5650_p0, %p5649_p9 }
  0x20   : > { %p5652_p2 = pnand %p5651_p1, %p5645_p12 }
  0x22   : > { %5655 = shalt.err (!%p5652_p2)
}
  0x23   : > { %s5693_s28 = smov 128   ;;  %s5694_s16 = smov 8  }
  0x24   : > { %5478 = dma.hbm_to_vmem [thread:$0]  (!%p5810_p8), %s5806_s18, 2048, %s5808_s20, %s5815_s27, %s5693_s28, %s5693_s28, %s5694_s16  }
  0x25   : > { %p378_p11 = scmp.lt.s32.totalorder %s5690_s24, 3  ;;  %p12454_p13 = scmp.ge.s32.totalorder %s5690_s24, 1 }
  0x27   : > { %p379_p3 = pnand %p12454_p13, %p378_p11 }
  0x29   : > { %382 = sbr.rel (%p379_p3) target bundleno = 1656 (0x678), region = 68 }
  0x30   : > { %s384_s19 = sand.u32 1, %s5682_s22  }
  0x31   : > { %s5344_s13 = sshll.u32 %s384_s19, 7  ;;  %s385_s14 = scalar_lea.sflag [#allocation7], %s384_s19 }
  0x32   : > { %s5847_s15 = scalar_lea.vmem [#allocation6], %s5344_s13 }
  0x33   : > { %5673 = dma.done.wait (%p5797_p7), %s385_s14, 2048  }
  0x34   : > { %5675 = vsyncadd (%p5797_p7), %s385_s14, 4294965248  ;;  %vm506_vm0 = vcmask 1043456   ;;  %vm451_vm1 = vcmask 64512   ;;  %v493_v0 = vld [vmem:[%s11669_s2] sm:$0xf]  ;;  %v436_v1 = vld [vmem:[%s5847_s15 + $0x8] sm:$0xff]  ;;  %v778_v45 = vlaneseq }
  0x35   : > { %v438_v2 = vld [vmem:[%s5847_s15 + $0x18] sm:$0xff]  ;;  %5471 = vmatprep.subr.msk.bf16.mxu0 %vm506_vm0, %v493_v0  ;;  %v508_v3 = vsel %vm506_vm0, %v493_v0, 0  ;;  %453 = vst.msk [vmem:[#allocation3] sm:$0xff] %vm451_vm1, %v436_v1  ;;  %v480_v4 = vld [vmem:[%s11668_s1] sm:$0xf]  ;;  %v440_v5 = vld [vmem:[%s5847_s15 + $0x28] sm:$0xff] }
  0x36   : > { %455 = vst.msk [vmem:[#allocation3 + $0x8] sm:$0xff] %vm451_vm1, %v438_v2  ;;  %v442_v6 = vld [vmem:[%s5847_s15 + $0x38] sm:$0xff]  ;;  %5408 = vmatpush3.bf16.msra.mxu0 %v508_v3  ;;  %457 = vst.msk [vmem:[#allocation3 + $0x10] sm:$0xff] %vm451_vm1, %v440_v5  ;;  %v444_v7 = vld [vmem:[%s5847_s15 + $0x48] sm:$0xff]  ;;  %v588_v25 = vsel %vm506_vm0, %v480_v4, 0  ;;  %vm670_vm2 = vcmask 261120  }
  0x37   : > { %459 = vst.msk [vmem:[#allocation3 + $0x18] sm:$0xff] %vm451_vm1, %v442_v6  ;;  %v446_v8 = vld [vmem:[%s5847_s15 + $0x58] sm:$0xff]  ;;  %v448_v9 = vld [vmem:[%s5847_s15 + $0x68] sm:$0xff]  ;;  %5472 = vmatprep.subr.msk.bf16.mxu0 %vm506_vm0, %v480_v4  ;;  %461 = vst.msk [vmem:[#allocation3 + $0x20] sm:$0xff] %vm451_vm1, %v444_v7  ;;  %v5695_v44 = vmov 0.0   ;;  %v5945_v46 = vshrl.u32 %v778_v45, 7 }
  0x38   : > { %463 = vst.msk [vmem:[#allocation3 + $0x28] sm:$0xff] %vm451_vm1, %v446_v8  ;;  %v450_v10 = vld [vmem:[%s5847_s15 + $0x78] sm:$0xff]  ;;  %465 = vst.msk [vmem:[#allocation3 + $0x30] sm:$0xff] %vm451_vm1, %v448_v9  ;;  %v435_v11 = vld [vmem:[%s5847_s15] sm:$0xff]  ;;  %vm1066_vm3 = vcmask 1046528   ;;  %vm1711_vm4 = vcmask 1045504  }
  0x39   : > { %v437_v12 = vld [vmem:[%s5847_s15 + $0x10] sm:$0xff]  ;;  %467 = vst.msk [vmem:[#allocation3 + $0x38] sm:$0xff] %vm451_vm1, %v450_v10  ;;  %452 = vst.msk [vmem:[#allocation2] sm:$0xff] %vm451_vm1, %v435_v11  ;;  %v439_v13 = vld [vmem:[%s5847_s15 + $0x20] sm:$0xff]  ;;  %v3330_v47 = vsub.s32 5, %v5945_v46  ;;  %v3975_v48 = vsub.s32 6, %v5945_v46 }
  0x3a   : > { %454 = vst.msk [vmem:[#allocation2 + $0x8] sm:$0xff] %vm451_vm1, %v437_v12  ;;  %v441_v14 = vld [vmem:[%s5847_s15 + $0x30] sm:$0xff]  ;;  %v443_v15 = vld [vmem:[%s5847_s15 + $0x40] sm:$0xff]  ;;  %456 = vst.msk [vmem:[#allocation2 + $0x10] sm:$0xff] %vm451_vm1, %v439_v13  ;;  %v780_v4 = vsub.s32 0, %v5945_v46  ;;  %vm4641_vm5 = vcmask 261125  }
  0x3b   : > { %458 = vst.msk [vmem:[#allocation2 + $0x18] sm:$0xff] %vm451_vm1, %v441_v14  ;;  %v445_v16 = vld [vmem:[%s5847_s15 + $0x50] sm:$0xff]  ;;  %460 = vst.msk [vmem:[#allocation2 + $0x20] sm:$0xff] %vm451_vm1, %v443_v15  ;;  %v447_v17 = vld [vmem:[%s5847_s15 + $0x60] sm:$0xff]  ;;  %vm3364_vm6 = vcmask 1042432   ;;  %vm4009_vm7 = vcmask 1041408  }
  0x3c   : > { %v449_v18 = vld [vmem:[%s5847_s15 + $0x70] sm:$0xff]  ;;  %462 = vst.msk [vmem:[#allocation2 + $0x28] sm:$0xff] %vm451_vm1, %v445_v16  ;;  %464 = vst.msk [vmem:[#allocation2 + $0x30] sm:$0xff] %vm451_vm1, %v447_v17  ;;  %v5957_v50 = vld [vmem:[%s11671_s4 + $0x8] sm:$0x7f]  ;;  %vm4645_vm8 = vcmask 258048  }
  0x3d   : > { %466 = vst.msk [vmem:[#allocation2 + $0x38] sm:$0xff] %vm451_vm1, %v449_v18  ;;  %v481_v19 = vld [vmem:[#allocation3] sm:$0xff]  ;;  %v482_v20 = vld [vmem:[#allocation3 + $0x8] sm:$0xff]  ;;  %v483_v22 = vld [vmem:[#allocation3 + $0x10] sm:$0xff]  ;;  %v5988_v57 = vrot.slane %v5957_v50, %v3330_v47  ;;  %v6009_v0 = vrot.slane %v5957_v50, %v3975_v48  ;;  %v6031_v8 = vrot.slane %v5957_v50, %v780_v4  ;;  %p429_p7 = scmp.lt.s32.totalorder %s5780_s25, 1 }
  0x3e   : > { %v489_v21 = vpack.c.bf16 %v482_v20, %v481_v19  ;;  %v484_v23 = vld [vmem:[#allocation3 + $0x18] sm:$0xff]  ;;  %v485_v26 = vld [vmem:[#allocation3 + $0x20] sm:$0xff]  ;;  %687 = vst.msk [vmem:[#allocation4 + $0x80] sm:$0xff] %vm670_vm2, %v5695_v44  ;;  %671 = vst.msk [vmem:[#allocation4] sm:$0xff] %vm670_vm2, %v5695_v44 }
  0x3f   : > { %v490_v24 = vpack.c.bf16 %v484_v23, %v483_v22  ;;  %v486_v27 = vld [vmem:[#allocation3 + $0x28] sm:$0xff]  ;;  %v487_v29 = vld [vmem:[#allocation3 + $0x30] sm:$0xff]  ;;  %672 = vst.msk [vmem:[#allocation4 + $0x8] sm:$0xff] %vm670_vm2, %v5695_v44  ;;  %673 = vst.msk [vmem:[#allocation4 + $0x10] sm:$0xff] %vm670_vm2, %v5695_v44  ;;  %s14551_s25 = smov (!%p429_p7, %s5780_s25), 1 }
  0x40   : > { %5409 = vmatprep.mubr.msk.bf16.mxu0 %vm451_vm1, %v489_v21  ;;  %v491_v28 = vpack.c.bf16 %v486_v27, %v485_v26  ;;  %v488_v30 = vld [vmem:[#allocation3 + $0x38] sm:$0xff]  ;;  %v468_v31 = vld [vmem:[#allocation2] sm:$0xff]  ;;  %674 = vst.msk [vmem:[#allocation4 + $0x18] sm:$0xff] %vm670_vm2, %v5695_v44  ;;  %675 = vst.msk [vmem:[#allocation4 + $0x20] sm:$0xff] %vm670_vm2, %v5695_v44  ;;  %s5378_s21 = sshll.u32 %s14551_s25, 6 }
  0x41   : > { %5410 = vmatmul.mubr.msk.bf16.vlgmr.msra.gmra.mrb[0].mxu0 %vm451_vm1, %v490_v24  ;;  %v469_v32 = vld [vmem:[#allocation2 + $0x8] sm:$0xff]  ;;  %v492_v33 = vpack.c.bf16 %v488_v30, %v487_v29  ;;  %v470_v35 = vld [vmem:[#allocation2 + $0x10] sm:$0xff]  ;;  %676 = vst.msk [vmem:[#allocation4 + $0x28] sm:$0xff] %vm670_vm2, %v5695_v44  ;;  %677 = vst.msk [vmem:[#allocation4 + $0x30] sm:$0xff] %vm670_vm2, %v5695_v44  ;;  %v6069_v29 = vsub.s32 1, %v5945_v46  ;;  %s433_s28 = scalar_lea.vmem %s11679_s12, %s5378_s21 }
  0x42   : > { %5418 = vmatpush3.bf16.msra.mxu0 %v588_v25  ;;  %5413 = vmatprep.mubr.msk.bf16.mxu0 %vm451_vm1, %v491_v28  ;;  %v476_v34 = vpack.c.bf16 %v469_v32, %v468_v31  ;;  %v471_v36 = vld [vmem:[#allocation2 + $0x18] sm:$0xff]  ;;  %v472_v37 = vld [vmem:[#allocation2 + $0x20] sm:$0xff]  ;;  %678 = vst.msk [vmem:[#allocation4 + $0x38] sm:$0xff] %vm670_vm2, %v5695_v44  ;;  %679 = vst.msk [vmem:[#allocation4 + $0x40] sm:$0xff] %vm670_vm2, %v5695_v44 }
  0x43   : > { %v473_v38 = vld [vmem:[#allocation2 + $0x28] sm:$0xff]  ;;  %v477_v39 = vpack.c.bf16 %v471_v36, %v470_v35  ;;  %v474_v41 = vld [vmem:[#allocation2 + $0x30] sm:$0xff]  ;;  %680 = vst.msk [vmem:[#allocation4 + $0x48] sm:$0xff] %vm670_vm2, %v5695_v44  ;;  %681 = vst.msk [vmem:[#allocation4 + $0x50] sm:$0xff] %vm670_vm2, %v5695_v44 }
  0x44   : > { %v478_v40 = vpack.c.bf16 %v473_v38, %v472_v37  ;;  %v475_v42 = vld [vmem:[#allocation2 + $0x38] sm:$0xff]  ;;  %682 = vst.msk [vmem:[#allocation4 + $0x58] sm:$0xff] %vm670_vm2, %v5695_v44  ;;  %683 = vst.msk [vmem:[#allocation4 + $0x60] sm:$0xff] %vm670_vm2, %v5695_v44  ;;  %v5952_v49 = vld [vmem:[%s11671_s4] sm:$0x7f] }
  0x45   : > { %v479_v43 = vpack.c.bf16 %v475_v42, %v474_v41  ;;  %684 = vst.msk [vmem:[#allocation4 + $0x68] sm:$0xff] %vm670_vm2, %v5695_v44  ;;  %685 = vst.msk [vmem:[#allocation4 + $0x70] sm:$0xff] %vm670_vm2, %v5695_v44  ;;  %v5962_v51 = vld [vmem:[%s11671_s4 + $0x10] sm:$0x7f]  ;;  %v5967_v52 = vld [vmem:[%s11671_s4 + $0x18] sm:$0x7f]  ;;  %v5975_v54 = vrot.slane %v5952_v49, %v3330_v47  ;;  %v6006_v63 = vrot.slane %v5952_v49, %v3975_v48 }
  0x46   : > { %686 = vst.msk [vmem:[#allocation4 + $0x78] sm:$0xff] %vm670_vm2, %v5695_v44  ;;  %688 = vst.msk [vmem:[#allocation4 + $0x88] sm:$0xff] %vm670_vm2, %v5695_v44  ;;  %v5972_v53 = vld [vmem:[%s11671_s4 + $0x20] sm:$0x7f]  ;;  %v5980_v55 = vld [vmem:[%s11671_s4 + $0x28] sm:$0x7f]  ;;  %v5991_v58 = vrot.slane %v5962_v51, %v3330_v47  ;;  %v5994_v59 = vrot.slane %v5967_v52, %v3330_v47  ;;  %v6012_v1 = vrot.slane %v5962_v51, %v3975_v48 }
  0x47   : > { %689 = vst.msk [vmem:[#allocation4 + $0x90] sm:$0xff] %vm670_vm2, %v5695_v44  ;;  %690 = vst.msk [vmem:[#allocation4 + $0x98] sm:$0xff] %vm670_vm2, %v5695_v44  ;;  %v5985_v56 = vld [vmem:[%s11671_s4 + $0x30] sm:$0x7f]  ;;  %v5997_v60 = vrot.slane %v5972_v53, %v3330_v47  ;;  %v6000_v61 = vrot.slane %v5980_v55, %v3330_v47  ;;  %v6015_v2 = vrot.slane %v5967_v52, %v3975_v48  ;;  %v6033_v9 = vld [vmem:[#allocation4] sm:$0xff] }
  0x48   : > { %691 = vst.msk [vmem:[#allocation4 + $0xa0] sm:$0xff] %vm670_vm2, %v5695_v44  ;;  %692 = vst.msk [vmem:[#allocation4 + $0xa8] sm:$0xff] %vm670_vm2, %v5695_v44  ;;  %v6003_v62 = vrot.slane %v5985_v56, %v3330_v47  ;;  %v6018_v3 = vrot.slane %v5972_v53, %v3975_v48  ;;  %v6022_v5 = vrot.slane %v5980_v55, %v3975_v48  ;;  %v6035_v10 = vld [vmem:[#allocation4 + $0x18] sm:$0xff]  ;;  %v6037_v11 = vld [vmem:[#allocation4 + $0x30] sm:$0xff] }
  0x49   : > { %5414 = vmatmul.mubr.msk.bf16.gmra.mrb[4].mxu0 %vm451_vm1, %v492_v33  ;;  %693 = vst.msk [vmem:[#allocation4 + $0xb0] sm:$0xff] %vm670_vm2, %v5695_v44  ;;  %694 = vst.msk [vmem:[#allocation4 + $0xb8] sm:$0xff] %vm670_vm2, %v5695_v44  ;;  %v6025_v6 = vrot.slane %v5985_v56, %v3975_v48  ;;  %v6028_v7 = vrot.slane %v5952_v49, %v780_v4  ;;  %v818_v13 = vmul.f32 %v6031_v8, %v6035_v10  ;;  %v6084_v37 = vld [vmem:[#allocation4 + $0x8] sm:$0xff]  ;;  %v6086_v38 = vld [vmem:[#allocation4 + $0x20] sm:$0xff] }
  0x4a   : > { %5419 = vmatprep.mubr.msk.bf16.mxu0 %vm451_vm1, %v476_v34  ;;  %695 = vst.msk [vmem:[#allocation4 + $0xc0] sm:$0xff] %vm670_vm2, %v5695_v44  ;;  %696 = vst.msk [vmem:[#allocation4 + $0xc8] sm:$0xff] %vm670_vm2, %v5695_v44  ;;  %v6044_v14 = vrot.slane %v5962_v51, %v780_v4  ;;  %v820_v16 = vmul.f32 %v6031_v8, %v6037_v11  ;;  %v6050_v17 = vld [vmem:[#allocation4 + $0x48] sm:$0xff]  ;;  %v6055_v20 = vrot.slane %v5967_v52, %v780_v4 }
  0x4b   : > { %697 = vst.msk [vmem:[#allocation4 + $0xd0] sm:$0xff] %vm670_vm2, %v5695_v44  ;;  %698 = vst.msk [vmem:[#allocation4 + $0xd8] sm:$0xff] %vm670_vm2, %v5695_v44  ;;  %v782_v12 = vmul.f32 %v6028_v7, %v6033_v9  ;;  %v784_v15 = vmul.f32 %v6028_v7, %v6035_v10  ;;  %v6059_v23 = vld [vmem:[#allocation4 + $0x60] sm:$0xff]  ;;  %v6064_v26 = vrot.slane %v5972_v53, %v780_v4 }
  0x4c   : > { %699 = vst.msk [vmem:[#allocation4 + $0xe0] sm:$0xff] %vm670_vm2, %v5695_v44  ;;  %700 = vst.msk [vmem:[#allocation4 + $0xe8] sm:$0xff] %vm670_vm2, %v5695_v44  ;;  %v854_v19 = vmul.f32 %v6044_v14, %v6037_v11  ;;  %v856_v22 = vmul.f32 %v6044_v14, %v6050_v17  ;;  %v890_v25 = vmul.f32 %v6055_v20, %v6050_v17 }
  0x4d   : > { %701 = vst.msk [vmem:[#allocation4 + $0xf0] sm:$0xff] %vm670_vm2, %v5695_v44  ;;  %702 = vst.msk [vmem:[#allocation4 + $0xf8] sm:$0xff] %vm670_vm2, %v5695_v44  ;;  %v834_v18 = vadd.f32 %v818_v13, %v782_v12  ;;  %v836_v21 = vadd.f32 %v820_v16, %v784_v15  ;;  %v892_v28 = vmul.f32 %v6055_v20, %v6059_v23  ;;  %v6071_v30 = vld [vmem:[#allocation4 + $0x78] sm:$0xff] }
  0x4e   : > { %703 = vst.msk [vmem:[#allocation4 + $0x100] sm:$0xff] %vm670_vm2, %v5695_v44  ;;  %704 = vst.msk [vmem:[#allocation4 + $0x108] sm:$0xff] %vm670_vm2, %v5695_v44  ;;  %v926_v32 = vmul.f32 %v6064_v26, %v6059_v23  ;;  %v6076_v33 = vrot.slane %v5980_v55, %v780_v4  ;;  %v928_v35 = vmul.f32 %v6064_v26, %v6071_v30  ;;  %v6113_v13 = vld [vmem:[#allocation4 + $0x38] sm:$0xff] }
  0x4f   : > { %705 = vst.msk [vmem:[#allocation4 + $0x110] sm:$0xff] %vm670_vm2, %v5695_v44  ;;  %706 = vst.msk [vmem:[#allocation4 + $0x118] sm:$0xff] %vm670_vm2, %v5695_v44  ;;  %v870_v24 = vadd.f32 %v854_v19, %v834_v18  ;;  %v872_v27 = vadd.f32 %v856_v22, %v836_v21  ;;  %v6082_v36 = vrot.slane %v5952_v49, %v6069_v29  ;;  %v6115_v15 = vld [vmem:[#allocation4 + $0xa8] sm:$0xff] }
  0x50   : > { %707 = vst.msk [vmem:[#allocation4 + $0x120] sm:$0xff] %vm670_vm2, %v5695_v44  ;;  %708 = vst.msk [vmem:[#allocation4 + $0x128] sm:$0xff] %vm670_vm2, %v5695_v44  ;;  %v962_v41 = vmul.f32 %v6076_v33, %v6071_v30  ;;  %v6093_v42 = vrot.slane %v5985_v56, %v780_v4  ;;  %v6111_v4 = vrot.slane %v5957_v50, %v6069_v29 }
  0x51   : > { %5420 = vmatmul.mubr.msk.bf16.vlgmr.msra.gmra.mrb[0].mxu0 %vm451_vm1, %v477_v39  ;;  %709 = vst.msk [vmem:[#allocation4 + $0x130] sm:$0xff] %vm670_vm2, %v5695_v44  ;;  %710 = vst.msk [vmem:[#allocation4 + $0x138] sm:$0xff] %vm670_vm2, %v5695_v44  ;;  %v906_v31 = vadd.f32 %v890_v25, %v870_v24  ;;  %v908_v34 = vadd.f32 %v892_v28, %v872_v27  ;;  %v6088_v39 = vld [vmem:[#allocation4 + $0x90] sm:$0xff]  ;;  %v1034_v45 = vmul.f32 %v6082_v36, %v6033_v9 }
  0x52   : > { %5423 = vmatprep.mubr.msk.bf16.mxu0 %vm451_vm1, %v478_v40  ;;  %711 = vst.msk [vmem:[#allocation4 + $0x140] sm:$0xff] %vm670_vm2, %v5695_v44  ;;  %712 = vst.msk [vmem:[#allocation4 + $0x148] sm:$0xff] %vm670_vm2, %v5695_v44  ;;  %v964_v44 = vmul.f32 %v6076_v33, %v6088_v39  ;;  %v6101_v47 = vmul.f32 %v6082_v36, %v6084_v37  ;;  %v1036_v48 = vmul.f32 %v6082_v36, %v6035_v10 }
  0x53   : > { %12455 = vst [vmem:[#allocation9_spill] sm:$0xff] %v5975_v54  ;;  %12456 = vst [vmem:[#allocation10_spill] sm:$0xff] %v5988_v57  ;;  %v942_v40 = vadd.f32 %v926_v32, %v906_v31  ;;  %v6107_v12 = vmul.f32 %v6082_v36, %v6086_v38  ;;  %v998_v18 = vmul.f32 %v6093_v42, %v6088_v39  ;;  %v1067_v22 = vrot.slane %v1034_v45, 1 }
  0x54   : > { %12457 = vst [vmem:[#allocation11_spill] sm:$0xff] %v5991_v58  ;;  %12458 = vst [vmem:[#allocation12_spill] sm:$0xff] %v5994_v59  ;;  %v1000_v21 = vmul.f32 %v6093_v42, %v6115_v15  ;;  %v11686_v24 = vrot.slane %v6101_v47, 1  ;;  %v1070_v25 = vrot.slane %v1036_v48, 1  ;;  %v1127_v28 = vmul.f32 %v6111_v4, %v6035_v10 }
  0x55   : > { %12459 = vst [vmem:[#allocation13_spill] sm:$0xff] %v5997_v60  ;;  %12460 = vst [vmem:[#allocation14_spill] sm:$0xff] %v6000_v61  ;;  %v978_v16 = vadd.f32 %v962_v41, %v942_v40  ;;  %v11685_v27 = vrot.slane %v6107_v12, 1  ;;  %v6127_v31 = vmul.f32 %v6111_v4, %v6086_v38  ;;  %v1129_v32 = vmul.f32 %v6111_v4, %v6037_v11 }
  0x56   : > { %12461 = vst [vmem:[#allocation15_spill] sm:$0xff] %v6003_v62  ;;  %12462 = vst [vmem:[#allocation16_spill] sm:$0xff] %v6006_v63  ;;  %v783_v40 = vmul.f32 %v6028_v7, %v6084_v37  ;;  %v819_v41 = vmul.f32 %v6031_v8, %v6086_v38  ;;  %v1069_v45 = vsel %vm1066_vm3, %v1067_v22, %v11686_v24 }
  0x57   : > { %12463 = vst [vmem:[#allocation17_spill] sm:$0xff] %v6009_v0  ;;  %12464 = vst [vmem:[#allocation18_spill] sm:$0xff] %v6012_v1  ;;  %v1072_v48 = vsel %vm1066_vm3, %v1070_v25, %v11685_v27  ;;  %v11688_v62 = vrot.slane %v6127_v31, 1  ;;  %v855_v25 = vmul.f32 %v6044_v14, %v6113_v13  ;;  %v6169_v24 = vrot.slane %v5967_v52, %v6069_v29 }
  0x58   : > { %12465 = vst [vmem:[#allocation19_spill] sm:$0xff] %v6015_v2  ;;  %12466 = vst [vmem:[#allocation20_spill] sm:$0xff] %v6018_v3  ;;  %v835_v22 = vadd.f32 %v819_v41, %v783_v40  ;;  %v6173_v2 = vrot.slane %v5980_v55, %v6069_v29  ;;  %v858_v60 = vmul.f32 %v6044_v14, %v6059_v23 }
  0x59   : > { %5424 = vmatmul.mubr.msk.bf16.gmra.mrb[4].mxu0 %vm451_vm1, %v479_v43  ;;  %12467 = vst [vmem:[#allocation21_spill] sm:$0xff] %v6022_v5  ;;  %12468 = vst [vmem:[#allocation22_spill] sm:$0xff] %v6025_v6  ;;  %v944_v43 = vadd.f32 %v928_v35, %v908_v34  ;;  %v6133_v34 = vmul.f32 %v6111_v4, %v6113_v13  ;;  %v6137_v35 = vrot.slane %v5962_v51, %v6069_v29 }
  0x5a   : > { %12469 = vst [vmem:[#allocation23_spill] sm:$0xff] %v6028_v7  ;;  %12470 = vst [vmem:[#allocation24_spill] sm:$0xff] %v6031_v8  ;;  %v1159_v6 = vrot.slane %v1127_v28, 1  ;;  %v1162_v5 = vrot.slane %v1129_v32, 1 }
  0x5b   : > { %12471 = vst [vmem:[#allocation25_spill] sm:$0xff] %v6044_v14  ;;  %12472 = vst [vmem:[#allocation26_spill] sm:$0xff] %v6055_v20  ;;  %v980_v19 = vadd.f32 %v964_v44, %v944_v43  ;;  %v1014_v43 = vadd.f32 %v998_v18, %v978_v16  ;;  %v1219_v3 = vmul.f32 %v6137_v35, %v6037_v11 }
  0x5c   : > { %12473 = vst [vmem:[#allocation27_spill] sm:$0xff] %v6064_v26  ;;  %12474 = vst [vmem:[#allocation28_spill] sm:$0xff] %v6076_v33  ;;  %v6155_v16 = vmul.f32 %v6137_v35, %v6113_v13  ;;  %v785_v18 = vmul.f32 %v6028_v7, %v6086_v38  ;;  %v1161_v27 = vsel %vm1066_vm3, %v1159_v6, %v11688_v62 }
  0x5d   : > { %12475 = vst [vmem:[#allocation29_spill] sm:$0xff] %v6082_v36  ;;  %12476 = vst [vmem:[#allocation30_spill] sm:$0xff] %v6093_v42  ;;  %v1016_v44 = vadd.f32 %v1000_v21, %v980_v19  ;;  %v1677_v19 = vsub.s32 2, %v5945_v46  ;;  %v821_v21 = vmul.f32 %v6031_v8, %v6113_v13  ;;  %v1107_v28 = vadd.f32 %v1069_v45, %v1014_v43 }
  0x5e   : > { %12477 = vst [vmem:[#allocation31_spill] sm:$0xff] %v6101_v47  ;;  %12478 = vst [vmem:[#allocation32_spill] sm:$0xff] %v6107_v12  ;;  %v12486_v12 = vrot.slane %v6133_v34, 1  ;;  %v1251_v41 = vrot.slane %v1219_v3, 1  ;;  %v11690_v43 = vrot.slane %v6155_v16, 1  ;;  %v6185_v6 = vrot.slane %v5972_v53, %v6069_v29 }
  0x5f   : > { %12479 = vst [vmem:[#allocation33_spill] sm:$0xff] %v6111_v4  ;;  %12480 = vst [vmem:[#allocation34_spill] sm:$0xff] %v6127_v31  ;;  %v1109_v32 = vadd.f32 %v1072_v48, %v1016_v44  ;;  %v6181_v44 = vrot.slane %v5985_v56, %v6069_v29  ;;  %v786_v45 = vmul.f32 %v6028_v7, %v6037_v11 }
  0x60   : > { %12481 = vst [vmem:[#allocation35_spill] sm:$0xff] %v6133_v34  ;;  %12482 = vst [vmem:[#allocation36_spill] sm:$0xff] %v6137_v35  ;;  %v1164_v40 = vsel %vm1066_vm3, %v1162_v5, %v12486_v12  ;;  %v6189_v48 = vadd.f32 %v821_v21, %v785_v18  ;;  %v6191_v62 = vadd.f32 %v855_v25, %v835_v22 }
  0x61   : > { %12483 = vst [vmem:[#allocation37_spill] sm:$0xff] %v6155_v16  ;;  %12484 = vst [vmem:[#allocation38_spill] sm:$0xff] %v6169_v24  ;;  %v1199_v34 = vadd.f32 %v1161_v27, %v1107_v28  ;;  %v6193_v5 = vadd.f32 %v1164_v40, %v1109_v32  ;;  %v6197_v3 = vmul.f32 %v6169_v24, %v6050_v17 }
  0x62   : > { %12485 = vst [vmem:[#allocation39_spill] sm:$0xff] %v6173_v2  ;;  %12487 = vst [vmem:[#allocation40_spill] sm:$0xff] %v6181_v44  ;;  %v6201_v12 = vmul.f32 %v6185_v6, %v6059_v23  ;;  %v6204_v29 = vrot.slane %v5952_v49, %v1677_v19  ;;  %v1253_v18 = vsel %vm1066_vm3, %v1251_v41, %v11690_v43 }
  0x63   : > { %12488 = vst [vmem:[#allocation41_spill] sm:$0xff] %v6185_v6  ;;  %12489 = vst [vmem:[#allocation42_spill] sm:$0xff] %v6189_v48  ;;  %v6211_v27 = vmul.f32 %v6173_v2, %v6071_v30  ;;  %v6215_v21 = vmul.f32 %v6181_v44, %v6088_v39  ;;  %v6218_v22 = vrot.slane %v5957_v50, %v1677_v19 }
  0x64   : > { %12490 = vst [vmem:[#allocation43_spill] sm:$0xff] %v6191_v62  ;;  %12491 = vst [vmem:[#allocation44_spill] sm:$0xff] %v6193_v5  ;;  %v1679_v25 = vmul.f32 %v6204_v29, %v6033_v9  ;;  %v6224_v28 = vmul.f32 %v6204_v29, %v6084_v37  ;;  %v6227_v32 = vrot.slane %v5962_v51, %v1677_v19 }
  0x65   : > { %12492 = vst [vmem:[#allocation45_spill] sm:$0xff] %v6197_v3  ;;  %12493 = vst [vmem:[#allocation46_spill] sm:$0xff] %v6201_v12  ;;  %v822_v40 = vmul.f32 %v6031_v8, %v6050_v17  ;;  %v1772_v41 = vmul.f32 %v6218_v22, %v6035_v10  ;;  %v6234_v43 = vrot.slane %v5967_v52, %v1677_v19 }
  0x66   : > { %12494 = vst [vmem:[#allocation47_spill] sm:$0xff] %v6204_v29  ;;  %12495 = vst [vmem:[#allocation48_spill] sm:$0xff] %v6211_v27  ;;  %v6237_v16 = vrot.slane %v5980_v55, %v1677_v19  ;;  %v6239_v9 = vadd.f32 %v1253_v18, %v1199_v34  ;;  %v6243_v31 = vmul.f32 %v6218_v22, %v6086_v38  ;;  %v12511_v14 = vrot.slane %v6224_v28, 2 }
  0x67   : > { %12496 = vst [vmem:[#allocation49_spill] sm:$0xff] %v6215_v21  ;;  %12497 = vst [vmem:[#allocation50_spill] sm:$0xff] %v6218_v22  ;;  %v1864_v47 = vmul.f32 %v6227_v32, %v6037_v11  ;;  %v6249_v5 = vmul.f32 %v6227_v32, %v6113_v13  ;;  %v6254_v48 = vmul.f32 %v6204_v29, %v6035_v10  ;;  %v1804_v1 = vrot.slane %v1772_v41, 2 }
  0x68   : > { %12498 = vst [vmem:[#allocation51_spill] sm:$0xff] %v6224_v28  ;;  %12499 = vst [vmem:[#allocation52_spill] sm:$0xff] %v6227_v32  ;;  %v6257_v34 = vrot.slane %v5972_v53, %v1677_v19  ;;  %v6260_v18 = vrot.slane %v5985_v56, %v1677_v19  ;;  %v838_v59 = vadd.f32 %v822_v40, %v786_v45  ;;  %v2322_v40 = vsub.s32 3, %v5945_v46 }
  0x69   : > { %12500 = vst [vmem:[#allocation53_spill] sm:$0xff] %v6234_v43  ;;  %12501 = vst [vmem:[#allocation54_spill] sm:$0xff] %v6237_v16  ;;  %v6267_v62 = vmul.f32 %v6234_v43, %v6050_v17  ;;  %v6275_v19 = vmul.f32 %v6237_v16, %v6071_v30  ;;  %v1896_v61 = vrot.slane %v1864_v47, 2  ;;  %v2686_v21 = vsub.s32 4, %v5945_v46 }
  0x6a   : > { %12502 = vst [vmem:[#allocation55_spill] sm:$0xff] %v6239_v9  ;;  %12503 = vst [vmem:[#allocation56_spill] sm:$0xff] %v6243_v31  ;;  %v1712_v9 = vrot.slane %v1679_v25, 2  ;;  %v6271_v10 = vmul.f32 %v6257_v34, %v6059_v23  ;;  %v6285_v63 = vmul.f32 %v6260_v18, %v6088_v39  ;;  %v874_v45 = vadd.f32 %v858_v60, %v838_v59 }
  0x6b   : > { %12504 = vst [vmem:[#allocation57_spill] sm:$0xff] %v6249_v5  ;;  %12505 = vst [vmem:[#allocation58_spill] sm:$0xff] %v6257_v34  ;;  %v894_v25 = vmul.f32 %v6055_v20, %v6071_v30  ;;  %v12513_v27 = vrot.slane %v6243_v31, 2  ;;  %v6310_v60 = vrot.slane %v5952_v49, %v2322_v40  ;;  %v6318_v46 = vrot.slane %v5957_v50, %v2322_v40 }
  0x6c   : > { %12506 = vst [vmem:[#allocation59_spill] sm:$0xff] %v6260_v18  ;;  %12507 = vst [vmem:[#allocation60_spill] sm:$0xff] %v6267_v62  ;;  %v6290_v58 = vsel %vm1711_vm4, %v1712_v9, %v12511_v14  ;;  %v12515_v14 = vrot.slane %v6249_v5, 2  ;;  %v6314_v9 = vmul.f32 %v6137_v35, %v6050_v17  ;;  %v930_v41 = vmul.f32 %v6064_v26, %v6088_v39 }
  0x6d   : > { %12508 = vst [vmem:[#allocation61_spill] sm:$0xff] %v6271_v10  ;;  %12509 = vst [vmem:[#allocation62_spill] sm:$0xff] %v6275_v19  ;;  %v6302_v28 = vsel %vm1711_vm4, %v1804_v1, %v12513_v27  ;;  %v6321_v1 = vrot.slane %v5962_v51, %v2322_v40  ;;  %v6324_v27 = vrot.slane %v5967_v52, %v2322_v40  ;;  %v6416_v10 = vld [vmem:[#allocation4 + $0xc0] sm:$0xff] }
  0x6e   : > { %12510 = vst [vmem:[#allocation63_spill] sm:$0xff] %v6285_v63  ;;  %12512 = vst [vmem:[#allocation64_spill] sm:$0xff] %v6290_v58  ;;  %v6307_v59 = vsel %vm1711_vm4, %v1896_v61, %v12515_v14  ;;  %v6327_v61 = vrot.slane %v5972_v53, %v2322_v40  ;;  %v6330_v14 = vrot.slane %v5980_v55, %v2322_v40 }
  0x6f   : > { %12514 = vst [vmem:[#allocation65_spill] sm:$0xff] %v6302_v28  ;;  %12516 = vst [vmem:[#allocation66_spill] sm:$0xff] %v6307_v59  ;;  %v910_v3 = vadd.f32 %v894_v25, %v874_v45  ;;  %v6336_v0 = vmul.f32 %v6310_v60, %v6084_v37  ;;  %v6339_v47 = vrot.slane %v5985_v56, %v2322_v40 }
  0x70   : > { %12517 = vst [vmem:[#allocation67_spill] sm:$0xff] %v6310_v60  ;;  %12518 = vst [vmem:[#allocation68_spill] sm:$0xff] %v6314_v9  ;;  %v6342_v5 = vrot.slane %v5952_v49, %v2686_v21  ;;  %v6345_v31 = vrot.slane %v5957_v50, %v2686_v21  ;;  %v6348_v59 = vrot.slane %v5962_v51, %v2686_v21 }
  0x71   : > { %12519 = vst [vmem:[#allocation69_spill] sm:$0xff] %v6318_v46  ;;  %12520 = vst [vmem:[#allocation70_spill] sm:$0xff] %v6321_v1  ;;  %v6351_v25 = vrot.slane %v5967_v52, %v2686_v21  ;;  %v6354_v45 = vrot.slane %v5972_v53, %v2686_v21  ;;  %v6358_v63 = vmul.f32 %v6169_v24, %v6059_v23 }
  0x72   : > { %12521 = vst [vmem:[#allocation71_spill] sm:$0xff] %v6324_v27  ;;  %12522 = vst [vmem:[#allocation72_spill] sm:$0xff] %v6327_v61  ;;  %v6362_v49 = vmul.f32 %v6318_v46, %v6086_v38  ;;  %v6365_v50 = vrot.slane %v5980_v55, %v2686_v21  ;;  %v6368_v51 = vrot.slane %v5985_v56, %v2686_v21 }
  0x73   : > { %12523 = vst [vmem:[#allocation73_spill] sm:$0xff] %v6330_v14  ;;  %12524 = vst [vmem:[#allocation74_spill] sm:$0xff] %v6336_v0  ;;  %v6373_v53 = vmul.f32 %v6185_v6, %v6071_v30  ;;  %v6377_v40 = vmul.f32 %v6173_v2, %v6088_v39  ;;  %v966_v19 = vmul.f32 %v6076_v33, %v6115_v15 }
  0x74   : > { %12525 = vst [vmem:[#allocation75_spill] sm:$0xff] %v6339_v47  ;;  %12526 = vst [vmem:[#allocation76_spill] sm:$0xff] %v6342_v5  ;;  %v946_v47 = vadd.f32 %v930_v41, %v910_v3  ;;  %v6384_v56 = vmul.f32 %v6181_v44, %v6115_v15  ;;  %v1038_v21 = vmul.f32 %v6082_v36, %v6037_v11 }
  0x75   : > { %12527 = vst [vmem:[#allocation77_spill] sm:$0xff] %v6345_v31  ;;  %12528 = vst [vmem:[#allocation78_spill] sm:$0xff] %v6348_v59  ;;  %v6390_v52 = vmul.f32 %v6082_v36, %v6113_v13  ;;  %v6395_v3 = vmul.f32 %v6204_v29, %v6086_v38  ;;  %v1774_v41 = vmul.f32 %v6218_v22, %v6037_v11 }
  0x76   : > { %12529 = vst [vmem:[#allocation79_spill] sm:$0xff] %v6351_v25  ;;  %12530 = vst [vmem:[#allocation80_spill] sm:$0xff] %v6354_v45  ;;  %v6401_v55 = vmul.f32 %v6218_v22, %v6113_v13  ;;  %v6406_v28 = vmul.f32 %v6321_v1, %v6113_v13  ;;  %v6410_v9 = vmul.f32 %v6227_v32, %v6050_v17  ;;  %v1073_v61 = vrot.slane %v1038_v21, 1 }
  0x77   : > { %12531 = vst [vmem:[#allocation81_spill] sm:$0xff] %v6358_v63  ;;  %12532 = vst [vmem:[#allocation82_spill] sm:$0xff] %v6362_v49  ;;  %v6414_v63 = vmul.f32 %v6234_v43, %v6059_v23  ;;  %v982_v14 = vadd.f32 %v966_v19, %v946_v47  ;;  %v1002_v0 = vmul.f32 %v6093_v42, %v6416_v10  ;;  %v1807_v36 = vrot.slane %v1774_v41, 2 }
  0x78   : > { %12533 = vst [vmem:[#allocation83_spill] sm:$0xff] %v6365_v50  ;;  %12534 = vst [vmem:[#allocation84_spill] sm:$0xff] %v6368_v51  ;;  %v6425_v49 = vmul.f32 %v6257_v34, %v6071_v30  ;;  %v6432_v19 = vmul.f32 %v6237_v16, %v6088_v39  ;;  %v6436_v47 = vmul.f32 %v6342_v5, %v6084_v37  ;;  %v12550_v1 = vrot.slane %v6390_v52, 1 }
  0x79   : > { %12535 = vst [vmem:[#allocation85_spill] sm:$0xff] %v6373_v53  ;;  %12536 = vst [vmem:[#allocation86_spill] sm:$0xff] %v6377_v40  ;;  %v6442_v21 = vmul.f32 %v6260_v18, %v6115_v15  ;;  %v6447_v62 = vmul.f32 %v6345_v31, %v6086_v38  ;;  %v6451_v12 = vmul.f32 %v6348_v59, %v6113_v13 }
  0x7a   : > { %12537 = vst [vmem:[#allocation87_spill] sm:$0xff] %v6384_v56  ;;  %12538 = vst [vmem:[#allocation88_spill] sm:$0xff] %v6390_v52  ;;  %v1018_v27 = vadd.f32 %v1002_v0, %v982_v14  ;;  %v1075_v58 = vsel %vm1066_vm3, %v1073_v61, %v12550_v1  ;;  %v6463_v41 = vmul.f32 %v6169_v24, %v6071_v30  ;;  %v12556_v14 = vrot.slane %v6401_v55, 2 }
  0x7b   : > { %12539 = vst [vmem:[#allocation89_spill] sm:$0xff] %v6395_v3  ;;  %12540 = vst [vmem:[#allocation90_spill] sm:$0xff] %v6401_v55  ;;  %v6480_v61 = vmul.f32 %v6137_v35, %v6059_v23  ;;  %v1683_v55 = vmul.f32 %v6204_v29, %v6037_v11  ;;  %v6519_v52 = vmul.f32 %v5988_v57, %v6086_v38 }
  0x7c   : > { %12541 = vst [vmem:[#allocation91_spill] sm:$0xff] %v6406_v28  ;;  %12542 = vst [vmem:[#allocation92_spill] sm:$0xff] %v6410_v9  ;;  %v12553_v9 = vrot.slane %v6395_v3, 2  ;;  %v12554_v28 = vrot.slane %v6254_v48, 2  ;;  %v6475_v56 = vsel %vm1711_vm4, %v1807_v36, %v12556_v14  ;;  %v6486_v48 = vmul.f32 %v6310_v60, %v6086_v38 }
  0x7d   : > { %12543 = vst [vmem:[#allocation93_spill] sm:$0xff] %v6414_v63  ;;  %12544 = vst [vmem:[#allocation94_spill] sm:$0xff] %v6425_v49  ;;  %v6459_v63 = vmul.f32 %v6111_v4, %v6050_v17  ;;  %v6496_v14 = vmul.f32 %v5975_v54, %v6084_v37  ;;  %v6498_v1 = vadd.f32 %v1075_v58, %v1018_v27  ;;  %v12577_v49 = vld [vmem:[#allocation16_spill] sm:$0xff] }
  0x7e   : > { %12545 = vst [vmem:[#allocation95_spill] sm:$0xff] %v6432_v19  ;;  %12546 = vst [vmem:[#allocation96_spill] sm:$0xff] %v6436_v47  ;;  %v6470_v0 = vsel %vm1711_vm4, %v12554_v28, %v12553_v9  ;;  %v6490_v28 = vmul.f32 %v6185_v6, %v6088_v39  ;;  %v6511_v9 = vmul.f32 %v6204_v29, %v6113_v13 }
  0x7f   : > { %12547 = vst [vmem:[#allocation97_spill] sm:$0xff] %v6442_v21  ;;  %12548 = vst [vmem:[#allocation98_spill] sm:$0xff] %v6447_v62  ;;  %v6506_v21 = vmul.f32 %v6218_v22, %v6050_v17  ;;  %v788_v58 = vmul.f32 %v6028_v7, %v6050_v17  ;;  %v824_v27 = vmul.f32 %v6031_v8, %v6059_v23  ;;  %v12579_v62 = vld [vmem:[#allocation17_spill] sm:$0xff] }
  0x80   : > { %12549 = vst [vmem:[#allocation99_spill] sm:$0xff] %v6451_v12  ;;  %12551 = vst [vmem:[#allocation100_spill] sm:$0xff] %v6459_v63  ;;  %v6524_v3 = vmul.f32 %v6318_v46, %v6113_v13  ;;  %v6534_v8 = vmul.f32 %v6227_v32, %v6059_v23  ;;  %v6542_v11 = vmul.f32 %v6173_v2, %v6115_v15 }
  0x81   : > { %12552 = vst [vmem:[#allocation101_spill] sm:$0xff] %v6463_v41  ;;  %12555 = vst [vmem:[#allocation102_spill] sm:$0xff] %v6470_v0  ;;  %v6546_v36 = vmul.f32 %v6181_v44, %v6416_v10  ;;  %v1718_v41 = vrot.slane %v1683_v55, 2  ;;  %v6550_v46 = vmul.f32 %v6257_v34, %v6088_v39  ;;  %v840_v63 = vadd.f32 %v824_v27, %v788_v58  ;;  %v749_v58 = vld [vmem:[#allocation4 + $0xa0] sm:$0xff]  ;;  %v12583_v55 = vld [vmem:[#allocation18_spill] sm:$0xff] }
  0x82   : > { %12557 = vst [vmem:[#allocation103_spill] sm:$0xff] %v6475_v56  ;;  %12558 = vst [vmem:[#allocation104_spill] sm:$0xff] %v6480_v61  ;;  %v6538_v61 = vmul.f32 %v6234_v43, %v6071_v30  ;;  %v6564_v47 = vmul.f32 %v6260_v18, %v6416_v10  ;;  %v6569_v56 = vmul.f32 %v12577_v49, %v6084_v37  ;;  %v12581_v37 = vrot.slane %v6511_v9, 2 }
  0x83   : > { %12559 = vst [vmem:[#allocation105_spill] sm:$0xff] %v6486_v48  ;;  %12560 = vst [vmem:[#allocation106_spill] sm:$0xff] %v6490_v28  ;;  %v12575_v48 = vld [vmem:[#allocation25_spill] sm:$0xff]  ;;  %v6590_v19 = vmul.f32 %v12583_v55, %v6113_v13 }
  0x84   : > { %12561 = vst [vmem:[#allocation107_spill] sm:$0xff] %v6496_v14  ;;  %12562 = vst [vmem:[#allocation108_spill] sm:$0xff] %v6498_v1  ;;  %v12567_v1 = vld [vmem:[#allocation11_spill] sm:$0xff]  ;;  %v6555_v14 = vmul.f32 %v6237_v16, %v6115_v15  ;;  %v860_v12 = vmul.f32 %v12575_v48, %v6071_v30  ;;  %v743_v28 = vld [vmem:[#allocation4 + $0x70] sm:$0xff]  ;;  %v6583_v0 = vsel %vm1711_vm4, %v1718_v41, %v12581_v37 }
  0x85   : > { %12563 = vst [vmem:[#allocation109_spill] sm:$0xff] %v6506_v21  ;;  %12564 = vst [vmem:[#allocation110_spill] sm:$0xff] %v6511_v9  ;;  %v6530_v7 = vmul.f32 %v12567_v1, %v6113_v13  ;;  %v6594_v21 = vmul.f32 %v6342_v5, %v6086_v38  ;;  %v6598_v9 = vmul.f32 %v6345_v31, %v6113_v13 }
  0x86   : > { %12565 = vst [vmem:[#allocation111_spill] sm:$0xff] %v6519_v52  ;;  %12566 = vst [vmem:[#allocation112_spill] sm:$0xff] %v6524_v3  ;;  %v6575_v52 = vmul.f32 %v12579_v62, %v6086_v38  ;;  %v740_v3 = vld [vmem:[#allocation4 + $0x58] sm:$0xff]  ;;  %v6617_v31 = vmul.f32 %v6365_v50, %v749_v58  ;;  %v6624_v37 = vmul.f32 %v5975_v54, %v6086_v38 }
  0x87   : > { %12568 = vst [vmem:[#allocation113_spill] sm:$0xff] %v6530_v7  ;;  %12569 = vst [vmem:[#allocation114_spill] sm:$0xff] %v6534_v8  ;;  %v746_v7 = vld [vmem:[#allocation4 + $0x88] sm:$0xff]  ;;  %v896_v8 = vmul.f32 %v6055_v20, %v6088_v39  ;;  %v6620_v41 = vmul.f32 %v12567_v1, %v740_v3  ;;  %v6641_v1 = vld [vmem:[%s11670_s3] ss:$0 sm:$0xff] }
  0x88   : > { %12570 = vst [vmem:[#allocation115_spill] sm:$0xff] %v6538_v61  ;;  %12571 = vst [vmem:[#allocation116_spill] sm:$0xff] %v6542_v11  ;;  %v876_v61 = vadd.f32 %v860_v12, %v840_v63  ;;  %v6603_v63 = vmul.f32 %v6348_v59, %v740_v3  ;;  %v6606_v12 = vmul.f32 %v6351_v25, %v743_v28 }
  0x89   : > { %12572 = vst [vmem:[#allocation117_spill] sm:$0xff] %v6546_v36  ;;  %12573 = vst [vmem:[#allocation118_spill] sm:$0xff] %v6550_v46  ;;  %v6609_v27 = vmul.f32 %v6354_v45, %v746_v7  ;;  %v6614_v46 = vmul.f32 %v6310_v60, %v6113_v13  ;;  %v6636_v11 = vmul.f32 %v5988_v57, %v6113_v13 }
  0x8a   : > { %12574 = vst [vmem:[#allocation119_spill] sm:$0xff] %v6555_v14  ;;  %12576 = vst [vmem:[#allocation120_spill] sm:$0xff] %v6564_v47  ;;  %v12594_v47 = vld [vmem:[#allocation13_spill] sm:$0xff]  ;;  %v932_v14 = vmul.f32 %v6064_v26, %v6115_v15  ;;  %v968_v60 = vmul.f32 %v6076_v33, %v6416_v10 }
  0x8b   : > { %12578 = vst [vmem:[#allocation121_spill] sm:$0xff] %v6569_v56  ;;  %12580 = vst [vmem:[#allocation122_spill] sm:$0xff] %v6575_v52  ;;  %v6627_v56 = vmul.f32 %v12594_v47, %v746_v7 }
  0x8c   : > { %12582 = vst [vmem:[#allocation123_spill] sm:$0xff] %v6583_v0  ;;  %12584 = vst [vmem:[#allocation124_spill] sm:$0xff] %v6590_v19  ;;  %v912_v0 = vadd.f32 %v896_v8, %v876_v61  ;;  %v6645_v8 = vmul.f32 %v12577_v49, %v6086_v38  ;;  %v752_v38 = vld [vmem:[#allocation4 + $0xb8] sm:$0xff] }
  0x8d   : > { %12585 = vst [vmem:[#allocation125_spill] sm:$0xff] %v6594_v21  ;;  %12586 = vst [vmem:[#allocation126_spill] sm:$0xff] %v6598_v9  ;;  %v12598_v9 = vld [vmem:[#allocation12_spill] sm:$0xff]  ;;  %v12601_v19 = vld [vmem:[#allocation14_spill] sm:$0xff] }
  0x8e   : > { %12587 = vst [vmem:[#allocation127_spill] sm:$0xff] %v6603_v63  ;;  %12588 = vst [vmem:[#allocation128_spill] sm:$0xff] %v6606_v12  ;;  %v6654_v21 = vmul.f32 %v12598_v9, %v743_v28  ;;  %v948_v61 = vadd.f32 %v932_v14, %v912_v0  ;;  %v6676_v14 = vmul.f32 %v12579_v62, %v6113_v13  ;;  %v12612_v0 = vld [vmem:[#allocation21_spill] sm:$0xff] }
  0x8f   : > { %12589 = vst [vmem:[#allocation129_spill] sm:$0xff] %v6609_v27  ;;  %12590 = vst [vmem:[#allocation130_spill] sm:$0xff] %v6614_v46  ;;  %v12610_v27 = vld [vmem:[#allocation19_spill] sm:$0xff]  ;;  %v6693_v63 = vmul.f32 %v12612_v0, %v749_v58 }
  0x90   : > { %12591 = vst [vmem:[#allocation131_spill] sm:$0xff] %v6617_v31  ;;  %12592 = vst [vmem:[#allocation132_spill] sm:$0xff] %v6620_v41  ;;  %v6665_v41 = vmul.f32 %v12601_v19, %v749_v58  ;;  %v6668_v31 = vmul.f32 %v12583_v55, %v740_v3  ;;  %v6690_v12 = vmul.f32 %v12610_v27, %v743_v28 }
  0x91   : > { %12593 = vst [vmem:[#allocation133_spill] sm:$0xff] %v6624_v37  ;;  %12595 = vst [vmem:[#allocation134_spill] sm:$0xff] %v6627_v56  ;;  %v984_v62 = vadd.f32 %v968_v60, %v948_v61  ;;  %v12619_v37 = vld [vmem:[#allocation22_spill] sm:$0xff]  ;;  %v6725_v28 = vmul.f32 %v6137_v35, %v6071_v30 }
  0x92   : > { %12596 = vst [vmem:[#allocation135_spill] sm:$0xff] %v6636_v11  ;;  %12597 = vst [vmem:[#allocation136_spill] sm:$0xff] %v6645_v8  ;;  %v6695_v8 = vld [vmem:[#allocation4 + $0xd8] sm:$0xff]  ;;  %v6721_v55 = vmul.f32 %v12619_v37, %v752_v38  ;;  %v6743_v11 = vmul.f32 %v6204_v29, %v6050_v17 }
  0x93   : > { %12599 = vst [vmem:[#allocation137_spill] sm:$0xff] %v6654_v21  ;;  %12602 = vst [vmem:[#allocation139_spill] sm:$0xff] %v6665_v41  ;;  %v1004_v46 = vmul.f32 %v6093_v42, %v6695_v8 }
  0x94   : > { %12603 = vst [vmem:[#allocation140_spill] sm:$0xff] %v6668_v31  ;;  %12605 = vst [vmem:[#allocation142_spill] sm:$0xff] %v6676_v14  ;;  %v6782_v31 = vmul.f32 %v6218_v22, %v6059_v23  ;;  %v12669_v22 = vld [vmem:[#allocation61_spill] sm:$0xff] }
  0x95   : > { %12611 = vst [vmem:[#allocation146_spill] sm:$0xff] %v6690_v12  ;;  %12613 = vst [vmem:[#allocation147_spill] sm:$0xff] %v6693_v63  ;;  %v6750_v63 = vmul.f32 %v6342_v5, %v6113_v13 }
  0x96   : > { %12620 = vst [vmem:[#allocation151_spill] sm:$0xff] %v6721_v55  ;;  %12621 = vst [vmem:[#allocation152_spill] sm:$0xff] %v6725_v28  ;;  %v6812_v28 = vmul.f32 %v6227_v32, %v6071_v30  ;;  %v12641_v30 = vld [vmem:[#allocation55_spill] sm:$0xff] }
  0x97   : > { %12625 = vst [vmem:[#allocation156_spill] sm:$0xff] %v6743_v11  ;;  %12627 = vst [vmem:[#allocation158_spill] sm:$0xff] %v6750_v63 }
  0x98   : > { %12633 = vst [vmem:[#allocation164_spill] sm:$0xff] %v6782_v31  ;;  %12636 = vst [vmem:[#allocation167_spill] sm:$0xff] %v6812_v28 }
 0x124   : > { %v5421_v59 = vpop.f32.mrb[0].mxu0 }
 0x125   : > { %v6661_v52 = vadd.f32 %v5421_v59, %v6641_v1  ;;  %v624_v36 = vpop.f32.mrb[1].mxu0  ;;  %v12606_v59 = vld [vmem:[#allocation20_spill] sm:$0xff] }
 0x126   : > { %v6671_v40 = vadd.f32 %v6641_v1, %v624_v36  ;;  %v5422_v53 = vpop.f32.mrb[2].mxu0  ;;  %v6679_v56 = vmul.f32 %v12606_v59, %v746_v7  ;;  %v6687_v36 = vmul.f32 %v6368_v51, %v752_v38 }
 0x127   : > { %12600 = vst [vmem:[#allocation138_spill] sm:$0xff] %v6661_v52  ;;  %718 = vst.msk [vmem:[#allocation4 + $0x80] sm:$0xff] %vm670_vm2, %v6661_v52  ;;  %v6684_v57 = vadd.f32 %v5422_v53, %v6641_v1  ;;  %v627_v3 = vpop.f32.mrb[3].mxu0  ;;  %v12615_v53 = vld [vmem:[#allocation15_spill] sm:$0xff] }
 0x128   : > { %12604 = vst [vmem:[#allocation141_spill] sm:$0xff] %v6671_v40  ;;  %12607 = vst [vmem:[#allocation143_spill] sm:$0xff] %v6679_v56  ;;  %v6700_v7 = vadd.f32 %v6641_v1, %v627_v3  ;;  %v6703_v52 = vmul.f32 %v12615_v53, %v752_v38  ;;  %v6735_v56 = vadd.f32 %v1004_v46, %v984_v62 }
 0x129   : > { %12608 = vst [vmem:[#allocation144_spill] sm:$0xff] %v6684_v57  ;;  %12609 = vst [vmem:[#allocation145_spill] sm:$0xff] %v6687_v36  ;;  %v6739_v38 = vmul.f32 %v6169_v24, %v6088_v39  ;;  %v6754_v62 = vmul.f32 %v5975_v54, %v6113_v13 }
 0x12a   : > { %714 = vst.msk [vmem:[#allocation4 + $0x50] sm:$0xff] %vm670_vm2, %v6671_v40  ;;  %12614 = vst [vmem:[#allocation148_spill] sm:$0xff] %v6700_v7  ;;  %v12617_v40 = vld [vmem:[#allocation29_spill] sm:$0xff] }
 0x12b   : > { %12616 = vst [vmem:[#allocation149_spill] sm:$0xff] %v6703_v52  ;;  %720 = vst.msk [vmem:[#allocation4 + $0x98] sm:$0xff] %vm670_vm2, %v6684_v57  ;;  %v6714_v3 = vmul.f32 %v12617_v40, %v6050_v17  ;;  %v6766_v52 = vmul.f32 %v6181_v44, %v6695_v8  ;;  %v12666_v40 = vld [vmem:[#allocation60_spill] sm:$0xff] }
 0x12c   : > { %716 = vst.msk [vmem:[#allocation4 + $0x68] sm:$0xff] %vm670_vm2, %v6700_v7  ;;  %v6732_v7 = vmul.f32 %v6111_v4, %v6059_v23  ;;  %v5425_v60 = vpop.f32.mrb[4].mxu0  ;;  %12623 = vst [vmem:[#allocation154_spill] sm:$0xff] %v6735_v56  ;;  %v12638_v56 = vld [vmem:[#allocation45_spill] sm:$0xff]  ;;  %v12667_v63 = vrot.slane %v12666_v40, 2 }
 0x12d   : > { %12618 = vst [vmem:[#allocation150_spill] sm:$0xff] %v6714_v3  ;;  %12624 = vst [vmem:[#allocation155_spill] sm:$0xff] %v6739_v38  ;;  %v6746_v58 = vadd.f32 %v5425_v60, %v6641_v1  ;;  %v640_v57 = vpop.f32.mrb[5].mxu0  ;;  %v6778_v60 = vmul.f32 %v6185_v6, %v6115_v15  ;;  %v6842_v38 = vmul.f32 %v12577_v49, %v6113_v13 }
 0x12e   : > { %12622 = vst [vmem:[#allocation153_spill] sm:$0xff] %v6732_v7  ;;  %12628 = vst [vmem:[#allocation159_spill] sm:$0xff] %v6754_v62  ;;  %v6757_v61 = vld [vmem:[#allocation4 + $0x80] sm:$0xff]  ;;  %v6760_v12 = vadd.f32 %v6641_v1, %v640_v57  ;;  %v5426_v17 = vpop.f32.mrb[6].mxu0  ;;  %v12639_v7 = vrot.slane %v12638_v56, 1  ;;  %v6852_v56 = vmul.f32 %v6260_v18, %v6695_v8 }
 0x12f   : > { %12626 = vst [vmem:[#allocation157_spill] sm:$0xff] %v6746_v58  ;;  %12630 = vst [vmem:[#allocation161_spill] sm:$0xff] %v6766_v52  ;;  %v6773_v46 = vadd.f32 %v5426_v17, %v6641_v1  ;;  %v643_v29 = vpop.f32.mrb[7].mxu0  ;;  %v6797_v57 = vmul.f32 %v6173_v2, %v6757_v61  ;;  %v6870_v8 = vmul.f32 %v6237_v16, %v6757_v61 }
 0x130   : > { %12629 = vst [vmem:[#allocation160_spill] sm:$0xff] %v6760_v12  ;;  %726 = vst.msk [vmem:[#allocation4 + $0xe0] sm:$0xff] %vm670_vm2, %v6746_v58  ;;  %v6789_v58 = vadd.f32 %v6641_v1, %v643_v29  ;;  %v6808_v1 = vmul.f32 %v6173_v2, %v6416_v10 }
 0x131   : > { %v6768_v41 = vld [vmem:[#allocation4 + $0x50] sm:$0xff]  ;;  %12631 = vst [vmem:[#allocation162_spill] sm:$0xff] %v6773_v46  ;;  %12632 = vst [vmem:[#allocation163_spill] sm:$0xff] %v6778_v60  ;;  %v12650_v31 = vrot.slane %v6797_v57, 1  ;;  %v929_v60 = vmul.f32 %v6064_v26, %v6757_v61 }
 0x132   : > { %v6784_v55 = vld [vmem:[#allocation4 + $0x98] sm:$0xff]  ;;  %722 = vst.msk [vmem:[#allocation4 + $0xb0] sm:$0xff] %vm670_vm2, %v6760_v12  ;;  %12634 = vst [vmem:[#allocation165_spill] sm:$0xff] %v6789_v58  ;;  %v6793_v17 = vmul.f32 %v6169_v24, %v6768_v41  ;;  %v857_v49 = vmul.f32 %v12575_v48, %v6768_v41  ;;  %v891_v36 = vmul.f32 %v6055_v20, %v6768_v41  ;;  %v12656_v48 = vld [vmem:[#allocation71_spill] sm:$0xff] }
 0x133   : > { %v6800_v23 = vld [vmem:[#allocation4 + $0x68] sm:$0xff]  ;;  %728 = vst.msk [vmem:[#allocation4 + $0xf8] sm:$0xff] %vm670_vm2, %v6773_v46  ;;  %12635 = vst [vmem:[#allocation166_spill] sm:$0xff] %v6808_v1  ;;  %v6823_v29 = vmul.f32 %v6181_v44, %v6784_v55 }
 0x134   : > { %724 = vst.msk [vmem:[#allocation4 + $0xc8] sm:$0xff] %vm670_vm2, %v6789_v58  ;;  %v11838_v21 = vrot.slane %v6793_v17, 1  ;;  %v6819_v46 = vmul.f32 %v6185_v6, %v6800_v23  ;;  %v6831_v58 = vmul.f32 %v6234_v43, %v6088_v39  ;;  %12640 = vst [vmem:[#allocation45_spill] sm:$0xff] %v6842_v38  ;;  %v6848_v39 = vmul.f32 %v6257_v34, %v6115_v15 }
 0x135   : > { %12643 = vst [vmem:[#allocation169_spill] sm:$0xff] %v6852_v56  ;;  %v6866_v15 = vmul.f32 %v6257_v34, %v6800_v23  ;;  %12647 = vst [vmem:[#allocation170_spill] sm:$0xff] %v6870_v8  ;;  %v6908_v56 = vmul.f32 %v12656_v48, %v6768_v41 }
 0x136   : > { %12637 = vst [vmem:[#allocation168_spill] sm:$0xff] %v6831_v58  ;;  %v1345_v3 = vsel %vm1066_vm3, %v12639_v7, %v11838_v21  ;;  %v11839_v54 = vrot.slane %v6819_v46, 1  ;;  %12642 = vst [vmem:[#allocation55_spill] sm:$0xff] %v6848_v39  ;;  %v12644_v7 = vld [vmem:[#allocation46_spill] sm:$0xff]  ;;  %v12664_v39 = vld [vmem:[#allocation43_spill] sm:$0xff] }
 0x137   : > { %v1383_v62 = vadd.f32 %v1345_v3, %v12641_v30  ;;  %v12645_v21 = vrot.slane %v12644_v7, 1  ;;  %v6862_v3 = vmul.f32 %v6234_v43, %v6768_v41  ;;  %12646 = vst [vmem:[#allocation46_spill] sm:$0xff] %v6866_v15  ;;  %v6874_v7 = vmul.f32 %v6260_v18, %v6784_v55 }
 0x138   : > { %v907_v28 = vadd.f32 %v891_v36, %v12664_v39  ;;  %v12668_v5 = vrot.slane %v6866_v15, 2 }
 0x139   : > { %v1437_v12 = vsel %vm1066_vm3, %v12645_v21, %v11839_v54  ;;  %12648 = vst [vmem:[#allocation171_spill] sm:$0xff] %v6874_v7  ;;  %v6878_v21 = vmul.f32 %v6237_v16, %v6416_v10  ;;  %v12651_v54 = vld [vmem:[#allocation48_spill] sm:$0xff]  ;;  %v6922_v10 = vmul.f32 %v6076_v33, %v6784_v55  ;;  %v12665_v38 = vrot.slane %v6862_v3, 2 }
 0x13a   : > { %v1475_v30 = vadd.f32 %v1437_v12, %v1383_v62  ;;  %v12652_v13 = vrot.slane %v12651_v54, 1  ;;  %v12653_v54 = vrot.slane %v6823_v29, 1  ;;  %12657 = vst [vmem:[#allocation48_spill] sm:$0xff] %v6908_v56  ;;  %v12663_v62 = vld [vmem:[#allocation42_spill] sm:$0xff]  ;;  %v12675_v39 = vrot.slane %v6874_v7, 2 }
 0x13b   : > { %12649 = vst [vmem:[#allocation172_spill] sm:$0xff] %v6878_v21  ;;  %v873_v21 = vadd.f32 %v857_v49, %v12663_v62  ;;  %v1990_v14 = vsel %vm1711_vm4, %v12667_v63, %v12665_v38  ;;  %v12676_v62 = vld [vmem:[#allocation63_spill] sm:$0xff] }
 0x13c   : > { %v1529_v11 = vsel %vm1066_vm3, %v12652_v13, %v12650_v31  ;;  %v12654_v31 = vld [vmem:[#allocation49_spill] sm:$0xff]  ;;  %v12677_v40 = vrot.slane %v12676_v62, 2  ;;  %v12678_v38 = vld [vmem:[#allocation75_spill] sm:$0xff]  ;;  %v927_v62 = vmul.f32 %v6064_v26, %v6800_v23  ;;  %v6991_v26 = vmul.f32 %v6368_v51, %v6784_v55 }
 0x13d   : > { %v1567_v1 = vadd.f32 %v1529_v11, %v1475_v30  ;;  %v12655_v13 = vrot.slane %v12654_v31, 1  ;;  %v999_v30 = vmul.f32 %v6093_v42, %v6784_v55  ;;  %v12662_v11 = vld [vmem:[#allocation64_spill] sm:$0xff]  ;;  %v6952_v15 = vmul.f32 %v12678_v38, %v6784_v55 }
 0x13e   : > { %v2266_v63 = vsel %vm1711_vm4, %v12677_v40, %v12675_v39  ;;  %v6970_v39 = vmul.f32 %v6365_v50, %v6757_v61  ;;  %v893_v40 = vmul.f32 %v6055_v20, %v6800_v23  ;;  %12687 = vst [vmem:[#allocation63_spill] sm:$0xff] %v6991_v26  ;;  %v943_v20 = vadd.f32 %v927_v62, %v907_v28 }
 0x13f   : > { %v1621_v12 = vsel %vm1066_vm3, %v12655_v13, %v12653_v54  ;;  %v12658_v54 = vld [vmem:[#allocation72_spill] sm:$0xff]  ;;  %v12660_v13 = vld [vmem:[#allocation73_spill] sm:$0xff]  ;;  %12679 = vst [vmem:[#allocation64_spill] sm:$0xff] %v6952_v15  ;;  %v6997_v50 = vmul.f32 %v6173_v2, %v6784_v55 }
 0x140   : > { %v1659_v58 = vadd.f32 %v1621_v12, %v1567_v1  ;;  %v6912_v31 = vmul.f32 %v12658_v54, %v6800_v23  ;;  %v6916_v1 = vmul.f32 %v12660_v13, %v6757_v61  ;;  %v963_v12 = vmul.f32 %v6076_v33, %v6757_v61  ;;  %v12671_v13 = vld [vmem:[#allocation65_spill] sm:$0xff]  ;;  %12683 = vst [vmem:[#allocation60_spill] sm:$0xff] %v6970_v39 }
 0x141   : > { %v12670_v33 = vrot.slane %v12669_v22, 2  ;;  %v6978_v22 = vmul.f32 %v6137_v35, %v6768_v41  ;;  %v909_v62 = vadd.f32 %v893_v40, %v873_v21  ;;  %v12694_v35 = vld [vmem:[#allocation81_spill] sm:$0xff] }
 0x142   : > { %12659 = vst [vmem:[#allocation49_spill] sm:$0xff] %v6912_v31  ;;  %12661 = vst [vmem:[#allocation173_spill] sm:$0xff] %v6916_v1  ;;  %v1752_v52 = vadd.f32 %v12662_v11, %v1659_v58  ;;  %v12672_v58 = vrot.slane %v6870_v8, 2  ;;  %v12673_v11 = vld [vmem:[#allocation62_spill] sm:$0xff]  ;;  %v979_v28 = vadd.f32 %v963_v12, %v943_v20  ;;  %v12691_v8 = vld [vmem:[#allocation68_spill] sm:$0xff] }
 0x143   : > { %v2082_v4 = vsel %vm1711_vm4, %v12670_v33, %v12668_v5  ;;  %v12674_v49 = vrot.slane %v12673_v11, 2  ;;  %12684 = vst [vmem:[#allocation61_spill] sm:$0xff] %v6978_v22  ;;  %v11890_v7 = vrot.slane %v6978_v22, 1  ;;  %v7006_v33 = vmul.f32 %v12598_v9, %v6768_v41  ;;  %v12696_v20 = vld [vmem:[#allocation44_spill] sm:$0xff]  ;;  %v12773_v22 = vld [vmem:[#allocation99_spill] sm:$0xff] }
 0x144   : > { %v1844_v54 = vadd.f32 %v12671_v13, %v1752_v52  ;;  %v6959_v52 = vmul.f32 %v6351_v25, %v6768_v41  ;;  %v6961_v13 = vld [vmem:[#allocation4 + $0xb0] sm:$0xff]  ;;  %v12692_v51 = vrot.slane %v12691_v8, 1  ;;  %v7024_v8 = vmul.f32 %v12594_v47, %v6800_v23 }
 0x145   : > { %v2174_v36 = vsel %vm1711_vm4, %v12674_v49, %v12672_v58  ;;  %v12681_v58 = vld [vmem:[#allocation66_spill] sm:$0xff]  ;;  %v6966_v49 = vmul.f32 %v6354_v45, %v6800_v23  ;;  %12690 = vst [vmem:[#allocation175_spill] sm:$0xff] %v7006_v33 }
 0x146   : > { %12680 = vst [vmem:[#allocation42_spill] sm:$0xff] %v6959_v52  ;;  %v1936_v11 = vadd.f32 %v12681_v58, %v1844_v54  ;;  %v6982_v54 = vmul.f32 %v6169_v24, %v6800_v23  ;;  %v6986_v58 = vmul.f32 %v6185_v6, %v6757_v61  ;;  %12688 = vst [vmem:[#allocation66_spill] sm:$0xff] %v6997_v50 }
 0x147   : > { %12682 = vst [vmem:[#allocation43_spill] sm:$0xff] %v6966_v49  ;;  %v7001_v6 = vmul.f32 %v6181_v44, %v6961_v13  ;;  %v1256_v2 = vsel %vm1066_vm3, %v12692_v51, %v11890_v7  ;;  %v12695_v44 = vrot.slane %v12694_v35, 1  ;;  %v1015_v52 = vadd.f32 %v999_v30, %v979_v28  ;;  %12697 = vst [vmem:[#allocation68_spill] sm:$0xff] %v7024_v8 }
 0x148   : > { %12685 = vst [vmem:[#allocation65_spill] sm:$0xff] %v6982_v54  ;;  %12686 = vst [vmem:[#allocation62_spill] sm:$0xff] %v6986_v58  ;;  %v2028_v5 = vadd.f32 %v1990_v14, %v1936_v11  ;;  %v12693_v24 = vrot.slane %v6982_v54, 1  ;;  %v1293_v21 = vadd.f32 %v1256_v2, %v12696_v20  ;;  %v11892_v51 = vrot.slane %v6997_v50, 1  ;;  %v12701_v20 = vld [vmem:[#allocation85_spill] sm:$0xff] }
 0x149   : > { %12689 = vst [vmem:[#allocation174_spill] sm:$0xff] %v7001_v6  ;;  %v11893_v35 = vrot.slane %v7001_v6, 1  ;;  %v7034_v2 = vmul.f32 %v12601_v19, %v6757_v61  ;;  %v945_v28 = vadd.f32 %v929_v60, %v909_v62  ;;  %v12702_v12 = vrot.slane %v12701_v20, 1  ;;  %v12708_v60 = vld [vmem:[#allocation86_spill] sm:$0xff] }
 0x14a   : > { %v2120_v14 = vadd.f32 %v2082_v4, %v2028_v5  ;;  %v1348_v4 = vsel %vm1066_vm3, %v12695_v44, %v12693_v24  ;;  %v11891_v5 = vrot.slane %v6986_v58, 1  ;;  %v12698_v44 = vld [vmem:[#allocation31_spill] sm:$0xff]  ;;  %v12709_v62 = vrot.slane %v12708_v60, 1  ;;  %v12766_v58 = vld [vmem:[#allocation97_spill] sm:$0xff] }
 0x14b   : > { %v1385_v7 = vadd.f32 %v1348_v4, %v1293_v21  ;;  %12700 = vst [vmem:[#allocation81_spill] sm:$0xff] %v7034_v2  ;;  %v12706_v4 = vld [vmem:[#allocation34_spill] sm:$0xff]  ;;  %v12767_v54 = vrot.slane %v12766_v58, 2 }
 0x14c   : > { %v2212_v11 = vadd.f32 %v2174_v36, %v2120_v14  ;;  %v12699_v36 = vrot.slane %v12698_v44, 1  ;;  %v1440_v9 = vsel %vm1066_vm3, %v12702_v12, %v11891_v5  ;;  %v12707_v21 = vrot.slane %v12706_v4, 1  ;;  %v12710_v12 = vld [vmem:[#allocation87_spill] sm:$0xff] }
 0x14d   : > { %v1532_v20 = vsel %vm1066_vm3, %v12709_v62, %v11892_v51  ;;  %v7062_v5 = vmul.f32 %v6227_v32, %v6768_v41  ;;  %v7068_v4 = vmul.f32 %v12610_v27, %v6768_v41 }
 0x14e   : > { %v2304_v40 = vadd.f32 %v2266_v63, %v2212_v11  ;;  %v1108_v14 = vadd.f32 %v12699_v36, %v1015_v52  ;;  %v12703_v63 = vld [vmem:[#allocation74_spill] sm:$0xff]  ;;  %v7045_v52 = vmul.f32 %v12615_v53, %v6784_v55  ;;  %v1477_v36 = vadd.f32 %v1440_v9, %v1385_v7 }
 0x14f   : > { %v12704_v11 = vrot.slane %v12703_v63, 3  ;;  %12712 = vst [vmem:[#allocation31_spill] sm:$0xff] %v7062_v5  ;;  %12715 = vst [vmem:[#allocation85_spill] sm:$0xff] %v7068_v4 }
 0x150   : > { %12705 = vst [vmem:[#allocation44_spill] sm:$0xff] %v7045_v52  ;;  %v1200_v44 = vadd.f32 %v12707_v21, %v1108_v14  ;;  %v12713_v14 = vld [vmem:[#allocation82_spill] sm:$0xff]  ;;  %v12716_v21 = vld [vmem:[#allocation37_spill] sm:$0xff]  ;;  %v1569_v51 = vadd.f32 %v1532_v20, %v1477_v36  ;;  %v12723_v36 = vrot.slane %v6793_v17, 1  ;;  %v12727_v17 = vrot.slane %v6819_v46, 1 }
 0x151   : > { %v2356_v24 = vadd.f32 %v12704_v11, %v2304_v40  ;;  %v12711_v40 = vrot.slane %v12710_v12, 1  ;;  %v12714_v9 = vrot.slane %v12713_v14, 3  ;;  %v12717_v60 = vrot.slane %v12716_v21, 1 }
 0x152   : > { %v7074_v12 = vmul.f32 %v12606_v59, %v6800_v23  ;;  %v12732_v46 = vrot.slane %v6797_v57, 1 }
 0x153   : > { %v1624_v11 = vsel %vm1066_vm3, %v12711_v40, %v11893_v35  ;;  %v2408_v7 = vadd.f32 %v12714_v9, %v2356_v24  ;;  %v1292_v62 = vadd.f32 %v12717_v60, %v1200_v44  ;;  %v981_v40 = vadd.f32 %v6922_v10, %v945_v28  ;;  %v12720_v9 = vld [vmem:[#allocation91_spill] sm:$0xff]  ;;  %v12735_v28 = vld [vmem:[#allocation92_spill] sm:$0xff] }
 0x154   : > { %12718 = vst [vmem:[#allocation74_spill] sm:$0xff] %v7074_v12  ;;  %v1001_v35 = vmul.f32 %v6093_v42, %v6961_v13  ;;  %v7081_v24 = vmul.f32 %v6234_v43, %v6800_v23  ;;  %v12721_v30 = vrot.slane %v12720_v9, 3  ;;  %v7087_v44 = vmul.f32 %v12612_v0, %v6757_v61 }
 0x155   : > { %v1384_v20 = vadd.f32 %v12723_v36, %v1292_v62  ;;  %v1661_v21 = vadd.f32 %v1624_v11, %v1569_v51  ;;  %v7096_v42 = vmul.f32 %v6257_v34, %v6757_v61  ;;  %v7102_v9 = vmul.f32 %v12619_v37, %v6784_v55  ;;  %v12728_v11 = vld [vmem:[#allocation102_spill] sm:$0xff] }
 0x156   : > { %12719 = vst [vmem:[#allocation34_spill] sm:$0xff] %v7081_v24  ;;  %v2460_v14 = vadd.f32 %v12721_v30, %v2408_v7  ;;  %12722 = vst [vmem:[#allocation86_spill] sm:$0xff] %v7087_v44  ;;  %v12725_v30 = vrot.slane %v6908_v56, 3  ;;  %v1017_v36 = vadd.f32 %v1001_v35, %v981_v40  ;;  %v7110_v10 = vmul.f32 %v6237_v16, %v6784_v55 }
 0x157   : > { %12724 = vst [vmem:[#allocation87_spill] sm:$0xff] %v7096_v42  ;;  %12726 = vst [vmem:[#allocation37_spill] sm:$0xff] %v7102_v9  ;;  %v1476_v51 = vadd.f32 %v12727_v17, %v1384_v20  ;;  %v1754_v62 = vadd.f32 %v12728_v11, %v1661_v21  ;;  %v7114_v60 = vmul.f32 %v6260_v18, %v6961_v13  ;;  %v12733_v21 = vld [vmem:[#allocation103_spill] sm:$0xff]  ;;  %v12734_v11 = vrot.slane %v7062_v5, 2 }
 0x158   : > { %v2512_v7 = vadd.f32 %v12725_v30, %v2460_v14  ;;  %12729 = vst [vmem:[#allocation102_spill] sm:$0xff] %v7110_v10  ;;  %v12731_v14 = vrot.slane %v6912_v31, 3  ;;  %v12736_v6 = vrot.slane %v12735_v28, 2  ;;  %v11901_v31 = vrot.slane %v7096_v42, 2  ;;  %v12743_v28 = vld [vmem:[#allocation93_spill] sm:$0xff] }
 0x159   : > { %12730 = vst [vmem:[#allocation176_spill] sm:$0xff] %v7114_v60  ;;  %v1568_v20 = vadd.f32 %v12732_v46, %v1476_v51  ;;  %v1846_v35 = vadd.f32 %v12733_v21, %v1754_v62  ;;  %v12738_v51 = vrot.slane %v6823_v29, 1  ;;  %v12739_v21 = vld [vmem:[#allocation32_spill] sm:$0xff]  ;;  %v12742_v56 = vrot.slane %v7081_v24, 2  ;;  %v12746_v29 = vld [vmem:[#allocation51_spill] sm:$0xff] }
 0x15a   : > { %v2564_v30 = vadd.f32 %v12731_v14, %v2512_v7  ;;  %v1901_v50 = vsel %vm1711_vm4, %v12736_v6, %v12734_v11  ;;  %v12737_v7 = vrot.slane %v6916_v1, 3  ;;  %v12740_v40 = vrot.slane %v12739_v21, 1 }
 0x15b   : > { %v1660_v62 = vadd.f32 %v12738_v51, %v1568_v20  ;;  %v1938_v46 = vadd.f32 %v1901_v50, %v1846_v35  ;;  %v12744_v5 = vrot.slane %v12743_v28, 2  ;;  %v12747_v20 = vrot.slane %v12746_v29, 2  ;;  %v12750_v51 = vld [vmem:[#allocation94_spill] sm:$0xff] }
 0x15c   : > { %v2616_v14 = vadd.f32 %v12737_v7, %v2564_v30  ;;  %v7137_v17 = vadd.f32 %v12740_v40, %v1017_v36  ;;  %v12745_v7 = vrot.slane %v6952_v15, 3  ;;  %v12748_v36 = vld [vmem:[#allocation70_spill] sm:$0xff]  ;;  %v12751_v21 = vrot.slane %v12750_v51, 2  ;;  %v12763_v15 = vld [vmem:[#allocation95_spill] sm:$0xff] }
 0x15d   : > { %v1993_v6 = vsel %vm1711_vm4, %v12744_v5, %v12742_v56  ;;  %v1753_v50 = vadd.f32 %v12747_v20, %v1660_v62  ;;  %v7152_v40 = vmul.f32 %v12748_v36, %v6768_v41  ;;  %v7161_v5 = vmul.f32 %v12656_v48, %v6800_v23  ;;  %v12755_v62 = vld [vmem:[#allocation73_spill] sm:$0xff]  ;;  %v12759_v20 = vld [vmem:[#allocation56_spill] sm:$0xff] }
 0x15e   : > { %12741 = vst [vmem:[#allocation103_spill] sm:$0xff] %v7137_v17  ;;  %v2668_v57 = vadd.f32 %v12745_v7, %v2616_v14  ;;  %v2030_v35 = vadd.f32 %v1993_v6, %v1938_v46  ;;  %v2085_v56 = vsel %vm1711_vm4, %v12751_v21, %v11901_v31  ;;  %v12753_v14 = vld [vmem:[#allocation72_spill] sm:$0xff]  ;;  %v7169_v46 = vmul.f32 %v12755_v62, %v6784_v55 }
 0x15f   : > { %12749 = vst [vmem:[#allocation92_spill] sm:$0xff] %v7152_v40  ;;  %12752 = vst [vmem:[#allocation32_spill] sm:$0xff] %v7161_v5  ;;  %v7165_v28 = vmul.f32 %v12753_v14, %v6757_v61  ;;  %v12757_v6 = vld [vmem:[#allocation96_spill] sm:$0xff]  ;;  %v12760_v30 = vrot.slane %v12759_v20, 2  ;;  %v7177_v21 = vmul.f32 %v12678_v38, %v6961_v13  ;;  %v12762_v31 = vrot.slane %v7110_v10, 2 }
 0x160   : > { %12756 = vst [vmem:[#allocation51_spill] sm:$0xff] %v7169_v46  ;;  %v12758_v7 = vrot.slane %v12757_v6, 4  ;;  %v2122_v11 = vadd.f32 %v2085_v56, %v2030_v35  ;;  %v12764_v1 = vrot.slane %v12763_v15, 2  ;;  %v12765_v24 = vrot.slane %v7114_v60, 2  ;;  %v12769_v35 = vld [vmem:[#allocation98_spill] sm:$0xff]  ;;  %v12771_v15 = vld [vmem:[#allocation57_spill] sm:$0xff] }
 0x161   : > { %12754 = vst [vmem:[#allocation93_spill] sm:$0xff] %v7165_v28  ;;  %v1845_v51 = vadd.f32 %v12760_v30, %v1753_v50  ;;  %12761 = vst [vmem:[#allocation94_spill] sm:$0xff] %v7177_v21  ;;  %v7195_v50 = vmul.f32 %v6351_v25, %v6800_v23  ;;  %v12770_v56 = vrot.slane %v12769_v35, 4  ;;  %v12772_v6 = vrot.slane %v12771_v15, 2  ;;  %v12776_v15 = vld [vmem:[#allocation33_spill] sm:$0xff]  ;;  %v12780_v60 = vld [vmem:[#allocation42_spill] sm:$0xff] }
 0x162   : > { %v2760_v29 = vadd.f32 %v12758_v7, %v2668_v57  ;;  %v2177_v42 = vsel %vm1711_vm4, %v12764_v1, %v12762_v31  ;;  %v2269_v57 = vsel %vm1711_vm4, %v12767_v54, %v12765_v24  ;;  %v12768_v7 = vld [vmem:[#allocation78_spill] sm:$0xff]  ;;  %v7207_v10 = vmul.f32 %v6354_v45, %v6757_v61  ;;  %v12778_v54 = vld [vmem:[#allocation36_spill] sm:$0xff] }
 0x163   : > { %v7191_v30 = vmul.f32 %v12768_v7, %v6768_v41  ;;  %v1937_v31 = vadd.f32 %v12772_v6, %v1845_v51  ;;  %v2214_v1 = vadd.f32 %v2177_v42, %v2122_v11  ;;  %v12774_v9 = vrot.slane %v12773_v22, 4  ;;  %v12786_v11 = vld [vmem:[#allocation38_spill] sm:$0xff]  ;;  %v12788_v22 = vld [vmem:[#allocation83_spill] sm:$0xff]  ;;  %v12797_v17 = vld [vmem:[#allocation100_spill] sm:$0xff] }
 0x164   : > { %v2852_v20 = vadd.f32 %v12770_v56, %v2760_v29  ;;  %v12775_v29 = vrot.slane %v6862_v3, 2  ;;  %v7218_v24 = vmul.f32 %v12776_v15, %v6768_v41  ;;  %v7222_v58 = vmul.f32 %v12778_v54, %v6800_v23  ;;  %v12782_v3 = vld [vmem:[#allocation46_spill] sm:$0xff]  ;;  %v12800_v25 = vld [vmem:[#allocation104_spill] sm:$0xff] }
 0x165   : > { %v2306_v6 = vadd.f32 %v2269_v57, %v2214_v1  ;;  %v12784_v1 = vld [vmem:[#allocation105_spill] sm:$0xff]  ;;  %v7232_v51 = vmul.f32 %v12786_v11, %v6757_v61  ;;  %v7236_v15 = vmul.f32 %v12788_v22, %v6784_v55  ;;  %v12798_v45 = vrot.slane %v12797_v17, 1 }
 0x166   : > { %v2944_v35 = vadd.f32 %v12774_v9, %v2852_v20  ;;  %v2029_v56 = vadd.f32 %v12775_v29, %v1937_v31  ;;  %12777 = vst [vmem:[#allocation56_spill] sm:$0xff] %v7218_v24  ;;  %12779 = vst [vmem:[#allocation95_spill] sm:$0xff] %v7222_v58  ;;  %v12781_v9 = vrot.slane %v12780_v60, 4  ;;  %v12783_v31 = vrot.slane %v12782_v3, 2 }
 0x167   : > { %v12785_v29 = vrot.slane %v12784_v1, 3  ;;  %12787 = vst [vmem:[#allocation97_spill] sm:$0xff] %v7232_v51  ;;  %v11923_v54 = vrot.slane %v7218_v24, 1  ;;  %v12795_v1 = vld [vmem:[#allocation112_spill] sm:$0xff]  ;;  %v12799_v12 = vrot.slane %v7222_v58, 1  ;;  %v12801_v4 = vrot.slane %v12800_v25, 1 }
 0x168   : > { %v3036_v20 = vadd.f32 %v12781_v9, %v2944_v35  ;;  %v2121_v57 = vadd.f32 %v12783_v31, %v2029_v56  ;;  %v12789_v35 = vld [vmem:[#allocation41_spill] sm:$0xff]  ;;  %v7244_v56 = vld [vmem:[#allocation4 + $0xc8] sm:$0xff]  ;;  %v12793_v31 = vld [vmem:[#allocation170_spill] sm:$0xff]  ;;  %v12796_v11 = vrot.slane %v12795_v1, 3 }
 0x169   : > { %v2358_v42 = vadd.f32 %v12785_v29, %v2306_v6  ;;  %v7242_v9 = vmul.f32 %v12789_v35, %v6784_v55  ;;  %12791 = vst [vmem:[#allocation46_spill] sm:$0xff] %v7244_v56  ;;  %v12792_v6 = vrot.slane %v6966_v49, 4  ;;  %v12794_v29 = vrot.slane %v12793_v31, 2  ;;  %v12808_v58 = vld [vmem:[#allocation108_spill] sm:$0xff]  ;;  %v12816_v25 = vld [vmem:[#allocation11_spill] sm:$0xff] }
 0x16a   : > { %v1167_v35 = vsel %vm1066_vm3, %v12798_v45, %v11923_v54  ;;  %v12807_v45 = vrot.slane %v7152_v40, 3  ;;  %v12835_v40 = vrot.slane %v7169_v46, 3 }
 0x16b   : > { %12790 = vst [vmem:[#allocation57_spill] sm:$0xff] %v7242_v9  ;;  %v3128_v3 = vadd.f32 %v12792_v6, %v3036_v20  ;;  %v2213_v60 = vadd.f32 %v12794_v29, %v2121_v57  ;;  %v2410_v44 = vadd.f32 %v12796_v11, %v2358_v42  ;;  %v1259_v20 = vsel %vm1066_vm3, %v12801_v4, %v12799_v12  ;;  %v12802_v57 = vld [vmem:[#allocation39_spill] sm:$0xff]  ;;  %v12809_v6 = vld [vmem:[#allocation40_spill] sm:$0xff] }
 0x16c   : > { %v7266_v31 = vmul.f32 %v12802_v57, %v6961_v13  ;;  %v12804_v42 = vrot.slane %v6970_v39, 4  ;;  %v12805_v29 = vld [vmem:[#allocation171_spill] sm:$0xff]  ;;  %v1203_v24 = vadd.f32 %v1167_v35, %v12808_v58  ;;  %v7280_v49 = vmul.f32 %v12809_v6, %v7244_v56  ;;  %v7598_v57 = vld [vmem:[#allocation4 + $0x28] sm:$0xff] }
 0x16d   : > { %v12806_v22 = vrot.slane %v12805_v29, 2  ;;  %v2462_v54 = vadd.f32 %v12807_v45, %v2410_v44  ;;  %v12814_v44 = vrot.slane %v7161_v5, 3  ;;  %v12815_v29 = vld [vmem:[#allocation84_spill] sm:$0xff]  ;;  %v7296_v12 = vmul.f32 %v12816_v25, %v6768_v41 }
 0x16e   : > { %12803 = vst [vmem:[#allocation170_spill] sm:$0xff] %v7266_v31  ;;  %v3220_v11 = vadd.f32 %v12804_v42, %v3128_v3  ;;  %12810 = vst [vmem:[#allocation100_spill] sm:$0xff] %v7280_v49  ;;  %v12811_v3 = vrot.slane %v6991_v26, 4  ;;  %v1295_v35 = vadd.f32 %v1259_v20, %v1203_v24  ;;  %v7292_v45 = vmul.f32 %v12815_v29, %v6961_v13  ;;  %v12819_v26 = vld [vmem:[#allocation101_spill] sm:$0xff] }
 0x16f   : > { %v2305_v17 = vadd.f32 %v12806_v22, %v2213_v60  ;;  %v12812_v22 = vrot.slane %v12703_v63, 3  ;;  %v2514_v58 = vadd.f32 %v12814_v44, %v2462_v54  ;;  %12817 = vst [vmem:[#allocation171_spill] sm:$0xff] %v7296_v12  ;;  %v12818_v4 = vrot.slane %v7232_v51, 1  ;;  %v12824_v44 = vld [vmem:[#allocation12_spill] sm:$0xff] }
 0x170   : > { %v3312_v42 = vadd.f32 %v12811_v3, %v3220_v11  ;;  %v12820_v11 = vrot.slane %v12819_v26, 1  ;;  %v12821_v3 = vld [vmem:[#allocation107_spill] sm:$0xff]  ;;  %v12823_v24 = vrot.slane %v7165_v28, 3  ;;  %v7310_v39 = vmul.f32 %v12824_v44, %v6800_v23 }
 0x171   : > { %v7286_v60 = vadd.f32 %v12812_v22, %v2305_v17  ;;  %v12822_v22 = vrot.slane %v12821_v3, 5  ;;  %v7314_v51 = vmul.f32 %v12594_v47, %v6757_v61  ;;  %v12825_v26 = vrot.slane %v7242_v9, 1 }
 0x172   : > { %v1351_v63 = vsel %vm1066_vm3, %v12820_v11, %v12818_v4  ;;  %v2566_v20 = vadd.f32 %v12823_v24, %v2514_v58  ;;  %v12826_v4 = vld [vmem:[#allocation106_spill] sm:$0xff] }
 0x173   : > { %12813 = vst [vmem:[#allocation104_spill] sm:$0xff] %v7286_v60  ;;  %v3405_v54 = vadd.f32 %v12822_v22, %v3312_v42  ;;  %v1387_v60 = vadd.f32 %v1351_v63, %v1295_v35  ;;  %v12827_v11 = vrot.slane %v12826_v4, 1  ;;  %v12828_v42 = vrot.slane %v7266_v31, 1  ;;  %v12829_v22 = vld [vmem:[#allocation116_spill] sm:$0xff]  ;;  %v12831_v24 = vld [vmem:[#allocation50_spill] sm:$0xff]  ;;  %v12833_v35 = vld [vmem:[#allocation111_spill] sm:$0xff] }
 0x174   : > { %v12830_v3 = vrot.slane %v12829_v22, 1  ;;  %v7328_v28 = vmul.f32 %v12831_v24, %v6768_v41  ;;  %v12834_v63 = vrot.slane %v12833_v35, 5  ;;  %v2618_v9 = vadd.f32 %v12835_v40, %v2566_v20  ;;  %v12840_v40 = vld [vmem:[#allocation113_spill] sm:$0xff]  ;;  %v12847_v22 = vld [vmem:[#allocation18_spill] sm:$0xff] }
 0x175   : > { %v1443_v17 = vsel %vm1066_vm3, %v12827_v11, %v12825_v26  ;;  %v7336_v4 = vmul.f32 %v12601_v19, %v6784_v55  ;;  %v12841_v20 = vrot.slane %v12840_v40, 5  ;;  %v12842_v35 = vrot.slane %v7177_v21, 3 }
 0x176   : > { %v1535_v58 = vsel %vm1066_vm3, %v12830_v3, %v12828_v42  ;;  %12832 = vst [vmem:[#allocation108_spill] sm:$0xff] %v7328_v28  ;;  %v3497_v5 = vadd.f32 %v12834_v63, %v3405_v54  ;;  %v1479_v26 = vadd.f32 %v1443_v17, %v1387_v60  ;;  %v12836_v3 = vrot.slane %v7280_v49, 1  ;;  %v12837_v42 = vld [vmem:[#allocation117_spill] sm:$0xff] }
 0x177   : > { %v12838_v31 = vrot.slane %v12837_v42, 1  ;;  %v7347_v54 = vmul.f32 %v6227_v32, %v6800_v23  ;;  %v2670_v60 = vadd.f32 %v12842_v35, %v2618_v9  ;;  %v7357_v42 = vmul.f32 %v12615_v53, %v6961_v13  ;;  %v12845_v49 = vld [vmem:[#allocation125_spill] sm:$0xff] }
 0x178   : > { %v3589_v63 = vadd.f32 %v12841_v20, %v3497_v5  ;;  %v1571_v11 = vadd.f32 %v1535_v58, %v1479_v26  ;;  %v12844_v5 = vrot.slane %v7006_v33, 5  ;;  %v12846_v9 = vrot.slane %v12845_v49, 4  ;;  %v12852_v58 = vld [vmem:[#allocation123_spill] sm:$0xff] }
 0x179   : > { %v1627_v24 = vsel %vm1066_vm3, %v12838_v31, %v12836_v3  ;;  %12839 = vst [vmem:[#allocation101_spill] sm:$0xff] %v7347_v54  ;;  %v7362_v3 = vmul.f32 %v6234_v43, %v6757_v61  ;;  %v7371_v17 = vmul.f32 %v12847_v22, %v6768_v41  ;;  %v7375_v31 = vmul.f32 %v12610_v27, %v6800_v23  ;;  %v12854_v43 = vld [vmem:[#allocation109_spill] sm:$0xff] }
 0x17a   : > { %v3681_v20 = vadd.f32 %v12844_v5, %v3589_v63  ;;  %v2762_v35 = vadd.f32 %v12846_v9, %v2670_v60  ;;  %v1663_v26 = vadd.f32 %v1627_v24, %v1571_v11  ;;  %v7380_v33 = vmul.f32 %v6257_v34, %v6784_v55  ;;  %v12850_v5 = vld [vmem:[#allocation126_spill] sm:$0xff] }
 0x17b   : > { %12843 = vst [vmem:[#allocation106_spill] sm:$0xff] %v7362_v3  ;;  %v12849_v63 = vrot.slane %v7024_v8, 5  ;;  %v12851_v9 = vrot.slane %v12850_v5, 4  ;;  %v7388_v11 = vmul.f32 %v12606_v59, %v6757_v61  ;;  %v12853_v40 = vrot.slane %v7328_v28, 2 }
 0x17c   : > { %12848 = vst [vmem:[#allocation116_spill] sm:$0xff] %v7380_v33  ;;  %v1756_v21 = vadd.f32 %v12852_v58, %v1663_v26  ;;  %v12855_v32 = vrot.slane %v12854_v43, 2  ;;  %v7408_v26 = vmul.f32 %v12612_v0, %v6784_v55  ;;  %v7412_v43 = vmul.f32 %v12619_v37, %v6961_v13 }
 0x17d   : > { %v3773_v60 = vadd.f32 %v12849_v63, %v3681_v20  ;;  %v2854_v24 = vadd.f32 %v12851_v9, %v2762_v35  ;;  %v7400_v20 = vmul.f32 %v6237_v16, %v6961_v13  ;;  %v12857_v35 = vrot.slane %v7034_v2, 5 }
 0x17e   : > { %v1812_v34 = vsel %vm1711_vm4, %v12855_v32, %v12853_v40  ;;  %v12858_v9 = vrot.slane %v7191_v30, 4  ;;  %v12859_v32 = vrot.slane %v7347_v54, 2  ;;  %v12860_v40 = vld [vmem:[#allocation114_spill] sm:$0xff] }
 0x17f   : > { %12856 = vst [vmem:[#allocation117_spill] sm:$0xff] %v7400_v20  ;;  %v3865_v63 = vadd.f32 %v12857_v35, %v3773_v60  ;;  %v1848_v46 = vadd.f32 %v1812_v34, %v1756_v21  ;;  %v12861_v8 = vrot.slane %v12860_v40, 2  ;;  %v12863_v35 = vrot.slane %v7045_v52, 5  ;;  %v12868_v52 = vld [vmem:[#allocation121_spill] sm:$0xff] }
 0x180   : > { %v2946_v58 = vadd.f32 %v12858_v9, %v2854_v24  ;;  %v7422_v24 = vmul.f32 %v6260_v18, %v7244_v56  ;;  %v12864_v34 = vrot.slane %v7195_v50, 4  ;;  %v7459_v40 = vmul.f32 %v12748_v36, %v6800_v23  ;;  %v12901_v36 = vld [vmem:[#allocation74_spill] sm:$0xff] }
 0x181   : > { %v1904_v28 = vsel %vm1711_vm4, %v12861_v8, %v12859_v32  ;;  %v3957_v9 = vadd.f32 %v12863_v35, %v3865_v63  ;;  %v12865_v8 = vrot.slane %v7362_v3, 2  ;;  %v12866_v32 = vld [vmem:[#allocation115_spill] sm:$0xff]  ;;  %v12869_v63 = vrot.slane %v12868_v52, 6 }
 0x182   : > { %12862 = vst [vmem:[#allocation125_spill] sm:$0xff] %v7422_v24  ;;  %v3038_v21 = vadd.f32 %v12864_v34, %v2946_v58  ;;  %v1940_v16 = vadd.f32 %v1904_v28, %v1848_v46  ;;  %v12867_v60 = vrot.slane %v12866_v32, 2  ;;  %v12870_v58 = vrot.slane %v7207_v10, 4  ;;  %v12871_v28 = vld [vmem:[#allocation69_spill] sm:$0xff]  ;;  %12879 = vst [vmem:[#allocation123_spill] sm:$0xff] %v7459_v40 }
 0x183   : > { %v4050_v35 = vadd.f32 %v12869_v63, %v3957_v9  ;;  %v7443_v46 = vmul.f32 %v12871_v28, %v6768_v41  ;;  %v12873_v32 = vrot.slane %v7380_v33, 2  ;;  %v11959_v9 = vrot.slane %v7422_v24, 2  ;;  %v12876_v63 = vld [vmem:[#allocation122_spill] sm:$0xff]  ;;  %v12881_v33 = vld [vmem:[#allocation119_spill] sm:$0xff] }
 0x184   : > { %v1996_v18 = vsel %vm1711_vm4, %v12867_v60, %v12865_v8  ;;  %v3130_v34 = vadd.f32 %v12870_v58, %v3038_v21  ;;  %v12874_v60 = vld [vmem:[#allocation118_spill] sm:$0xff]  ;;  %v12877_v3 = vrot.slane %v12876_v63, 6  ;;  %v12880_v54 = vrot.slane %v7400_v20, 2 }
 0x185   : > { %v2032_v2 = vadd.f32 %v1996_v18, %v1940_v16  ;;  %12872 = vst [vmem:[#allocation126_spill] sm:$0xff] %v7443_v46  ;;  %v12875_v8 = vrot.slane %v12874_v60, 2  ;;  %v12878_v16 = vrot.slane %v7236_v15, 4  ;;  %v12882_v52 = vrot.slane %v12881_v33, 2 }
 0x186   : > { %v4142_v21 = vadd.f32 %v12877_v3, %v4050_v35  ;;  %v7472_v3 = vmul.f32 %v12753_v14, %v6784_v55  ;;  %v12902_v28 = vrot.slane %v12901_v36, 6  ;;  %v7539_v14 = vld [vmem:[%s11672_s5] ss:$0 sm:$0xff] }
 0x187   : > { %v2088_v1 = vsel %vm1711_vm4, %v12875_v8, %v12873_v32  ;;  %v3222_v18 = vadd.f32 %v12878_v16, %v3130_v34  ;;  %v2180_v60 = vsel %vm1711_vm4, %v12882_v52, %v12880_v54  ;;  %v7468_v32 = vmul.f32 %v12656_v48, %v6757_v61  ;;  %v12889_v54 = vld [vmem:[#allocation120_spill] sm:$0xff]  ;;  %12915 = vst [vmem:[#allocation180_spill] sm:$0xff] %v7539_v14 }
 0x188   : > { %v2124_v58 = vadd.f32 %v2088_v1, %v2032_v2  ;;  %12884 = vst [vmem:[#allocation114_spill] sm:$0xff] %v7472_v3  ;;  %v7476_v2 = vmul.f32 %v12755_v62, %v6961_v13  ;;  %v12886_v1 = vld [vmem:[#allocation124_spill] sm:$0xff]  ;;  %v12888_v8 = vrot.slane %v7292_v45, 4  ;;  %v12890_v20 = vrot.slane %v12889_v54, 2 }
 0x189   : > { %12883 = vst [vmem:[#allocation109_spill] sm:$0xff] %v7468_v32  ;;  %v12887_v35 = vrot.slane %v12886_v1, 6  ;;  %v7490_v62 = vmul.f32 %v12678_v38, %v7244_v56  ;;  %v12892_v1 = vld [vmem:[#allocation77_spill] sm:$0xff]  ;;  %v7543_v48 = vmul.f32 %v12815_v29, %v7244_v56  ;;  %v12917_v38 = vld [vmem:[#allocation10_spill] sm:$0xff]  ;;  %v12926_v29 = vrot.slane %v7459_v40, 3  ;;  %v7600_v40 = vld [vmem:[#allocation4 + $0x40] sm:$0xff] }
 0x18a   : > { %12885 = vst [vmem:[#allocation115_spill] sm:$0xff] %v7476_v2  ;;  %v3314_v33 = vadd.f32 %v12888_v8, %v3222_v18  ;;  %v2216_v16 = vadd.f32 %v2180_v60, %v2124_v58  ;;  %v2272_v63 = vsel %vm1711_vm4, %v12890_v20, %v11959_v9  ;;  %v7498_v18 = vmul.f32 %v12768_v7, %v6800_v23  ;;  %v12895_v58 = vld [vmem:[#allocation85_spill] sm:$0xff]  ;;  %v12899_v20 = vld [vmem:[#allocation79_spill] sm:$0xff] }
 0x18b   : > { %v4234_v34 = vadd.f32 %v12887_v35, %v4142_v21  ;;  %12891 = vst [vmem:[#allocation118_spill] sm:$0xff] %v7490_v62  ;;  %v7494_v21 = vmul.f32 %v12892_v1, %v6768_v41  ;;  %v12896_v60 = vrot.slane %v12895_v58, 6  ;;  %v12897_v8 = vld [vmem:[#allocation133_spill] sm:$0xff]  ;;  %v7506_v9 = vmul.f32 %v12899_v20, %v6757_v61  ;;  %v12909_v7 = vld [vmem:[#allocation83_spill] sm:$0xff]  ;;  %12916 = vst [vmem:[#allocation181_spill] sm:$0xff] %v7543_v48 }
 0x18c   : > { %12894 = vst [vmem:[#allocation120_spill] sm:$0xff] %v7498_v18  ;;  %v12898_v52 = vrot.slane %v12897_v8, 5  ;;  %v2308_v24 = vadd.f32 %v2272_v63, %v2216_v16  ;;  %v7527_v36 = vmul.f32 %v12909_v7, %v6961_v13  ;;  %v12925_v7 = vrot.slane %v7310_v39, 5 }
 0x18d   : > { %12893 = vst [vmem:[#allocation119_spill] sm:$0xff] %v7494_v21  ;;  %v4326_v35 = vadd.f32 %v12896_v60, %v4234_v34  ;;  %12900 = vst [vmem:[#allocation177_spill] sm:$0xff] %v7506_v9  ;;  %v12903_v34 = vld [vmem:[#allocation135_spill] sm:$0xff] }
 0x18e   : > { %v3407_v54 = vadd.f32 %v12898_v52, %v3314_v33  ;;  %v12904_v60 = vrot.slane %v12903_v34, 5  ;;  %v12905_v33 = vld [vmem:[#allocation130_spill] sm:$0xff]  ;;  %v12907_v52 = vld [vmem:[#allocation80_spill] sm:$0xff]  ;;  %12910 = vst [vmem:[#allocation179_spill] sm:$0xff] %v7527_v36 }
 0x18f   : > { %v4418_v58 = vadd.f32 %v12902_v28, %v4326_v35  ;;  %v12906_v63 = vrot.slane %v12905_v33, 3  ;;  %v7520_v20 = vmul.f32 %v12907_v52, %v6784_v55  ;;  %v12911_v28 = vld [vmem:[#allocation86_spill] sm:$0xff]  ;;  %v12923_v52 = vld [vmem:[#allocation37_spill] sm:$0xff] }
 0x190   : > { %v3499_v8 = vadd.f32 %v12904_v60, %v3407_v54  ;;  %v12912_v35 = vrot.slane %v12911_v28, 6  ;;  %v12913_v60 = vrot.slane %v7296_v12, 5  ;;  %v7583_v12 = vmul.f32 %v12601_v19, %v6961_v13 }
 0x191   : > { %v2360_v16 = vadd.f32 %v12906_v63, %v2308_v24  ;;  %12908 = vst [vmem:[#allocation178_spill] sm:$0xff] %v7520_v20  ;;  %v12914_v63 = vrot.slane %v7443_v46, 3  ;;  %v12924_v46 = vrot.slane %v12923_v52, 6 }
 0x192   : > { %v4510_v54 = vadd.f32 %v12912_v35, %v4418_v58  ;;  %v3591_v24 = vadd.f32 %v12913_v60, %v3499_v8  ;;  %v7547_v58 = vmul.f32 %v12917_v38, %v6768_v41  ;;  %v7551_v8 = vmul.f32 %v12816_v25, %v6800_v23  ;;  %v12921_v35 = vld [vmem:[#allocation35_spill] sm:$0xff]  ;;  %12934 = vst [vmem:[#allocation184_spill] sm:$0xff] %v7583_v12  ;;  %v12964_v12 = vld [vmem:[#allocation89_spill] sm:$0xff] }
 0x193   : > { %v2412_v33 = vadd.f32 %v12914_v63, %v2360_v16  ;;  %v12920_v16 = vld [vmem:[#allocation103_spill] sm:$0xff]  ;;  %v12922_v60 = vrot.slane %v12921_v35, 1  ;;  %v7566_v25 = vmul.f32 %v12824_v44, %v6757_v61  ;;  %v12929_v35 = vld [vmem:[#allocation61_spill] sm:$0xff] }
 0x194   : > { %12918 = vst [vmem:[#allocation182_spill] sm:$0xff] %v7547_v58  ;;  %12919 = vst [vmem:[#allocation183_spill] sm:$0xff] %v7551_v8  ;;  %v4602_v28 = vadd.f32 %v12924_v46, %v4510_v54  ;;  %v3683_v34 = vadd.f32 %v12925_v7, %v3591_v24  ;;  %v12930_v46 = vrot.slane %v12929_v35, 1  ;;  %v12933_v24 = vrot.slane %v7468_v32, 3 }
 0x195   : > { %v1202_v63 = vadd.f32 %v12922_v60, %v12920_v16  ;;  %v2464_v6 = vadd.f32 %v12926_v29, %v2412_v33  ;;  %12927 = vst [vmem:[#allocation103_spill] sm:$0xff] %v7566_v25  ;;  %v7570_v16 = vmul.f32 %v12594_v47, %v6784_v55  ;;  %v12932_v29 = vrot.slane %v7314_v51, 5 }
 0x196   : > { %v7575_v7 = vadd.f32 %v7539_v14, %v4602_v28 }
 0x197   : > { %12928 = vst [vmem:[#allocation35_spill] sm:$0xff] %v7570_v16  ;;  %v1294_v54 = vadd.f32 %v12930_v46, %v1202_v63  ;;  %v3775_v33 = vadd.f32 %v12932_v29, %v3683_v34  ;;  %v2516_v60 = vadd.f32 %v12933_v24, %v2464_v6  ;;  %v12935_v63 = vld [vmem:[#allocation65_spill] sm:$0xff]  ;;  %v12937_v34 = vrot.slane %v7336_v4, 5 }
 0x198   : > { %12931 = vst [vmem:[#allocation61_spill] sm:$0xff] %v7575_v7  ;;  %v12936_v46 = vrot.slane %v12935_v63, 1  ;;  %v4642_v52 = vsel %vm4641_vm5, %v7575_v7, 0.0  ;;  %v4708_v6 = vmul.f32 %v7575_v7, %v7575_v7  ;;  %v12938_v24 = vrot.slane %v7472_v3, 3 }
 0x199   : > { %v3867_v29 = vadd.f32 %v12937_v34, %v3775_v33  ;;  %4643 = vadd.xlane.f32.xlu0 %v4642_v52  ;;  %v12940_v33 = vld [vmem:[#allocation62_spill] sm:$0xff]  ;;  %v12942_v7 = vrot.slane %v7357_v42, 5  ;;  %v12944_v52 = vld [vmem:[#allocation17_spill] sm:$0xff] }
 0x19a   : > { %v1386_v28 = vadd.f32 %v12936_v46, %v1294_v54  ;;  %v2568_v32 = vadd.f32 %v12938_v24, %v2516_v60  ;;  %v7606_v46 = vmul.f32 %v12615_v53, %v7244_v56  ;;  %v12941_v34 = vrot.slane %v12940_v33, 1  ;;  %v12947_v53 = vld [vmem:[#allocation66_spill] sm:$0xff] }
 0x19b   : > { %v3959_v3 = vadd.f32 %v12942_v7, %v3867_v29  ;;  %v12943_v60 = vrot.slane %v7476_v2, 3  ;;  %v7617_v63 = vmul.f32 %v12944_v52, %v6768_v41  ;;  %v7621_v54 = vmul.f32 %v12847_v22, %v6800_v23 }
 0x19c   : > { %12939 = vst [vmem:[#allocation65_spill] sm:$0xff] %v7606_v46  ;;  %v1478_v35 = vadd.f32 %v12941_v34, %v1386_v28  ;;  %v12948_v47 = vrot.slane %v12947_v53, 1  ;;  %v12949_v28 = vld [vmem:[#allocation76_spill] sm:$0xff]  ;;  %v2783_v7 = vmul.f32 %v12892_v1, %v7600_v40  ;;  %v4724_v19 = vsel %vm4641_vm5, %v4708_v6, 0.0 }
 0x19d   : > { %v2620_v24 = vadd.f32 %v12943_v60, %v2568_v32  ;;  %12945 = vst [vmem:[#allocation62_spill] sm:$0xff] %v7617_v63  ;;  %12946 = vst [vmem:[#allocation185_spill] sm:$0xff] %v7621_v54  ;;  %v2691_v34 = vmul.f32 %v12949_v28, %v7598_v57  ;;  %v12950_v32 = vld [vmem:[#allocation136_spill] sm:$0xff]  ;;  %v12952_v2 = vrot.slane %v7490_v62, 3  ;;  %v7636_v22 = vmul.f32 %v12610_v27, %v6757_v61  ;;  %v12961_v27 = vld [vmem:[#allocation158_spill] sm:$0xff] }
 0x19e   : > { %v1570_v33 = vadd.f32 %v12948_v47, %v1478_v35  ;;  %v12951_v29 = vrot.slane %v12950_v32, 6  ;;  %4725 = vadd.xlane.f32.xlu0 %v4724_v19  ;;  %v7640_v47 = vmul.f32 %v12606_v59, %v6784_v55  ;;  %v7644_v53 = vmul.f32 %v12612_v0, %v6961_v13  ;;  %v12957_v35 = vld [vmem:[#allocation174_spill] sm:$0xff]  ;;  %v12975_v0 = vld [vmem:[#allocation31_spill] sm:$0xff] }
 0x19f   : > { %v2672_v44 = vadd.f32 %v12952_v2, %v2620_v24  ;;  %12953 = vst [vmem:[#allocation66_spill] sm:$0xff] %v7636_v22  ;;  %v12958_v6 = vrot.slane %v12957_v35, 1  ;;  %v12959_v24 = vld [vmem:[#allocation142_spill] sm:$0xff]  ;;  %v12962_v19 = vrot.slane %v12961_v27, 4  ;;  %v7659_v32 = vmul.f32 %v12892_v1, %v7598_v57 }
 0x1a0   : > { %v4052_v60 = vadd.f32 %v12951_v29, %v3959_v3  ;;  %12954 = vst [vmem:[#allocation186_spill] sm:$0xff] %v7640_v47  ;;  %12955 = vst [vmem:[#allocation187_spill] sm:$0xff] %v7644_v53  ;;  %v7648_v3 = vmul.f32 %v12619_v37, %v7244_v56  ;;  %v12960_v29 = vrot.slane %v12959_v24, 6  ;;  %v12965_v37 = vrot.slane %v12964_v12, 2 }
 0x1a1   : > { %v1662_v2 = vadd.f32 %v12958_v6, %v1570_v33  ;;  %v2764_v28 = vadd.f32 %v12962_v19, %v2672_v44  ;;  %12963 = vst [vmem:[#allocation174_spill] sm:$0xff] %v7659_v32  ;;  %v2724_v16 = vrot.slane %v2691_v34, 4  ;;  %v2816_v35 = vrot.slane %v2783_v7, 4 }
 0x1a2   : > { %12956 = vst [vmem:[#allocation188_spill] sm:$0xff] %v7648_v3  ;;  %v4144_v62 = vadd.f32 %v12960_v29, %v4052_v60  ;;  %v12966_v33 = vrot.slane %v7371_v17, 6  ;;  %v12967_v6 = vrot.slane %v7494_v21, 4  ;;  %v12974_v19 = vrot.slane %v7191_v30, 4 }
 0x1a3   : > { %v1755_v52 = vadd.f32 %v12965_v37, %v1662_v2  ;;  %v12968_v37 = vld [vmem:[#allocation90_spill] sm:$0xff]  ;;  %v12970_v2 = vrot.slane %v7375_v31, 6  ;;  %v12976_v12 = vrot.slane %v12975_v0, 2  ;;  %v12981_v30 = vrot.slane %v7195_v50, 4 }
 0x1a4   : > { %v4236_v60 = vadd.f32 %v12966_v33, %v4144_v62  ;;  %v2856_v44 = vadd.f32 %v12967_v6, %v2764_v28  ;;  %v12969_v34 = vrot.slane %v12968_v37, 2  ;;  %v12971_v62 = vrot.slane %v7498_v18, 4  ;;  %v12972_v6 = vld [vmem:[#allocation127_spill] sm:$0xff] }
 0x1a5   : > { %v12973_v29 = vrot.slane %v12972_v6, 4  ;;  %v12982_v0 = vrot.slane %v7388_v11, 6  ;;  %v12989_v50 = vrot.slane %v7236_v15, 4  ;;  %v12998_v15 = vrot.slane %v7408_v26, 6  ;;  %v13005_v28 = vld [vmem:[#allocation87_spill] sm:$0xff] }
 0x1a6   : > { %v1847_v7 = vadd.f32 %v12969_v34, %v1755_v52  ;;  %v4328_v27 = vadd.f32 %v12970_v2, %v4236_v60  ;;  %v2948_v33 = vadd.f32 %v12971_v62, %v2856_v44  ;;  %v12977_v52 = vrot.slane %v12845_v49, 4  ;;  %v12979_v34 = vld [vmem:[#allocation128_spill] sm:$0xff]  ;;  %v12987_v62 = vld [vmem:[#allocation131_spill] sm:$0xff] }
 0x1a7   : > { %v7685_v59 = vsel %vm506_vm0, %v12974_v19, %v12973_v29  ;;  %v12978_v60 = vrot.slane %v12850_v5, 4  ;;  %v12980_v2 = vrot.slane %v12979_v34, 4  ;;  %v12983_v49 = vrot.slane %v7506_v9, 4  ;;  %v7782_v18 = vld [vmem:[#allocation4 + $0xe0] sm:$0xff] }
 0x1a8   : > { %v1939_v21 = vadd.f32 %v12976_v12, %v1847_v7  ;;  %v7692_v37 = vsel %vm506_vm0, %v12977_v52, %v2724_v16  ;;  %v4420_v19 = vadd.f32 %v12982_v0, %v4328_v27  ;;  %v12984_v16 = vld [vmem:[#allocation129_spill] sm:$0xff]  ;;  %v12986_v5 = vrot.slane %v7207_v10, 4  ;;  %v12996_v0 = vld [vmem:[#allocation36_spill] sm:$0xff]  ;;  %13020 = vst [vmem:[#allocation128_spill] sm:$0xff] %v7782_v18 }
 0x1a9   : > { %v7697_v44 = vsel %vm506_vm0, %v12978_v60, %v2816_v35  ;;  %v7704_v29 = vsel %vm506_vm0, %v12981_v30, %v12980_v2  ;;  %v3040_v12 = vadd.f32 %v12983_v49, %v2948_v33  ;;  %v12985_v7 = vrot.slane %v12984_v16, 4  ;;  %v12990_v60 = vld [vmem:[#allocation34_spill] sm:$0xff]  ;;  %v12992_v2 = vld [vmem:[#allocation29_spill] sm:$0xff] }
 0x1aa   : > { %v12988_v6 = vrot.slane %v12987_v62, 4  ;;  %v12991_v34 = vrot.slane %v12990_v60, 2  ;;  %v7728_v33 = vmul.f32 %v12992_v2, %v6768_v41  ;;  %v12994_v30 = vld [vmem:[#allocation33_spill] sm:$0xff]  ;;  %v7736_v49 = vmul.f32 %v12996_v0, %v6757_v61  ;;  %v13003_v60 = vld [vmem:[#allocation38_spill] sm:$0xff] }
 0x1ab   : > { %v7715_v35 = vsel %vm506_vm0, %v12986_v5, %v12985_v7  ;;  %v7732_v10 = vmul.f32 %v12994_v30, %v6800_v23  ;;  %v4512_v16 = vadd.f32 %v12998_v15, %v4420_v19  ;;  %v12999_v7 = vrot.slane %v7520_v20, 4  ;;  %v13000_v62 = vld [vmem:[#allocation145_spill] sm:$0xff]  ;;  %v13015_v20 = vld [vmem:[#allocation150_spill] sm:$0xff] }
 0x1ac   : > { %v7722_v52 = vsel %vm506_vm0, %v12989_v50, %v12988_v6  ;;  %v2031_v27 = vadd.f32 %v12991_v34, %v1939_v21  ;;  %12993 = vst [vmem:[#allocation142_spill] sm:$0xff] %v7728_v33  ;;  %12997 = vst [vmem:[#allocation90_spill] sm:$0xff] %v7736_v49  ;;  %v13001_v21 = vrot.slane %v13000_v62, 4  ;;  %v13002_v6 = vrot.slane %v7292_v45, 4 }
 0x1ad   : > { %12995 = vst [vmem:[#allocation89_spill] sm:$0xff] %v7732_v10  ;;  %v3132_v5 = vadd.f32 %v12999_v7, %v3040_v12  ;;  %v7751_v34 = vmul.f32 %v13003_v60, %v6784_v55  ;;  %v13006_v0 = vrot.slane %v13005_v28, 2  ;;  %v13007_v12 = vld [vmem:[#allocation41_spill] sm:$0xff]  ;;  %v13009_v45 = vrot.slane %v7412_v43, 6 }
 0x1ae   : > { %v7747_v50 = vsel %vm506_vm0, %v13002_v6, %v13001_v21  ;;  %v7759_v15 = vmul.f32 %v13007_v12, %v6961_v13  ;;  %v13010_v62 = vrot.slane %v7527_v36, 4  ;;  %v13011_v6 = vld [vmem:[#allocation9_spill] sm:$0xff]  ;;  %v3428_v28 = vmul.f32 %v12917_v38, %v7600_v40 }
 0x1af   : > { %13004 = vst [vmem:[#allocation127_spill] sm:$0xff] %v7751_v34  ;;  %v2123_v30 = vadd.f32 %v13006_v0, %v2031_v27  ;;  %v4604_v7 = vadd.f32 %v13009_v45, %v4512_v16  ;;  %v3335_v60 = vmul.f32 %v13011_v6, %v7598_v57  ;;  %v13012_v27 = vld [vmem:[#allocation102_spill] sm:$0xff]  ;;  %v13014_v19 = vrot.slane %v7728_v33, 1  ;;  %v13018_v45 = vld [vmem:[#allocation153_spill] sm:$0xff]  ;;  %v13025_v33 = vld [vmem:[#allocation171_spill] sm:$0xff] }
 0x1b0   : > { %13008 = vst [vmem:[#allocation31_spill] sm:$0xff] %v7759_v15  ;;  %v3224_v21 = vadd.f32 %v13010_v62, %v3132_v5  ;;  %v13013_v0 = vrot.slane %v13012_v27, 2  ;;  %v13016_v12 = vrot.slane %v13015_v20, 1  ;;  %v13017_v16 = vrot.slane %v7732_v10, 1  ;;  %v13031_v6 = vld [vmem:[#allocation39_spill] sm:$0xff] }
 0x1b1   : > { %v13019_v36 = vrot.slane %v13018_v45, 1  ;;  %v7785_v32 = vadd.f32 %v7539_v14, %v4604_v7  ;;  %v13028_v45 = vld [vmem:[#allocation154_spill] sm:$0xff] }
 0x1b2   : > { %v2215_v2 = vadd.f32 %v13013_v0, %v2123_v30  ;;  %v1078_v9 = vsel %vm1066_vm3, %v13016_v12, %v13014_v19  ;;  %v13022_v30 = vrot.slane %v7543_v48, 4  ;;  %v13023_v0 = vld [vmem:[#allocation132_spill] sm:$0xff]  ;;  %v13026_v19 = vrot.slane %v13025_v33, 5  ;;  %v13033_v33 = vld [vmem:[#allocation159_spill] sm:$0xff] }
 0x1b3   : > { %v1170_v5 = vsel %vm1066_vm3, %v13019_v36, %v13017_v16  ;;  %13021 = vst [vmem:[#allocation129_spill] sm:$0xff] %v7785_v32  ;;  %v13024_v20 = vrot.slane %v13023_v0, 5  ;;  %v1113_v10 = vadd.f32 %v1078_v9, %v13028_v45  ;;  %v13029_v36 = vld [vmem:[#allocation176_spill] sm:$0xff]  ;;  %v7803_v48 = vmul.f32 %v13031_v6, %v7244_v56 }
 0x1b4   : > { %v3316_v27 = vadd.f32 %v13022_v30, %v3224_v21  ;;  %v13030_v16 = vrot.slane %v13029_v36, 2  ;;  %v4649_v21 = vsel %vm4641_vm5, %v7785_v32, 0.0  ;;  %v13034_v30 = vrot.slane %v13033_v33, 5 }
 0x1b5   : > { %v7794_v12 = vsel %vm3364_vm6, %v13026_v19, %v13024_v20  ;;  %13032 = vst [vmem:[#allocation34_spill] sm:$0xff] %v7803_v48  ;;  %v3369_v20 = vrot.slane %v3335_v60, 5  ;;  %v1205_v9 = vadd.f32 %v1170_v5, %v1113_v10  ;;  %4650 = vadd.xlane.f32.xlu1 %v4649_v21  ;;  %v13035_v19 = vld [vmem:[#allocation105_spill] sm:$0xff]  ;;  %v13037_v36 = vrot.slane %v7736_v49, 1 }
 0x1b6   : > { %13027 = vst [vmem:[#allocation131_spill] sm:$0xff] %v7794_v12  ;;  %v2307_v62 = vadd.f32 %v13030_v16, %v2215_v2  ;;  %v3409_v0 = vadd.f32 %v13034_v30, %v3316_v27  ;;  %v13036_v2 = vrot.slane %v13035_v19, 3  ;;  %v13038_v16 = vld [vmem:[#allocation152_spill] sm:$0xff]  ;;  %v13042_v60 = vrot.slane %v7547_v58, 5  ;;  %v13043_v10 = vld [vmem:[#allocation137_spill] sm:$0xff]  ;;  %v13046_v30 = vld [vmem:[#allocation134_spill] sm:$0xff] }
 0x1b7   : > { %v13039_v7 = vrot.slane %v13038_v16, 1  ;;  %v13040_v12 = vld [vmem:[#allocation40_spill] sm:$0xff]  ;;  %v13044_v5 = vrot.slane %v13043_v10, 5  ;;  %v13045_v21 = vrot.slane %v7310_v39, 5  ;;  %v13047_v19 = vrot.slane %v13046_v30, 5  ;;  %v13197_v58 = vld [vmem:[#allocation82_spill] sm:$0xff] }
 0x1b8   : > { %v2359_v45 = vadd.f32 %v13036_v2, %v2307_v62  ;;  %v7819_v14 = vmul.f32 %v13040_v12, %v7782_v18  ;;  %v3501_v27 = vadd.f32 %v13042_v60, %v3409_v0  ;;  %v13049_v16 = vld [vmem:[#allocation112_spill] sm:$0xff]  ;;  %v13051_v0 = vrot.slane %v7751_v34, 1  ;;  %v13052_v60 = vld [vmem:[#allocation155_spill] sm:$0xff] }
 0x1b9   : > { %v1262_v38 = vsel %vm1066_vm3, %v13039_v7, %v13037_v36  ;;  %v7828_v62 = vsel %vm3364_vm6, %v13045_v21, %v13044_v5  ;;  %v13048_v7 = vrot.slane %v7314_v51, 5  ;;  %v13050_v6 = vrot.slane %v13049_v16, 3  ;;  %v13055_v21 = vld [vmem:[#allocation163_spill] sm:$0xff] }
 0x1ba   : > { %13041 = vst [vmem:[#allocation145_spill] sm:$0xff] %v7819_v14  ;;  %v1297_v36 = vadd.f32 %v1262_v38, %v1205_v9  ;;  %v13053_v10 = vrot.slane %v13052_v60, 1  ;;  %v13054_v5 = vrot.slane %v7759_v15, 1  ;;  %v13056_v12 = vrot.slane %v13055_v21, 1  ;;  %v13057_v51 = vld [vmem:[#allocation47_spill] sm:$0xff] }
 0x1bb   : > { %v7835_v2 = vsel %vm3364_vm6, %v13048_v7, %v13047_v19  ;;  %v2411_v49 = vadd.f32 %v13050_v6, %v2359_v45  ;;  %v7851_v19 = vmul.f32 %v13057_v51, %v6768_v41  ;;  %v13059_v38 = vrot.slane %v7551_v8, 5  ;;  %v13060_v45 = vld [vmem:[#allocation139_spill] sm:$0xff] }
 0x1bc   : > { %v1354_v39 = vsel %vm1066_vm3, %v13053_v10, %v13051_v0  ;;  %v1446_v30 = vsel %vm1066_vm3, %v13056_v12, %v13054_v5  ;;  %v3461_v6 = vrot.slane %v3428_v28, 5  ;;  %v13061_v7 = vrot.slane %v13060_v45, 5  ;;  %v13063_v10 = vld [vmem:[#allocation92_spill] sm:$0xff]  ;;  %v13066_v5 = vld [vmem:[#allocation166_spill] sm:$0xff] }
 0x1bd   : > { %13058 = vst [vmem:[#allocation87_spill] sm:$0xff] %v7851_v19  ;;  %v3593_v9 = vadd.f32 %v13059_v38, %v3501_v27  ;;  %v13062_v16 = vrot.slane %v7336_v4, 5  ;;  %v1389_v60 = vadd.f32 %v1354_v39, %v1297_v36  ;;  %v13064_v21 = vrot.slane %v13063_v10, 3  ;;  %v13068_v28 = vld [vmem:[#allocation50_spill] sm:$0xff] }
 0x1be   : > { %v13065_v12 = vrot.slane %v7803_v48, 1  ;;  %v13067_v41 = vrot.slane %v13066_v5, 1  ;;  %v7872_v38 = vmul.f32 %v13068_v28, %v6800_v23  ;;  %v13070_v4 = vrot.slane %v7566_v25, 5  ;;  %v13089_v25 = vld [vmem:[#allocation161_spill] sm:$0xff] }
 0x1bf   : > { %v7860_v0 = vsel %vm3364_vm6, %v13062_v16, %v13061_v7  ;;  %v2463_v15 = vadd.f32 %v13064_v21, %v2411_v49  ;;  %v13071_v7 = vld [vmem:[#allocation133_spill] sm:$0xff]  ;;  %v13073_v49 = vld [vmem:[#allocation16_spill] sm:$0xff]  ;;  %v1481_v10 = vadd.f32 %v1446_v30, %v1389_v60  ;;  %v13078_v48 = vrot.slane %v7357_v42, 5  ;;  %v13083_v30 = vld [vmem:[#allocation135_spill] sm:$0xff] }
 0x1c0   : > { %v1538_v34 = vsel %vm1066_vm3, %v13067_v41, %v13065_v12  ;;  %13069 = vst [vmem:[#allocation102_spill] sm:$0xff] %v7872_v38  ;;  %v3685_v45 = vadd.f32 %v13070_v4, %v3593_v9  ;;  %v13072_v36 = vrot.slane %v13071_v7, 5  ;;  %v3980_v16 = vmul.f32 %v13073_v49, %v7598_v57  ;;  %v13074_v21 = vld [vmem:[#allocation32_spill] sm:$0xff]  ;;  %v13076_v41 = vld [vmem:[#allocation149_spill] sm:$0xff]  ;;  %v13081_v7 = vld [vmem:[#allocation35_spill] sm:$0xff] }
 0x1c1   : > { %v13075_v12 = vrot.slane %v13074_v21, 3  ;;  %v13077_v27 = vrot.slane %v13076_v41, 5  ;;  %v13079_v4 = vld [vmem:[#allocation52_spill] sm:$0xff]  ;;  %v13084_v60 = vrot.slane %v13083_v30, 5  ;;  %v13085_v21 = vld [vmem:[#allocation17_spill] sm:$0xff]  ;;  %v13088_v9 = vrot.slane %v7819_v14, 1 }
 0x1c2   : > { %v7879_v39 = vsel %vm3364_vm6, %v13072_v36, %v3369_v20  ;;  %v7895_v20 = vmul.f32 %v13079_v4, %v6757_v61  ;;  %v13082_v36 = vrot.slane %v13081_v7, 5  ;;  %v4073_v42 = vmul.f32 %v13085_v21, %v7600_v40  ;;  %v13099_v14 = vld [vmem:[#allocation140_spill] sm:$0xff] }
 0x1c3   : > { %v2515_v5 = vadd.f32 %v13075_v12, %v2463_v15  ;;  %v7890_v28 = vsel %vm3364_vm6, %v13078_v48, %v13077_v27  ;;  %v7902_v15 = vsel %vm3364_vm6, %v13084_v60, %v3461_v6  ;;  %v1573_v12 = vadd.f32 %v1538_v34, %v1481_v10  ;;  %v13086_v48 = vld [vmem:[#allocation93_spill] sm:$0xff]  ;;  %v13093_v6 = vld [vmem:[#allocation184_spill] sm:$0xff]  ;;  %v13095_v10 = vld [vmem:[#allocation58_spill] sm:$0xff] }
 0x1c4   : > { %13080 = vst [vmem:[#allocation150_spill] sm:$0xff] %v7895_v20  ;;  %v3777_v51 = vadd.f32 %v13082_v36, %v3685_v45  ;;  %v13087_v27 = vrot.slane %v13086_v48, 3  ;;  %v13090_v61 = vrot.slane %v13089_v25, 1  ;;  %v13091_v36 = vld [vmem:[#allocation53_spill] sm:$0xff]  ;;  %v13094_v60 = vrot.slane %v13093_v6, 5  ;;  %v13097_v48 = vld [vmem:[#allocation51_spill] sm:$0xff] }
 0x1c5   : > { %v7916_v30 = vmul.f32 %v13091_v36, %v6784_v55  ;;  %v4014_v8 = vrot.slane %v3980_v16, 6  ;;  %v13102_v55 = vrot.slane %v7851_v19, 2  ;;  %v13103_v36 = vld [vmem:[#allocation156_spill] sm:$0xff] }
 0x1c6   : > { %v2567_v41 = vadd.f32 %v13087_v27, %v2515_v5  ;;  %v1630_v4 = vsel %vm1066_vm3, %v13090_v61, %v13088_v9  ;;  %v3869_v7 = vadd.f32 %v13094_v60, %v3777_v51  ;;  %v7922_v5 = vmul.f32 %v13095_v10, %v6961_v13  ;;  %v13196_v6 = vld [vmem:[#allocation104_spill] sm:$0xff] }
 0x1c7   : > { %13092 = vst [vmem:[#allocation153_spill] sm:$0xff] %v7916_v30  ;;  %v1665_v34 = vadd.f32 %v1630_v4, %v1573_v12  ;;  %v13098_v27 = vrot.slane %v13097_v48, 3  ;;  %v13100_v9 = vrot.slane %v13099_v14, 6  ;;  %v13101_v61 = vrot.slane %v7371_v17, 6 }
 0x1c8   : > { %13096 = vst [vmem:[#allocation132_spill] sm:$0xff] %v7922_v5  ;;  %v13104_v51 = vrot.slane %v13103_v36, 2  ;;  %v13105_v12 = vrot.slane %v7606_v46, 5  ;;  %v4106_v48 = vrot.slane %v4073_v42, 6  ;;  %v13108_v14 = vrot.slane %v7375_v31, 6  ;;  %v13114_v42 = vld [vmem:[#allocation54_spill] sm:$0xff] }
 0x1c9   : > { %v2619_v25 = vadd.f32 %v13098_v27, %v2567_v41  ;;  %v7931_v45 = vsel %vm4009_vm7, %v13101_v61, %v13100_v9  ;;  %v13106_v41 = vld [vmem:[#allocation146_spill] sm:$0xff]  ;;  %v13111_v36 = vrot.slane %v7872_v38, 2  ;;  %v13116_v31 = vld [vmem:[#allocation45_spill] sm:$0xff]  ;;  %v13124_v38 = vrot.slane %v7388_v11, 6  ;;  %v13132_v11 = vld [vmem:[#allocation151_spill] sm:$0xff] }
 0x1ca   : > { %v1723_v16 = vsel %vm1711_vm4, %v13104_v51, %v13102_v55  ;;  %v3961_v60 = vadd.f32 %v13105_v12, %v3869_v7  ;;  %v13107_v27 = vrot.slane %v13106_v41, 6  ;;  %v13109_v61 = vld [vmem:[#allocation94_spill] sm:$0xff]  ;;  %v13112_v55 = vld [vmem:[#allocation164_spill] sm:$0xff]  ;;  %v7958_v12 = vmul.f32 %v13114_v42, %v7244_v56 }
 0x1cb   : > { %v1758_v9 = vadd.f32 %v1723_v16, %v1665_v34  ;;  %v13110_v19 = vrot.slane %v13109_v61, 3  ;;  %v13113_v51 = vrot.slane %v13112_v55, 2  ;;  %v13117_v41 = vrot.slane %v13116_v31, 6  ;;  %v13120_v61 = vld [vmem:[#allocation136_spill] sm:$0xff]  ;;  %v13207_v42 = vld [vmem:[#allocation14_spill] sm:$0xff] }
 0x1cc   : > { %v7946_v17 = vsel %vm4009_vm7, %v13108_v14, %v13107_v27  ;;  %13115 = vst [vmem:[#allocation171_spill] sm:$0xff] %v7958_v12 }
 0x1cd   : > { %v2671_v10 = vadd.f32 %v13110_v19, %v2619_v25  ;;  %v1815_v4 = vsel %vm1711_vm4, %v13113_v51, %v13111_v36  ;;  %v4054_v27 = vadd.f32 %v13117_v41, %v3961_v60  ;;  %v13118_v19 = vld [vmem:[#allocation59_spill] sm:$0xff]  ;;  %v13121_v36 = vrot.slane %v13120_v61, 6 }
 0x1ce   : > { %v1850_v14 = vadd.f32 %v1815_v4, %v1758_v9  ;;  %v7965_v25 = vmul.f32 %v13118_v19, %v7782_v18  ;;  %v13122_v51 = vld [vmem:[#allocation143_spill] sm:$0xff]  ;;  %v13125_v4 = vrot.slane %v7895_v20, 2  ;;  %v13155_v20 = vrot.slane %v7958_v12, 2 }
 0x1cf   : > { %v2763_v16 = vadd.f32 %v7692_v37, %v2671_v10  ;;  %v7971_v55 = vsel %vm4009_vm7, %v13121_v36, %v4014_v8  ;;  %v13123_v7 = vrot.slane %v13122_v51, 6  ;;  %v13126_v9 = vld [vmem:[#allocation167_spill] sm:$0xff]  ;;  %v13128_v37 = vrot.slane %v7617_v63, 6 }
 0x1d0   : > { %13119 = vst [vmem:[#allocation154_spill] sm:$0xff] %v7965_v25  ;;  %v13127_v41 = vrot.slane %v13126_v9, 2  ;;  %v13129_v61 = vld [vmem:[#allocation147_spill] sm:$0xff]  ;;  %v13131_v8 = vrot.slane %v7408_v26, 6  ;;  %v13133_v51 = vrot.slane %v13132_v11, 6 }
 0x1d1   : > { %v7978_v60 = vsel %vm4009_vm7, %v13124_v38, %v13123_v7  ;;  %v4146_v10 = vadd.f32 %v13128_v37, %v4054_v27  ;;  %v13130_v19 = vrot.slane %v13129_v61, 6  ;;  %v13134_v38 = vrot.slane %v7412_v43, 6  ;;  %v13136_v37 = vld [vmem:[#allocation168_spill] sm:$0xff]  ;;  %v13153_v61 = vld [vmem:[#allocation71_spill] sm:$0xff] }
 0x1d2   : > { %v1907_v34 = vsel %vm1711_vm4, %v13127_v41, %v13125_v4  ;;  %v4710_v4 = vmul.f32 %v7785_v32, %v7785_v32  ;;  %v2855_v27 = vadd.f32 %v7697_v44, %v2763_v16  ;;  %v13135_v41 = vrot.slane %v7916_v30, 2  ;;  %v8019_v32 = vld [vmem:[#allocation4 + $0x50] sm:$0xff]  ;;  %v8042_v44 = vld [vmem:[#allocation4 + $0x98] sm:$0xff] }
 0x1d3   : > { %v7992_v36 = vsel %vm4009_vm7, %v13131_v8, %v13130_v19  ;;  %v7999_v7 = vsel %vm4009_vm7, %v13134_v38, %v13133_v51  ;;  %v1942_v9 = vadd.f32 %v1907_v34, %v1850_v14  ;;  %v13137_v26 = vrot.slane %v13136_v37, 2  ;;  %v13140_v14 = vld [vmem:[#allocation55_spill] sm:$0xff]  ;;  %13142 = vst [vmem:[#allocation176_spill] sm:$0xff] %v8019_v32  ;;  %13152 = vst [vmem:[#allocation112_spill] sm:$0xff] %v8042_v44 }
 0x1d4   : > { %v13138_v8 = vrot.slane %v7621_v54, 6  ;;  %v13139_v51 = vrot.slane %v7922_v5, 2  ;;  %v13141_v34 = vrot.slane %v13140_v14, 2  ;;  %v2947_v16 = vadd.f32 %v7685_v59, %v2855_v27  ;;  %v13143_v37 = vld [vmem:[#allocation67_spill] sm:$0xff] }
 0x1d5   : > { %v1999_v19 = vsel %vm1711_vm4, %v13137_v26, %v13135_v41  ;;  %v8023_v41 = vmul.f32 %v8019_v32, %v13143_v37  ;;  %v13145_v26 = vld [vmem:[#allocation69_spill] sm:$0xff]  ;;  %v13151_v59 = vrot.slane %v12959_v24, 6  ;;  %v4730_v5 = vsel %vm4641_vm5, %v4710_v4, 0.0  ;;  %v13200_v37 = vld [vmem:[#allocation12_spill] sm:$0xff] }
 0x1d6   : > { %v4238_v43 = vadd.f32 %v13138_v8, %v4146_v10  ;;  %v2034_v11 = vadd.f32 %v1999_v19, %v1942_v9  ;;  %v2091_v38 = vsel %vm1711_vm4, %v13141_v34, %v13139_v51  ;;  %v8027_v10 = vmul.f32 %v13145_v26, %v6800_v23  ;;  %v8029_v9 = vld [vmem:[#allocation4 + $0x80] sm:$0xff]  ;;  %v13148_v19 = vld [vmem:[#allocation70_spill] sm:$0xff]  ;;  %v13162_v26 = vld [vmem:[#allocation169_spill] sm:$0xff] }
 0x1d7   : > { %13144 = vst [vmem:[#allocation105_spill] sm:$0xff] %v8023_v41  ;;  %13147 = vst [vmem:[#allocation137_spill] sm:$0xff] %v8029_v9  ;;  %v8033_v8 = vmul.f32 %v8029_v9, %v13148_v19  ;;  %v13150_v51 = vrot.slane %v7636_v22, 6  ;;  %v8040_v27 = vsel %vm4009_vm7, %v13151_v59, %v4106_v48  ;;  %v8046_v23 = vmul.f32 %v8042_v44, %v13153_v61  ;;  %v13156_v19 = vld [vmem:[#allocation172_spill] sm:$0xff]  ;;  %v13188_v22 = vld [vmem:[#allocation9_spill] sm:$0xff] }
 0x1d8   : > { %13146 = vst [vmem:[#allocation152_spill] sm:$0xff] %v8027_v10  ;;  %v2126_v34 = vadd.f32 %v2091_v38, %v2034_v11  ;;  %v3039_v30 = vadd.f32 %v7704_v29, %v2947_v16  ;;  %v13158_v48 = vld [vmem:[#allocation72_spill] sm:$0xff]  ;;  %v13160_v11 = vrot.slane %v7640_v47, 6  ;;  %v13161_v61 = vrot.slane %v7965_v25, 2  ;;  %v13164_v16 = vld [vmem:[#allocation73_spill] sm:$0xff]  ;;  %v13177_v25 = vld [vmem:[#allocation79_spill] sm:$0xff] }
 0x1d9   : > { %13149 = vst [vmem:[#allocation134_spill] sm:$0xff] %v8033_v8  ;;  %v4330_v14 = vadd.f32 %v13150_v51, %v4238_v43  ;;  %13154 = vst [vmem:[#allocation155_spill] sm:$0xff] %v8046_v23  ;;  %v13157_v43 = vrot.slane %v13156_v19, 2  ;;  %v8057_v51 = vmul.f32 %v13158_v48, %v6961_v13  ;;  %v13163_v4 = vrot.slane %v13162_v26, 2 }
 0x1da   : > { %v8068_v12 = vmul.f32 %v13164_v16, %v7244_v56  ;;  %v13179_v16 = vld [vmem:[#allocation80_spill] sm:$0xff]  ;;  %v8130_v54 = vmul.f32 %v8019_v32, %v13188_v22  ;;  %v8161_v31 = vmul.f32 %v8042_v44, %v13200_v37 }
 0x1db   : > { %v2183_v24 = vsel %vm1711_vm4, %v13157_v43, %v13155_v20  ;;  %13159 = vst [vmem:[#allocation163_spill] sm:$0xff] %v8057_v51  ;;  %v4422_v38 = vadd.f32 %v13160_v11, %v4330_v14  ;;  %v2275_v29 = vsel %vm1711_vm4, %v13163_v4, %v13161_v61  ;;  %v3131_v20 = vadd.f32 %v7715_v35, %v3039_v30  ;;  %v13167_v61 = vld [vmem:[#allocation75_spill] sm:$0xff]  ;;  %v13169_v30 = vld [vmem:[#allocation76_spill] sm:$0xff] }
 0x1dc   : > { %v2218_v59 = vadd.f32 %v2183_v24, %v2126_v34  ;;  %13165 = vst [vmem:[#allocation139_spill] sm:$0xff] %v8068_v12  ;;  %v13166_v14 = vrot.slane %v7644_v53, 6  ;;  %v8079_v11 = vmul.f32 %v13167_v61, %v7782_v18  ;;  %v8085_v19 = vmul.f32 %v8019_v32, %v13169_v30  ;;  %v8087_v43 = vld [vmem:[#allocation4 + $0x68] sm:$0xff]  ;;  %13189 = vst [vmem:[#allocation156_spill] sm:$0xff] %v8130_v54 }
 0x1dd   : > { %v3223_v4 = vadd.f32 %v7722_v52, %v3131_v20  ;;  %13171 = vst [vmem:[#allocation133_spill] sm:$0xff] %v8087_v43  ;;  %v13175_v20 = vld [vmem:[#allocation78_spill] sm:$0xff]  ;;  %v8105_v61 = vmul.f32 %v8042_v44, %v13177_v25  ;;  %v8109_v53 = vmul.f32 %v13179_v16, %v6961_v13  ;;  %v13185_v52 = vrot.slane %v8027_v10, 3  ;;  %13201 = vst [vmem:[#allocation164_spill] sm:$0xff] %v8161_v31 }
 0x1de   : > { %v4514_v34 = vadd.f32 %v13166_v14, %v4422_v38  ;;  %v2310_v24 = vadd.f32 %v2275_v29, %v2218_v59  ;;  %13168 = vst [vmem:[#allocation92_spill] sm:$0xff] %v8079_v11  ;;  %13170 = vst [vmem:[#allocation166_spill] sm:$0xff] %v8085_v19  ;;  %v8091_v38 = vmul.f32 %v8087_v43, %v12892_v1  ;;  %v13173_v59 = vrot.slane %v7648_v3, 6  ;;  %v13191_v10 = vld [vmem:[#allocation10_spill] sm:$0xff] }
 0x1df   : > { %v13174_v14 = vrot.slane %v8023_v41, 3  ;;  %v8100_v35 = vmul.f32 %v8029_v9, %v13175_v20  ;;  %v3315_v48 = vadd.f32 %v7747_v50, %v3223_v4  ;;  %13178 = vst [vmem:[#allocation135_spill] sm:$0xff] %v8105_v61  ;;  %13180 = vst [vmem:[#allocation93_spill] sm:$0xff] %v8109_v53  ;;  %v13186_v4 = vld [vmem:[#allocation84_spill] sm:$0xff]  ;;  %v8139_v63 = vmul.f32 %v8087_v43, %v13191_v10  ;;  %v13194_v50 = vld [vmem:[#allocation11_spill] sm:$0xff] }
 0x1e0   : > { %13172 = vst [vmem:[#allocation32_spill] sm:$0xff] %v8091_v38  ;;  %v4606_v29 = vadd.f32 %v13173_v59, %v4514_v34  ;;  %v13181_v34 = vld [vmem:[#allocation83_spill] sm:$0xff]  ;;  %v8123_v3 = vmul.f32 %v13186_v4, %v7782_v18  ;;  %v8152_v46 = vmul.f32 %v8029_v9, %v13194_v50  ;;  %v8177_v1 = vmul.f32 %v13207_v42, %v7244_v56 }
 0x1e1   : > { %v2362_v26 = vadd.f32 %v13174_v14, %v2310_v24  ;;  %13176 = vst [vmem:[#allocation149_spill] sm:$0xff] %v8100_v35  ;;  %v8113_v59 = vmul.f32 %v13181_v34, %v7244_v56  ;;  %v13183_v24 = vld [vmem:[#allocation180_spill] sm:$0xff]  ;;  %v3408_v47 = vadd.f32 %v7879_v39, %v3315_v48  ;;  %13192 = vst [vmem:[#allocation146_spill] sm:$0xff] %v8139_v63  ;;  %v8141_v39 = vld [vmem:[#allocation4 + $0x10] sm:$0xff] }
 0x1e2   : > { %v8116_v14 = vadd.f32 %v13183_v24, %v4606_v29  ;;  %13187 = vst [vmem:[#allocation140_spill] sm:$0xff] %v8123_v3  ;;  %13195 = vst [vmem:[#allocation94_spill] sm:$0xff] %v8152_v46  ;;  %v13219_v46 = vld [vmem:[#allocation49_spill] sm:$0xff] }
 0x1e3   : > { %13182 = vst [vmem:[#allocation161_spill] sm:$0xff] %v8113_v59  ;;  %v2414_v41 = vadd.f32 %v13185_v52, %v2362_v26  ;;  %v13190_v26 = vrot.slane %v8033_v8, 3  ;;  %v3500_v48 = vadd.f32 %v7902_v15, %v3408_v47  ;;  %v13193_v8 = vrot.slane %v8046_v23, 3  ;;  %v13199_v47 = vld [vmem:[#allocation131_spill] sm:$0xff]  ;;  %13208 = vst [vmem:[#allocation143_spill] sm:$0xff] %v8177_v1 }
 0x1e4   : > { %13184 = vst [vmem:[#allocation51_spill] sm:$0xff] %v8116_v14  ;;  %v4655_v29 = vsel %vm4641_vm5, %v8116_v14, 0.0  ;;  %v13203_v14 = vld [vmem:[#allocation13_spill] sm:$0xff]  ;;  %v13221_v23 = vrot.slane %v8085_v19, 4 }
 0x1e5   : > { %v2466_v52 = vadd.f32 %v13190_v26, %v2414_v41  ;;  %4656 = vadd.xlane.f32.xlu0 %v4655_v29  ;;  %v13198_v29 = vrot.slane %v13197_v58, 3  ;;  %v3592_v15 = vadd.f32 %v13199_v47, %v3500_v48  ;;  %v8170_v58 = vmul.f32 %v13203_v14, %v6961_v13 }
 0x1e6   : > { %v13212_v13 = vrot.slane %v8068_v12, 3  ;;  %v13216_v12 = vrot.slane %v8079_v11, 3 }
 0x1e7   : > { %v2518_v41 = vadd.f32 %v13193_v8, %v2466_v52  ;;  %v2409_v33 = vadd.f32 %v13198_v29, %v13196_v6  ;;  %v2689_v8 = vmul.f32 %v13169_v30, %v8141_v39  ;;  %v13202_v52 = vrot.slane %v8057_v51, 3  ;;  %13204 = vst [vmem:[#allocation136_spill] sm:$0xff] %v8170_v58  ;;  %v13205_v6 = vld [vmem:[#allocation91_spill] sm:$0xff] }
 0x1e8   : > { %v13206_v48 = vrot.slane %v13205_v6, 3  ;;  %v3684_v47 = vadd.f32 %v7828_v62, %v3592_v15  ;;  %v13209_v30 = vld [vmem:[#allocation15_spill] sm:$0xff]  ;;  %v8192_v62 = vmul.f32 %v8087_v43, %v13085_v21 }
 0x1e9   : > { %v2570_v26 = vadd.f32 %v13202_v52, %v2518_v41  ;;  %4731 = vadd.xlane.f32.xlu0 %v4730_v5  ;;  %v8181_v51 = vmul.f32 %v13209_v30, %v7782_v18  ;;  %v8185_v41 = vmul.f32 %v8019_v32, %v13073_v49  ;;  %v13214_v5 = vld [vmem:[#allocation48_spill] sm:$0xff]  ;;  %v2721_v24 = vrot.slane %v2689_v8, 4 }
 0x1ea   : > { %v2461_v29 = vadd.f32 %v13206_v48, %v2409_v33  ;;  %13213 = vst [vmem:[#allocation151_spill] sm:$0xff] %v8192_v62  ;;  %v13215_v15 = vrot.slane %v13214_v5, 3  ;;  %v3776_v48 = vadd.f32 %v7835_v2, %v3684_v47  ;;  %v2873_v32 = vmul.f32 %v13175_v20, %v7600_v40  ;;  %v13217_v33 = vld [vmem:[#allocation18_spill] sm:$0xff]  ;;  %v13224_v20 = vld [vmem:[#allocation173_spill] sm:$0xff] }
 0x1eb   : > { %13210 = vst [vmem:[#allocation167_spill] sm:$0xff] %v8181_v51  ;;  %13211 = vst [vmem:[#allocation147_spill] sm:$0xff] %v8185_v41  ;;  %v2622_v52 = vadd.f32 %v13212_v13, %v2570_v26  ;;  %v8205_v43 = vmul.f32 %v8029_v9, %v13217_v33  ;;  %v13220_v5 = vrot.slane %v13219_v46, 3  ;;  %v13222_v13 = vld [vmem:[#allocation19_spill] sm:$0xff]  ;;  %v13225_v46 = vrot.slane %v13224_v20, 3  ;;  %v8233_v62 = vld [vmem:[#allocation4 + $0xb0] sm:$0xff] }
 0x1ec   : > { %v2513_v6 = vadd.f32 %v13215_v15, %v2461_v29  ;;  %v3868_v2 = vadd.f32 %v7860_v0, %v3776_v48  ;;  %v8218_v11 = vmul.f32 %v8042_v44, %v13222_v13  ;;  %v13226_v48 = vld [vmem:[#allocation96_spill] sm:$0xff]  ;;  %v2905_v47 = vrot.slane %v2873_v32, 4  ;;  %v8226_v15 = vld [vmem:[#allocation4 + $0x58] sm:$0xff]  ;;  %13230 = vst [vmem:[#allocation169_spill] sm:$0xff] %v8233_v62  ;;  %v8272_v51 = vld [vmem:[#allocation4 + $0xa0] sm:$0xff] }
 0x1ed   : > { %v2674_v26 = vadd.f32 %v13216_v12, %v2622_v52  ;;  %13218 = vst [vmem:[#allocation168_spill] sm:$0xff] %v8205_v43  ;;  %13228 = vst [vmem:[#allocation172_spill] sm:$0xff] %v8226_v15  ;;  %v13231_v20 = vld [vmem:[#allocation20_spill] sm:$0xff]  ;;  %v8251_v43 = vld [vmem:[#allocation4 + $0x70] sm:$0xff] }
 0x1ee   : > { %v2565_v29 = vadd.f32 %v13220_v5, %v2513_v6  ;;  %13223 = vst [vmem:[#allocation55_spill] sm:$0xff] %v8218_v11  ;;  %v3960_v0 = vadd.f32 %v7890_v28, %v3868_v2  ;;  %v13227_v5 = vrot.slane %v13226_v48, 4  ;;  %v8237_v28 = vmul.f32 %v8233_v62, %v13231_v20  ;;  %13241 = vst [vmem:[#allocation131_spill] sm:$0xff] %v8251_v43  ;;  %v8261_v41 = vld [vmem:[#allocation4 + $0x88] sm:$0xff] }
 0x1ef   : > { %v2766_v12 = vadd.f32 %v13221_v23, %v2674_v26  ;;  %v2965_v23 = vmul.f32 %v8226_v15, %v13177_v25  ;;  %v13229_v26 = vrot.slane %v8091_v38, 4  ;;  %v3057_v25 = vmul.f32 %v8251_v43, %v13179_v16  ;;  %13245 = vst [vmem:[#allocation48_spill] sm:$0xff] %v8261_v41  ;;  %13249 = vst [vmem:[#allocation49_spill] sm:$0xff] %v8272_v51 }
 0x1f0   : > { %v2617_v6 = vadd.f32 %v13225_v46, %v2565_v29  ;;  %v2722_v8 = vsel %vm506_vm0, %v13227_v5, %v2721_v24  ;;  %13232 = vst [vmem:[#allocation104_spill] sm:$0xff] %v8237_v28  ;;  %v13233_v29 = vld [vmem:[#allocation64_spill] sm:$0xff]  ;;  %v4053_v32 = vadd.f32 %v7971_v55, %v3960_v0  ;;  %v13235_v46 = vld [vmem:[#allocation21_spill] sm:$0xff]  ;;  %v13237_v5 = vld [vmem:[#allocation174_spill] sm:$0xff] }
 0x1f1   : > { %v2858_v52 = vadd.f32 %v13229_v26, %v2766_v12  ;;  %v13234_v2 = vrot.slane %v13233_v29, 3  ;;  %v8244_v48 = vmul.f32 %v13235_v46, %v7244_v56  ;;  %v13238_v38 = vrot.slane %v13237_v5, 4  ;;  %v13239_v12 = vld [vmem:[#allocation98_spill] sm:$0xff] }
 0x1f2   : > { %v13240_v26 = vrot.slane %v13239_v12, 4  ;;  %v13242_v29 = vrot.slane %v8100_v35, 4  ;;  %v13243_v55 = vld [vmem:[#allocation22_spill] sm:$0xff]  ;;  %v3149_v5 = vmul.f32 %v8261_v41, %v13181_v34  ;;  %v2997_v35 = vrot.slane %v2965_v23, 4  ;;  %v13257_v12 = vld [vmem:[#allocation60_spill] sm:$0xff] }
 0x1f3   : > { %v2669_v24 = vadd.f32 %v13234_v2, %v2617_v6  ;;  %13236 = vst [vmem:[#allocation82_spill] sm:$0xff] %v8244_v48  ;;  %v8259_v0 = vmul.f32 %v13243_v55, %v7782_v18 }
 0x1f4   : > { %v2814_v19 = vsel %vm506_vm0, %v13240_v26, %v13238_v38  ;;  %v2950_v6 = vadd.f32 %v13242_v29, %v2858_v52  ;;  %v4145_v38 = vadd.f32 %v8040_v27, %v4053_v32  ;;  %v13246_v26 = vld [vmem:[#allocation99_spill] sm:$0xff]  ;;  %v13248_v52 = vrot.slane %v8105_v61, 4 }
 0x1f5   : > { %13244 = vst [vmem:[#allocation91_spill] sm:$0xff] %v8259_v0  ;;  %v2761_v2 = vadd.f32 %v2722_v8, %v2669_v24  ;;  %v13247_v56 = vrot.slane %v13246_v26, 4  ;;  %v3241_v8 = vmul.f32 %v8272_v51, %v13186_v4  ;;  %v3333_v24 = vmul.f32 %v13188_v22, %v8141_v39 }
 0x1f6   : > { %v3042_v29 = vadd.f32 %v13248_v52, %v2950_v6  ;;  %v4237_v27 = vadd.f32 %v7931_v45, %v4145_v38  ;;  %v3089_v26 = vrot.slane %v3057_v25, 4  ;;  %v3181_v6 = vrot.slane %v3149_v5, 4  ;;  %v13251_v38 = vld [vmem:[#allocation42_spill] sm:$0xff] }
 0x1f7   : > { %v2906_v16 = vsel %vm506_vm0, %v13247_v56, %v2905_v47  ;;  %v2853_v18 = vadd.f32 %v2814_v19, %v2761_v2  ;;  %v3426_v56 = vmul.f32 %v13191_v10, %v7598_v57  ;;  %v13250_v47 = vrot.slane %v8109_v53, 4 }
 0x1f8   : > { %v3518_v2 = vmul.f32 %v13194_v50, %v7600_v40  ;;  %v4329_v52 = vadd.f32 %v7946_v17, %v4237_v27  ;;  %v13252_v32 = vrot.slane %v13251_v38, 4  ;;  %v13253_v61 = vrot.slane %v8113_v59, 4 }
 0x1f9   : > { %v3134_v23 = vadd.f32 %v13250_v47, %v3042_v29  ;;  %v2945_v19 = vadd.f32 %v2906_v16, %v2853_v18  ;;  %v3273_v18 = vrot.slane %v3241_v8, 4  ;;  %v3366_v16 = vrot.slane %v3333_v24, 5  ;;  %v13254_v47 = vld [vmem:[#allocation43_spill] sm:$0xff] }
 0x1fa   : > { %v2998_v25 = vsel %vm506_vm0, %v13252_v32, %v2997_v35  ;;  %v4421_v5 = vadd.f32 %v7978_v60, %v4329_v52  ;;  %v13255_v50 = vrot.slane %v13254_v47, 4  ;;  %v3458_v27 = vrot.slane %v3426_v56, 5 }
 0x1fb   : > { %v3226_v53 = vadd.f32 %v13253_v61, %v3134_v23  ;;  %v3037_v29 = vadd.f32 %v2998_v25, %v2945_v19  ;;  %v3610_v45 = vmul.f32 %v8226_v15, %v13200_v37  ;;  %v13256_v38 = vrot.slane %v8123_v3, 4  ;;  %v13260_v19 = vld [vmem:[#allocation63_spill] sm:$0xff] }
 0x1fc   : > { %v3090_v17 = vsel %vm506_vm0, %v13255_v50, %v3089_v26  ;;  %v13258_v59 = vrot.slane %v13257_v12, 4  ;;  %v3550_v8 = vrot.slane %v3518_v2, 5  ;;  %v4513_v24 = vadd.f32 %v7992_v36, %v4421_v5  ;;  %v13264_v25 = vld [vmem:[#allocation111_spill] sm:$0xff] }
 0x1fd   : > { %v3318_v35 = vadd.f32 %v13256_v38, %v3226_v53  ;;  %v3129_v32 = vadd.f32 %v3090_v17, %v3037_v29  ;;  %v3702_v60 = vmul.f32 %v8251_v43, %v13203_v14  ;;  %v3794_v50 = vmul.f32 %v8261_v41, %v13207_v42 }
 0x1fe   : > { %v3182_v61 = vsel %vm506_vm0, %v13258_v59, %v3181_v6  ;;  %v3886_v26 = vmul.f32 %v8272_v51, %v13209_v30  ;;  %v13259_v56 = vrot.slane %v8130_v54, 5  ;;  %v13261_v12 = vrot.slane %v13260_v19, 4  ;;  %v13262_v6 = vld [vmem:[#allocation107_spill] sm:$0xff]  ;;  %v13283_v54 = vld [vmem:[#allocation81_spill] sm:$0xff] }
 0x1ff   : > { %v3221_v23 = vadd.f32 %v3182_v61, %v3129_v32  ;;  %v13263_v2 = vrot.slane %v13262_v6, 5  ;;  %v4605_v52 = vadd.f32 %v7999_v7, %v4513_v24  ;;  %v13265_v29 = vrot.slane %v13264_v25, 5  ;;  %v13267_v61 = vld [vmem:[#allocation113_spill] sm:$0xff]  ;;  %v13269_v7 = vld [vmem:[#allocation180_spill] sm:$0xff] }
 0x200   : > { %v3411_v53 = vadd.f32 %v13259_v56, %v3318_v35  ;;  %v3274_v59 = vsel %vm506_vm0, %v13261_v12, %v3273_v18  ;;  %v3642_v47 = vrot.slane %v3610_v45, 5  ;;  %v3978_v17 = vmul.f32 %v13073_v49, %v8141_v39  ;;  %v13271_v12 = vld [vmem:[#allocation94_spill] sm:$0xff] }
 0x201   : > { %v3367_v36 = vsel %vm3364_vm6, %v13263_v2, %v3366_v16  ;;  %v3459_v5 = vsel %vm3364_vm6, %v13265_v29, %v3458_v27  ;;  %v13266_v38 = vrot.slane %v8139_v63, 5  ;;  %v3313_v32 = vadd.f32 %v3274_v59, %v3221_v23  ;;  %v5582_v23 = vld [vmem:[#allocation4 + $0x38] sm:$0xff]  ;;  %v13273_v59 = vld [vmem:[#allocation23_spill] sm:$0xff]  ;;  %v13274_v29 = vld [vmem:[#allocation24_spill] sm:$0xff] }
 0x202   : > { %v13268_v18 = vrot.slane %v13267_v61, 5  ;;  %v4071_v16 = vmul.f32 %v13085_v21, %v7598_v57  ;;  %v8334_v24 = vadd.f32 %v13269_v7, %v4605_v52  ;;  %v3734_v19 = vrot.slane %v3702_v60, 5  ;;  %v13275_v52 = vld [vmem:[#allocation176_spill] sm:$0xff]  ;;  %v13276_v60 = vld [vmem:[#allocation25_spill] sm:$0xff]  ;;  %v13279_v61 = vld [vmem:[#allocation175_spill] sm:$0xff] }
 0x203   : > { %v3503_v35 = vadd.f32 %v13266_v38, %v3411_v53  ;;  %v3826_v27 = vrot.slane %v3794_v50, 5  ;;  %v3918_v45 = vrot.slane %v3886_v26, 5  ;;  %v13272_v6 = vrot.slane %v13271_v12, 5  ;;  %v13277_v50 = vld [vmem:[#allocation133_spill] sm:$0xff]  ;;  %v13281_v12 = vld [vmem:[#allocation68_spill] sm:$0xff] }
 0x204   : > { %v3551_v56 = vsel %vm3364_vm6, %v13268_v18, %v3550_v8  ;;  %13270 = vst [vmem:[#allocation173_spill] sm:$0xff] %v8334_v24  ;;  %v3406_v2 = vadd.f32 %v3367_v36, %v3313_v32  ;;  %v4163_v53 = vmul.f32 %v13217_v33, %v7600_v40  ;;  %v787_v25 = vmul.f32 %v5582_v23, %v13273_v59 }
 0x205   : > { %v3595_v39 = vadd.f32 %v13272_v6, %v3503_v35  ;;  %v4652_v8 = vsel %vm4645_vm8, %v8334_v24, 0.0  ;;  %v4011_v57 = vrot.slane %v3978_v17, 6  ;;  %v823_v38 = vmul.f32 %v13275_v52, %v13274_v29  ;;  %v13285_v24 = vld [vmem:[#allocation44_spill] sm:$0xff] }
 0x206   : > { %v859_v26 = vmul.f32 %v13277_v50, %v13276_v60  ;;  %4653 = vadd.xlane.f32.xlu1 %v4652_v8  ;;  %v13278_v35 = vrot.slane %v8161_v31, 5  ;;  %v3498_v32 = vadd.f32 %v3459_v5, %v3406_v2  ;;  %v13280_v18 = vrot.slane %v13279_v61, 5 }
 0x207   : > { %v4103_v23 = vrot.slane %v4071_v16, 6  ;;  %v13282_v63 = vrot.slane %v13281_v12, 5  ;;  %v13284_v3 = vrot.slane %v13283_v54, 5  ;;  %v13286_v33 = vrot.slane %v13285_v24, 5  ;;  %v13288_v16 = vld [vmem:[#allocation121_spill] sm:$0xff]  ;;  %v13290_v24 = vld [vmem:[#allocation26_spill] sm:$0xff] }
 0x208   : > { %v3687_v36 = vadd.f32 %v13278_v35, %v3595_v39  ;;  %v3643_v6 = vsel %vm3364_vm6, %v13280_v18, %v3642_v47  ;;  %v839_v31 = vadd.f32 %v823_v38, %v787_v25  ;;  %v13287_v5 = vrot.slane %v8170_v58, 5  ;;  %v13296_v18 = vld [vmem:[#allocation167_spill] sm:$0xff] }
 0x209   : > { %v3735_v17 = vsel %vm3364_vm6, %v13282_v63, %v3734_v19  ;;  %v3827_v52 = vsel %vm3364_vm6, %v13284_v3, %v3826_v27  ;;  %v3919_v8 = vsel %vm3364_vm6, %v13286_v33, %v3918_v45  ;;  %v3590_v2 = vadd.f32 %v3551_v56, %v3498_v32  ;;  %v13292_v56 = vld [vmem:[#allocation122_spill] sm:$0xff]  ;;  %v13294_v32 = vld [vmem:[#allocation27_spill] sm:$0xff] }
 0x20a   : > { %v3779_v39 = vadd.f32 %v13287_v5, %v3687_v36  ;;  %v4195_v35 = vrot.slane %v4163_v53, 6  ;;  %v4255_v47 = vmul.f32 %v8226_v15, %v13222_v13  ;;  %v13289_v12 = vrot.slane %v13288_v16, 6 }
 0x20b   : > { %v4347_v54 = vmul.f32 %v8251_v43, %v13231_v20  ;;  %v875_v3 = vadd.f32 %v859_v26, %v839_v31  ;;  %v895_v33 = vmul.f32 %v8029_v9, %v13290_v24  ;;  %v13291_v19 = vrot.slane %v8177_v1, 5  ;;  %v13295_v26 = vld [vmem:[#allocation28_spill] sm:$0xff]  ;;  %v13301_v1 = vld [vmem:[#allocation30_spill] sm:$0xff] }
 0x20c   : > { %v4012_v63 = vsel %vm4009_vm7, %v13289_v12, %v4011_v57  ;;  %v3682_v45 = vadd.f32 %v3643_v6, %v3590_v2  ;;  %v13293_v53 = vrot.slane %v13292_v56, 6  ;;  %v4439_v38 = vmul.f32 %v8261_v41, %v13235_v46  ;;  %v13298_v2 = vld [vmem:[#allocation124_spill] sm:$0xff] }
 0x20d   : > { %v3871_v27 = vadd.f32 %v13291_v19, %v3779_v39  ;;  %v4531_v57 = vmul.f32 %v8272_v51, %v13243_v55  ;;  %v911_v36 = vadd.f32 %v895_v33, %v875_v3  ;;  %v931_v31 = vmul.f32 %v8042_v44, %v13294_v32  ;;  %v13302_v33 = vld [vmem:[#allocation76_spill] sm:$0xff]  ;;  %v13303_v55 = vld [vmem:[#allocation147_spill] sm:$0xff] }
 0x20e   : > { %v4104_v25 = vsel %vm4009_vm7, %v13293_v53, %v4103_v23  ;;  %v967_v61 = vmul.f32 %v8233_v62, %v13295_v26  ;;  %v13297_v5 = vrot.slane %v13296_v18, 5  ;;  %v3774_v39 = vadd.f32 %v3735_v17, %v3682_v45  ;;  %v13300_v53 = vld [vmem:[#allocation46_spill] sm:$0xff] }
 0x20f   : > { %v13299_v16 = vrot.slane %v13298_v2, 6  ;;  %v4287_v12 = vrot.slane %v4255_v47, 6  ;;  %v4379_v19 = vrot.slane %v4347_v54, 6  ;;  %v947_v56 = vadd.f32 %v931_v31, %v911_v36  ;;  %v13307_v54 = vld [vmem:[#allocation78_spill] sm:$0xff]  ;;  %v13308_v31 = vld [vmem:[#allocation151_spill] sm:$0xff] }
 0x210   : > { %v3963_v6 = vadd.f32 %v13297_v5, %v3871_v27  ;;  %v1003_v3 = vmul.f32 %v13301_v1, %v13300_v53  ;;  %v2693_v58 = vmul.f32 %v13302_v33, %v7600_v40  ;;  %v13304_v44 = vrot.slane %v13303_v55, 6  ;;  %v13305_v27 = vld [vmem:[#allocation77_spill] sm:$0xff]  ;;  %v13306_v5 = vld [vmem:[#allocation51_spill] sm:$0xff]  ;;  %v13314_v55 = vld [vmem:[#allocation74_spill] sm:$0xff] }
 0x211   : > { %v4196_v23 = vsel %vm4009_vm7, %v13299_v16, %v4195_v35  ;;  %v3866_v46 = vadd.f32 %v3827_v52, %v3774_v39  ;;  %v4471_v18 = vrot.slane %v4439_v38, 6  ;;  %v2785_v17 = vmul.f32 %v8226_v15, %v13305_v27  ;;  %v13310_v33 = vld [vmem:[#allocation79_spill] sm:$0xff]  ;;  %v13311_v52 = vld [vmem:[#allocation80_spill] sm:$0xff]  ;;  %v8419_v1 = vld [vmem:[#allocation4 + $0xd0] sm:$0xff] }
 0x212   : > { %v4056_v62 = vadd.f32 %v13304_v44, %v3963_v6  ;;  %v4563_v45 = vrot.slane %v4531_v57, 6  ;;  %v4712_v35 = vmul.f32 %v13306_v5, %v13306_v5  ;;  %v983_v47 = vadd.f32 %v967_v61, %v947_v56  ;;  %v13312_v6 = vld [vmem:[#allocation85_spill] sm:$0xff]  ;;  %v13316_v27 = vld [vmem:[#allocation168_spill] sm:$0xff] }
 0x213   : > { %v2877_v36 = vmul.f32 %v8251_v43, %v13307_v54  ;;  %v13309_v2 = vrot.slane %v13308_v31, 6  ;;  %v3958_v53 = vadd.f32 %v3919_v8, %v3866_v46  ;;  %v2969_v44 = vmul.f32 %v8261_v41, %v13310_v33  ;;  %v13318_v8 = vld [vmem:[#allocation86_spill] sm:$0xff] }
 0x214   : > { %v3061_v38 = vmul.f32 %v8272_v51, %v13311_v52  ;;  %v13313_v39 = vrot.slane %v13312_v6, 6  ;;  %v13315_v5 = vrot.slane %v13314_v55, 6  ;;  %v1019_v56 = vadd.f32 %v1003_v3, %v983_v47  ;;  %v13320_v6 = vld [vmem:[#allocation37_spill] sm:$0xff] }
 0x215   : > { %v4148_v16 = vadd.f32 %v13309_v2, %v4056_v62  ;;  %v2727_v54 = vrot.slane %v2693_v58, 4  ;;  %v13317_v31 = vrot.slane %v13316_v27, 6  ;;  %v4051_v46 = vadd.f32 %v4012_v63, %v3958_v53  ;;  %v13325_v53 = vld [vmem:[#allocation56_spill] sm:$0xff]  ;;  %v13380_v27 = vld [vmem:[#allocation65_spill] sm:$0xff] }
 0x216   : > { %v4288_v57 = vsel %vm4009_vm7, %v13313_v39, %v4287_v12  ;;  %v4380_v61 = vsel %vm4009_vm7, %v13315_v5, %v4379_v19  ;;  %v13319_v2 = vrot.slane %v13318_v8, 6  ;;  %v2819_v52 = vrot.slane %v2785_v17, 4  ;;  %v13322_v19 = vld [vmem:[#allocation88_spill] sm:$0xff]  ;;  %v13327_v8 = vld [vmem:[#allocation158_spill] sm:$0xff] }
 0x217   : > { %v4240_v62 = vadd.f32 %v13317_v31, %v4148_v16  ;;  %v13321_v9 = vrot.slane %v13320_v6, 6  ;;  %v8425_v55 = vsel %vm4641_vm5, %v4712_v35, 0.0  ;;  %v13323_v58 = vrot.slane %v13322_v19, 1  ;;  %v13333_v6 = vld [vmem:[#allocation95_spill] sm:$0xff] }
 0x218   : > { %v4472_v33 = vsel %vm4009_vm7, %v13319_v2, %v4471_v18  ;;  %v2911_v5 = vrot.slane %v2877_v36, 4  ;;  %v13324_v63 = vrot.slane %v8218_v11, 6  ;;  %v4143_v31 = vadd.f32 %v4104_v25, %v4051_v46 }
 0x219   : > { %v4564_v12 = vsel %vm4009_vm7, %v13321_v9, %v4563_v45  ;;  %v1112_v3 = vadd.f32 %v13323_v58, %v1019_v56  ;;  %v3003_v16 = vrot.slane %v2969_v44, 4  ;;  %v3095_v18 = vrot.slane %v3061_v38, 4  ;;  %v8438_v45 = vld [vmem:[#allocation4 + $0xb8] sm:$0xff]  ;;  %v13331_v56 = vld [vmem:[#allocation119_spill] sm:$0xff] }
 0x21a   : > { %v4332_v47 = vadd.f32 %v13324_v63, %v4240_v62  ;;  %v13326_v39 = vrot.slane %v13325_v53, 1  ;;  %v13328_v2 = vrot.slane %v13327_v8, 4  ;;  %13329 = vst [vmem:[#allocation96_spill] sm:$0xff] %v8438_v45  ;;  %v3153_v35 = vmul.f32 %v8438_v45, %v13181_v34 }
 0x21b   : > { %v3245_v36 = vmul.f32 %v13186_v4, %v8419_v1  ;;  %v13330_v25 = vrot.slane %v8237_v28, 6  ;;  %v4235_v38 = vadd.f32 %v4196_v23, %v4143_v31  ;;  %v13332_v62 = vrot.slane %v13331_v56, 4  ;;  %v13337_v23 = vld [vmem:[#allocation11_spill] sm:$0xff] }
 0x21c   : > { %v1204_v17 = vadd.f32 %v13326_v39, %v1112_v3  ;;  %v8436_v9 = vsel %vm506_vm0, %v13328_v2, %v2727_v54  ;;  %v3337_v54 = vmul.f32 %v13188_v22, %v7600_v40  ;;  %v13334_v19 = vrot.slane %v13333_v6, 1  ;;  %v13335_v3 = vld [vmem:[#allocation120_spill] sm:$0xff]  ;;  %v13339_v2 = vld [vmem:[#allocation177_spill] sm:$0xff] }
 0x21d   : > { %v4424_v44 = vadd.f32 %v13330_v25, %v4332_v47  ;;  %v8449_v46 = vsel %vm506_vm0, %v13332_v62, %v2819_v52  ;;  %v13336_v63 = vrot.slane %v13335_v3, 4  ;;  %v3430_v47 = vmul.f32 %v8226_v15, %v13191_v10  ;;  %v13343_v6 = vld [vmem:[#allocation97_spill] sm:$0xff] }
 0x21e   : > { %v1296_v58 = vadd.f32 %v13334_v19, %v1204_v17  ;;  %v3522_v31 = vmul.f32 %v8251_v43, %v13337_v23  ;;  %v13338_v52 = vrot.slane %v8244_v48, 6  ;;  %v4327_v8 = vadd.f32 %v4288_v57, %v4235_v38  ;;  %v13341_v17 = vld [vmem:[#allocation178_spill] sm:$0xff] }
 0x21f   : > { %v8458_v53 = vsel %vm506_vm0, %v13336_v63, %v2911_v5  ;;  %v13340_v25 = vrot.slane %v13339_v2, 4  ;;  %v13342_v62 = vrot.slane %v13341_v17, 4  ;;  %v13344_v19 = vrot.slane %v13343_v6, 1  ;;  %v13346_v2 = vld [vmem:[#allocation57_spill] sm:$0xff] }
 0x220   : > { %v4516_v39 = vadd.f32 %v13338_v52, %v4424_v44  ;;  %v3187_v63 = vrot.slane %v3153_v35, 4  ;;  %v3279_v28 = vrot.slane %v3245_v36, 4  ;;  %v3614_v48 = vmul.f32 %v8261_v41, %v13200_v37  ;;  %v13420_v37 = vld [vmem:[#allocation128_spill] sm:$0xff] }
 0x221   : > { %v8469_v56 = vsel %vm506_vm0, %v13340_v25, %v3003_v16  ;;  %v8474_v5 = vsel %vm506_vm0, %v13342_v62, %v3095_v18  ;;  %v1388_v3 = vadd.f32 %v13344_v19, %v1296_v58  ;;  %v13345_v57 = vrot.slane %v8259_v0, 6  ;;  %v13351_v19 = vld [vmem:[#allocation179_spill] sm:$0xff] }
 0x222   : > { %v4419_v38 = vadd.f32 %v4380_v61, %v4327_v8  ;;  %v3372_v52 = vrot.slane %v3337_v54, 5  ;;  %v3706_v16 = vmul.f32 %v8272_v51, %v13203_v14  ;;  %v13347_v25 = vrot.slane %v13346_v2, 1  ;;  %v13349_v54 = vld [vmem:[#allocation170_spill] sm:$0xff] }
 0x223   : > { %v4608_v44 = vadd.f32 %v13345_v57, %v4516_v39  ;;  %v3464_v17 = vrot.slane %v3430_v47, 5  ;;  %v3556_v62 = vrot.slane %v3522_v31, 5  ;;  %v3798_v35 = vmul.f32 %v8438_v45, %v13207_v42  ;;  %v13353_v31 = vld [vmem:[#allocation181_spill] sm:$0xff] }
 0x224   : > { %v1480_v18 = vadd.f32 %v13347_v25, %v1388_v3  ;;  %v4511_v58 = vadd.f32 %v4472_v33, %v4419_v38  ;;  %v3890_v39 = vmul.f32 %v13209_v30, %v8419_v1  ;;  %v3982_v61 = vmul.f32 %v13073_v49, %v7600_v40  ;;  %v13355_v25 = vld [vmem:[#allocation159_spill] sm:$0xff]  ;;  %v8654_v30 = vld [vmem:[#allocation4 + $0xc8] sm:$0xff] }
 0x225   : > { %v8489_v36 = vadd.f32 %v13269_v7, %v4608_v44  ;;  %v13350_v8 = vrot.slane %v13349_v54, 1  ;;  %v13352_v3 = vrot.slane %v13351_v19, 4  ;;  %v13354_v57 = vrot.slane %v13353_v31, 4 }
 0x226   : > { %v3648_v33 = vrot.slane %v3614_v48, 5  ;;  %v4603_v2 = vadd.f32 %v4564_v12, %v4511_v58  ;;  %v13356_v40 = vrot.slane %v13355_v25, 5  ;;  %v13361_v48 = vld [vmem:[#allocation183_spill] sm:$0xff]  ;;  %v3832_v12 = vrot.slane %v3798_v35, 5  ;;  %v13364_v25 = vld [vmem:[#allocation110_spill] sm:$0xff]  ;;  %v8544_v35 = vld [vmem:[#allocation4 + $0x90] sm:$0xff] }
 0x227   : > { %13348 = vst [vmem:[#allocation64_spill] sm:$0xff] %v8489_v36  ;;  %v1572_v6 = vadd.f32 %v13350_v8, %v1480_v18  ;;  %v8500_v47 = vsel %vm506_vm0, %v13352_v3, %v3187_v63  ;;  %v8505_v44 = vsel %vm506_vm0, %v13354_v57, %v3279_v28  ;;  %v4661_v38 = vsel %vm4641_vm5, %v8489_v36, 0.0  ;;  %v13357_v8 = vld [vmem:[#allocation100_spill] sm:$0xff]  ;;  %v13359_v3 = vld [vmem:[#allocation182_spill] sm:$0xff]  ;;  %13370 = vst [vmem:[#allocation42_spill] sm:$0xff] %v8544_v35 }
 0x228   : > { %v8512_v54 = vsel %vm3364_vm6, %v13356_v40, %v3372_v52  ;;  %v3740_v18 = vrot.slane %v3706_v16, 5  ;;  %4662 = vadd.xlane.f32.xlu0 %v4661_v38  ;;  %v13358_v63 = vrot.slane %v13357_v8, 1  ;;  %v13360_v31 = vrot.slane %v13359_v3, 5  ;;  %v8529_v38 = vld [vmem:[#allocation4 + $0x60] sm:$0xff] }
 0x229   : > { %v13362_v57 = vrot.slane %v13361_v48, 5  ;;  %v8527_v58 = vadd.f32 %v13269_v7, %v4603_v2  ;;  %v3924_v52 = vrot.slane %v3890_v39, 5  ;;  %v4017_v16 = vrot.slane %v3982_v61, 6  ;;  %v13366_v8 = vld [vmem:[#allocation103_spill] sm:$0xff] }
 0x22a   : > { %v1664_v19 = vadd.f32 %v13358_v63, %v1572_v6  ;;  %v8519_v28 = vsel %vm3364_vm6, %v13360_v31, %v3464_v17  ;;  %v790_v6 = vmul.f32 %v8529_v38, %v13273_v59  ;;  %v13365_v40 = vrot.slane %v13364_v25, 2  ;;  %v13371_v2 = vld [vmem:[#allocation35_spill] sm:$0xff] }
 0x22b   : > { %v8524_v0 = vsel %vm3364_vm6, %v13362_v57, %v3556_v62  ;;  %13363 = vst [vmem:[#allocation174_spill] sm:$0xff] %v8527_v58  ;;  %v13367_v63 = vrot.slane %v13366_v8, 5  ;;  %v8540_v62 = vld [vmem:[#allocation4 + $0x78] sm:$0xff]  ;;  %v862_v39 = vmul.f32 %v8544_v35, %v13276_v60  ;;  %v4709_v61 = vmul.f32 %v8527_v58, %v8527_v58  ;;  %v13374_v57 = vld [vmem:[#allocation108_spill] sm:$0xff] }
 0x22c   : > { %v1757_v17 = vadd.f32 %v13365_v40, %v1664_v19  ;;  %13369 = vst [vmem:[#allocation99_spill] sm:$0xff] %v8540_v62  ;;  %v826_v7 = vmul.f32 %v8540_v62, %v13274_v29  ;;  %v13372_v19 = vrot.slane %v13371_v2, 5  ;;  %v4714_v48 = vmul.f32 %v8489_v36, %v8489_v36  ;;  %4737 = vadd.xlane.f32.xlu0 %v8425_v55  ;;  %v13376_v8 = vld [vmem:[#allocation184_spill] sm:$0xff]  ;;  %v13418_v60 = vld [vmem:[#allocation130_spill] sm:$0xff] }
 0x22d   : > { %v8538_v3 = vsel %vm3364_vm6, %v13367_v63, %v3648_v33  ;;  %v8557_v33 = vmul.f32 %v8226_v15, %v13085_v21  ;;  %v13375_v25 = vrot.slane %v13374_v57, 2  ;;  %v13377_v63 = vrot.slane %v13376_v8, 5  ;;  %v13383_v57 = vld [vmem:[#allocation45_spill] sm:$0xff] }
 0x22e   : > { %13368 = vst [vmem:[#allocation98_spill] sm:$0xff] %v8538_v3  ;;  %v8553_v31 = vsel %vm3364_vm6, %v13372_v19, %v3740_v18  ;;  %v842_v2 = vadd.f32 %v826_v7, %v790_v6  ;;  %v8569_v18 = vld [vmem:[#allocation4 + $0xa8] sm:$0xff]  ;;  %v4727_v11 = vsel %vm4645_vm8, %v4709_v61, 0.0  ;;  %v13381_v36 = vrot.slane %v13380_v27, 5  ;;  %v13387_v7 = vld [vmem:[#allocation101_spill] sm:$0xff] }
 0x22f   : > { %13373 = vst [vmem:[#allocation43_spill] sm:$0xff] %v8553_v31  ;;  %v1849_v40 = vadd.f32 %v13375_v25, %v1757_v17  ;;  %v8567_v58 = vsel %vm3364_vm6, %v13377_v63, %v3832_v12  ;;  %13379 = vst [vmem:[#allocation63_spill] sm:$0xff] %v8569_v18  ;;  %v898_v19 = vmul.f32 %v8569_v18, %v13290_v24  ;;  %v13384_v17 = vrot.slane %v13383_v57, 6  ;;  %v13386_v12 = vld [vmem:[#allocation29_spill] sm:$0xff] }
 0x230   : > { %13378 = vst [vmem:[#allocation60_spill] sm:$0xff] %v8567_v58  ;;  %v8577_v55 = vsel %vm3364_vm6, %v13381_v36, %v3924_v52  ;;  %v1042_v6 = vmul.f32 %v8529_v38, %v13386_v12  ;;  %4728 = vadd.xlane.f32.xlu1 %v4727_v11  ;;  %v13388_v8 = vrot.slane %v13387_v7, 2  ;;  %v878_v15 = vadd.f32 %v862_v39, %v842_v2  ;;  %v8588_v58 = vld [vmem:[#allocation4 + $0xc0] sm:$0xff]  ;;  %v8608_v7 = vld [vmem:[#allocation4 + $0xd8] sm:$0xff]  ;;  %v13412_v21 = vld [vmem:[#allocation41_spill] sm:$0xff] }
 0x231   : > { %13382 = vst [vmem:[#allocation107_spill] sm:$0xff] %v8577_v55  ;;  %v8582_v25 = vsel %vm4009_vm7, %v13384_v17, %v4017_v16  ;;  %13389 = vst [vmem:[#allocation113_spill] sm:$0xff] %v8588_v58  ;;  %v934_v27 = vmul.f32 %v8588_v58, %v13294_v32  ;;  %v8594_v36 = vmul.f32 %v13277_v50, %v13386_v12  ;;  %v4109_v52 = vrot.slane %v8557_v33, 6  ;;  %v13391_v16 = vld [vmem:[#allocation18_spill] sm:$0xff] }
 0x232   : > { %13385 = vst [vmem:[#allocation111_spill] sm:$0xff] %v8582_v25  ;;  %v1941_v63 = vadd.f32 %v13388_v8, %v1849_v40  ;;  %v8599_v61 = vmul.f32 %v8251_v43, %v13391_v16  ;;  %v8603_v11 = vmul.f32 %v8261_v41, %v13222_v13  ;;  %v4742_v39 = vsel %vm4641_vm5, %v4714_v48, 0.0  ;;  %v13392_v40 = vld [vmem:[#allocation106_spill] sm:$0xff]  ;;  %13394 = vst [vmem:[#allocation133_spill] sm:$0xff] %v8608_v7  ;;  %v13395_v8 = vld [vmem:[#allocation33_spill] sm:$0xff] }
 0x233   : > { %13390 = vst [vmem:[#allocation180_spill] sm:$0xff] %v8594_v36  ;;  %v13393_v2 = vrot.slane %v13392_v40, 2  ;;  %4743 = vadd.xlane.f32.xlu0 %v4742_v39  ;;  %v914_v17 = vadd.f32 %v898_v19, %v878_v15  ;;  %v970_v33 = vmul.f32 %v8608_v7, %v13295_v26  ;;  %v1135_v12 = vmul.f32 %v8540_v62, %v13395_v8  ;;  %v8618_v41 = vld [vmem:[#allocation4 + $0xf0] sm:$0xff]  ;;  %v13399_v19 = vld [vmem:[#allocation116_spill] sm:$0xff]  ;;  %v13401_v55 = vld [vmem:[#allocation30_spill] sm:$0xff] }
 0x234   : > { %v8616_v25 = vmul.f32 %v8272_v51, %v13231_v20  ;;  %13396 = vst [vmem:[#allocation175_spill] sm:$0xff] %v8618_v41  ;;  %v1079_v48 = vrot.slane %v1042_v6, 1  ;;  %v13400_v39 = vrot.slane %v13399_v19, 2  ;;  %v1006_v13 = vmul.f32 %v13401_v55, %v8618_v41  ;;  %v13402_v16 = vld [vmem:[#allocation36_spill] sm:$0xff]  ;;  %v13403_v20 = vld [vmem:[#allocation21_spill] sm:$0xff] }
 0x235   : > { %v2033_v57 = vadd.f32 %v13393_v2, %v1941_v63  ;;  %v13397_v63 = vld [vmem:[#allocation137_spill] sm:$0xff]  ;;  %v950_v43 = vadd.f32 %v934_v27, %v914_v17  ;;  %v1227_v51 = vmul.f32 %v8544_v35, %v13402_v16  ;;  %v8633_v26 = vmul.f32 %v8438_v45, %v13403_v20  ;;  %v13404_v6 = vld [vmem:[#allocation112_spill] sm:$0xff] }
 0x236   : > { %v8623_v15 = vmul.f32 %v13397_v63, %v13395_v8  ;;  %v8637_v40 = vmul.f32 %v13404_v6, %v13402_v16  ;;  %v13406_v8 = vld [vmem:[#allocation38_spill] sm:$0xff]  ;;  %v13409_v17 = vld [vmem:[#allocation117_spill] sm:$0xff]  ;;  %v4201_v55 = vrot.slane %v8599_v61, 6  ;;  %v1171_v24 = vrot.slane %v1135_v12, 1 }
 0x237   : > { %v2125_v2 = vadd.f32 %v13400_v39, %v2033_v57  ;;  %v1319_v31 = vmul.f32 %v8569_v18, %v13406_v8  ;;  %v13407_v57 = vld [vmem:[#allocation169_spill] sm:$0xff]  ;;  %v13410_v19 = vrot.slane %v13409_v17, 2  ;;  %v986_v32 = vadd.f32 %v970_v33, %v950_v43 }
 0x238   : > { %13398 = vst [vmem:[#allocation68_spill] sm:$0xff] %v8623_v15  ;;  %13405 = vst [vmem:[#allocation81_spill] sm:$0xff] %v8637_v40  ;;  %v8643_v27 = vmul.f32 %v13407_v57, %v13406_v8  ;;  %v13411_v45 = vrot.slane %v8594_v36, 1  ;;  %v1411_v49 = vmul.f32 %v8588_v58, %v13412_v21  ;;  %v8658_v8 = vmul.f32 %v8654_v30, %v13412_v21  ;;  %v13415_v61 = vld [vmem:[#allocation125_spill] sm:$0xff]  ;;  %v13417_v36 = vld [vmem:[#allocation39_spill] sm:$0xff] }
 0x239   : > { %v2217_v39 = vadd.f32 %v13410_v19, %v2125_v2  ;;  %v8660_v2 = vld [vmem:[#allocation4 + $0xf8] sm:$0xff]  ;;  %v13416_v43 = vrot.slane %v13415_v61, 2  ;;  %v4293_v33 = vrot.slane %v8603_v11, 6  ;;  %v1022_v17 = vadd.f32 %v1006_v13, %v986_v32  ;;  %v13422_v11 = vld [vmem:[#allocation40_spill] sm:$0xff] }
 0x23a   : > { %13408 = vst [vmem:[#allocation44_spill] sm:$0xff] %v8643_v27  ;;  %v1081_v20 = vsel %vm1066_vm3, %v1079_v48, %v13411_v45  ;;  %13413 = vst [vmem:[#allocation121_spill] sm:$0xff] %v8658_v8  ;;  %v1263_v45 = vrot.slane %v1227_v51, 1  ;;  %v1355_v19 = vrot.slane %v1319_v31, 1  ;;  %v1503_v3 = vmul.f32 %v8608_v7, %v13417_v36  ;;  %v13434_v48 = vld [vmem:[#allocation47_spill] sm:$0xff] }
 0x23b   : > { %13414 = vst [vmem:[#allocation122_spill] sm:$0xff] %v8660_v2  ;;  %v2309_v12 = vadd.f32 %v13416_v43, %v2217_v39  ;;  %v13419_v21 = vrot.slane %v13418_v60, 3  ;;  %v1115_v14 = vadd.f32 %v1081_v20, %v1022_v17  ;;  %v8673_v61 = vmul.f32 %v13417_v36, %v13420_v37 }
 0x23c   : > { %v1595_v13 = vmul.f32 %v13422_v11, %v8618_v41  ;;  %v13423_v51 = vrot.slane %v8623_v15, 1  ;;  %v1447_v31 = vrot.slane %v1411_v49, 1  ;;  %v8683_v43 = vmul.f32 %v13422_v11, %v8660_v2 }
 0x23d   : > { %v2361_v42 = vadd.f32 %v13419_v21, %v2309_v12  ;;  %13421 = vst [vmem:[#allocation124_spill] sm:$0xff] %v8673_v61  ;;  %v13425_v21 = vld [vmem:[#allocation126_spill] sm:$0xff]  ;;  %v13429_v49 = vrot.slane %v8637_v40, 1  ;;  %v13430_v39 = vrot.slane %v8643_v27, 1 }
 0x23e   : > { %v1173_v32 = vsel %vm1066_vm3, %v1171_v24, %v13423_v51  ;;  %13424 = vst [vmem:[#allocation46_spill] sm:$0xff] %v8683_v43  ;;  %v13426_v20 = vrot.slane %v13425_v21, 3  ;;  %v13427_v12 = vld [vmem:[#allocation62_spill] sm:$0xff]  ;;  %v1539_v21 = vrot.slane %v1503_v3, 1  ;;  %v13436_v3 = vld [vmem:[#allocation109_spill] sm:$0xff]  ;;  %v13451_v27 = vrot.slane %v8683_v43, 1 }
 0x23f   : > { %v13428_v17 = vrot.slane %v13427_v12, 6  ;;  %v1207_v15 = vadd.f32 %v1173_v32, %v1115_v14  ;;  %v1265_v51 = vsel %vm1066_vm3, %v1263_v45, %v13429_v49  ;;  %v1357_v11 = vsel %vm1066_vm3, %v1355_v19, %v13430_v39  ;;  %v13438_v49 = vld [vmem:[#allocation50_spill] sm:$0xff] }
 0x240   : > { %v2413_v60 = vadd.f32 %v13426_v20, %v2361_v42  ;;  %v13431_v42 = vld [vmem:[#allocation123_spill] sm:$0xff]  ;;  %v13433_v14 = vrot.slane %v8658_v8, 1  ;;  %v1687_v45 = vmul.f32 %v8529_v38, %v13434_v48  ;;  %v8711_v19 = vmul.f32 %v13277_v50, %v13434_v48  ;;  %v13442_v38 = vld [vmem:[#allocation66_spill] sm:$0xff] }
 0x241   : > { %v8690_v16 = vsel %vm4009_vm7, %v13428_v17, %v4109_v52  ;;  %v13432_v20 = vrot.slane %v13431_v42, 3  ;;  %v1299_v36 = vadd.f32 %v1265_v51, %v1207_v15  ;;  %v1631_v17 = vrot.slane %v1595_v13, 1 }
 0x242   : > { %v1449_v32 = vsel %vm1066_vm3, %v1447_v31, %v13433_v14  ;;  %13435 = vst [vmem:[#allocation85_spill] sm:$0xff] %v8711_v19  ;;  %v13437_v39 = vrot.slane %v13436_v3, 3  ;;  %v1780_v13 = vmul.f32 %v8540_v62, %v13438_v49  ;;  %v8719_v51 = vmul.f32 %v13397_v63, %v13438_v49  ;;  %v13440_v31 = vld [vmem:[#allocation185_spill] sm:$0xff]  ;;  %v13444_v3 = vld [vmem:[#allocation52_spill] sm:$0xff] }
 0x243   : > { %v2465_v12 = vadd.f32 %v13432_v20, %v2413_v60  ;;  %v1391_v15 = vadd.f32 %v1357_v11, %v1299_v36  ;;  %v13441_v42 = vrot.slane %v13440_v31, 6  ;;  %v13443_v14 = vrot.slane %v13442_v38, 6  ;;  %v13448_v31 = vld [vmem:[#allocation22_spill] sm:$0xff] }
 0x244   : > { %13439 = vst [vmem:[#allocation74_spill] sm:$0xff] %v8719_v51  ;;  %v1872_v36 = vmul.f32 %v8544_v35, %v13444_v3  ;;  %v8735_v11 = vmul.f32 %v13404_v6, %v13444_v3  ;;  %v4535_v8 = vmul.f32 %v13448_v31, %v8419_v1  ;;  %v1633_v40 = vsel %vm1066_vm3, %v1631_v17, %v13451_v27  ;;  %v13456_v27 = vld [vmem:[#allocation118_spill] sm:$0xff] }
 0x245   : > { %v2517_v60 = vadd.f32 %v13437_v39, %v2465_v12  ;;  %v8724_v20 = vsel %vm4009_vm7, %v13441_v42, %v4201_v55  ;;  %v8729_v24 = vsel %vm4009_vm7, %v13443_v14, %v4293_v33  ;;  %v13446_v12 = vld [vmem:[#allocation114_spill] sm:$0xff]  ;;  %v13449_v55 = vld [vmem:[#allocation173_spill] sm:$0xff]  ;;  %v1483_v38 = vadd.f32 %v1449_v32, %v1391_v15 }
 0x246   : > { %13445 = vst [vmem:[#allocation86_spill] sm:$0xff] %v8735_v11  ;;  %v13447_v39 = vrot.slane %v13446_v12, 3  ;;  %v4711_v42 = vmul.f32 %v13449_v55, %v13449_v55  ;;  %v13450_v33 = vrot.slane %v8673_v61, 1  ;;  %v1724_v3 = vrot.slane %v1687_v45, 2  ;;  %v13452_v12 = vld [vmem:[#allocation115_spill] sm:$0xff]  ;;  %v13454_v15 = vld [vmem:[#allocation53_spill] sm:$0xff] }
 0x247   : > { %v1816_v35 = vrot.slane %v1780_v13, 2  ;;  %v1908_v55 = vrot.slane %v1872_v36, 2  ;;  %v13457_v17 = vrot.slane %v13456_v27, 3  ;;  %v13460_v36 = vrot.slane %v8711_v19, 2 }
 0x248   : > { %v2569_v52 = vadd.f32 %v13447_v39, %v2517_v60  ;;  %v1541_v14 = vsel %vm1066_vm3, %v1539_v21, %v13450_v33  ;;  %v13453_v60 = vrot.slane %v13452_v12, 3  ;;  %v1964_v21 = vmul.f32 %v8569_v18, %v13454_v15  ;;  %v13458_v12 = vld [vmem:[#allocation58_spill] sm:$0xff] }
 0x249   : > { %v1575_v48 = vadd.f32 %v1541_v14, %v1483_v38  ;;  %v8758_v33 = vmul.f32 %v13407_v57, %v13454_v15  ;;  %v8766_v13 = vmul.f32 %v8654_v30, %v13458_v12  ;;  %v1726_v38 = vsel %vm1711_vm4, %v1724_v3, %v13460_v36  ;;  %v13461_v14 = vld [vmem:[#allocation54_spill] sm:$0xff]  ;;  %v13516_v15 = vld [vmem:[#allocation25_spill] sm:$0xff] }
 0x24a   : > { %v2621_v39 = vadd.f32 %v13453_v60, %v2569_v52  ;;  %v2056_v52 = vmul.f32 %v8588_v58, %v13458_v12  ;;  %v2148_v60 = vmul.f32 %v8608_v7, %v13461_v14  ;;  %v8775_v32 = vmul.f32 %v13461_v14, %v13420_v37  ;;  %v13523_v58 = vld [vmem:[#allocation17_spill] sm:$0xff] }
 0x24b   : > { %13455 = vst [vmem:[#allocation37_spill] sm:$0xff] %v8758_v33  ;;  %v1667_v49 = vadd.f32 %v1633_v40, %v1575_v48  ;;  %13459 = vst [vmem:[#allocation88_spill] sm:$0xff] %v8766_v13  ;;  %v13463_v40 = vld [vmem:[#allocation59_spill] sm:$0xff]  ;;  %v4569_v27 = vrot.slane %v4535_v8, 6  ;;  %v13465_v3 = vrot.slane %v8719_v51, 2  ;;  %v13466_v19 = vrot.slane %v8735_v11, 2 }
 0x24c   : > { %v2673_v45 = vadd.f32 %v13457_v17, %v2621_v39  ;;  %13462 = vst [vmem:[#allocation56_spill] sm:$0xff] %v8775_v32  ;;  %v2240_v48 = vmul.f32 %v13463_v40, %v8618_v41  ;;  %v8782_v62 = vmul.f32 %v13463_v40, %v8660_v2  ;;  %v2000_v43 = vrot.slane %v1964_v21, 2  ;;  %v13467_v51 = vld [vmem:[#allocation67_spill] sm:$0xff]  ;;  %v13469_v21 = vld [vmem:[#allocation69_spill] sm:$0xff] }
 0x24d   : > { %v1760_v17 = vadd.f32 %v1726_v38, %v1667_v49  ;;  %v1818_v36 = vsel %vm1711_vm4, %v1816_v35, %v13465_v3  ;;  %v1910_v37 = vsel %vm1711_vm4, %v1908_v55, %v13466_v19  ;;  %v12132_v61 = vrot.slane %v8758_v33, 2 }
 0x24e   : > { %v2765_v39 = vadd.f32 %v8436_v9, %v2673_v45  ;;  %13464 = vst [vmem:[#allocation158_spill] sm:$0xff] %v8782_v62  ;;  %v2092_v8 = vrot.slane %v2056_v52, 2  ;;  %v12133_v49 = vrot.slane %v8766_v13, 2  ;;  %v2184_v45 = vrot.slane %v2148_v60, 2  ;;  %v13497_v13 = vld [vmem:[#allocation79_spill] sm:$0xff] }
 0x24f   : > { %v1852_v9 = vadd.f32 %v1818_v36, %v1760_v17  ;;  %v2276_v40 = vrot.slane %v2240_v48, 2  ;;  %v8796_v35 = vmul.f32 %v13277_v50, %v13467_v51  ;;  %v12134_v55 = vrot.slane %v8782_v62, 2  ;;  %v13475_v36 = vld [vmem:[#allocation187_spill] sm:$0xff]  ;;  %v13495_v62 = vld [vmem:[#allocation78_spill] sm:$0xff] }
 0x250   : > { %v2857_v14 = vadd.f32 %v8449_v46, %v2765_v39  ;;  %v8802_v46 = vmul.f32 %v13397_v63, %v13469_v21  ;;  %v13471_v52 = vrot.slane %v8616_v25, 6  ;;  %v13472_v39 = vld [vmem:[#allocation186_spill] sm:$0xff]  ;;  %v13474_v48 = vrot.slane %v8633_v26, 6  ;;  %v13480_v26 = vld [vmem:[#allocation71_spill] sm:$0xff] }
 0x251   : > { %13468 = vst [vmem:[#allocation119_spill] sm:$0xff] %v8796_v35  ;;  %v1944_v19 = vadd.f32 %v1910_v37, %v1852_v9  ;;  %v13473_v60 = vrot.slane %v13472_v39, 6  ;;  %v13476_v38 = vrot.slane %v13475_v36, 6  ;;  %v13477_v37 = vld [vmem:[#allocation70_spill] sm:$0xff]  ;;  %v8881_v33 = vmul.f32 %v13407_v57, %v13497_v13 }
 0x252   : > { %v2949_v3 = vadd.f32 %v8458_v53, %v2857_v14  ;;  %13470 = vst [vmem:[#allocation95_spill] sm:$0xff] %v8802_v46  ;;  %v2002_v14 = vsel %vm1711_vm4, %v2000_v43, %v12132_v61  ;;  %v8823_v9 = vmul.f32 %v13404_v6, %v13477_v37  ;;  %v2094_v43 = vsel %vm1711_vm4, %v2092_v8, %v12133_v49  ;;  %v8855_v49 = vld [vmem:[#allocation4 + $0xe0] sm:$0xff] }
 0x253   : > { %v8809_v17 = vsel %vm4009_vm7, %v13473_v60, %v13471_v52  ;;  %v8816_v53 = vsel %vm4009_vm7, %v13476_v38, %v13474_v48  ;;  %v8827_v52 = vsel %vm4645_vm8, %v4711_v42, 0.0  ;;  %v2036_v39 = vadd.f32 %v2002_v14, %v1944_v19  ;;  %v13482_v38 = vld [vmem:[#allocation188_spill] sm:$0xff]  ;;  %13498 = vst [vmem:[#allocation100_spill] sm:$0xff] %v8881_v33 }
 0x254   : > { %13478 = vst [vmem:[#allocation120_spill] sm:$0xff] %v8823_v9  ;;  %v3041_v25 = vadd.f32 %v8469_v56, %v2949_v3  ;;  %13479 = vst [vmem:[#allocation177_spill] sm:$0xff] %v8827_v52  ;;  %v8831_v60 = vmul.f32 %v13407_v57, %v13480_v26  ;;  %v13483_v48 = vrot.slane %v13482_v38, 6  ;;  %v13484_v61 = vrot.slane %v8775_v32, 2  ;;  %v13521_v52 = vld [vmem:[#allocation16_spill] sm:$0xff] }
 0x255   : > { %v2128_v19 = vadd.f32 %v2094_v43, %v2036_v39  ;;  %v2278_v14 = vsel %vm1711_vm4, %v2276_v40, %v12134_v55  ;;  %v13491_v55 = vld [vmem:[#allocation76_spill] sm:$0xff]  ;;  %v8877_v32 = vmul.f32 %v13404_v6, %v13495_v62  ;;  %v8890_v43 = vmul.f32 %v8855_v49, %v13181_v34 }
 0x256   : > { %13481 = vst [vmem:[#allocation178_spill] sm:$0xff] %v8831_v60  ;;  %v8836_v36 = vsel %vm4009_vm7, %v13483_v48, %v4569_v27  ;;  %v2186_v56 = vsel %vm1711_vm4, %v2184_v45, %v13484_v61  ;;  %v3133_v3 = vadd.f32 %v8474_v5, %v3041_v25  ;;  %v13485_v48 = vld [vmem:[#allocation72_spill] sm:$0xff]  ;;  %v13487_v61 = vld [vmem:[#allocation73_spill] sm:$0xff]  ;;  %v13489_v5 = vld [vmem:[#allocation75_spill] sm:$0xff]  ;;  %v8869_v38 = vmul.f32 %v13277_v50, %v13491_v55 }
 0x257   : > { %v8853_v8 = vmul.f32 %v8654_v30, %v13485_v48  ;;  %v8859_v45 = vmul.f32 %v8855_v49, %v13487_v61  ;;  %v8863_v25 = vmul.f32 %v13489_v5, %v8660_v2  ;;  %v2220_v39 = vadd.f32 %v2186_v56, %v2128_v19  ;;  %v13493_v27 = vld [vmem:[#allocation77_spill] sm:$0xff]  ;;  %13496 = vst [vmem:[#allocation159_spill] sm:$0xff] %v8877_v32  ;;  %v13508_v61 = vld [vmem:[#allocation176_spill] sm:$0xff] }
 0x258   : > { %v3225_v40 = vadd.f32 %v8500_v47, %v3133_v3  ;;  %13492 = vst [vmem:[#allocation179_spill] sm:$0xff] %v8869_v38  ;;  %v8873_v42 = vmul.f32 %v13397_v63, %v13493_v27  ;;  %v13499_v47 = vld [vmem:[#allocation80_spill] sm:$0xff]  ;;  %13501 = vst [vmem:[#allocation183_spill] sm:$0xff] %v8890_v43  ;;  %v8894_v11 = vmul.f32 %v13186_v4, %v8660_v2 }
 0x259   : > { %13486 = vst [vmem:[#allocation97_spill] sm:$0xff] %v8853_v8  ;;  %13488 = vst [vmem:[#allocation57_spill] sm:$0xff] %v8859_v45  ;;  %v8885_v56 = vmul.f32 %v8654_v30, %v13499_v47  ;;  %v2312_v19 = vadd.f32 %v2278_v14, %v2220_v39  ;;  %v8901_v26 = vmul.f32 %v13277_v50, %v13188_v22  ;;  %v13504_v14 = vrot.slane %v8796_v35, 3  ;;  %v13514_v35 = vld [vmem:[#allocation14_spill] sm:$0xff] }
 0x25a   : > { %13490 = vst [vmem:[#allocation170_spill] sm:$0xff] %v8863_v25  ;;  %13494 = vst [vmem:[#allocation181_spill] sm:$0xff] %v8873_v42  ;;  %v3317_v3 = vadd.f32 %v8505_v44, %v3225_v40  ;;  %v8909_v37 = vmul.f32 %v13397_v63, %v13191_v10  ;;  %v8923_v5 = vmul.f32 %v13404_v6, %v13337_v23 }
 0x25b   : > { %13500 = vst [vmem:[#allocation182_spill] sm:$0xff] %v8885_v56  ;;  %13502 = vst [vmem:[#allocation110_spill] sm:$0xff] %v8894_v11  ;;  %v2364_v40 = vadd.f32 %v13504_v14, %v2312_v19  ;;  %v789_v48 = vmul.f32 %v13508_v61, %v13273_v59  ;;  %v825_v21 = vmul.f32 %v13277_v50, %v13274_v29  ;;  %v13510_v14 = vld [vmem:[#allocation12_spill] sm:$0xff]  ;;  %v13512_v19 = vld [vmem:[#allocation13_spill] sm:$0xff] }
 0x25c   : > { %13503 = vst [vmem:[#allocation103_spill] sm:$0xff] %v8901_v26  ;;  %v3410_v44 = vadd.f32 %v8512_v54, %v3317_v3  ;;  %13505 = vst [vmem:[#allocation35_spill] sm:$0xff] %v8909_v37  ;;  %v13506_v54 = vrot.slane %v8802_v46, 3  ;;  %v8935_v39 = vmul.f32 %v13407_v57, %v13510_v14  ;;  %v8939_v46 = vmul.f32 %v8654_v30, %v13512_v19  ;;  %v13536_v59 = vld [vmem:[#allocation107_spill] sm:$0xff] }
 0x25d   : > { %13507 = vst [vmem:[#allocation108_spill] sm:$0xff] %v8923_v5  ;;  %v8943_v61 = vmul.f32 %v8855_v49, %v13514_v35  ;;  %v841_v12 = vadd.f32 %v825_v21, %v789_v48  ;;  %v8956_v7 = vmul.f32 %v13277_v50, %v13521_v52  ;;  %v8960_v18 = vmul.f32 %v13397_v63, %v13523_v58  ;;  %v13525_v48 = vld [vmem:[#allocation26_spill] sm:$0xff]  ;;  %v13541_v50 = vld [vmem:[#allocation21_spill] sm:$0xff] }
 0x25e   : > { %v3502_v51 = vadd.f32 %v8519_v28, %v3410_v44  ;;  %v2416_v3 = vadd.f32 %v13506_v54, %v2364_v40  ;;  %v13509_v44 = vrot.slane %v8823_v9, 3  ;;  %13511 = vst [vmem:[#allocation184_spill] sm:$0xff] %v8935_v39  ;;  %13513 = vst [vmem:[#allocation65_spill] sm:$0xff] %v8939_v46  ;;  %v13519_v9 = vld [vmem:[#allocation15_spill] sm:$0xff]  ;;  %v9000_v37 = vmul.f32 %v8855_v49, %v13541_v50 }
 0x25f   : > { %13515 = vst [vmem:[#allocation45_spill] sm:$0xff] %v8943_v61  ;;  %v8952_v41 = vmul.f32 %v13519_v9, %v8660_v2  ;;  %13522 = vst [vmem:[#allocation106_spill] sm:$0xff] %v8956_v7 }
 0x260   : > { %v3594_v28 = vadd.f32 %v8524_v0, %v3502_v51  ;;  %v2468_v40 = vadd.f32 %v13509_v44, %v2416_v3  ;;  %v861_v0 = vmul.f32 %v13397_v63, %v13516_v15  ;;  %v13517_v51 = vld [vmem:[#allocation98_spill] sm:$0xff]  ;;  %v13518_v44 = vrot.slane %v8831_v60, 3  ;;  %13524 = vst [vmem:[#allocation137_spill] sm:$0xff] %v8960_v18  ;;  %v13534_v63 = vld [vmem:[#allocation19_spill] sm:$0xff]  ;;  %13542 = vst [vmem:[#allocation117_spill] sm:$0xff] %v9000_v37 }
 0x261   : > { %13520 = vst [vmem:[#allocation101_spill] sm:$0xff] %v8952_v41  ;;  %v897_v15 = vmul.f32 %v13404_v6, %v13525_v48  ;;  %v13528_v60 = vrot.slane %v8853_v8, 3  ;;  %v13530_v48 = vld [vmem:[#allocation60_spill] sm:$0xff] }
 0x262   : > { %v3686_v3 = vadd.f32 %v13517_v51, %v3594_v28  ;;  %v2520_v54 = vadd.f32 %v13518_v44, %v2468_v40  ;;  %v877_v21 = vadd.f32 %v861_v0, %v841_v12  ;;  %v13526_v28 = vld [vmem:[#allocation27_spill] sm:$0xff]  ;;  %v13529_v0 = vld [vmem:[#allocation28_spill] sm:$0xff] }
 0x263   : > { %v933_v51 = vmul.f32 %v13407_v57, %v13526_v28  ;;  %v13527_v40 = vld [vmem:[#allocation43_spill] sm:$0xff]  ;;  %v969_v58 = vmul.f32 %v8654_v30, %v13529_v0  ;;  %v13531_v28 = vrot.slane %v8859_v45, 3 }
 0x264   : > { %v3778_v44 = vadd.f32 %v13527_v40, %v3686_v3  ;;  %v2572_v29 = vadd.f32 %v13528_v60, %v2520_v54  ;;  %v913_v12 = vadd.f32 %v897_v15, %v877_v21  ;;  %v13532_v60 = vld [vmem:[#allocation18_spill] sm:$0xff]  ;;  %v8987_v15 = vmul.f32 %v13407_v57, %v13534_v63 }
 0x265   : > { %v8981_v54 = vmul.f32 %v13404_v6, %v13532_v60  ;;  %v13540_v6 = vld [vmem:[#allocation172_spill] sm:$0xff]  ;;  %v13543_v57 = vld [vmem:[#allocation30_spill] sm:$0xff]  ;;  %v13549_v60 = vld [vmem:[#allocation49_spill] sm:$0xff] }
 0x266   : > { %v3870_v52 = vadd.f32 %v13530_v48, %v3778_v44  ;;  %v2624_v3 = vadd.f32 %v13531_v28, %v2572_v29  ;;  %13535 = vst [vmem:[#allocation112_spill] sm:$0xff] %v8987_v15  ;;  %v949_v21 = vadd.f32 %v933_v51, %v913_v12  ;;  %v13537_v44 = vrot.slane %v8863_v25, 3  ;;  %v13538_v28 = vld [vmem:[#allocation20_spill] sm:$0xff]  ;;  %v13545_v12 = vld [vmem:[#allocation111_spill] sm:$0xff] }
 0x267   : > { %13533 = vst [vmem:[#allocation116_spill] sm:$0xff] %v8981_v54  ;;  %v8994_v40 = vmul.f32 %v8654_v30, %v13538_v28  ;;  %v2695_v45 = vmul.f32 %v13540_v6, %v13491_v55  ;;  %v1005_v51 = vmul.f32 %v8855_v49, %v13543_v57  ;;  %v9011_v28 = vmul.f32 %v13448_v31, %v8660_v2  ;;  %v13548_v55 = vld [vmem:[#allocation48_spill] sm:$0xff] }
 0x268   : > { %v3962_v48 = vadd.f32 %v13536_v59, %v3870_v52  ;;  %v2676_v29 = vadd.f32 %v13537_v44, %v2624_v3  ;;  %v985_v8 = vadd.f32 %v969_v58, %v949_v21  ;;  %v13544_v59 = vld [vmem:[#allocation131_spill] sm:$0xff]  ;;  %v13546_v44 = vrot.slane %v8869_v38, 4  ;;  %v13551_v31 = vld [vmem:[#allocation96_spill] sm:$0xff]  ;;  %v13552_v21 = vld [vmem:[#allocation142_spill] sm:$0xff] }
 0x269   : > { %13539 = vst [vmem:[#allocation169_spill] sm:$0xff] %v8994_v40  ;;  %v2787_v52 = vmul.f32 %v13544_v59, %v13493_v27  ;;  %13547 = vst [vmem:[#allocation125_spill] sm:$0xff] %v9011_v28  ;;  %v2879_v50 = vmul.f32 %v13548_v55, %v13495_v62  ;;  %v2971_v27 = vmul.f32 %v13549_v60, %v13497_v13  ;;  %v2730_v38 = vrot.slane %v2695_v45, 4  ;;  %v13555_v45 = vld [vmem:[#allocation89_spill] sm:$0xff] }
 0x26a   : > { %v4055_v3 = vadd.f32 %v13545_v12, %v3962_v48  ;;  %v2768_v25 = vadd.f32 %v13546_v44, %v2676_v29  ;;  %v1021_v63 = vadd.f32 %v1005_v51, %v985_v8  ;;  %v13550_v12 = vrot.slane %v8873_v42, 4  ;;  %v9022_v44 = vld [vmem:[#allocation4 + $0xe8] sm:$0xff] }
 0x26b   : > { %v3063_v2 = vmul.f32 %v13551_v31, %v13499_v47  ;;  %v13553_v8 = vrot.slane %v13552_v21, 1  ;;  %v2822_v15 = vrot.slane %v2787_v52, 4  ;;  %v13556_v42 = vrot.slane %v13555_v45, 1 }
 0x26c   : > { %v4147_v48 = vadd.f32 %v8690_v16, %v4055_v3  ;;  %v2860_v29 = vadd.f32 %v13550_v12, %v2768_v25  ;;  %v13554_v16 = vrot.slane %v8877_v32, 4  ;;  %v2914_v12 = vrot.slane %v2879_v50, 4  ;;  %v13602_v32 = vld [vmem:[#allocation25_spill] sm:$0xff] }
 0x26d   : > { %v1114_v51 = vadd.f32 %v13553_v8, %v1021_v63  ;;  %v3006_v47 = vrot.slane %v2971_v27, 4  ;;  %v3155_v62 = vmul.f32 %v13181_v34, %v8419_v1  ;;  %v3247_v21 = vmul.f32 %v13186_v4, %v9022_v44 }
 0x26e   : > { %v4239_v13 = vadd.f32 %v8724_v20, %v4147_v48  ;;  %v2952_v3 = vadd.f32 %v13554_v16, %v2860_v29  ;;  %v13557_v20 = vrot.slane %v8881_v33, 4  ;;  %v13558_v48 = vld [vmem:[#allocation166_spill] sm:$0xff]  ;;  %v3098_v50 = vrot.slane %v3063_v2, 4  ;;  %v13565_v2 = vld [vmem:[#allocation149_spill] sm:$0xff] }
 0x26f   : > { %v1206_v54 = vadd.f32 %v13556_v42, %v1114_v51  ;;  %v13559_v29 = vrot.slane %v13558_v48, 4  ;;  %v13560_v16 = vld [vmem:[#allocation90_spill] sm:$0xff]  ;;  %v13562_v51 = vld [vmem:[#allocation32_spill] sm:$0xff]  ;;  %v13566_v48 = vrot.slane %v13565_v2, 4 }
 0x270   : > { %v4331_v63 = vadd.f32 %v8729_v24, %v4239_v13  ;;  %v3044_v52 = vadd.f32 %v13557_v20, %v2952_v3  ;;  %v13561_v42 = vrot.slane %v13560_v16, 1  ;;  %v13563_v45 = vrot.slane %v13562_v51, 4  ;;  %v13569_v51 = vld [vmem:[#allocation135_spill] sm:$0xff] }
 0x271   : > { %v9046_v8 = vsel %vm506_vm0, %v13559_v29, %v2730_v38  ;;  %v3339_v24 = vmul.f32 %v13540_v6, %v13188_v22  ;;  %v3432_v13 = vmul.f32 %v13544_v59, %v13191_v10  ;;  %v13564_v38 = vrot.slane %v8885_v56, 4  ;;  %v13567_v29 = vld [vmem:[#allocation127_spill] sm:$0xff]  ;;  %v13601_v56 = vld [vmem:[#allocation42_spill] sm:$0xff] }
 0x272   : > { %v1298_v27 = vadd.f32 %v13561_v42, %v1206_v54  ;;  %v9053_v25 = vsel %vm506_vm0, %v13563_v45, %v2822_v15  ;;  %v4423_v3 = vadd.f32 %v8809_v17, %v4331_v63  ;;  %v9065_v54 = vsel %vm506_vm0, %v13566_v48, %v2914_v12  ;;  %v13572_v12 = vld [vmem:[#allocation93_spill] sm:$0xff] }
 0x273   : > { %v3136_v20 = vadd.f32 %v13564_v38, %v3044_v52  ;;  %v3524_v15 = vmul.f32 %v13548_v55, %v13337_v23  ;;  %v13568_v16 = vrot.slane %v13567_v29, 1  ;;  %v13570_v45 = vrot.slane %v13569_v51, 4 }
 0x274   : > { %v3190_v17 = vrot.slane %v3155_v62, 4  ;;  %v3282_v63 = vrot.slane %v3247_v21, 4  ;;  %v4515_v52 = vadd.f32 %v8816_v53, %v4423_v3  ;;  %v13571_v38 = vrot.slane %v8890_v43, 4 }
 0x275   : > { %v1390_v42 = vadd.f32 %v13568_v16, %v1298_v27  ;;  %v9074_v59 = vsel %vm506_vm0, %v13570_v45, %v3006_v47  ;;  %v13573_v48 = vrot.slane %v13572_v12, 4  ;;  %v3616_v55 = vmul.f32 %v13549_v60, %v13510_v14  ;;  %v13574_v27 = vld [vmem:[#allocation31_spill] sm:$0xff]  ;;  %v13577_v45 = vld [vmem:[#allocation34_spill] sm:$0xff]  ;;  %v13579_v12 = vld [vmem:[#allocation161_spill] sm:$0xff] }
 0x276   : > { %v3228_v2 = vadd.f32 %v13571_v38, %v3136_v20  ;;  %v13575_v29 = vrot.slane %v13574_v27, 1  ;;  %v3375_v47 = vrot.slane %v3339_v24, 5  ;;  %v3467_v51 = vrot.slane %v3432_v13, 5  ;;  %v13581_v13 = vld [vmem:[#allocation140_spill] sm:$0xff] }
 0x277   : > { %v9082_v58 = vsel %vm506_vm0, %v13573_v48, %v3098_v50  ;;  %v3708_v62 = vmul.f32 %v13551_v31, %v13512_v19  ;;  %v4607_v53 = vadd.f32 %v8836_v36, %v4515_v52  ;;  %v13576_v21 = vrot.slane %v8894_v11, 4 }
 0x278   : > { %v1482_v16 = vadd.f32 %v13575_v29, %v1390_v42  ;;  %v3559_v20 = vrot.slane %v3524_v15, 5  ;;  %v3800_v50 = vmul.f32 %v13514_v35, %v8419_v1  ;;  %v13578_v38 = vrot.slane %v13577_v45, 1  ;;  %v9114_v15 = vld [vmem:[%s11672_s5] ss:$0 sm:$0xff]  ;;  %v13619_v35 = vld [vmem:[#allocation29_spill] sm:$0xff] }
 0x279   : > { %v3320_v3 = vadd.f32 %v13576_v21, %v3228_v2  ;;  %v13580_v48 = vrot.slane %v13579_v12, 4  ;;  %v13582_v42 = vrot.slane %v13581_v13, 4  ;;  %v9109_v36 = vmul.f32 %v13519_v9, %v9022_v44  ;;  %v13586_v21 = vld [vmem:[#allocation145_spill] sm:$0xff]  ;;  %v13588_v12 = vld [vmem:[#allocation156_spill] sm:$0xff] }
 0x27a   : > { %v1574_v60 = vadd.f32 %v13578_v38, %v1482_v16  ;;  %v9117_v52 = vadd.f32 %v9114_v15, %v4607_v53  ;;  %v3651_v29 = vrot.slane %v3616_v55, 5  ;;  %v13585_v16 = vld [vmem:[#allocation16_spill] sm:$0xff]  ;;  %v13587_v45 = vrot.slane %v13586_v21, 1 }
 0x27b   : > { %v9100_v24 = vsel %vm506_vm0, %v13580_v48, %v3190_v17  ;;  %v9105_v27 = vsel %vm506_vm0, %v13582_v42, %v3282_v63  ;;  %v13584_v17 = vrot.slane %v8901_v26, 5  ;;  %v3984_v63 = vmul.f32 %v13540_v6, %v13585_v16  ;;  %v13590_v42 = vld [vmem:[#allocation146_spill] sm:$0xff]  ;;  %v13610_v16 = vld [vmem:[#allocation136_spill] sm:$0xff] }
 0x27c   : > { %13583 = vst [vmem:[#allocation130_spill] sm:$0xff] %v9117_v52  ;;  %v1666_v38 = vadd.f32 %v13587_v45, %v1574_v60  ;;  %v13589_v48 = vrot.slane %v13588_v12, 5  ;;  %v13591_v11 = vrot.slane %v13590_v42, 5  ;;  %v3743_v43 = vrot.slane %v3708_v62, 5  ;;  %v13594_v26 = vld [vmem:[#allocation94_spill] sm:$0xff]  ;;  %v13598_v42 = vld [vmem:[#allocation23_spill] sm:$0xff] }
 0x27d   : > { %v3413_v2 = vadd.f32 %v13584_v17, %v3320_v3  ;;  %v4658_v55 = vsel %vm4645_vm8, %v9117_v52, 0.0  ;;  %v13592_v3 = vld [vmem:[#allocation35_spill] sm:$0xff]  ;;  %v13595_v21 = vrot.slane %v13594_v26, 5  ;;  %v3835_v45 = vrot.slane %v3800_v50, 5  ;;  %v13600_v62 = vld [vmem:[#allocation24_spill] sm:$0xff] }
 0x27e   : > { %v9128_v13 = vsel %vm3364_vm6, %v13589_v48, %v3375_v47  ;;  %v9133_v53 = vsel %vm3364_vm6, %v13591_v11, %v3467_v51  ;;  %v13593_v17 = vrot.slane %v13592_v3, 5  ;;  %4659 = vadd.xlane.f32.xlu1 %v4658_v55  ;;  %v13596_v47 = vld [vmem:[#allocation87_spill] sm:$0xff]  ;;  %v828_v33 = vmul.f32 %v13601_v56, %v13600_v62 }
 0x27f   : > { %v9142_v60 = vsel %vm3364_vm6, %v13595_v21, %v3559_v20  ;;  %v13597_v12 = vrot.slane %v13596_v47, 2  ;;  %v13599_v11 = vld [vmem:[#allocation99_spill] sm:$0xff]  ;;  %v3927_v55 = vrot.slane %v9109_v36, 5  ;;  %v13608_v21 = vld [vmem:[#allocation102_spill] sm:$0xff]  ;;  %v13611_v9 = vrot.slane %v13610_v16, 5  ;;  %v13618_v36 = vld [vmem:[#allocation133_spill] sm:$0xff] }
 0x280   : > { %v3505_v6 = vadd.f32 %v13593_v17, %v3413_v2  ;;  %v792_v51 = vmul.f32 %v13599_v11, %v13598_v42  ;;  %v13603_v52 = vld [vmem:[#allocation63_spill] sm:$0xff]  ;;  %v13604_v2 = vrot.slane %v8923_v5, 5  ;;  %v13605_v17 = vld [vmem:[#allocation164_spill] sm:$0xff]  ;;  %v13609_v47 = vrot.slane %v13608_v21, 2  ;;  %v13613_v42 = vld [vmem:[#allocation26_spill] sm:$0xff] }
 0x281   : > { %v1759_v48 = vadd.f32 %v13597_v12, %v1666_v38  ;;  %v864_v3 = vmul.f32 %v13603_v52, %v13602_v32  ;;  %v13606_v20 = vrot.slane %v13605_v17, 5  ;;  %v4020_v38 = vrot.slane %v3984_v63, 6  ;;  %v13614_v5 = vld [vmem:[#allocation113_spill] sm:$0xff]  ;;  %v9177_v21 = vld [vmem:[#allocation4 + $0x80] sm:$0xff] }
 0x282   : > { %v3597_v26 = vadd.f32 %v13604_v2, %v3505_v6  ;;  %v9165_v62 = vsel %vm3364_vm6, %v13611_v9, %v3743_v43  ;;  %v844_v32 = vadd.f32 %v828_v33, %v792_v51  ;;  %v900_v6 = vmul.f32 %v13614_v5, %v13613_v42  ;;  %13620 = vst [vmem:[#allocation123_spill] sm:$0xff] %v9177_v21  ;;  %v13622_v33 = vld [vmem:[#allocation177_spill] sm:$0xff]  ;;  %v13623_v43 = vld [vmem:[#allocation150_spill] sm:$0xff] }
 0x283   : > { %v9157_v50 = vsel %vm3364_vm6, %v13606_v20, %v3651_v29  ;;  %v1851_v12 = vadd.f32 %v13609_v47, %v1759_v48  ;;  %13612 = vst [vmem:[#allocation126_spill] sm:$0xff] %v9165_v62  ;;  %v13615_v2 = vrot.slane %v8935_v39, 5  ;;  %v9171_v29 = vld [vmem:[#allocation4 + $0x108] sm:$0xff]  ;;  %v13617_v20 = vld [vmem:[#allocation27_spill] sm:$0xff]  ;;  %v1044_v48 = vmul.f32 %v13599_v11, %v13619_v35  ;;  %4734 = vadd.xlane.f32.xlu1 %v13622_v33  ;;  %v13625_v47 = vld [vmem:[#allocation33_spill] sm:$0xff] }
 0x284   : > { %13607 = vst [vmem:[#allocation128_spill] sm:$0xff] %v9157_v50  ;;  %13616 = vst [vmem:[#allocation62_spill] sm:$0xff] %v9171_v29  ;;  %v936_v63 = vmul.f32 %v13618_v36, %v13617_v20  ;;  %v9181_v9 = vmul.f32 %v9177_v21, %v13619_v35  ;;  %v13624_v16 = vrot.slane %v13623_v43, 2  ;;  %v9188_v39 = vld [vmem:[#allocation4 + $0x98] sm:$0xff]  ;;  %v13628_v42 = vrot.slane %v8939_v46, 5  ;;  %v13629_v35 = vld [vmem:[#allocation143_spill] sm:$0xff] }
 0x285   : > { %v3689_v17 = vadd.f32 %v13615_v2, %v3597_v26  ;;  %v880_v26 = vadd.f32 %v864_v3, %v844_v32  ;;  %v1137_v2 = vmul.f32 %v13601_v56, %v13625_v47  ;;  %13626 = vst [vmem:[#allocation185_spill] sm:$0xff] %v9188_v39  ;;  %v9192_v20 = vmul.f32 %v9188_v39, %v13625_v47  ;;  %v13632_v43 = vld [vmem:[#allocation175_spill] sm:$0xff]  ;;  %v13633_v3 = vld [vmem:[#allocation36_spill] sm:$0xff] }
 0x286   : > { %13621 = vst [vmem:[#allocation109_spill] sm:$0xff] %v9181_v9  ;;  %v1943_v51 = vadd.f32 %v13624_v16, %v1851_v12  ;;  %v13630_v19 = vrot.slane %v13629_v35, 5  ;;  %v972_v32 = vmul.f32 %v13529_v0, %v13632_v43  ;;  %v1229_v12 = vmul.f32 %v13603_v52, %v13633_v3  ;;  %v13634_v16 = vld [vmem:[#allocation153_spill] sm:$0xff] }
 0x287   : > { %13627 = vst [vmem:[#allocation66_spill] sm:$0xff] %v9192_v20  ;;  %v3781_v62 = vadd.f32 %v13628_v42, %v3689_v17  ;;  %v13635_v14 = vrot.slane %v13634_v16, 2  ;;  %v916_v23 = vadd.f32 %v900_v6, %v880_v26  ;;  %v1008_v47 = vmul.f32 %v13543_v57, %v9171_v29  ;;  %v9212_v17 = vld [vmem:[#allocation4 + $0xb0] sm:$0xff]  ;;  %v13641_v26 = vld [vmem:[#allocation38_spill] sm:$0xff] }
 0x288   : > { %v9199_v33 = vsel %vm3364_vm6, %v13630_v19, %v3835_v45  ;;  %v1082_v46 = vrot.slane %v1044_v48, 1  ;;  %v13636_v42 = vrot.slane %v8943_v61, 5  ;;  %v1174_v45 = vrot.slane %v1137_v2, 1  ;;  %13637 = vst [vmem:[#allocation115_spill] sm:$0xff] %v9212_v17 }
 0x289   : > { %13631 = vst [vmem:[#allocation114_spill] sm:$0xff] %v9199_v33  ;;  %v2035_v50 = vadd.f32 %v13635_v14, %v1943_v51  ;;  %v9216_v0 = vmul.f32 %v9212_v17, %v13633_v3  ;;  %v13639_v33 = vld [vmem:[#allocation132_spill] sm:$0xff]  ;;  %v952_v6 = vadd.f32 %v936_v63, %v916_v23  ;;  %v1321_v48 = vmul.f32 %v13614_v5, %v13641_v26  ;;  %v13644_v3 = vld [vmem:[#allocation171_spill] sm:$0xff] }
 0x28a   : > { %v3873_v35 = vadd.f32 %v13636_v42, %v3781_v62  ;;  %v13640_v16 = vrot.slane %v13639_v33, 2  ;;  %v13642_v62 = vrot.slane %v8952_v41, 5  ;;  %v1266_v19 = vrot.slane %v1229_v12, 1 }
 0x28b   : > { %13638 = vst [vmem:[#allocation118_spill] sm:$0xff] %v9216_v0  ;;  %v9228_v61 = vmul.f32 %v8654_v30, %v13641_v26  ;;  %v13645_v57 = vrot.slane %v13644_v3, 2  ;;  %v988_v12 = vadd.f32 %v972_v32, %v952_v6  ;;  %v13653_v2 = vrot.slane %v9181_v9, 1  ;;  %v13666_v9 = vld [vmem:[#allocation122_spill] sm:$0xff] }
 0x28c   : > { %v2127_v14 = vadd.f32 %v13640_v16, %v2035_v50  ;;  %v3965_v42 = vadd.f32 %v13642_v62, %v3873_v35  ;;  %v13646_v50 = vld [vmem:[#allocation167_spill] sm:$0xff]  ;;  %v13652_v35 = vrot.slane %v8956_v7, 6  ;;  %v1358_v3 = vrot.slane %v1321_v48, 1  ;;  %v13660_v48 = vld [vmem:[#allocation17_spill] sm:$0xff]  ;;  %v13668_v7 = vld [vmem:[#allocation116_spill] sm:$0xff] }
 0x28d   : > { %13643 = vst [vmem:[#allocation186_spill] sm:$0xff] %v9228_v61  ;;  %v13647_v23 = vrot.slane %v13646_v50, 5  ;;  %v13649_v16 = vld [vmem:[#allocation147_spill] sm:$0xff]  ;;  %v1084_v26 = vsel %vm1066_vm3, %v1082_v46, %v13653_v2  ;;  %v13655_v50 = vld [vmem:[#allocation154_spill] sm:$0xff]  ;;  %v13658_v6 = vrot.slane %v8960_v18, 6  ;;  %v9260_v46 = vld [vmem:[#allocation4 + $0x70] sm:$0xff] }
 0x28e   : > { %v2219_v33 = vadd.f32 %v13645_v57, %v2127_v14  ;;  %v13650_v51 = vrot.slane %v13649_v16, 6  ;;  %v4058_v62 = vadd.f32 %v13652_v35, %v3965_v42  ;;  %v13654_v57 = vld [vmem:[#allocation41_spill] sm:$0xff]  ;;  %v1024_v16 = vadd.f32 %v1008_v47, %v988_v12  ;;  %13659 = vst [vmem:[#allocation98_spill] sm:$0xff] %v9260_v46 }
 0x28f   : > { %v9235_v63 = vsel %vm3364_vm6, %v13647_v23, %v3927_v55  ;;  %v1413_v14 = vmul.f32 %v13618_v36, %v13654_v57  ;;  %v13656_v55 = vrot.slane %v13655_v50, 2  ;;  %v9256_v32 = vmul.f32 %v8855_v49, %v13654_v57  ;;  %v13663_v35 = vld [vmem:[#allocation105_spill] sm:$0xff] }
 0x290   : > { %13648 = vst [vmem:[#allocation187_spill] sm:$0xff] %v9235_v63  ;;  %v9240_v41 = vsel %vm4009_vm7, %v13650_v51, %v4020_v38  ;;  %v9251_v63 = vld [vmem:[#allocation4 + $0x110] sm:$0xff]  ;;  %v4150_v51 = vadd.f32 %v13658_v6, %v4058_v62  ;;  %v9264_v42 = vmul.f32 %v9260_v46, %v13660_v48  ;;  %v13661_v2 = vrot.slane %v9192_v20, 1  ;;  %v13665_v62 = vld [vmem:[#allocation39_spill] sm:$0xff]  ;;  %v9316_v48 = vld [vmem:[#allocation4 + $0x88] sm:$0xff] }
 0x291   : > { %13651 = vst [vmem:[#allocation188_spill] sm:$0xff] %v9240_v41  ;;  %v2311_v23 = vadd.f32 %v13656_v55, %v2219_v33  ;;  %13657 = vst [vmem:[#allocation176_spill] sm:$0xff] %v9256_v32  ;;  %v13662_v47 = vrot.slane %v9216_v0, 1  ;;  %v13664_v50 = vrot.slane %v13663_v35, 3  ;;  %v1117_v38 = vadd.f32 %v1084_v26, %v1024_v16  ;;  %v13679_v41 = vld [vmem:[#allocation50_spill] sm:$0xff] }
 0x292   : > { %v1176_v33 = vsel %vm1066_vm3, %v1174_v45, %v13661_v2  ;;  %v1505_v6 = vmul.f32 %v13665_v62, %v13632_v43  ;;  %v9278_v18 = vmul.f32 %v13665_v62, %v13666_v9  ;;  %v13669_v57 = vrot.slane %v13668_v7, 6  ;;  %v13670_v45 = vld [vmem:[#allocation40_spill] sm:$0xff] }
 0x293   : > { %v1268_v12 = vsel %vm1066_vm3, %v1266_v19, %v13662_v47  ;;  %v2363_v55 = vadd.f32 %v13664_v50, %v2311_v23  ;;  %v1450_v46 = vrot.slane %v1413_v14, 1  ;;  %v1597_v2 = vmul.f32 %v13670_v45, %v9171_v29  ;;  %v13672_v23 = vld [vmem:[#allocation152_spill] sm:$0xff] }
 0x294   : > { %13667 = vst [vmem:[#allocation43_spill] sm:$0xff] %v9278_v18  ;;  %v4242_v20 = vadd.f32 %v13669_v57, %v4150_v51  ;;  %v9286_v19 = vmul.f32 %v13670_v45, %v9251_v63  ;;  %v13673_v26 = vrot.slane %v13672_v23, 3  ;;  %v1209_v47 = vadd.f32 %v1176_v33, %v1117_v38  ;;  %v13675_v7 = vld [vmem:[#allocation112_spill] sm:$0xff]  ;;  %v13677_v51 = vld [vmem:[#allocation47_spill] sm:$0xff]  ;;  %v13680_v38 = vld [vmem:[#allocation134_spill] sm:$0xff] }
 0x295   : > { %v13674_v35 = vrot.slane %v9228_v61, 1  ;;  %v13676_v57 = vrot.slane %v13675_v7, 6  ;;  %v1689_v62 = vmul.f32 %v13599_v11, %v13677_v51  ;;  %v9300_v45 = vmul.f32 %v9177_v21, %v13677_v51  ;;  %v13684_v7 = vld [vmem:[#allocation155_spill] sm:$0xff] }
 0x296   : > { %13671 = vst [vmem:[#allocation60_spill] sm:$0xff] %v9286_v19  ;;  %v2415_v16 = vadd.f32 %v13673_v26, %v2363_v55  ;;  %v1782_v55 = vmul.f32 %v13601_v56, %v13679_v41  ;;  %v13681_v33 = vrot.slane %v13680_v38, 3  ;;  %v1301_v26 = vadd.f32 %v1268_v12, %v1209_v47 }
 0x297   : > { %v1360_v50 = vsel %vm1066_vm3, %v1358_v3, %v13674_v35  ;;  %v4334_v14 = vadd.f32 %v13676_v57, %v4242_v20  ;;  %13678 = vst [vmem:[#allocation107_spill] sm:$0xff] %v9300_v45  ;;  %v1542_v3 = vrot.slane %v1505_v6, 1  ;;  %v13682_v0 = vrot.slane %v8994_v40, 6 }
 0x298   : > { %v2467_v23 = vadd.f32 %v13681_v33, %v2415_v16  ;;  %v1634_v57 = vrot.slane %v1597_v2, 1  ;;  %v9312_v61 = vmul.f32 %v9188_v39, %v13679_v41  ;;  %v13685_v51 = vrot.slane %v13684_v7, 3  ;;  %v13686_v16 = vld [vmem:[#allocation18_spill] sm:$0xff]  ;;  %v13689_v7 = vld [vmem:[#allocation163_spill] sm:$0xff]  ;;  %v13691_v41 = vld [vmem:[#allocation52_spill] sm:$0xff] }
 0x299   : > { %v4426_v20 = vadd.f32 %v13682_v0, %v4334_v14  ;;  %v9320_v12 = vmul.f32 %v9316_v48, %v13686_v16  ;;  %v1393_v6 = vadd.f32 %v1360_v50, %v1301_v26  ;;  %v13687_v47 = vrot.slane %v9256_v32, 1 }
 0x29a   : > { %13683 = vst [vmem:[#allocation172_spill] sm:$0xff] %v9312_v61  ;;  %v2519_v56 = vadd.f32 %v13685_v51, %v2467_v23  ;;  %v13688_v2 = vrot.slane %v9000_v37, 6  ;;  %v1727_v38 = vrot.slane %v1689_v62, 2  ;;  %v12218_v33 = vrot.slane %v9300_v45, 2 }
 0x29b   : > { %v1452_v0 = vsel %vm1066_vm3, %v1450_v46, %v13687_v47  ;;  %v1819_v11 = vrot.slane %v1782_v55, 2  ;;  %v13690_v51 = vrot.slane %v13689_v7, 3  ;;  %v12217_v40 = vrot.slane %v9312_v61, 2 }
 0x29c   : > { %v4518_v14 = vadd.f32 %v13688_v2, %v4426_v20  ;;  %v1485_v35 = vadd.f32 %v1452_v0, %v1393_v6  ;;  %v1874_v50 = vmul.f32 %v13603_v52, %v13691_v41  ;;  %v13692_v26 = vrot.slane %v9011_v28, 6  ;;  %v13696_v6 = vld [vmem:[#allocation139_spill] sm:$0xff]  ;;  %v13698_v52 = vld [vmem:[#allocation53_spill] sm:$0xff]  ;;  %v13705_v28 = vld [vmem:[#allocation58_spill] sm:$0xff] }
 0x29d   : > { %v2571_v23 = vadd.f32 %v13690_v51, %v2519_v56  ;;  %v13693_v46 = vrot.slane %v9278_v18, 1  ;;  %v13694_v62 = vrot.slane %v9286_v19, 1  ;;  %v9343_v56 = vmul.f32 %v9212_v17, %v13691_v41  ;;  %v9356_v51 = vld [vmem:[#allocation4 + $0xa0] sm:$0xff] }
 0x29e   : > { %v4610_v32 = vadd.f32 %v13692_v26, %v4518_v14  ;;  %v13697_v47 = vrot.slane %v13696_v6, 3  ;;  %v1966_v7 = vmul.f32 %v13614_v5, %v13698_v52  ;;  %v9351_v14 = vmul.f32 %v8654_v30, %v13698_v52  ;;  %v13703_v5 = vld [vmem:[#allocation92_spill] sm:$0xff]  ;;  %v13770_v41 = vld [vmem:[#allocation15_spill] sm:$0xff] }
 0x29f   : > { %v1544_v20 = vsel %vm1066_vm3, %v1542_v3, %v13693_v46  ;;  %v1636_v55 = vsel %vm1066_vm3, %v1634_v57, %v13694_v62  ;;  %13695 = vst [vmem:[#allocation131_spill] sm:$0xff] %v9343_v56  ;;  %v13701_v57 = vld [vmem:[#allocation19_spill] sm:$0xff]  ;;  %v13702_v46 = vld [vmem:[#allocation20_spill] sm:$0xff]  ;;  %v12224_v18 = vrot.slane %v9343_v56, 2  ;;  %v9585_v52 = vmul.f32 %v9212_v17, %v13686_v16 }
 0x2a0   : > { %v2623_v0 = vadd.f32 %v13697_v47, %v2571_v23  ;;  %v1577_v2 = vadd.f32 %v1544_v20, %v1485_v35  ;;  %13699 = vst [vmem:[#allocation111_spill] sm:$0xff] %v9351_v14  ;;  %v9354_v3 = vadd.f32 %v9114_v15, %v4610_v32  ;;  %v4261_v26 = vmul.f32 %v9356_v51, %v13701_v57 }
 0x2a1   : > { %v4353_v62 = vmul.f32 %v13551_v31, %v13702_v46  ;;  %v1729_v35 = vsel %vm1711_vm4, %v1727_v38, %v12218_v33  ;;  %v13704_v23 = vrot.slane %v13703_v5, 3  ;;  %v1821_v32 = vsel %vm1711_vm4, %v1819_v11, %v12217_v40  ;;  %13779 = vst [vmem:[#allocation113_spill] sm:$0xff] %v9585_v52 }
 0x2a2   : > { %13700 = vst [vmem:[#allocation48_spill] sm:$0xff] %v9354_v3  ;;  %v1669_v6 = vadd.f32 %v1636_v55, %v1577_v2  ;;  %v1911_v47 = vrot.slane %v1874_v50, 2  ;;  %v4667_v19 = vsel %vm4641_vm5, %v9354_v3, 0.0  ;;  %v2058_v31 = vmul.f32 %v13618_v36, %v13705_v28  ;;  %v13707_v50 = vld [vmem:[#allocation54_spill] sm:$0xff]  ;;  %v13709_v36 = vld [vmem:[#allocation59_spill] sm:$0xff] }
 0x2a3   : > { %v2675_v20 = vadd.f32 %v13704_v23, %v2623_v0  ;;  %v9377_v38 = vmul.f32 %v8855_v49, %v13705_v28  ;;  %4668 = vadd.xlane.f32.xlu0 %v4667_v19  ;;  %v2003_v2 = vrot.slane %v1966_v7, 2  ;;  %v2150_v5 = vmul.f32 %v13707_v50, %v13632_v43  ;;  %v13711_v7 = vld [vmem:[#allocation21_spill] sm:$0xff]  ;;  %v13712_v43 = vld [vmem:[#allocation22_spill] sm:$0xff] }
 0x2a4   : > { %v1762_v0 = vadd.f32 %v1729_v35, %v1669_v6  ;;  %v9385_v23 = vmul.f32 %v13707_v50, %v13666_v9  ;;  %v2242_v40 = vmul.f32 %v13709_v36, %v9171_v29  ;;  %v9391_v33 = vmul.f32 %v13709_v36, %v9251_v63  ;;  %v13714_v50 = vld [vmem:[#allocation151_spill] sm:$0xff] }
 0x2a5   : > { %13706 = vst [vmem:[#allocation49_spill] sm:$0xff] %v9377_v38  ;;  %v2767_v55 = vadd.f32 %v9046_v8, %v2675_v20  ;;  %v4112_v19 = vrot.slane %v9264_v42, 6  ;;  %v4445_v35 = vmul.f32 %v13711_v7, %v8419_v1  ;;  %v4537_v6 = vmul.f32 %v13712_v43, %v9022_v44 }
 0x2a6   : > { %13708 = vst [vmem:[#allocation96_spill] sm:$0xff] %v9385_v23  ;;  %13710 = vst [vmem:[#allocation142_spill] sm:$0xff] %v9391_v33  ;;  %v1854_v20 = vadd.f32 %v1821_v32, %v1762_v0  ;;  %v1913_v11 = vsel %vm1711_vm4, %v1911_v47, %v12224_v18  ;;  %v2095_v61 = vrot.slane %v2058_v31, 2  ;;  %v13713_v42 = vrot.slane %v9351_v14, 2 }
 0x2a7   : > { %v2859_v8 = vadd.f32 %v9053_v25, %v2767_v55  ;;  %v4204_v25 = vrot.slane %v9320_v12, 6  ;;  %v2187_v32 = vrot.slane %v2150_v5, 2  ;;  %v12227_v0 = vrot.slane %v9385_v23, 2 }
 0x2a8   : > { %v1946_v55 = vadd.f32 %v1913_v11, %v1854_v20  ;;  %v2005_v1 = vsel %vm1711_vm4, %v2003_v2, %v13713_v42  ;;  %v2279_v36 = vrot.slane %v2242_v40, 2  ;;  %v12226_v56 = vrot.slane %v9391_v33, 2  ;;  %v13717_v42 = vld [vmem:[#allocation67_spill] sm:$0xff] }
 0x2a9   : > { %v2951_v37 = vadd.f32 %v9065_v54, %v2859_v8  ;;  %v4296_v31 = vrot.slane %v4261_v26, 6  ;;  %v4388_v18 = vrot.slane %v4353_v62, 6  ;;  %v13715_v54 = vrot.slane %v13714_v50, 6 }
 0x2aa   : > { %v2038_v45 = vadd.f32 %v2005_v1, %v1946_v55  ;;  %v4480_v11 = vrot.slane %v4445_v35, 6  ;;  %v4572_v8 = vrot.slane %v4537_v6, 6  ;;  %v13716_v2 = vrot.slane %v9377_v38, 2  ;;  %v13725_v6 = vld [vmem:[#allocation168_spill] sm:$0xff] }
 0x2ab   : > { %v3043_v47 = vadd.f32 %v9074_v59, %v2951_v37  ;;  %v9414_v12 = vsel %vm4009_vm7, %v13715_v54, %v4112_v19  ;;  %v9422_v37 = vmul.f32 %v9177_v21, %v13717_v42  ;;  %v13719_v59 = vld [vmem:[#allocation69_spill] sm:$0xff]  ;;  %v2189_v62 = vsel %vm1711_vm4, %v2187_v32, %v12227_v0  ;;  %v13727_v32 = vld [vmem:[#allocation55_spill] sm:$0xff]  ;;  %v13731_v0 = vld [vmem:[#allocation82_spill] sm:$0xff] }
 0x2ac   : > { %v2097_v5 = vsel %vm1711_vm4, %v2095_v61, %v13716_v2  ;;  %v9426_v26 = vmul.f32 %v9188_v39, %v13719_v59  ;;  %v2281_v50 = vsel %vm1711_vm4, %v2279_v36, %v12226_v56  ;;  %v13721_v61 = vld [vmem:[#allocation70_spill] sm:$0xff]  ;;  %v13726_v55 = vrot.slane %v13725_v6, 6  ;;  %v13729_v2 = vld [vmem:[#allocation104_spill] sm:$0xff] }
 0x2ad   : > { %v3135_v40 = vadd.f32 %v9082_v58, %v3043_v47  ;;  %v2130_v20 = vadd.f32 %v2097_v5, %v2038_v45  ;;  %13718 = vst [vmem:[#allocation89_spill] sm:$0xff] %v9422_v37  ;;  %v9436_v58 = vmul.f32 %v9212_v17, %v13721_v61  ;;  %v13723_v45 = vld [vmem:[#allocation71_spill] sm:$0xff]  ;;  %v13728_v47 = vrot.slane %v13727_v32, 6  ;;  %v13759_v42 = vld [vmem:[#allocation128_spill] sm:$0xff] }
 0x2ae   : > { %13720 = vst [vmem:[#allocation166_spill] sm:$0xff] %v9426_v26  ;;  %v9440_v19 = vmul.f32 %v8654_v30, %v13723_v45  ;;  %v9446_v1 = vsel %vm4009_vm7, %v13726_v55, %v4204_v25  ;;  %v13730_v5 = vrot.slane %v13729_v2, 6  ;;  %v13732_v33 = vrot.slane %v13731_v0, 6  ;;  %v13735_v55 = vld [vmem:[#allocation72_spill] sm:$0xff]  ;;  %v13747_v32 = vld [vmem:[#allocation79_spill] sm:$0xff] }
 0x2af   : > { %13722 = vst [vmem:[#allocation90_spill] sm:$0xff] %v9436_v58  ;;  %v3227_v35 = vadd.f32 %v9100_v24, %v3135_v40  ;;  %v9451_v54 = vsel %vm4009_vm7, %v13728_v47, %v4296_v31  ;;  %v2222_v36 = vadd.f32 %v2189_v62, %v2130_v20  ;;  %v13733_v40 = vld [vmem:[#allocation91_spill] sm:$0xff]  ;;  %v9470_v31 = vmul.f32 %v8855_v49, %v13735_v55  ;;  %v5599_v55 = vld [vmem:[#allocation4 + $0x68] sm:$0xff] }
 0x2b0   : > { %13724 = vst [vmem:[#allocation32_spill] sm:$0xff] %v9440_v19  ;;  %v9456_v56 = vsel %vm4009_vm7, %v13730_v5, %v4388_v18  ;;  %v9461_v24 = vsel %vm4009_vm7, %v13732_v33, %v4480_v11  ;;  %v13734_v6 = vrot.slane %v13733_v40, 6  ;;  %v12229_v18 = vrot.slane %v9422_v37, 3  ;;  %v13737_v11 = vld [vmem:[#allocation73_spill] sm:$0xff]  ;;  %v13745_v33 = vld [vmem:[#allocation78_spill] sm:$0xff]  ;;  %v13757_v61 = vld [vmem:[#allocation11_spill] sm:$0xff] }
 0x2b1   : > { %13736 = vst [vmem:[#allocation149_spill] sm:$0xff] %v9470_v31  ;;  %v3319_v20 = vadd.f32 %v9105_v27, %v3227_v35  ;;  %v2314_v62 = vadd.f32 %v2281_v50, %v2222_v36  ;;  %v9479_v47 = vmul.f32 %v13737_v11, %v13666_v9  ;;  %v13741_v50 = vld [vmem:[#allocation76_spill] sm:$0xff]  ;;  %v13743_v36 = vld [vmem:[#allocation77_spill] sm:$0xff]  ;;  %v9499_v0 = vmul.f32 %v9212_v17, %v13745_v33 }
 0x2b2   : > { %v9466_v25 = vsel %vm4009_vm7, %v13734_v6, %v4572_v8  ;;  %v13739_v8 = vld [vmem:[#allocation75_spill] sm:$0xff]  ;;  %v9490_v35 = vmul.f32 %v9177_v21, %v13741_v50  ;;  %v9494_v40 = vmul.f32 %v9188_v39, %v13743_v36  ;;  %v13751_v37 = vrot.slane %v9426_v26, 3  ;;  %v13763_v26 = vld [vmem:[#allocation13_spill] sm:$0xff] }
 0x2b3   : > { %13738 = vst [vmem:[#allocation127_spill] sm:$0xff] %v9479_v47  ;;  %v9483_v2 = vmul.f32 %v13739_v8, %v9251_v63  ;;  %v3412_v5 = vadd.f32 %v9128_v13, %v3319_v20  ;;  %v2366_v27 = vadd.f32 %v12229_v18, %v2314_v62  ;;  %13746 = vst [vmem:[#allocation34_spill] sm:$0xff] %v9499_v0  ;;  %v13749_v20 = vld [vmem:[#allocation80_spill] sm:$0xff] }
 0x2b4   : > { %13742 = vst [vmem:[#allocation93_spill] sm:$0xff] %v9490_v35  ;;  %13744 = vst [vmem:[#allocation31_spill] sm:$0xff] %v9494_v40  ;;  %v9503_v13 = vmul.f32 %v8654_v30, %v13747_v32  ;;  %v9507_v62 = vmul.f32 %v8855_v49, %v13749_v20  ;;  %v9514_v6 = vmul.f32 %v13181_v34, %v13666_v9  ;;  %v13761_v8 = vld [vmem:[#allocation12_spill] sm:$0xff] }
 0x2b5   : > { %13740 = vst [vmem:[#allocation135_spill] sm:$0xff] %v9483_v2  ;;  %v3504_v18 = vadd.f32 %v9133_v53, %v3412_v5  ;;  %v2418_v23 = vadd.f32 %v13751_v37, %v2366_v27  ;;  %v9518_v38 = vmul.f32 %v13186_v4, %v9251_v63  ;;  %v9524_v11 = vmul.f32 %v9177_v21, %v13188_v22 }
 0x2b6   : > { %13748 = vst [vmem:[#allocation161_spill] sm:$0xff] %v9503_v13  ;;  %13750 = vst [vmem:[#allocation140_spill] sm:$0xff] %v9507_v62  ;;  %v9528_v53 = vmul.f32 %v9188_v39, %v13191_v10  ;;  %v13756_v5 = vrot.slane %v9436_v58, 3  ;;  %v9540_v59 = vmul.f32 %v9212_v17, %v13757_v61  ;;  %v9551_v45 = vmul.f32 %v8654_v30, %v13761_v8  ;;  %v13777_v8 = vld [vmem:[#allocation17_spill] sm:$0xff] }
 0x2b7   : > { %13752 = vst [vmem:[#allocation145_spill] sm:$0xff] %v9514_v6  ;;  %13753 = vst [vmem:[#allocation156_spill] sm:$0xff] %v9518_v38  ;;  %v3596_v37 = vadd.f32 %v9142_v60, %v3504_v18  ;;  %v13760_v60 = vrot.slane %v9440_v19, 3  ;;  %v9555_v58 = vmul.f32 %v8855_v49, %v13763_v26  ;;  %v13769_v19 = vld [vmem:[#allocation23_spill] sm:$0xff]  ;;  %v9568_v29 = vmul.f32 %v13770_v41, %v9251_v63  ;;  %v13781_v41 = vld [vmem:[#allocation25_spill] sm:$0xff] }
 0x2b8   : > { %13754 = vst [vmem:[#allocation146_spill] sm:$0xff] %v9524_v11  ;;  %13755 = vst [vmem:[#allocation94_spill] sm:$0xff] %v9528_v53  ;;  %v2470_v27 = vadd.f32 %v13756_v5, %v2418_v23  ;;  %v13767_v23 = vld [vmem:[#allocation14_spill] sm:$0xff]  ;;  %v791_v14 = vmul.f32 %v5599_v55, %v13769_v19  ;;  %v13772_v53 = vld [vmem:[#allocation16_spill] sm:$0xff]  ;;  %v9581_v55 = vmul.f32 %v9188_v39, %v13777_v8 }
 0x2b9   : > { %13758 = vst [vmem:[#allocation87_spill] sm:$0xff] %v9540_v59  ;;  %v3688_v28 = vadd.f32 %v13759_v42, %v3596_v37  ;;  %13762 = vst [vmem:[#allocation99_spill] sm:$0xff] %v9551_v45  ;;  %v13765_v42 = vld [vmem:[#allocation126_spill] sm:$0xff]  ;;  %v9562_v5 = vmul.f32 %v13767_v23, %v13666_v9  ;;  %v9572_v26 = vmul.f32 %v9177_v21, %v13772_v53 }
 0x2ba   : > { %v2522_v18 = vadd.f32 %v13760_v60, %v2470_v27  ;;  %13764 = vst [vmem:[#allocation42_spill] sm:$0xff] %v9555_v58  ;;  %v13766_v27 = vrot.slane %v9470_v31, 3  ;;  %13771 = vst [vmem:[#allocation164_spill] sm:$0xff] %v9568_v29  ;;  %v13776_v31 = vrot.slane %v9479_v47, 3  ;;  %v9589_v19 = vmul.f32 %v8654_v30, %v13701_v57  ;;  %v13786_v57 = vld [vmem:[#allocation27_spill] sm:$0xff] }
 0x2bb   : > { %v3780_v37 = vadd.f32 %v13765_v42, %v3688_v28  ;;  %13768 = vst [vmem:[#allocation63_spill] sm:$0xff] %v9562_v5  ;;  %13773 = vst [vmem:[#allocation102_spill] sm:$0xff] %v9572_v26  ;;  %v13774_v28 = vld [vmem:[#allocation24_spill] sm:$0xff]  ;;  %v13775_v42 = vld [vmem:[#allocation114_spill] sm:$0xff]  ;;  %v13784_v47 = vrot.slane %v9483_v2, 3  ;;  %v9627_v59 = vmul.f32 %v13712_v43, %v9251_v63 }
 0x2bc   : > { %v2574_v60 = vadd.f32 %v13766_v27, %v2522_v18  ;;  %v827_v18 = vmul.f32 %v9177_v21, %v13774_v28  ;;  %13778 = vst [vmem:[#allocation136_spill] sm:$0xff] %v9581_v55  ;;  %13780 = vst [vmem:[#allocation133_spill] sm:$0xff] %v9589_v19  ;;  %v863_v21 = vmul.f32 %v9188_v39, %v13781_v41 }
 0x2bd   : > { %v3872_v27 = vadd.f32 %v13775_v42, %v3780_v37  ;;  %v13782_v37 = vld [vmem:[#allocation26_spill] sm:$0xff]  ;;  %v935_v39 = vmul.f32 %v8654_v30, %v13786_v57  ;;  %v13789_v30 = vrot.slane %v9494_v40, 4  ;;  %13792 = vst [vmem:[#allocation143_spill] sm:$0xff] %v9627_v59 }
 0x2be   : > { %v2626_v23 = vadd.f32 %v13776_v31, %v2574_v60  ;;  %v843_v53 = vadd.f32 %v827_v18, %v791_v14  ;;  %v899_v42 = vmul.f32 %v9212_v17, %v13782_v37  ;;  %v13783_v31 = vld [vmem:[#allocation187_spill] sm:$0xff]  ;;  %v9603_v14 = vmul.f32 %v8855_v49, %v13702_v46  ;;  %v13787_v17 = vld [vmem:[#allocation188_spill] sm:$0xff] }
 0x2bf   : > { %v3964_v60 = vadd.f32 %v13783_v31, %v3872_v27  ;;  %v13788_v27 = vrot.slane %v9490_v35, 4  ;;  %v9656_v35 = vld [vmem:[#allocation4 + $0xd0] sm:$0xff] }
 0x2c0   : > { %v2678_v8 = vadd.f32 %v13784_v47, %v2626_v23  ;;  %13785 = vst [vmem:[#allocation177_spill] sm:$0xff] %v9603_v14  ;;  %v879_v18 = vadd.f32 %v863_v21, %v843_v53  ;;  %v4716_v23 = vmul.f32 %v9354_v3, %v9354_v3  ;;  %v13796_v47 = vld [vmem:[#allocation30_spill] sm:$0xff] }
 0x2c1   : > { %v4057_v37 = vadd.f32 %v13787_v17, %v3964_v60  ;;  %v9620_v17 = vmul.f32 %v13711_v7, %v13666_v9  ;;  %v1007_v40 = vmul.f32 %v13796_v47, %v13666_v9  ;;  %v9652_v9 = vld [vmem:[#allocation4 + $0xb8] sm:$0xff] }
 0x2c2   : > { %v2770_v31 = vadd.f32 %v13788_v27, %v2678_v8  ;;  %v915_v2 = vadd.f32 %v899_v42, %v879_v18  ;;  %v13791_v8 = vld [vmem:[#allocation98_spill] sm:$0xff]  ;;  %v13793_v42 = vld [vmem:[#allocation28_spill] sm:$0xff]  ;;  %v13794_v18 = vrot.slane %v9499_v0, 4  ;;  %v2973_v3 = vmul.f32 %v9652_v9, %v13747_v32 }
 0x2c3   : > { %v4149_v21 = vadd.f32 %v9414_v12, %v4057_v37  ;;  %13790 = vst [vmem:[#allocation150_spill] sm:$0xff] %v9620_v17  ;;  %v2697_v60 = vmul.f32 %v13791_v8, %v13741_v50  ;;  %v971_v12 = vmul.f32 %v8855_v49, %v13793_v42  ;;  %v13798_v0 = vld [vmem:[#allocation174_spill] sm:$0xff] }
 0x2c4   : > { %v2862_v53 = vadd.f32 %v13789_v30, %v2770_v31  ;;  %v951_v28 = vadd.f32 %v935_v39, %v915_v2  ;;  %v13795_v30 = vld [vmem:[#allocation130_spill] sm:$0xff]  ;;  %v2789_v39 = vmul.f32 %v9316_v48, %v13743_v36  ;;  %v2881_v2 = vmul.f32 %v9356_v51, %v13745_v33 }
 0x2c5   : > { %v4241_v37 = vadd.f32 %v9446_v1, %v4149_v21  ;;  %v4713_v16 = vmul.f32 %v13795_v30, %v13795_v30  ;;  %v13797_v21 = vrot.slane %v9503_v13, 4  ;;  %v2733_v30 = vrot.slane %v2697_v60, 4 }
 0x2c6   : > { %v2954_v31 = vadd.f32 %v13794_v18, %v2862_v53  ;;  %v987_v27 = vadd.f32 %v971_v12, %v951_v28  ;;  %v9650_v28 = vsel %vm4645_vm8, %v13798_v0, 0.0  ;;  %v13800_v0 = vld [vmem:[#allocation180_spill] sm:$0xff]  ;;  %v2825_v33 = vrot.slane %v2789_v39, 4 }
 0x2c7   : > { %v4333_v1 = vadd.f32 %v9451_v54, %v4241_v37  ;;  %v3065_v54 = vmul.f32 %v9656_v35, %v13749_v20  ;;  %v4739_v18 = vsel %vm4645_vm8, %v4713_v16, 0.0  ;;  %v13801_v13 = vrot.slane %v13800_v0, 1 }
 0x2c8   : > { %v3046_v53 = vadd.f32 %v13797_v21, %v2954_v31  ;;  %v1023_v12 = vadd.f32 %v1007_v40, %v987_v27  ;;  %v13799_v31 = vrot.slane %v9507_v62, 4  ;;  %v9665_v40 = vld [vmem:[#allocation4 + $0x100] sm:$0xff]  ;;  %v9668_v27 = vsel %vm4641_vm5, %v4716_v23, 0.0  ;;  %v13805_v23 = vld [vmem:[#allocation68_spill] sm:$0xff] }
 0x2c9   : > { %v4425_v37 = vadd.f32 %v9456_v56, %v4333_v1  ;;  %v2917_v36 = vrot.slane %v2881_v2, 4  ;;  %v13802_v56 = vrot.slane %v9514_v6, 4  ;;  %v3157_v16 = vmul.f32 %v13181_v34, %v9022_v44  ;;  %v13821_v6 = vld [vmem:[#allocation13_spill] sm:$0xff] }
 0x2ca   : > { %v3138_v60 = vadd.f32 %v13799_v31, %v3046_v53  ;;  %v1116_v32 = vadd.f32 %v13801_v13, %v1023_v12  ;;  %v13803_v53 = vld [vmem:[#allocation179_spill] sm:$0xff]  ;;  %v13806_v62 = vrot.slane %v13805_v23, 1  ;;  %v3009_v0 = vrot.slane %v2973_v3, 4 }
 0x2cb   : > { %v4517_v20 = vadd.f32 %v9461_v24, %v4425_v37  ;;  %v13804_v31 = vrot.slane %v13803_v53, 4  ;;  %v3101_v13 = vrot.slane %v3065_v54, 4  ;;  %v3249_v39 = vmul.f32 %v13186_v4, %v9665_v40  ;;  %v13812_v54 = vld [vmem:[#allocation159_spill] sm:$0xff] }
 0x2cc   : > { %v3230_v1 = vadd.f32 %v13802_v56, %v3138_v60  ;;  %v1208_v50 = vadd.f32 %v13806_v62, %v1116_v32  ;;  %v13807_v2 = vrot.slane %v9518_v38, 4  ;;  %v3434_v37 = vmul.f32 %v9316_v48, %v13191_v10  ;;  %v13808_v60 = vld [vmem:[#allocation81_spill] sm:$0xff] }
 0x2cd   : > { %v9678_v21 = vsel %vm506_vm0, %v13804_v31, %v2733_v30  ;;  %v4609_v24 = vadd.f32 %v9466_v25, %v4517_v20  ;;  %v3341_v30 = vmul.f32 %v13791_v8, %v13188_v22  ;;  %v13809_v56 = vrot.slane %v13808_v60, 1  ;;  %v13810_v32 = vld [vmem:[#allocation181_spill] sm:$0xff]  ;;  %v13816_v60 = vld [vmem:[#allocation12_spill] sm:$0xff]  ;;  %v13829_v22 = vld [vmem:[#allocation87_spill] sm:$0xff] }
 0x2ce   : > { %v3322_v12 = vadd.f32 %v13807_v2, %v3230_v1  ;;  %v13811_v3 = vrot.slane %v13810_v32, 4  ;;  %v13813_v31 = vrot.slane %v13812_v54, 4  ;;  %v3526_v20 = vmul.f32 %v9356_v51, %v13757_v61  ;;  %v13819_v54 = vld [vmem:[#allocation100_spill] sm:$0xff] }
 0x2cf   : > { %v1300_v53 = vadd.f32 %v13809_v56, %v1208_v50  ;;  %v9708_v1 = vadd.f32 %v9114_v15, %v4609_v24  ;;  %v13815_v23 = vrot.slane %v9524_v11, 5  ;;  %v3193_v50 = vrot.slane %v3157_v16, 4 }
 0x2d0   : > { %v9698_v62 = vsel %vm506_vm0, %v13811_v3, %v2825_v33  ;;  %v9703_v25 = vsel %vm506_vm0, %v13813_v31, %v2917_v36  ;;  %v3618_v56 = vmul.f32 %v9652_v9, %v13816_v60  ;;  %v13817_v33 = vld [vmem:[#allocation44_spill] sm:$0xff]  ;;  %v13820_v38 = vrot.slane %v13819_v54, 4  ;;  %v13826_v54 = vld [vmem:[#allocation182_spill] sm:$0xff] }
 0x2d1   : > { %13814 = vst [vmem:[#allocation175_spill] sm:$0xff] %v9708_v1  ;;  %v3415_v2 = vadd.f32 %v13815_v23, %v3322_v12  ;;  %v13818_v32 = vrot.slane %v13817_v33, 1  ;;  %v3285_v31 = vrot.slane %v3249_v39, 4  ;;  %v3710_v24 = vmul.f32 %v9656_v35, %v13821_v6  ;;  %v13822_v12 = vld [vmem:[#allocation94_spill] sm:$0xff]  ;;  %v13824_v33 = vld [vmem:[#allocation121_spill] sm:$0xff] }
 0x2d2   : > { %v9719_v36 = vsel %vm506_vm0, %v13820_v38, %v3009_v0  ;;  %v4664_v11 = vsel %vm4645_vm8, %v9708_v1, 0.0  ;;  %v13823_v16 = vrot.slane %v13822_v12, 5  ;;  %v3378_v61 = vrot.slane %v3341_v30, 5  ;;  %v13828_v39 = vld [vmem:[#allocation14_spill] sm:$0xff]  ;;  %v13831_v12 = vld [vmem:[#allocation183_spill] sm:$0xff] }
 0x2d3   : > { %v1392_v3 = vadd.f32 %v13818_v32, %v1300_v53  ;;  %v3470_v60 = vrot.slane %v3434_v37, 5  ;;  %4665 = vadd.xlane.f32.xlu1 %v4664_v11  ;;  %v13825_v53 = vrot.slane %v13824_v33, 1  ;;  %v13827_v10 = vrot.slane %v13826_v54, 4  ;;  %v13833_v37 = vld [vmem:[#allocation15_spill] sm:$0xff] }
 0x2d4   : > { %v3507_v23 = vadd.f32 %v13823_v16, %v3415_v2  ;;  %v3562_v0 = vrot.slane %v3526_v20, 5  ;;  %v3802_v6 = vmul.f32 %v13828_v39, %v9022_v44  ;;  %v13830_v4 = vrot.slane %v13829_v22, 5  ;;  %v13834_v16 = vld [vmem:[#allocation124_spill] sm:$0xff] }
 0x2d5   : > { %v1484_v32 = vadd.f32 %v13825_v53, %v1392_v3  ;;  %v9732_v38 = vsel %vm506_vm0, %v13827_v10, %v3101_v13  ;;  %v13832_v2 = vrot.slane %v13831_v12, 4  ;;  %v3654_v11 = vrot.slane %v3618_v56, 5  ;;  %v13836_v13 = vld [vmem:[#allocation110_spill] sm:$0xff]  ;;  %v13839_v22 = vld [vmem:[#allocation16_spill] sm:$0xff] }
 0x2d6   : > { %v3599_v34 = vadd.f32 %v13830_v4, %v3507_v23  ;;  %v3894_v3 = vmul.f32 %v13833_v37, %v9665_v40  ;;  %v13835_v33 = vrot.slane %v13834_v16, 1  ;;  %v13837_v20 = vrot.slane %v13836_v13, 4  ;;  %v13841_v23 = vld [vmem:[#allocation103_spill] sm:$0xff] }
 0x2d7   : > { %v9741_v30 = vsel %vm506_vm0, %v13832_v2, %v3193_v50  ;;  %v3746_v54 = vrot.slane %v3710_v24, 5  ;;  %v9754_v4 = vmul.f32 %v13791_v8, %v13839_v22  ;;  %v13840_v50 = vrot.slane %v9551_v45, 5  ;;  %v13844_v16 = vld [vmem:[#allocation35_spill] sm:$0xff]  ;;  %4740 = vadd.xlane.f32.xlu1 %v4739_v18  ;;  %v13847_v24 = vld [vmem:[#allocation46_spill] sm:$0xff]  ;;  %v13861_v22 = vld [vmem:[#allocation65_spill] sm:$0xff] }
 0x2d8   : > { %v1576_v10 = vadd.f32 %v13835_v33, %v1484_v32  ;;  %v9750_v53 = vsel %vm506_vm0, %v13837_v20, %v3285_v31  ;;  %v4715_v56 = vmul.f32 %v9708_v1, %v9708_v1  ;;  %v13842_v2 = vrot.slane %v13841_v23, 5  ;;  %v13849_v20 = vld [vmem:[#allocation108_spill] sm:$0xff]  ;;  %v9777_v1 = vld [vmem:[#allocation4 + $0x90] sm:$0xff]  ;;  %v13852_v23 = vld [vmem:[#allocation23_spill] sm:$0xff] }
 0x2d9   : > { %13838 = vst [vmem:[#allocation153_spill] sm:$0xff] %v9750_v53  ;;  %v3691_v12 = vadd.f32 %v13840_v50, %v3599_v34  ;;  %v13845_v33 = vrot.slane %v13844_v16, 5  ;;  %v13848_v8 = vrot.slane %v13847_v24, 1  ;;  %v13850_v45 = vrot.slane %v13849_v20, 5  ;;  %v9788_v24 = vld [vmem:[#allocation4 + $0xa8] sm:$0xff]  ;;  %v13889_v53 = vld [vmem:[#allocation62_spill] sm:$0xff] }
 0x2da   : > { %v9763_v32 = vsel %vm3364_vm6, %v13842_v2, %v3378_v61  ;;  %v3838_v50 = vrot.slane %v3802_v6, 5  ;;  %v794_v61 = vmul.f32 %v9777_v1, %v13852_v23  ;;  %v13853_v2 = vrot.slane %v9555_v58, 5  ;;  %13857 = vst [vmem:[#allocation154_spill] sm:$0xff] %v9788_v24  ;;  %v13859_v6 = vld [vmem:[#allocation85_spill] sm:$0xff] }
 0x2db   : > { %13843 = vst [vmem:[#allocation132_spill] sm:$0xff] %v9763_v32  ;;  %v9768_v31 = vsel %vm3364_vm6, %v13845_v33, %v3470_v60  ;;  %v1668_v13 = vadd.f32 %v13848_v8, %v1576_v10  ;;  %v9775_v34 = vsel %vm3364_vm6, %v13850_v45, %v3562_v0  ;;  %v13854_v60 = vld [vmem:[#allocation184_spill] sm:$0xff]  ;;  %v3930_v10 = vrot.slane %v3894_v3, 5  ;;  %v13881_v23 = vld [vmem:[#allocation45_spill] sm:$0xff] }
 0x2dc   : > { %13846 = vst [vmem:[#allocation171_spill] sm:$0xff] %v9768_v31  ;;  %13851 = vst [vmem:[#allocation167_spill] sm:$0xff] %v9775_v34  ;;  %v3783_v16 = vadd.f32 %v13853_v2, %v3691_v12  ;;  %v13855_v33 = vrot.slane %v13854_v60, 5  ;;  %v13858_v8 = vld [vmem:[#allocation24_spill] sm:$0xff]  ;;  %v13860_v0 = vrot.slane %v13859_v6, 2  ;;  %v13862_v37 = vrot.slane %v13861_v22, 5 }
 0x2dd   : > { %v830_v45 = vmul.f32 %v9788_v24, %v13858_v8  ;;  %v9800_v2 = vld [vmem:[#allocation4 + $0xc0] sm:$0xff]  ;;  %v13865_v3 = vrot.slane %v9562_v5, 5  ;;  %v9807_v6 = vld [vmem:[#allocation4 + $0xd8] sm:$0xff]  ;;  %v13882_v34 = vrot.slane %v13881_v23, 5 }
 0x2de   : > { %v9786_v18 = vsel %vm3364_vm6, %v13855_v33, %v3654_v11  ;;  %v1761_v20 = vadd.f32 %v13860_v0, %v1668_v13  ;;  %v9797_v39 = vsel %vm3364_vm6, %v13862_v37, %v3746_v54  ;;  %13864 = vst [vmem:[#allocation122_spill] sm:$0xff] %v9800_v2  ;;  %v866_v11 = vmul.f32 %v9800_v2, %v13781_v41  ;;  %v13867_v13 = vld [vmem:[#allocation26_spill] sm:$0xff]  ;;  %v9813_v12 = vld [vmem:[#allocation4 + $0x120] sm:$0xff] }
 0x2df   : > { %13856 = vst [vmem:[#allocation147_spill] sm:$0xff] %v9786_v18  ;;  %13863 = vst [vmem:[#allocation105_spill] sm:$0xff] %v9797_v39  ;;  %v3875_v60 = vadd.f32 %v13865_v3, %v3783_v16  ;;  %v4745_v33 = vsel %vm4645_vm8, %v4715_v56, 0.0  ;;  %v846_v58 = vadd.f32 %v830_v45, %v794_v61  ;;  %v902_v22 = vmul.f32 %v9807_v6, %v13867_v13  ;;  %v13868_v37 = vld [vmem:[#allocation74_spill] sm:$0xff]  ;;  %v9815_v39 = vld [vmem:[#allocation4 + $0xf0] sm:$0xff] }
 0x2e0   : > { %13866 = vst [vmem:[#allocation152_spill] sm:$0xff] %v9807_v6  ;;  %4746 = vadd.xlane.f32.xlu1 %v4745_v33  ;;  %v13869_v54 = vrot.slane %v13868_v37, 2  ;;  %13870 = vst [vmem:[#allocation134_spill] sm:$0xff] %v9813_v12  ;;  %v938_v5 = vmul.f32 %v9815_v39, %v13786_v57  ;;  %v13872_v16 = vld [vmem:[#allocation29_spill] sm:$0xff]  ;;  %v13875_v3 = vrot.slane %v9568_v29, 5  ;;  %v13879_v18 = vld [vmem:[#allocation86_spill] sm:$0xff]  ;;  %v9838_v31 = vsel %vm3364_vm6, %v13882_v34, %v3838_v50 }
 0x2e1   : > { %13871 = vst [vmem:[#allocation155_spill] sm:$0xff] %v9815_v39  ;;  %v1046_v56 = vmul.f32 %v9777_v1, %v13872_v16  ;;  %v13873_v61 = vld [vmem:[#allocation185_spill] sm:$0xff]  ;;  %v882_v13 = vadd.f32 %v866_v11, %v846_v58  ;;  %v13880_v57 = vrot.slane %v13879_v18, 2  ;;  %13883 = vst [vmem:[#allocation92_spill] sm:$0xff] %v9838_v31  ;;  %v13887_v58 = vld [vmem:[#allocation36_spill] sm:$0xff]  ;;  %v1010_v23 = vmul.f32 %v13796_v47, %v9813_v12 }
 0x2e2   : > { %v1853_v0 = vadd.f32 %v13869_v54, %v1761_v20  ;;  %v9823_v45 = vmul.f32 %v13873_v61, %v13872_v16  ;;  %v3967_v33 = vadd.f32 %v13875_v3, %v3875_v60  ;;  %v13876_v37 = vld [vmem:[#allocation33_spill] sm:$0xff]  ;;  %v13877_v54 = vld [vmem:[#allocation115_spill] sm:$0xff]  ;;  %v1231_v11 = vmul.f32 %v9800_v2, %v13887_v58  ;;  %v13894_v47 = vld [vmem:[#allocation88_spill] sm:$0xff] }
 0x2e3   : > { %v1139_v20 = vmul.f32 %v9788_v24, %v13876_v37  ;;  %v9831_v41 = vmul.f32 %v13877_v54, %v13876_v37  ;;  %v13884_v16 = vld [vmem:[#allocation101_spill] sm:$0xff]  ;;  %v13888_v3 = vrot.slane %v9572_v26, 6  ;;  %v918_v29 = vadd.f32 %v902_v22, %v882_v13 }
 0x2e4   : > { %13874 = vst [vmem:[#allocation163_spill] sm:$0xff] %v9823_v45  ;;  %v1945_v8 = vadd.f32 %v13880_v57, %v1853_v0  ;;  %v13885_v32 = vrot.slane %v13884_v16, 5  ;;  %v974_v57 = vmul.f32 %v13793_v42, %v13889_v53  ;;  %v13890_v34 = vld [vmem:[#allocation37_spill] sm:$0xff]  ;;  %v1085_v0 = vrot.slane %v1046_v56, 1 }
 0x2e5   : > { %13878 = vst [vmem:[#allocation139_spill] sm:$0xff] %v9831_v41  ;;  %v4060_v37 = vadd.f32 %v13888_v3, %v3967_v33  ;;  %v13891_v50 = vrot.slane %v13890_v34, 2  ;;  %v13893_v13 = vrot.slane %v9581_v55, 6  ;;  %v954_v33 = vadd.f32 %v938_v5, %v918_v29  ;;  %v13899_v29 = vld [vmem:[#allocation41_spill] sm:$0xff] }
 0x2e6   : > { %v9843_v60 = vsel %vm3364_vm6, %v13885_v32, %v3930_v10  ;;  %v9856_v10 = vld [vmem:[#allocation4 + $0xc8] sm:$0xff]  ;;  %v1177_v3 = vrot.slane %v1139_v20, 1  ;;  %v12293_v26 = vrot.slane %v9831_v41, 1  ;;  %v13895_v42 = vrot.slane %v13894_v47, 2  ;;  %v13912_v41 = vld [vmem:[#allocation119_spill] sm:$0xff] }
 0x2e7   : > { %13886 = vst [vmem:[#allocation151_spill] sm:$0xff] %v9843_v60  ;;  %v2037_v18 = vadd.f32 %v13891_v50, %v1945_v8  ;;  %v9860_v16 = vmul.f32 %v9856_v10, %v13887_v58  ;;  %v4152_v22 = vadd.f32 %v13893_v13, %v4060_v37  ;;  %v1269_v8 = vrot.slane %v1231_v11, 1  ;;  %v13896_v50 = vld [vmem:[#allocation38_spill] sm:$0xff]  ;;  %v13900_v20 = vld [vmem:[#allocation56_spill] sm:$0xff]  ;;  %v13902_v11 = vld [vmem:[#allocation17_spill] sm:$0xff] }
 0x2e8   : > { %v1323_v32 = vmul.f32 %v9807_v6, %v13896_v50  ;;  %v13897_v60 = vrot.slane %v9585_v52, 6  ;;  %v990_v31 = vadd.f32 %v974_v57, %v954_v33  ;;  %v9874_v37 = vmul.f32 %v8855_v49, %v13896_v50  ;;  %v9895_v33 = vld [vmem:[#allocation4 + $0x128] sm:$0xff] }
 0x2e9   : > { %13892 = vst [vmem:[#allocation168_spill] sm:$0xff] %v9860_v16  ;;  %v2129_v34 = vadd.f32 %v13895_v42, %v2037_v18  ;;  %v1415_v5 = vmul.f32 %v9815_v39, %v13899_v29  ;;  %v13901_v47 = vrot.slane %v13900_v20, 2  ;;  %v9882_v18 = vmul.f32 %v9316_v48, %v13902_v11 }
 0x2ea   : > { %v4244_v58 = vadd.f32 %v13897_v60, %v4152_v22  ;;  %13898 = vst [vmem:[#allocation55_spill] sm:$0xff] %v9874_v37  ;;  %v13903_v13 = vrot.slane %v9823_v45, 1  ;;  %v9887_v60 = vld [vmem:[#allocation4 + $0xf8] sm:$0xff]  ;;  %v13905_v57 = vrot.slane %v9589_v19, 6  ;;  %v1179_v20 = vsel %vm1066_vm3, %v1177_v3, %v12293_v26 }
 0x2eb   : > { %v2221_v42 = vadd.f32 %v13901_v47, %v2129_v34  ;;  %v9891_v49 = vmul.f32 %v9887_v60, %v13899_v29  ;;  %v1026_v34 = vadd.f32 %v1010_v23, %v990_v31  ;;  %v13906_v47 = vld [vmem:[#allocation39_spill] sm:$0xff]  ;;  %v13909_v55 = vrot.slane %v9860_v16, 1 }
 0x2ec   : > { %v1087_v56 = vsel %vm1066_vm3, %v1085_v0, %v13903_v13  ;;  %v4336_v22 = vadd.f32 %v13905_v57, %v4244_v58  ;;  %v1507_v45 = vmul.f32 %v13906_v47, %v13889_v53  ;;  %v13907_v0 = vld [vmem:[#allocation158_spill] sm:$0xff]  ;;  %v1361_v50 = vrot.slane %v1323_v32, 1 }
 0x2ed   : > { %13904 = vst [vmem:[#allocation104_spill] sm:$0xff] %v9891_v49  ;;  %v13908_v13 = vrot.slane %v13907_v0, 2  ;;  %v1271_v29 = vsel %vm1066_vm3, %v1269_v8, %v13909_v55  ;;  %v9909_v58 = vmul.f32 %v13906_v47, %v9251_v63  ;;  %v13911_v31 = vrot.slane %v9603_v14, 6 }
 0x2ee   : > { %v1119_v57 = vadd.f32 %v1087_v56, %v1026_v34  ;;  %v1453_v26 = vrot.slane %v1415_v5, 1  ;;  %v13913_v19 = vrot.slane %v13912_v41, 3  ;;  %v13916_v8 = vrot.slane %v9620_v17, 6  ;;  %v13918_v41 = vld [vmem:[#allocation95_spill] sm:$0xff] }
 0x2ef   : > { %v2313_v52 = vadd.f32 %v13908_v13, %v2221_v42  ;;  %13910 = vst [vmem:[#allocation82_spill] sm:$0xff] %v9909_v58  ;;  %v4428_v23 = vadd.f32 %v13911_v31, %v4336_v22  ;;  %v13914_v13 = vld [vmem:[#allocation40_spill] sm:$0xff]  ;;  %v13917_v22 = vld [vmem:[#allocation18_spill] sm:$0xff]  ;;  %v1545_v34 = vrot.slane %v1507_v45, 1  ;;  %v13920_v42 = vld [vmem:[#allocation47_spill] sm:$0xff]  ;;  %v13923_v45 = vrot.slane %v9874_v37, 1 }
 0x2f0   : > { %v1599_v55 = vmul.f32 %v13914_v13, %v9813_v12  ;;  %v9921_v32 = vmul.f32 %v13914_v13, %v9895_v33  ;;  %v9927_v56 = vmul.f32 %v9356_v51, %v13917_v22  ;;  %v1211_v5 = vadd.f32 %v1179_v20, %v1119_v57  ;;  %v13924_v57 = vld [vmem:[#allocation120_spill] sm:$0xff]  ;;  %v13937_v17 = vld [vmem:[#allocation19_spill] sm:$0xff] }
 0x2f1   : > { %v2365_v0 = vadd.f32 %v13913_v19, %v2313_v52  ;;  %v4520_v16 = vadd.f32 %v13916_v8, %v4428_v23  ;;  %v13919_v52 = vrot.slane %v13918_v41, 3  ;;  %v1691_v3 = vmul.f32 %v9777_v1, %v13920_v42 }
 0x2f2   : > { %13915 = vst [vmem:[#allocation91_spill] sm:$0xff] %v9921_v32  ;;  %v9936_v14 = vmul.f32 %v13873_v61, %v13920_v42  ;;  %v13922_v23 = vrot.slane %v9627_v59, 6  ;;  %v1303_v13 = vadd.f32 %v1271_v29, %v1211_v5  ;;  %v1363_v20 = vsel %vm1066_vm3, %v1361_v50, %v13923_v45  ;;  %v13930_v5 = vld [vmem:[#allocation178_spill] sm:$0xff] }
 0x2f3   : > { %v2417_v19 = vadd.f32 %v13919_v52, %v2365_v0  ;;  %v13925_v0 = vrot.slane %v13924_v57, 3  ;;  %v13926_v52 = vrot.slane %v9891_v49, 1  ;;  %v1637_v31 = vrot.slane %v1599_v55, 1  ;;  %v13939_v49 = vld [vmem:[#allocation57_spill] sm:$0xff] }
 0x2f4   : > { %13921 = vst [vmem:[#allocation128_spill] sm:$0xff] %v9936_v14  ;;  %v4612_v8 = vadd.f32 %v13922_v23, %v4520_v16  ;;  %v12307_v42 = vrot.slane %v9921_v32, 1  ;;  %v1395_v16 = vadd.f32 %v1363_v20, %v1303_v13  ;;  %v13928_v23 = vld [vmem:[#allocation50_spill] sm:$0xff]  ;;  %v13932_v57 = vrot.slane %v9909_v58, 1  ;;  %v13938_v58 = vld [vmem:[#allocation53_spill] sm:$0xff] }
 0x2f5   : > { %v2469_v41 = vadd.f32 %v13925_v0, %v2417_v19  ;;  %v1455_v1 = vsel %vm1066_vm3, %v1453_v26, %v13926_v52  ;;  %v1784_v29 = vmul.f32 %v9788_v24, %v13928_v23  ;;  %v9957_v50 = vmul.f32 %v13877_v54, %v13928_v23  ;;  %v9991_v23 = vld [vmem:[#allocation4 + $0xe0] sm:$0xff] }
 0x2f6   : > { %v9951_v59 = vadd.f32 %v9114_v15, %v4612_v8  ;;  %v13931_v19 = vrot.slane %v13930_v5, 3  ;;  %v1547_v26 = vsel %vm1066_vm3, %v1545_v34, %v13932_v57  ;;  %v1730_v55 = vrot.slane %v1691_v3, 2  ;;  %v13933_v8 = vld [vmem:[#allocation52_spill] sm:$0xff] }
 0x2f7   : > { %13929 = vst [vmem:[#allocation114_spill] sm:$0xff] %v9957_v50  ;;  %v1487_v13 = vadd.f32 %v1455_v1, %v1395_v16  ;;  %v1876_v20 = vmul.f32 %v9800_v2, %v13933_v8  ;;  %v9971_v52 = vmul.f32 %v9856_v10, %v13933_v8  ;;  %v4263_v3 = vmul.f32 %v9652_v9, %v13937_v17  ;;  %v14020_v2 = vld [vmem:[#allocation13_spill] sm:$0xff] }
 0x2f8   : > { %13927 = vst [vmem:[#allocation126_spill] sm:$0xff] %v9951_v59  ;;  %v2521_v45 = vadd.f32 %v13931_v19, %v2469_v41  ;;  %v4673_v15 = vsel %vm4641_vm5, %v9951_v59, 0.0  ;;  %v13935_v41 = vld [vmem:[#allocation97_spill] sm:$0xff]  ;;  %v4355_v34 = vmul.f32 %v9656_v35, %v13702_v46  ;;  %v1639_v1 = vsel %vm1066_vm3, %v1637_v31, %v12307_v42  ;;  %v13943_v42 = vld [vmem:[#allocation58_spill] sm:$0xff]  ;;  %v14017_v59 = vld [vmem:[#allocation123_spill] sm:$0xff] }
 0x2f9   : > { %13934 = vst [vmem:[#allocation187_spill] sm:$0xff] %v9971_v52  ;;  %4674 = vadd.xlane.f32.xlu0 %v4673_v15  ;;  %v13936_v5 = vrot.slane %v13935_v41, 3  ;;  %v1579_v16 = vadd.f32 %v1547_v26, %v1487_v13  ;;  %v1822_v57 = vrot.slane %v1784_v29, 2  ;;  %v1968_v15 = vmul.f32 %v9807_v6, %v13938_v58 }
 0x2fa   : > { %v13940_v41 = vrot.slane %v13939_v49, 3  ;;  %v13941_v37 = vrot.slane %v9936_v14, 2  ;;  %v9995_v31 = vmul.f32 %v9991_v23, %v13938_v58  ;;  %v1914_v26 = vrot.slane %v1876_v20, 2  ;;  %v13950_v14 = vld [vmem:[#allocation59_spill] sm:$0xff] }
 0x2fb   : > { %v2573_v19 = vadd.f32 %v13936_v5, %v2521_v45  ;;  %v4207_v5 = vrot.slane %v9927_v56, 6  ;;  %v1671_v29 = vadd.f32 %v1639_v1, %v1579_v16  ;;  %v2060_v49 = vmul.f32 %v9815_v39, %v13943_v42  ;;  %v13944_v56 = vld [vmem:[#allocation170_spill] sm:$0xff]  ;;  %v14004_v58 = vld [vmem:[#allocation171_spill] sm:$0xff] }
 0x2fc   : > { %v1732_v8 = vsel %vm1711_vm4, %v1730_v55, %v13941_v37  ;;  %13942 = vst [vmem:[#allocation188_spill] sm:$0xff] %v9995_v31  ;;  %v10005_v37 = vmul.f32 %v9887_v60, %v13943_v42  ;;  %v13947_v55 = vld [vmem:[#allocation54_spill] sm:$0xff]  ;;  %v4447_v1 = vmul.f32 %v13711_v7, %v9022_v44  ;;  %v10024_v32 = vmul.f32 %v13950_v14, %v9895_v33  ;;  %v14019_v39 = vld [vmem:[#allocation147_spill] sm:$0xff] }
 0x2fd   : > { %v2625_v45 = vadd.f32 %v13940_v41, %v2573_v19  ;;  %4749 = vadd.xlane.f32.xlu0 %v9668_v27  ;;  %v13945_v19 = vrot.slane %v13944_v56, 3  ;;  %v2152_v0 = vmul.f32 %v13947_v55, %v13889_v53  ;;  %v10011_v20 = vmul.f32 %v13947_v55, %v9251_v63 }
 0x2fe   : > { %13946 = vst [vmem:[#allocation98_spill] sm:$0xff] %v10005_v37  ;;  %v1764_v16 = vadd.f32 %v1732_v8, %v1671_v29  ;;  %v13949_v27 = vrot.slane %v9957_v50, 2  ;;  %v2244_v53 = vmul.f32 %v13950_v14, %v9813_v12  ;;  %13951 = vst [vmem:[#allocation179_spill] sm:$0xff] %v10024_v32  ;;  %v4539_v44 = vmul.f32 %v13712_v43, %v9665_v40 }
 0x2ff   : > { %v2677_v41 = vadd.f32 %v13945_v19, %v2625_v45  ;;  %13948 = vst [vmem:[#allocation180_spill] sm:$0xff] %v10011_v20  ;;  %v2006_v45 = vrot.slane %v1968_v15, 2  ;;  %v13952_v29 = vrot.slane %v9971_v52, 2  ;;  %v2098_v15 = vrot.slane %v2060_v49, 2 }
 0x300   : > { %v1824_v56 = vsel %vm1711_vm4, %v1822_v57, %v13949_v27  ;;  %v2190_v27 = vrot.slane %v2152_v0, 2  ;;  %v12314_v13 = vrot.slane %v10011_v20, 2  ;;  %v4299_v50 = vrot.slane %v4263_v3, 6 }
 0x301   : > { %v2769_v19 = vadd.f32 %v9678_v21, %v2677_v41  ;;  %v1856_v8 = vadd.f32 %v1824_v56, %v1764_v16  ;;  %v1916_v57 = vsel %vm1711_vm4, %v1914_v26, %v13952_v29  ;;  %4647 = vadd.xlane.f32.xlu0 %v9650_v28  ;;  %v12316_v41 = vrot.slane %v10005_v37, 2 }
 0x302   : > { %v4391_v14 = vrot.slane %v4355_v34, 6  ;;  %v4483_v55 = vrot.slane %v4447_v1, 6  ;;  %v13953_v56 = vrot.slane %v9995_v31, 2  ;;  %v2282_v49 = vrot.slane %v2244_v53, 2  ;;  %v13957_v1 = vld [vmem:[#allocation67_spill] sm:$0xff]  ;;  %v13959_v53 = vld [vmem:[#allocation69_spill] sm:$0xff] }
 0x303   : > { %v2861_v21 = vadd.f32 %v9698_v62, %v2769_v19  ;;  %v1948_v42 = vadd.f32 %v1916_v57, %v1856_v8  ;;  %v12315_v28 = vrot.slane %v10024_v32, 2  ;;  %v13954_v62 = vrot.slane %v9754_v4, 6  ;;  %v13955_v19 = vld [vmem:[#allocation106_spill] sm:$0xff]  ;;  %v13996_v31 = vld [vmem:[#allocation80_spill] sm:$0xff] }
 0x304   : > { %v2008_v26 = vsel %vm1711_vm4, %v2006_v45, %v13953_v56  ;;  %v13956_v29 = vrot.slane %v13955_v19, 6  ;;  %v4575_v3 = vrot.slane %v4539_v44, 6  ;;  %v10049_v8 = vmul.f32 %v13873_v61, %v13957_v1  ;;  %v13962_v44 = vld [vmem:[#allocation137_spill] sm:$0xff]  ;;  %v14008_v1 = vld [vmem:[#allocation167_spill] sm:$0xff] }
 0x305   : > { %v2953_v16 = vadd.f32 %v9703_v25, %v2861_v21  ;;  %v2040_v34 = vadd.f32 %v2008_v26, %v1948_v42  ;;  %v2100_v45 = vsel %vm1711_vm4, %v2098_v15, %v12316_v41  ;;  %v2192_v4 = vsel %vm1711_vm4, %v2190_v27, %v12314_v13  ;;  %v13966_v15 = vld [vmem:[#allocation112_spill] sm:$0xff]  ;;  %v13968_v13 = vld [vmem:[#allocation169_spill] sm:$0xff] }
 0x306   : > { %v10045_v0 = vsel %vm4009_vm7, %v13956_v29, %v13954_v62  ;;  %13958 = vst [vmem:[#allocation68_spill] sm:$0xff] %v10049_v8  ;;  %v10060_v57 = vmul.f32 %v13877_v54, %v13959_v53  ;;  %v13961_v42 = vrot.slane %v9882_v18, 6  ;;  %v13963_v21 = vrot.slane %v13962_v44, 6 }
 0x307   : > { %v3045_v25 = vadd.f32 %v9719_v36, %v2953_v16  ;;  %v13964_v36 = vld [vmem:[#allocation116_spill] sm:$0xff]  ;;  %v13967_v62 = vrot.slane %v13966_v15, 6  ;;  %v2132_v19 = vadd.f32 %v2100_v45, %v2040_v34  ;;  %v13969_v18 = vrot.slane %v13968_v13, 6  ;;  %v13978_v15 = vld [vmem:[#allocation71_spill] sm:$0xff] }
 0x308   : > { %13960 = vst [vmem:[#allocation81_spill] sm:$0xff] %v10060_v57  ;;  %v10067_v56 = vsel %vm4009_vm7, %v13963_v21, %v13961_v42  ;;  %v13965_v16 = vrot.slane %v13964_v36, 6  ;;  %v13970_v42 = vld [vmem:[#allocation117_spill] sm:$0xff]  ;;  %v13995_v32 = vrot.slane %v10049_v8, 3  ;;  %v10196_v24 = vmul.f32 %v9887_v60, %v14020_v2 }
 0x309   : > { %v10077_v27 = vsel %vm4009_vm7, %v13967_v62, %v4299_v50  ;;  %v3137_v29 = vadd.f32 %v9732_v38, %v3045_v25  ;;  %v10083_v44 = vsel %vm4009_vm7, %v13969_v18, %v4391_v14  ;;  %v13971_v21 = vrot.slane %v13970_v42, 6  ;;  %v13976_v25 = vld [vmem:[#allocation70_spill] sm:$0xff]  ;;  %v13984_v42 = vld [vmem:[#allocation75_spill] sm:$0xff]  ;;  %v14029_v2 = vld [vmem:[#allocation105_spill] sm:$0xff] }
 0x30a   : > { %v10072_v26 = vsel %vm4009_vm7, %v13965_v16, %v4207_v5  ;;  %v2284_v5 = vsel %vm1711_vm4, %v2282_v49, %v12315_v28  ;;  %v13973_v16 = vld [vmem:[#allocation125_spill] sm:$0xff]  ;;  %v2224_v38 = vadd.f32 %v2192_v4, %v2132_v19  ;;  %v10101_v14 = vmul.f32 %v9856_v10, %v13976_v25  ;;  %v13980_v49 = vld [vmem:[#allocation72_spill] sm:$0xff]  ;;  %14021 = vst [vmem:[#allocation115_spill] sm:$0xff] %v10196_v24 }
 0x30b   : > { %v10088_v36 = vsel %vm4009_vm7, %v13971_v21, %v4483_v55  ;;  %v13974_v50 = vrot.slane %v13973_v16, 6  ;;  %v3229_v45 = vadd.f32 %v9741_v30, %v3137_v29  ;;  %v10107_v62 = vmul.f32 %v9991_v23, %v13978_v15  ;;  %v13982_v4 = vld [vmem:[#allocation73_spill] sm:$0xff]  ;;  %v13986_v30 = vld [vmem:[#allocation76_spill] sm:$0xff]  ;;  %v13991_v55 = vld [vmem:[#allocation78_spill] sm:$0xff] }
 0x30c   : > { %13972 = vst [vmem:[#allocation181_spill] sm:$0xff] %v10088_v36  ;;  %13977 = vst [vmem:[#allocation44_spill] sm:$0xff] %v10101_v14  ;;  %v10111_v18 = vmul.f32 %v9887_v60, %v13980_v49  ;;  %v10115_v19 = vmul.f32 %v13982_v4, %v9251_v63  ;;  %v10119_v21 = vmul.f32 %v13984_v42, %v9895_v33  ;;  %v13988_v16 = vld [vmem:[#allocation153_spill] sm:$0xff]  ;;  %v14000_v42 = vld [vmem:[#allocation132_spill] sm:$0xff]  ;;  %v14005_v49 = vrot.slane %v10101_v14, 3 }
 0x30d   : > { %v10096_v34 = vsel %vm4009_vm7, %v13974_v50, %v4575_v3  ;;  %13979 = vst [vmem:[#allocation100_spill] sm:$0xff] %v10107_v62  ;;  %v2316_v3 = vadd.f32 %v2284_v5, %v2224_v38  ;;  %v10123_v29 = vmul.f32 %v13873_v61, %v13986_v30  ;;  %v3321_v50 = vadd.f32 %v13988_v16, %v3229_v45  ;;  %v13989_v28 = vld [vmem:[#allocation77_spill] sm:$0xff]  ;;  %v13993_v38 = vld [vmem:[#allocation79_spill] sm:$0xff]  ;;  %v14001_v25 = vld [vmem:[#allocation84_spill] sm:$0xff] }
 0x30e   : > { %13975 = vst [vmem:[#allocation159_spill] sm:$0xff] %v10096_v34  ;;  %13981 = vst [vmem:[#allocation121_spill] sm:$0xff] %v10111_v18  ;;  %v10128_v41 = vmul.f32 %v13877_v54, %v13989_v28  ;;  %v10132_v5 = vmul.f32 %v9856_v10, %v13991_v55  ;;  %v10136_v13 = vmul.f32 %v9991_v23, %v13993_v38  ;;  %v13998_v16 = vld [vmem:[#allocation83_spill] sm:$0xff]  ;;  %v14022_v34 = vld [vmem:[#allocation14_spill] sm:$0xff] }
 0x30f   : > { %13983 = vst [vmem:[#allocation182_spill] sm:$0xff] %v10115_v19  ;;  %13985 = vst [vmem:[#allocation183_spill] sm:$0xff] %v10119_v21  ;;  %v2368_v20 = vadd.f32 %v13995_v32, %v2316_v3  ;;  %v10143_v45 = vmul.f32 %v9887_v60, %v13996_v31  ;;  %v10147_v52 = vmul.f32 %v13998_v16, %v9251_v63  ;;  %v14003_v32 = vrot.slane %v10060_v57, 3  ;;  %v14011_v15 = vld [vmem:[#allocation11_spill] sm:$0xff]  ;;  %v14030_v36 = vld [vmem:[#allocation16_spill] sm:$0xff] }
 0x310   : > { %13987 = vst [vmem:[#allocation124_spill] sm:$0xff] %v10123_v29  ;;  %13990 = vst [vmem:[#allocation110_spill] sm:$0xff] %v10128_v41  ;;  %v3414_v4 = vadd.f32 %v14000_v42, %v3321_v50  ;;  %v10154_v8 = vmul.f32 %v14001_v25, %v9895_v33  ;;  %v10181_v42 = vmul.f32 %v9856_v10, %v14011_v15  ;;  %v14016_v14 = vld [vmem:[#allocation23_spill] sm:$0xff] }
 0x311   : > { %13992 = vst [vmem:[#allocation103_spill] sm:$0xff] %v10132_v5  ;;  %13994 = vst [vmem:[#allocation35_spill] sm:$0xff] %v10136_v13  ;;  %v2420_v3 = vadd.f32 %v14003_v32, %v2368_v20  ;;  %v14006_v32 = vld [vmem:[#allocation9_spill] sm:$0xff]  ;;  %v14014_v20 = vld [vmem:[#allocation12_spill] sm:$0xff] }
 0x312   : > { %13997 = vst [vmem:[#allocation46_spill] sm:$0xff] %v10143_v45  ;;  %13999 = vst [vmem:[#allocation108_spill] sm:$0xff] %v10147_v52  ;;  %v3506_v47 = vadd.f32 %v14004_v58, %v3414_v4  ;;  %v10171_v53 = vmul.f32 %v13873_v61, %v14006_v32  ;;  %v14009_v4 = vld [vmem:[#allocation10_spill] sm:$0xff]  ;;  %v10187_v57 = vmul.f32 %v9991_v23, %v14014_v20  ;;  %v14025_v20 = vrot.slane %v10111_v18, 3  ;;  %v14036_v18 = vld [vmem:[#allocation27_spill] sm:$0xff] }
 0x313   : > { %14002 = vst [vmem:[#allocation184_spill] sm:$0xff] %v10154_v8  ;;  %v2472_v12 = vadd.f32 %v14005_v49, %v2420_v3  ;;  %v10177_v50 = vmul.f32 %v13877_v54, %v14009_v4  ;;  %14012 = vst [vmem:[#allocation74_spill] sm:$0xff] %v10181_v42  ;;  %v14013_v49 = vrot.slane %v10107_v62, 3  ;;  %v10200_v62 = vmul.f32 %v14022_v34, %v9251_v63 }
 0x314   : > { %14007 = vst [vmem:[#allocation85_spill] sm:$0xff] %v10171_v53  ;;  %v3598_v37 = vadd.f32 %v14008_v1, %v3506_v47  ;;  %14015 = vst [vmem:[#allocation185_spill] sm:$0xff] %v10187_v57  ;;  %v793_v47 = vmul.f32 %v14017_v59, %v14016_v14  ;;  %v14018_v1 = vld [vmem:[#allocation24_spill] sm:$0xff]  ;;  %v14026_v59 = vld [vmem:[#allocation15_spill] sm:$0xff]  ;;  %v10228_v34 = vmul.f32 %v13877_v54, %v13902_v11 }
 0x315   : > { %14010 = vst [vmem:[#allocation65_spill] sm:$0xff] %v10177_v50  ;;  %v2524_v3 = vadd.f32 %v14013_v49, %v2472_v12  ;;  %v829_v58 = vmul.f32 %v13873_v61, %v14018_v1  ;;  %14023 = vst [vmem:[#allocation86_spill] sm:$0xff] %v10200_v62  ;;  %v14024_v12 = vld [vmem:[#allocation25_spill] sm:$0xff]  ;;  %v10208_v14 = vmul.f32 %v14026_v59, %v9895_v33  ;;  %v14033_v59 = vld [vmem:[#allocation92_spill] sm:$0xff] }
 0x316   : > { %v3690_v6 = vadd.f32 %v14019_v39, %v3598_v37  ;;  %v865_v49 = vmul.f32 %v13877_v54, %v14024_v12  ;;  %v14028_v39 = vld [vmem:[#allocation26_spill] sm:$0xff]  ;;  %v10217_v12 = vmul.f32 %v13873_v61, %v14030_v36  ;;  %14034 = vst [vmem:[#allocation62_spill] sm:$0xff] %v10228_v34  ;;  %v14035_v61 = vrot.slane %v10119_v21, 3 }
 0x317   : > { %v2576_v8 = vadd.f32 %v14025_v20, %v2524_v3  ;;  %14027 = vst [vmem:[#allocation45_spill] sm:$0xff] %v10208_v14  ;;  %v845_v1 = vadd.f32 %v829_v58, %v793_v47  ;;  %v901_v37 = vmul.f32 %v9856_v10, %v14028_v39  ;;  %v14032_v20 = vrot.slane %v10115_v19, 3 }
 0x318   : > { %v3782_v15 = vadd.f32 %v14029_v2, %v3690_v6  ;;  %14031 = vst [vmem:[#allocation101_spill] sm:$0xff] %v10217_v12  ;;  %v937_v58 = vmul.f32 %v9991_v23, %v14036_v18  ;;  %v14039_v6 = vld [vmem:[#allocation28_spill] sm:$0xff]  ;;  %v14040_v2 = vrot.slane %v10123_v29, 4  ;;  %v2791_v21 = vmul.f32 %v9356_v51, %v13989_v28 }
 0x319   : > { %v2628_v3 = vadd.f32 %v14032_v20, %v2576_v8  ;;  %v881_v47 = vadd.f32 %v865_v49, %v845_v1  ;;  %v14037_v1 = vld [vmem:[#allocation151_spill] sm:$0xff]  ;;  %v973_v54 = vmul.f32 %v9887_v60, %v14039_v6  ;;  %v2699_v8 = vmul.f32 %v9316_v48, %v13986_v30 }
 0x31a   : > { %v3874_v39 = vadd.f32 %v14033_v59, %v3782_v15  ;;  %v10239_v59 = vmul.f32 %v9856_v10, %v13917_v22  ;;  %v10253_v15 = vmul.f32 %v9991_v23, %v13937_v17  ;;  %v10272_v19 = vmul.f32 %v13712_v43, %v9895_v33 }
 0x31b   : > { %v2680_v4 = vadd.f32 %v14035_v61, %v2628_v3  ;;  %v917_v20 = vadd.f32 %v901_v37, %v881_v47  ;;  %v14041_v37 = vld [vmem:[#allocation30_spill] sm:$0xff]  ;;  %v2736_v29 = vrot.slane %v2699_v8, 4  ;;  %v14049_v30 = vrot.slane %v10136_v13, 4 }
 0x31c   : > { %v3966_v49 = vadd.f32 %v14037_v1, %v3874_v39  ;;  %14038 = vst [vmem:[#allocation37_spill] sm:$0xff] %v10239_v59  ;;  %v1009_v47 = vmul.f32 %v14041_v37, %v9251_v63  ;;  %14042 = vst [vmem:[#allocation88_spill] sm:$0xff] %v10253_v15  ;;  %v10268_v1 = vmul.f32 %v13711_v7, %v9251_v63  ;;  %v2828_v63 = vrot.slane %v2791_v21, 4  ;;  %v14053_v13 = vld [vmem:[#allocation66_spill] sm:$0xff] }
 0x31d   : > { %v2772_v3 = vadd.f32 %v14040_v2, %v2680_v4  ;;  %v953_v61 = vadd.f32 %v937_v58, %v917_v20  ;;  %v14043_v4 = vrot.slane %v10128_v41, 4  ;;  %v10261_v2 = vmul.f32 %v9887_v60, %v13702_v46  ;;  %14046 = vst [vmem:[#allocation119_spill] sm:$0xff] %v10272_v19 }
 0x31e   : > { %v4059_v39 = vadd.f32 %v10045_v0, %v3966_v49  ;;  %v2883_v0 = vmul.f32 %v9652_v9, %v13991_v55  ;;  %14045 = vst [vmem:[#allocation158_spill] sm:$0xff] %v10268_v1  ;;  %v10281_v55 = vld [vmem:[#allocation4 + $0xe8] sm:$0xff] }
 0x31f   : > { %v2864_v58 = vadd.f32 %v14043_v4, %v2772_v3  ;;  %14044 = vst [vmem:[#allocation56_spill] sm:$0xff] %v10261_v2  ;;  %v989_v20 = vadd.f32 %v973_v54, %v953_v61  ;;  %v2975_v3 = vmul.f32 %v9656_v35, %v13993_v38  ;;  %v14047_v4 = vrot.slane %v10132_v5, 4  ;;  %14048 = vst [vmem:[#allocation95_spill] sm:$0xff] %v10281_v55  ;;  %v14055_v5 = vld [vmem:[#allocation93_spill] sm:$0xff] }
 0x320   : > { %v4151_v49 = vadd.f32 %v10067_v56, %v4059_v39  ;;  %v3067_v28 = vmul.f32 %v10281_v55, %v13996_v31  ;;  %v14052_v54 = vrot.slane %v10143_v45, 4  ;;  %v14056_v43 = vrot.slane %v14055_v5, 4 }
 0x321   : > { %v2956_v41 = vadd.f32 %v14047_v4, %v2864_v58  ;;  %v1025_v61 = vadd.f32 %v1009_v47, %v989_v20  ;;  %v10288_v58 = vld [vmem:[#allocation4 + $0x118] sm:$0xff]  ;;  %v14050_v4 = vld [vmem:[#allocation109_spill] sm:$0xff]  ;;  %v2920_v20 = vrot.slane %v2883_v0, 4  ;;  %v3012_v39 = vrot.slane %v2975_v3, 4 }
 0x322   : > { %v4243_v56 = vadd.f32 %v10072_v26, %v4151_v49  ;;  %v14051_v47 = vrot.slane %v14050_v4, 1  ;;  %v10302_v7 = vsel %vm506_vm0, %v14056_v43, %v2736_v29  ;;  %v3159_v0 = vmul.f32 %v13998_v16, %v9665_v40  ;;  %v14067_v49 = vld [vmem:[#allocation10_spill] sm:$0xff] }
 0x323   : > { %v3048_v38 = vadd.f32 %v14049_v30, %v2956_v41  ;;  %v14054_v41 = vrot.slane %v14053_v13, 1  ;;  %v3104_v4 = vrot.slane %v3067_v28, 4  ;;  %v3251_v13 = vmul.f32 %v14001_v25, %v10288_v58  ;;  %v14065_v28 = vld [vmem:[#allocation161_spill] sm:$0xff] }
 0x324   : > { %v1118_v8 = vadd.f32 %v14051_v47, %v1025_v61  ;;  %v4335_v26 = vadd.f32 %v10077_v27, %v4243_v56  ;;  %v14057_v61 = vld [vmem:[#allocation31_spill] sm:$0xff]  ;;  %v14062_v47 = vld [vmem:[#allocation34_spill] sm:$0xff] }
 0x325   : > { %v3140_v31 = vadd.f32 %v14052_v54, %v3048_v38  ;;  %v14058_v56 = vrot.slane %v14057_v61, 4  ;;  %v14059_v38 = vrot.slane %v10147_v52, 4  ;;  %v14060_v54 = vld [vmem:[#allocation118_spill] sm:$0xff]  ;;  %v14066_v61 = vrot.slane %v14065_v28, 4  ;;  %v14073_v52 = vld [vmem:[#allocation12_spill] sm:$0xff] }
 0x326   : > { %v1210_v30 = vadd.f32 %v14054_v41, %v1118_v8  ;;  %v4427_v27 = vadd.f32 %v10083_v44, %v4335_v26  ;;  %v14061_v43 = vrot.slane %v14060_v54, 1  ;;  %v14063_v8 = vrot.slane %v14062_v47, 4  ;;  %v14069_v54 = vld [vmem:[#allocation184_spill] sm:$0xff]  ;;  %v14071_v47 = vld [vmem:[#allocation186_spill] sm:$0xff] }
 0x327   : > { %v10310_v3 = vsel %vm506_vm0, %v14058_v56, %v2828_v63  ;;  %v3232_v5 = vadd.f32 %v14059_v38, %v3140_v31  ;;  %v3343_v44 = vmul.f32 %v9316_v48, %v14006_v32  ;;  %v14064_v63 = vld [vmem:[#allocation181_spill] sm:$0xff]  ;;  %v10329_v56 = vsel %vm506_vm0, %v14066_v61, %v3012_v39  ;;  %v14068_v38 = vld [vmem:[#allocation11_spill] sm:$0xff] }
 0x328   : > { %v1302_v29 = vadd.f32 %v14061_v43, %v1210_v30  ;;  %v10321_v41 = vsel %vm506_vm0, %v14063_v8, %v2920_v20  ;;  %v4519_v26 = vadd.f32 %v14064_v63, %v4427_v27  ;;  %v3436_v31 = vmul.f32 %v9356_v51, %v14067_v49  ;;  %v14074_v63 = vld [vmem:[#allocation159_spill] sm:$0xff]  ;;  %v14075_v61 = vld [vmem:[#allocation13_spill] sm:$0xff]  ;;  %v14076_v51 = vld [vmem:[#allocation14_spill] sm:$0xff] }
 0x329   : > { %v3528_v30 = vmul.f32 %v9652_v9, %v14068_v38  ;;  %v14070_v43 = vrot.slane %v14069_v54, 4  ;;  %v14072_v8 = vrot.slane %v14071_v47, 1  ;;  %v3196_v48 = vrot.slane %v3159_v0, 4  ;;  %v14080_v0 = vld [vmem:[#allocation15_spill] sm:$0xff] }
 0x32a   : > { %v3620_v27 = vmul.f32 %v9656_v35, %v14073_v52  ;;  %v4611_v28 = vadd.f32 %v14074_v63, %v4519_v26  ;;  %v3288_v39 = vrot.slane %v3251_v13, 4  ;;  %v3712_v45 = vmul.f32 %v10281_v55, %v14075_v61  ;;  %v10355_v13 = vld [vmem:[%s11672_s5] ss:$0 sm:$0xff]  ;;  %v5612_v61 = vld [vmem:[#allocation4 + $0x88] sm:$0xff] }
 0x32b   : > { %v3324_v20 = vadd.f32 %v14070_v43, %v3232_v5  ;;  %v1394_v21 = vadd.f32 %v14072_v8, %v1302_v29  ;;  %v3804_v49 = vmul.f32 %v14076_v51, %v9665_v40  ;;  %v14077_v38 = vrot.slane %v10171_v53, 5  ;;  %v14078_v5 = vld [vmem:[#allocation176_spill] sm:$0xff]  ;;  %14081 = vst [vmem:[#allocation120_spill] sm:$0xff] %v10355_v13 }
 0x32c   : > { %v14079_v43 = vrot.slane %v14078_v5, 1  ;;  %v3381_v29 = vrot.slane %v3343_v44, 5  ;;  %v3896_v8 = vmul.f32 %v14080_v0, %v10288_v58  ;;  %v10358_v26 = vadd.f32 %v10355_v13, %v4611_v28  ;;  %v14084_v44 = vld [vmem:[#allocation43_spill] sm:$0xff]  ;;  %v14086_v53 = vld [vmem:[#allocation140_spill] sm:$0xff] }
 0x32d   : > { %v3417_v54 = vadd.f32 %v14077_v38, %v3324_v20  ;;  %v3473_v63 = vrot.slane %v3436_v31, 5  ;;  %v3565_v51 = vrot.slane %v3528_v30, 5  ;;  %v3988_v38 = vmul.f32 %v5612_v61, %v14030_v36  ;;  %v14088_v31 = vld [vmem:[#allocation145_spill] sm:$0xff]  ;;  %v14095_v36 = vld [vmem:[#allocation146_spill] sm:$0xff] }
 0x32e   : > { %v1486_v47 = vadd.f32 %v14079_v43, %v1394_v21  ;;  %14082 = vst [vmem:[#allocation178_spill] sm:$0xff] %v10358_v26  ;;  %v14083_v20 = vrot.slane %v10177_v50, 5  ;;  %v14085_v5 = vrot.slane %v14084_v44, 1  ;;  %v14087_v0 = vrot.slane %v14086_v53, 4 }
 0x32f   : > { %v3657_v32 = vrot.slane %v3620_v27, 5  ;;  %v4670_v28 = vsel %vm4645_vm8, %v10358_v26, 0.0  ;;  %v14089_v30 = vrot.slane %v14088_v31, 4  ;;  %v3749_v61 = vrot.slane %v3712_v45, 5  ;;  %v14098_v45 = vld [vmem:[#allocation94_spill] sm:$0xff] }
 0x330   : > { %v3509_v21 = vadd.f32 %v14083_v20, %v3417_v54  ;;  %v1578_v43 = vadd.f32 %v14085_v5, %v1486_v47  ;;  %v10368_v52 = vsel %vm506_vm0, %v14087_v0, %v3104_v4  ;;  %v3841_v50 = vrot.slane %v3804_v49, 5  ;;  %4671 = vadd.xlane.f32.xlu1 %v4670_v28  ;;  %v14091_v20 = vld [vmem:[#allocation60_spill] sm:$0xff] }
 0x331   : > { %v10375_v25 = vsel %vm506_vm0, %v14089_v30, %v3196_v48  ;;  %v14090_v54 = vrot.slane %v10181_v42, 5  ;;  %v14092_v53 = vrot.slane %v14091_v20, 1  ;;  %v14093_v4 = vld [vmem:[#allocation156_spill] sm:$0xff]  ;;  %v3933_v5 = vrot.slane %v3896_v8, 5  ;;  %v14105_v8 = vld [vmem:[#allocation107_spill] sm:$0xff] }
 0x332   : > { %v14094_v0 = vrot.slane %v14093_v4, 4  ;;  %v14096_v31 = vrot.slane %v14095_v36, 5  ;;  %v14099_v49 = vrot.slane %v14098_v45, 5  ;;  %v14107_v4 = vld [vmem:[#allocation99_spill] sm:$0xff]  ;;  %v14128_v42 = vld [vmem:[#allocation152_spill] sm:$0xff] }
 0x333   : > { %v3601_v47 = vadd.f32 %v14090_v54, %v3509_v21  ;;  %v1670_v44 = vadd.f32 %v14092_v53, %v1578_v43  ;;  %v14101_v21 = vld [vmem:[#allocation87_spill] sm:$0xff]  ;;  %v4026_v54 = vrot.slane %v3988_v38, 6  ;;  %v14106_v53 = vrot.slane %v14105_v8, 2  ;;  %v14120_v8 = vld [vmem:[#allocation122_spill] sm:$0xff] }
 0x334   : > { %v10384_v27 = vsel %vm506_vm0, %v14094_v0, %v3288_v39  ;;  %v10389_v48 = vsel %vm3364_vm6, %v14096_v31, %v3381_v29  ;;  %v10394_v28 = vsel %vm3364_vm6, %v14099_v49, %v3473_v63  ;;  %v14102_v30 = vrot.slane %v14101_v21, 5  ;;  %v14110_v31 = vld [vmem:[#allocation23_spill] sm:$0xff]  ;;  %v14111_v63 = vld [vmem:[#allocation154_spill] sm:$0xff] }
 0x335   : > { %14097 = vst [vmem:[#allocation97_spill] sm:$0xff] %v10389_v48  ;;  %14100 = vst [vmem:[#allocation57_spill] sm:$0xff] %v10394_v28  ;;  %v14104_v39 = vrot.slane %v10187_v57, 5  ;;  %v1763_v36 = vadd.f32 %v14106_v53, %v1670_v44  ;;  %v14108_v29 = vrot.slane %v14107_v4, 5  ;;  %v796_v45 = vmul.f32 %v14111_v63, %v14110_v31  ;;  %v14112_v49 = vld [vmem:[#allocation42_spill] sm:$0xff]  ;;  %v14115_v38 = vld [vmem:[#allocation63_spill] sm:$0xff] }
 0x336   : > { %v10399_v43 = vsel %vm3364_vm6, %v14102_v30, %v3565_v51  ;;  %v14113_v21 = vrot.slane %v14112_v49, 5  ;;  %v14116_v30 = vrot.slane %v14115_v38, 5  ;;  %v14121_v4 = vrot.slane %v10196_v24, 5  ;;  %v14122_v49 = vld [vmem:[#allocation172_spill] sm:$0xff] }
 0x337   : > { %14103 = vst [vmem:[#allocation170_spill] sm:$0xff] %v10399_v43  ;;  %v3693_v20 = vadd.f32 %v14104_v39, %v3601_v47  ;;  %v10408_v0 = vsel %vm3364_vm6, %v14108_v29, %v3657_v32  ;;  %v10422_v39 = vld [vmem:[#allocation4 + $0xa0] sm:$0xff]  ;;  %v14119_v32 = vld [vmem:[#allocation24_spill] sm:$0xff]  ;;  %v10448_v24 = vmul.f32 %v9652_v9, %v13917_v22 }
 0x338   : > { %14109 = vst [vmem:[#allocation106_spill] sm:$0xff] %v10408_v0  ;;  %v10415_v51 = vsel %vm3364_vm6, %v14113_v21, %v3749_v61  ;;  %v10420_v47 = vsel %vm3364_vm6, %v14116_v30, %v3841_v50  ;;  %14118 = vst [vmem:[#allocation112_spill] sm:$0xff] %v10422_v39  ;;  %v10426_v44 = vmul.f32 %v10422_v39, %v13902_v11  ;;  %v14123_v61 = vrot.slane %v14122_v49, 2  ;;  %v14124_v57 = vld [vmem:[#allocation164_spill] sm:$0xff]  ;;  %v14127_v30 = vld [vmem:[#allocation25_spill] sm:$0xff] }
 0x339   : > { %14114 = vst [vmem:[#allocation137_spill] sm:$0xff] %v10415_v51  ;;  %14117 = vst [vmem:[#allocation116_spill] sm:$0xff] %v10420_v47  ;;  %v832_v53 = vmul.f32 %v14120_v8, %v14119_v32  ;;  %v3785_v29 = vadd.f32 %v14121_v4, %v3693_v20  ;;  %v14125_v38 = vrot.slane %v14124_v57, 5  ;;  %v868_v47 = vmul.f32 %v14128_v42, %v14127_v30  ;;  %v14129_v51 = vld [vmem:[#allocation102_spill] sm:$0xff] }
 0x33a   : > { %v1855_v21 = vadd.f32 %v14123_v61, %v1763_v36  ;;  %v14130_v39 = vrot.slane %v14129_v51, 6  ;;  %v14132_v4 = vld [vmem:[#allocation26_spill] sm:$0xff]  ;;  %v14133_v36 = vld [vmem:[#allocation155_spill] sm:$0xff]  ;;  %v14134_v57 = vrot.slane %v10200_v62, 5  ;;  %v10458_v51 = vmul.f32 %v9656_v35, %v13937_v17  ;;  %v10469_v62 = vld [vmem:[#allocation4 + $0x108] sm:$0xff] }
 0x33b   : > { %v10437_v50 = vsel %vm3364_vm6, %v14125_v38, %v3933_v5  ;;  %v848_v20 = vadd.f32 %v832_v53, %v796_v45  ;;  %v904_v49 = vmul.f32 %v14133_v36, %v14132_v4  ;;  %v14135_v61 = vld [vmem:[#allocation131_spill] sm:$0xff]  ;;  %v14137_v45 = vld [vmem:[#allocation126_spill] sm:$0xff]  ;;  %v14142_v17 = vld [vmem:[#allocation29_spill] sm:$0xff] }
 0x33c   : > { %14126 = vst [vmem:[#allocation169_spill] sm:$0xff] %v10437_v50  ;;  %v10444_v11 = vsel %vm4009_vm7, %v14130_v39, %v4026_v54  ;;  %v3877_v5 = vadd.f32 %v14134_v57, %v3785_v29  ;;  %v14136_v38 = vrot.slane %v14135_v61, 2  ;;  %v10462_v54 = vmul.f32 %v10281_v55, %v13702_v46  ;;  %v14139_v57 = vld [vmem:[#allocation111_spill] sm:$0xff]  ;;  %v10477_v55 = vld [vmem:[#allocation4 + $0x138] sm:$0xff] }
 0x33d   : > { %14131 = vst [vmem:[#allocation117_spill] sm:$0xff] %v10444_v11  ;;  %v10467_v39 = vmul.f32 %v14137_v45, %v14137_v45  ;;  %v884_v53 = vadd.f32 %v868_v47, %v848_v20  ;;  %v940_v29 = vmul.f32 %v10469_v62, %v14036_v18  ;;  %v14140_v61 = vrot.slane %v14139_v57, 2  ;;  %v14141_v46 = vld [vmem:[#allocation134_spill] sm:$0xff]  ;;  %v10483_v20 = vld [vmem:[#allocation4 + $0xb0] sm:$0xff] }
 0x33e   : > { %v1947_v50 = vadd.f32 %v14136_v38, %v1855_v21  ;;  %v14138_v21 = vrot.slane %v10208_v14, 5  ;;  %v976_v9 = vmul.f32 %v14039_v6, %v14141_v46  ;;  %v1048_v45 = vmul.f32 %v14111_v63, %v14142_v17  ;;  %v14143_v14 = vld [vmem:[#allocation33_spill] sm:$0xff]  ;;  %v14150_v6 = vld [vmem:[#allocation96_spill] sm:$0xff] }
 0x33f   : > { %v920_v47 = vadd.f32 %v904_v49, %v884_v53  ;;  %v10487_v22 = vmul.f32 %v10483_v20, %v14142_v17  ;;  %v14148_v53 = vld [vmem:[#allocation36_spill] sm:$0xff]  ;;  %v1012_v17 = vmul.f32 %v14041_v37, %v10477_v55 }
 0x340   : > { %v3969_v35 = vadd.f32 %v14138_v21, %v3877_v5  ;;  %v2039_v38 = vadd.f32 %v14140_v61, %v1947_v50  ;;  %v1141_v5 = vmul.f32 %v14120_v8, %v14143_v14  ;;  %v10493_v50 = vmul.f32 %v9856_v10, %v14143_v14  ;;  %v14146_v61 = vld [vmem:[#allocation49_spill] sm:$0xff] }
 0x341   : > { %v14145_v21 = vrot.slane %v10217_v12, 6  ;;  %v14147_v11 = vrot.slane %v14146_v61, 2  ;;  %v1088_v49 = vrot.slane %v1048_v45, 1  ;;  %v1233_v0 = vmul.f32 %v14128_v42, %v14148_v53 }
 0x342   : > { %14144 = vst [vmem:[#allocation125_spill] sm:$0xff] %v10493_v50  ;;  %v956_v16 = vadd.f32 %v940_v29, %v920_v47  ;;  %v12379_v43 = vrot.slane %v10487_v22, 1  ;;  %v1180_v28 = vrot.slane %v1141_v5, 1  ;;  %v14149_v14 = vrot.slane %v10228_v34, 6  ;;  %v14153_v47 = vld [vmem:[#allocation38_spill] sm:$0xff] }
 0x343   : > { %v4062_v57 = vadd.f32 %v14145_v21, %v3969_v35  ;;  %v2131_v32 = vadd.f32 %v14147_v11, %v2039_v38  ;;  %v14151_v12 = vrot.slane %v14150_v6, 2  ;;  %v10511_v11 = vmul.f32 %v9991_v23, %v14148_v53  ;;  %v14155_v6 = vld [vmem:[#allocation142_spill] sm:$0xff]  ;;  %v14158_v21 = vld [vmem:[#allocation41_spill] sm:$0xff] }
 0x344   : > { %v992_v45 = vadd.f32 %v976_v9, %v956_v16  ;;  %v1090_v29 = vsel %vm1066_vm3, %v1088_v49, %v12379_v43  ;;  %v1272_v38 = vrot.slane %v1233_v0, 1  ;;  %v1325_v5 = vmul.f32 %v14133_v36, %v14153_v47  ;;  %v10529_v49 = vld [vmem:[#allocation4 + $0x110] sm:$0xff] }
 0x345   : > { %v4154_v48 = vadd.f32 %v14149_v14, %v4062_v57  ;;  %v2223_v35 = vadd.f32 %v14151_v12, %v2131_v32  ;;  %14152 = vst [vmem:[#allocation153_spill] sm:$0xff] %v10511_v11  ;;  %v14154_v57 = vrot.slane %v10239_v59, 6  ;;  %v14156_v12 = vrot.slane %v14155_v6, 2 }
 0x346   : > { %v10525_v53 = vmul.f32 %v9887_v60, %v14153_v47  ;;  %v1028_v16 = vadd.f32 %v1012_v17, %v992_v45  ;;  %v1364_v9 = vrot.slane %v1325_v5, 1  ;;  %v1417_v0 = vmul.f32 %v10469_v62, %v14158_v21  ;;  %v10543_v5 = vld [vmem:[#allocation4 + $0x140] sm:$0xff] }
 0x347   : > { %v4246_v61 = vadd.f32 %v14154_v57, %v4154_v48  ;;  %v2315_v32 = vadd.f32 %v14156_v12, %v2223_v35  ;;  %v10533_v43 = vmul.f32 %v10529_v49, %v14158_v21  ;;  %v14160_v48 = vrot.slane %v10253_v15, 6  ;;  %v14161_v57 = vld [vmem:[#allocation89_spill] sm:$0xff]  ;;  %v14165_v15 = vld [vmem:[#allocation39_spill] sm:$0xff] }
 0x348   : > { %14157 = vst [vmem:[#allocation132_spill] sm:$0xff] %v10525_v53  ;;  %v14162_v6 = vrot.slane %v14161_v57, 3  ;;  %v14163_v47 = vrot.slane %v10493_v50, 1  ;;  %v12385_v45 = vrot.slane %v10525_v53, 1  ;;  %v1121_v14 = vadd.f32 %v1090_v29, %v1028_v16  ;;  %v14167_v57 = vld [vmem:[#allocation166_spill] sm:$0xff]  ;;  %v14170_v16 = vld [vmem:[#allocation40_spill] sm:$0xff] }
 0x349   : > { %14159 = vst [vmem:[#allocation171_spill] sm:$0xff] %v10533_v43  ;;  %v4338_v35 = vadd.f32 %v14160_v48, %v4246_v61  ;;  %v14164_v59 = vrot.slane %v10511_v11, 1  ;;  %v1456_v34 = vrot.slane %v1417_v0, 1  ;;  %v1509_v61 = vmul.f32 %v14165_v15, %v14141_v46  ;;  %v5617_v53 = vld [vmem:[#allocation4 + $0x98] sm:$0xff] }
 0x34a   : > { %v2367_v12 = vadd.f32 %v14162_v6, %v2315_v32  ;;  %v1182_v17 = vsel %vm1066_vm3, %v1180_v28, %v14163_v47  ;;  %v14166_v48 = vrot.slane %v10261_v2, 6  ;;  %v14168_v6 = vrot.slane %v14167_v57, 3  ;;  %v14172_v57 = vld [vmem:[#allocation90_spill] sm:$0xff]  ;;  %v14175_v2 = vld [vmem:[#allocation47_spill] sm:$0xff] }
 0x34b   : > { %v1274_v21 = vsel %vm1066_vm3, %v1272_v38, %v14164_v59  ;;  %v10557_v47 = vmul.f32 %v14165_v15, %v9895_v33  ;;  %v1213_v29 = vadd.f32 %v1182_v17, %v1121_v14  ;;  %v1366_v59 = vsel %vm1066_vm3, %v1364_v9, %v12385_v45 }
 0x34c   : > { %v4430_v32 = vadd.f32 %v14166_v48, %v4338_v35  ;;  %v2419_v50 = vadd.f32 %v14168_v6, %v2367_v12  ;;  %v1548_v38 = vrot.slane %v1509_v61, 1  ;;  %v1601_v0 = vmul.f32 %v14170_v16, %v10477_v55 }
 0x34d   : > { %14169 = vst [vmem:[#allocation167_spill] sm:$0xff] %v10557_v47  ;;  %v14171_v35 = vrot.slane %v10268_v1, 6  ;;  %v14173_v12 = vrot.slane %v14172_v57, 3  ;;  %v12388_v28 = vrot.slane %v10557_v47, 1  ;;  %v10571_v15 = vmul.f32 %v14170_v16, %v10543_v5  ;;  %v14178_v57 = vld [vmem:[#allocation32_spill] sm:$0xff]  ;;  %v14255_v47 = vld [vmem:[#allocation11_spill] sm:$0xff] }
 0x34e   : > { %v1305_v14 = vadd.f32 %v1274_v21, %v1213_v29  ;;  %v1640_v17 = vrot.slane %v1601_v0, 1  ;;  %v1693_v9 = vmul.f32 %v14111_v63, %v14175_v2  ;;  %v10577_v61 = vmul.f32 %v10483_v20, %v14175_v2  ;;  %v14181_v2 = vld [vmem:[#allocation50_spill] sm:$0xff] }
 0x34f   : > { %v4522_v48 = vadd.f32 %v14171_v35, %v4430_v32  ;;  %v2471_v6 = vadd.f32 %v14173_v12, %v2419_v50  ;;  %14174 = vst [vmem:[#allocation123_spill] sm:$0xff] %v10571_v15  ;;  %v14177_v32 = vrot.slane %v10272_v19, 6  ;;  %v14179_v50 = vrot.slane %v14178_v57, 3  ;;  %v14236_v19 = vld [vmem:[#allocation78_spill] sm:$0xff] }
 0x350   : > { %14176 = vst [vmem:[#allocation147_spill] sm:$0xff] %v10577_v61  ;;  %v14180_v45 = vrot.slane %v10533_v43, 1  ;;  %v12387_v21 = vrot.slane %v10571_v15, 1  ;;  %v1397_v29 = vadd.f32 %v1366_v59, %v1305_v14  ;;  %v1550_v63 = vsel %vm1066_vm3, %v1548_v38, %v12388_v28  ;;  %v14186_v14 = vld [vmem:[#allocation52_spill] sm:$0xff] }
 0x351   : > { %v4614_v35 = vadd.f32 %v14177_v32, %v4522_v48  ;;  %v2523_v12 = vadd.f32 %v14179_v50, %v2471_v6  ;;  %v1733_v0 = vrot.slane %v1693_v9, 2  ;;  %v1786_v1 = vmul.f32 %v14120_v8, %v14181_v2  ;;  %v14183_v32 = vld [vmem:[#allocation149_spill] sm:$0xff] }
 0x352   : > { %v1458_v16 = vsel %vm1066_vm3, %v1456_v34, %v14180_v45  ;;  %v14184_v6 = vrot.slane %v14183_v32, 3  ;;  %v12390_v50 = vrot.slane %v10577_v61, 2  ;;  %v10600_v34 = vmul.f32 %v9856_v10, %v14181_v2  ;;  %v14246_v61 = vld [vmem:[#allocation84_spill] sm:$0xff] }
 0x353   : > { %v10593_v48 = vadd.f32 %v10355_v13, %v4614_v35  ;;  %v1489_v45 = vadd.f32 %v1458_v16, %v1397_v29  ;;  %v1642_v59 = vsel %vm1066_vm3, %v1640_v17, %v12387_v21  ;;  %v1825_v38 = vrot.slane %v1786_v1, 2  ;;  %v14187_v35 = vld [vmem:[#allocation127_spill] sm:$0xff]  ;;  %v14190_v16 = vld [vmem:[#allocation21_spill] sm:$0xff] }
 0x354   : > { %v2575_v57 = vadd.f32 %v14184_v6, %v2523_v12  ;;  %14185 = vst [vmem:[#allocation92_spill] sm:$0xff] %v10600_v34  ;;  %v1878_v8 = vmul.f32 %v14128_v42, %v14186_v14  ;;  %v14188_v12 = vrot.slane %v14187_v35, 3  ;;  %v12389_v6 = vrot.slane %v10600_v34, 2  ;;  %v14191_v29 = vld [vmem:[#allocation53_spill] sm:$0xff]  ;;  %v14193_v35 = vld [vmem:[#allocation135_spill] sm:$0xff] }
 0x355   : > { %14182 = vst [vmem:[#allocation105_spill] sm:$0xff] %v10593_v48  ;;  %v4679_v9 = vsel %vm4641_vm5, %v10593_v48, 0.0  ;;  %v10614_v2 = vmul.f32 %v9991_v23, %v14186_v14  ;;  %v4449_v17 = vmul.f32 %v14190_v16, %v9665_v40  ;;  %v1581_v1 = vadd.f32 %v1550_v63, %v1489_v45 }
 0x356   : > { %v2627_v32 = vadd.f32 %v14188_v12, %v2575_v57  ;;  %4680 = vadd.xlane.f32.xlu0 %v4679_v9  ;;  %v1970_v42 = vmul.f32 %v14133_v36, %v14191_v29  ;;  %v10622_v21 = vmul.f32 %v9887_v60, %v14191_v29  ;;  %v14194_v57 = vrot.slane %v14193_v35, 3  ;;  %v14195_v9 = vld [vmem:[#allocation58_spill] sm:$0xff] }
 0x357   : > { %14189 = vst [vmem:[#allocation27_spill] sm:$0xff] %v10614_v2  ;;  %v4754_v28 = vsel %vm4641_vm5, %v10467_v39, 0.0  ;;  %v1735_v14 = vsel %vm1711_vm4, %v1733_v0, %v12390_v50  ;;  %v2062_v40 = vmul.f32 %v10469_v62, %v14195_v9  ;;  %v1673_v63 = vadd.f32 %v1642_v59, %v1581_v1  ;;  %v14197_v0 = vld [vmem:[#allocation54_spill] sm:$0xff] }
 0x358   : > { %14192 = vst [vmem:[#allocation151_spill] sm:$0xff] %v10622_v21  ;;  %v2679_v12 = vadd.f32 %v14194_v57, %v2627_v32  ;;  %v1827_v36 = vsel %vm1711_vm4, %v1825_v38, %v12389_v6  ;;  %v1917_v45 = vrot.slane %v1878_v8, 2  ;;  %v10638_v29 = vmul.f32 %v10529_v49, %v14195_v9 }
 0x359   : > { %v12395_v39 = vrot.slane %v10614_v2, 2  ;;  %v2009_v35 = vrot.slane %v1970_v42, 2  ;;  %v2154_v57 = vmul.f32 %v14197_v0, %v14141_v46  ;;  %v1766_v62 = vadd.f32 %v1735_v14, %v1673_v63  ;;  %v14201_v14 = vld [vmem:[#allocation22_spill] sm:$0xff]  ;;  %v14244_v2 = vld [vmem:[#allocation83_spill] sm:$0xff] }
 0x35a   : > { %14196 = vst [vmem:[#allocation30_spill] sm:$0xff] %v10638_v29  ;;  %v2771_v32 = vadd.f32 %v10302_v7, %v2679_v12  ;;  %4755 = vadd.xlane.f32.xlu0 %v4754_v28  ;;  %v12394_v59 = vrot.slane %v10622_v21, 2  ;;  %v2101_v1 = vrot.slane %v2062_v40, 2  ;;  %v10647_v38 = vmul.f32 %v14197_v0, %v9895_v33  ;;  %v14199_v7 = vld [vmem:[#allocation59_spill] sm:$0xff]  ;;  %v14263_v21 = vld [vmem:[#allocation116_spill] sm:$0xff] }
 0x35b   : > { %v12391_v9 = vrot.slane %v10638_v29, 2  ;;  %v2246_v12 = vmul.f32 %v14199_v7, %v10477_v55  ;;  %v10655_v42 = vmul.f32 %v14199_v7, %v10543_v5  ;;  %v4210_v46 = vrot.slane %v10448_v24, 6 }
 0x35c   : > { %14198 = vst [vmem:[#allocation109_spill] sm:$0xff] %v10647_v38  ;;  %v2863_v8 = vadd.f32 %v10310_v3, %v2771_v32  ;;  %v4302_v28 = vrot.slane %v10458_v51, 6  ;;  %v4541_v40 = vmul.f32 %v14201_v14, %v10288_v58  ;;  %v1858_v63 = vadd.f32 %v1827_v36, %v1766_v62  ;;  %v14203_v62 = vld [vmem:[#allocation136_spill] sm:$0xff] }
 0x35d   : > { %14200 = vst [vmem:[#allocation66_spill] sm:$0xff] %v10655_v42  ;;  %v1919_v3 = vsel %vm1711_vm4, %v1917_v45, %v12395_v39  ;;  %v2193_v32 = vrot.slane %v2154_v57, 2  ;;  %v12393_v55 = vrot.slane %v10647_v38, 2  ;;  %v4394_v7 = vrot.slane %v10462_v54, 6  ;;  %v14233_v39 = vld [vmem:[#allocation57_spill] sm:$0xff]  ;;  %v14243_v38 = vld [vmem:[#allocation170_spill] sm:$0xff] }
 0x35e   : > { %v2955_v0 = vadd.f32 %v10321_v41, %v2863_v8  ;;  %v4486_v6 = vrot.slane %v4449_v17, 6  ;;  %v1950_v50 = vadd.f32 %v1919_v3, %v1858_v63  ;;  %v2011_v24 = vsel %vm1711_vm4, %v2009_v35, %v12394_v59 }
 0x35f   : > { %v2103_v41 = vsel %vm1711_vm4, %v2101_v1, %v12391_v9  ;;  %v2285_v36 = vrot.slane %v2246_v12, 2  ;;  %v12392_v45 = vrot.slane %v10655_v42, 2  ;;  %v14202_v57 = vrot.slane %v10426_v44, 6  ;;  %v14207_v12 = vld [vmem:[#allocation133_spill] sm:$0xff]  ;;  %v14252_v42 = vld [vmem:[#allocation10_spill] sm:$0xff] }
 0x360   : > { %v3047_v51 = vadd.f32 %v10329_v56, %v2955_v0  ;;  %v14204_v8 = vrot.slane %v14203_v62, 6  ;;  %v4578_v17 = vrot.slane %v4541_v40, 6  ;;  %v4717_v35 = vmul.f32 %v10358_v26, %v10358_v26  ;;  %v14205_v0 = vld [vmem:[#allocation113_spill] sm:$0xff] }
 0x361   : > { %v2042_v63 = vadd.f32 %v2011_v24, %v1950_v50  ;;  %v14206_v3 = vrot.slane %v14205_v0, 6  ;;  %v14208_v9 = vrot.slane %v14207_v12, 6  ;;  %v2195_v40 = vsel %vm1711_vm4, %v2193_v32, %v12393_v55  ;;  %v14234_v26 = vld [vmem:[#allocation77_spill] sm:$0xff] }
 0x362   : > { %v10680_v54 = vsel %vm4009_vm7, %v14204_v8, %v14202_v57  ;;  %v3139_v56 = vadd.f32 %v10368_v52, %v3047_v51  ;;  %v14209_v57 = vld [vmem:[#allocation177_spill] sm:$0xff]  ;;  %v14211_v52 = vld [vmem:[#allocation150_spill] sm:$0xff]  ;;  %v14213_v8 = vld [vmem:[#allocation67_spill] sm:$0xff]  ;;  %v2287_v32 = vsel %vm1711_vm4, %v2285_v36, %v12392_v45  ;;  %v10730_v12 = vsel %vm4645_vm8, %v4717_v35, 0.0 }
 0x363   : > { %v10688_v1 = vsel %vm4009_vm7, %v14206_v3, %v4210_v46  ;;  %v10693_v44 = vsel %vm4009_vm7, %v14208_v9, %v4302_v28  ;;  %v14210_v62 = vrot.slane %v14209_v57, 6  ;;  %v14212_v24 = vrot.slane %v14211_v52, 6  ;;  %14219 = vst [vmem:[#allocation118_spill] sm:$0xff] %v10730_v12  ;;  %v14226_v45 = vld [vmem:[#allocation72_spill] sm:$0xff] }
 0x364   : > { %v2134_v46 = vadd.f32 %v2103_v41, %v2042_v63  ;;  %v10710_v0 = vmul.f32 %v10483_v20, %v14213_v8  ;;  %v3231_v9 = vadd.f32 %v10375_v25, %v3139_v56  ;;  %v10715_v28 = vmul.f32 %v10483_v20, %v14110_v31  ;;  %v14221_v8 = vld [vmem:[#allocation70_spill] sm:$0xff] }
 0x365   : > { %v10701_v50 = vsel %vm4009_vm7, %v14210_v62, %v4394_v7  ;;  %v10706_v51 = vsel %vm4009_vm7, %v14212_v24, %v4486_v6  ;;  %v14215_v7 = vld [vmem:[#allocation69_spill] sm:$0xff]  ;;  %v14217_v6 = vld [vmem:[#allocation143_spill] sm:$0xff]  ;;  %v10734_v25 = vmul.f32 %v9991_v23, %v14127_v30  ;;  %v10739_v36 = vmul.f32 %v9887_v60, %v14132_v4 }
 0x366   : > { %14214 = vst [vmem:[#allocation93_spill] sm:$0xff] %v10710_v0  ;;  %v10722_v3 = vmul.f32 %v9856_v10, %v14215_v7  ;;  %v14218_v41 = vrot.slane %v14217_v6, 6  ;;  %v2226_v56 = vadd.f32 %v2195_v40, %v2134_v46  ;;  %v3323_v57 = vadd.f32 %v10384_v27, %v3231_v9  ;;  %v14223_v27 = vld [vmem:[#allocation71_spill] sm:$0xff]  ;;  %v14225_v9 = vld [vmem:[#allocation97_spill] sm:$0xff] }
 0x367   : > { %v10743_v62 = vmul.f32 %v10529_v49, %v14036_v18  ;;  %v12398_v24 = vrot.slane %v10710_v0, 3  ;;  %v10752_v40 = vmul.f32 %v9991_v23, %v14221_v8  ;;  %v10756_v46 = vmul.f32 %v9887_v60, %v14223_v27  ;;  %v14228_v8 = vld [vmem:[#allocation73_spill] sm:$0xff]  ;;  %v14230_v27 = vld [vmem:[#allocation75_spill] sm:$0xff] }
 0x368   : > { %14216 = vst [vmem:[#allocation31_spill] sm:$0xff] %v10722_v3  ;;  %v10727_v63 = vsel %vm4009_vm7, %v14218_v41, %v4578_v17  ;;  %v14220_v17 = vld [vmem:[#allocation28_spill] sm:$0xff]  ;;  %v2318_v35 = vadd.f32 %v2287_v32, %v2226_v56  ;;  %v3416_v7 = vadd.f32 %v14225_v9, %v3323_v57  ;;  %v10761_v6 = vmul.f32 %v14041_v37, %v10543_v5 }
 0x369   : > { %v10747_v52 = vmul.f32 %v14220_v17, %v9895_v33  ;;  %14222 = vst [vmem:[#allocation34_spill] sm:$0xff] %v10752_v40  ;;  %14224 = vst [vmem:[#allocation181_spill] sm:$0xff] %v10756_v46  ;;  %v10766_v32 = vmul.f32 %v10529_v49, %v14226_v45  ;;  %v10772_v55 = vmul.f32 %v14228_v8, %v9895_v33  ;;  %v14232_v9 = vld [vmem:[#allocation76_spill] sm:$0xff]  ;;  %v14238_v8 = vld [vmem:[#allocation79_spill] sm:$0xff]  ;;  %v12414_v48 = vrot.slane %v10752_v40, 3 }
 0x36a   : > { %v2370_v56 = vadd.f32 %v12398_v24, %v2318_v35  ;;  %v10776_v57 = vmul.f32 %v14230_v27, %v10543_v5  ;;  %v10780_v59 = vmul.f32 %v10483_v20, %v14232_v9  ;;  %v3508_v41 = vadd.f32 %v14233_v39, %v3416_v7  ;;  %v14241_v39 = vld [vmem:[#allocation80_spill] sm:$0xff] }
 0x36b   : > { %14227 = vst [vmem:[#allocation161_spill] sm:$0xff] %v10766_v32  ;;  %14229 = vst [vmem:[#allocation186_spill] sm:$0xff] %v10772_v55  ;;  %v10785_v45 = vmul.f32 %v9856_v10, %v14234_v26  ;;  %v10789_v35 = vmul.f32 %v9991_v23, %v14236_v19  ;;  %v10793_v24 = vmul.f32 %v9887_v60, %v14238_v8  ;;  %v14240_v27 = vrot.slane %v10722_v3, 3  ;;  %v14258_v40 = vld [vmem:[#allocation12_spill] sm:$0xff] }
 0x36c   : > { %14231 = vst [vmem:[#allocation159_spill] sm:$0xff] %v10776_v57  ;;  %v10801_v7 = vmul.f32 %v10529_v49, %v14241_v39  ;;  %v3600_v29 = vadd.f32 %v14243_v38, %v3508_v41  ;;  %v10807_v34 = vmul.f32 %v14244_v2, %v9895_v33  ;;  %v10811_v3 = vmul.f32 %v14246_v61, %v10543_v5  ;;  %v14248_v38 = vld [vmem:[#allocation106_spill] sm:$0xff] }
 0x36d   : > { %14235 = vst [vmem:[#allocation176_spill] sm:$0xff] %v10785_v45  ;;  %14237 = vst [vmem:[#allocation43_spill] sm:$0xff] %v10789_v35  ;;  %v2422_v0 = vadd.f32 %v14240_v27, %v2370_v56  ;;  %v14249_v43 = vrot.slane %v10756_v46, 3  ;;  %v10831_v15 = vmul.f32 %v9856_v10, %v14252_v42  ;;  %v10838_v27 = vmul.f32 %v9991_v23, %v14255_v47 }
 0x36e   : > { %14239 = vst [vmem:[#allocation140_spill] sm:$0xff] %v10793_v24  ;;  %14242 = vst [vmem:[#allocation145_spill] sm:$0xff] %v10801_v7  ;;  %v3692_v41 = vadd.f32 %v14248_v38, %v3600_v29  ;;  %v14254_v29 = vld [vmem:[#allocation137_spill] sm:$0xff]  ;;  %v10844_v46 = vmul.f32 %v9887_v60, %v14258_v40  ;;  %v795_v47 = vmul.f32 %v5617_v53, %v14110_v31  ;;  %v14266_v31 = vld [vmem:[#allocation14_spill] sm:$0xff] }
 0x36f   : > { %14245 = vst [vmem:[#allocation60_spill] sm:$0xff] %v10807_v34  ;;  %14247 = vst [vmem:[#allocation156_spill] sm:$0xff] %v10811_v3  ;;  %v2474_v56 = vadd.f32 %v12414_v48, %v2422_v0  ;;  %v14250_v0 = vld [vmem:[#allocation9_spill] sm:$0xff]  ;;  %v10867_v53 = vmul.f32 %v14266_v31, %v9895_v33  ;;  %v903_v13 = vmul.f32 %v9991_v23, %v14132_v4 }
 0x370   : > { %v10827_v48 = vmul.f32 %v10483_v20, %v14250_v0  ;;  %14253 = vst [vmem:[#allocation94_spill] sm:$0xff] %v10831_v15  ;;  %v3784_v38 = vadd.f32 %v14254_v29, %v3692_v41  ;;  %14256 = vst [vmem:[#allocation87_spill] sm:$0xff] %v10838_v27  ;;  %v14260_v0 = vld [vmem:[#allocation13_spill] sm:$0xff]  ;;  %v14262_v41 = vld [vmem:[#allocation24_spill] sm:$0xff]  ;;  %v975_v4 = vmul.f32 %v10529_v49, %v14220_v17 }
 0x371   : > { %v2526_v61 = vadd.f32 %v14249_v43, %v2474_v56  ;;  %v14257_v43 = vrot.slane %v10766_v32, 3  ;;  %14259 = vst [vmem:[#allocation107_spill] sm:$0xff] %v10844_v46  ;;  %v10848_v42 = vmul.f32 %v10529_v49, %v14260_v0  ;;  %v833_v29 = vmul.f32 %v9856_v10, %v14262_v41  ;;  %v14265_v3 = vld [vmem:[#allocation169_spill] sm:$0xff]  ;;  %14267 = vst [vmem:[#allocation23_spill] sm:$0xff] %v10867_v53 }
 0x372   : > { %14251 = vst [vmem:[#allocation146_spill] sm:$0xff] %v10827_v48  ;;  %v3876_v12 = vadd.f32 %v14263_v21, %v3784_v38  ;;  %v831_v32 = vmul.f32 %v10483_v20, %v14262_v41 }
 0x373   : > { %v2578_v56 = vadd.f32 %v14257_v43, %v2526_v61  ;;  %14261 = vst [vmem:[#allocation99_spill] sm:$0xff] %v10848_v42  ;;  %v867_v61 = vmul.f32 %v9856_v10, %v14127_v30  ;;  %v14264_v43 = vrot.slane %v10772_v55, 3  ;;  %v849_v11 = vadd.f32 %v833_v29, %v10715_v28  ;;  %v14270_v29 = vld [vmem:[#allocation117_spill] sm:$0xff] }
 0x374   : > { %v3968_v21 = vadd.f32 %v14265_v3, %v3876_v12  ;;  %v847_v41 = vadd.f32 %v831_v32, %v795_v47  ;;  %v14268_v10 = vrot.slane %v10776_v57, 3  ;;  %v14271_v47 = vrot.slane %v10780_v59, 4  ;;  %v14273_v57 = vld [vmem:[#allocation17_spill] sm:$0xff] }
 0x375   : > { %v2630_v40 = vadd.f32 %v14264_v43, %v2578_v56  ;;  %v14269_v43 = vld [vmem:[#allocation15_spill] sm:$0xff]  ;;  %v885_v28 = vadd.f32 %v10734_v25, %v849_v11  ;;  %v5618_v56 = vld [vmem:[#allocation4 + $0xc8] sm:$0xff] }
 0x376   : > { %v10874_v0 = vmul.f32 %v14269_v43, %v10543_v5  ;;  %v4061_v3 = vadd.f32 %v14270_v29, %v3968_v21  ;;  %v883_v38 = vadd.f32 %v867_v61, %v847_v41  ;;  %v10888_v55 = vmul.f32 %v5618_v56, %v14273_v57  ;;  %v14277_v56 = vld [vmem:[#allocation19_spill] sm:$0xff] }
 0x377   : > { %v2682_v30 = vadd.f32 %v14268_v10, %v2630_v40  ;;  %v14272_v40 = vld [vmem:[#allocation16_spill] sm:$0xff]  ;;  %v921_v11 = vadd.f32 %v10739_v36, %v885_v28  ;;  %v939_v61 = vmul.f32 %v9887_v60, %v14036_v18  ;;  %v14274_v41 = vrot.slane %v10785_v45, 4 }
 0x378   : > { %v10885_v10 = vmul.f32 %v10483_v20, %v14272_v40  ;;  %v4153_v25 = vadd.f32 %v10680_v54, %v4061_v3  ;;  %v919_v21 = vadd.f32 %v903_v13, %v883_v38  ;;  %v14275_v20 = vld [vmem:[#allocation18_spill] sm:$0xff]  ;;  %v14279_v36 = vld [vmem:[#allocation20_spill] sm:$0xff]  ;;  %v1011_v38 = vmul.f32 %v14041_v37, %v9895_v33  ;;  %v10967_v3 = vld [vmem:[#allocation4 + $0x100] sm:$0xff] }
 0x379   : > { %v2774_v32 = vadd.f32 %v14271_v47, %v2682_v30  ;;  %v10900_v29 = vmul.f32 %v9991_v23, %v14275_v20  ;;  %v10904_v47 = vmul.f32 %v9887_v60, %v14277_v56  ;;  %v957_v54 = vadd.f32 %v10743_v62, %v921_v11  ;;  %v5619_v37 = vld [vmem:[#allocation4 + $0x128] sm:$0xff] }
 0x37a   : > { %v4245_v13 = vadd.f32 %v10688_v1, %v4153_v25  ;;  %v10910_v18 = vmul.f32 %v10529_v49, %v14279_v36  ;;  %v955_v17 = vadd.f32 %v939_v61, %v919_v21  ;;  %v14281_v28 = vrot.slane %v10789_v35, 4  ;;  %v14295_v49 = vld [vmem:[#allocation139_spill] sm:$0xff] }
 0x37b   : > { %v2866_v30 = vadd.f32 %v14274_v41, %v2774_v32  ;;  %14276 = vst [vmem:[#allocation154_spill] sm:$0xff] %v10900_v29  ;;  %14278 = vst [vmem:[#allocation42_spill] sm:$0xff] %v10904_v47  ;;  %v993_v32 = vadd.f32 %v10747_v52, %v957_v54  ;;  %v14282_v25 = vrot.slane %v10793_v24, 4  ;;  %v10926_v61 = vmul.f32 %v5619_v37, %v14190_v16  ;;  %v10938_v37 = vld [vmem:[#allocation4 + $0xb8] sm:$0xff] }
 0x37c   : > { %14280 = vst [vmem:[#allocation63_spill] sm:$0xff] %v10910_v18  ;;  %v4337_v62 = vadd.f32 %v10693_v44, %v4245_v13  ;;  %v991_v11 = vadd.f32 %v975_v4, %v955_v17  ;;  %v14284_v4 = vrot.slane %v10801_v7, 4  ;;  %v14285_v17 = vrot.slane %v10487_v22, 1 }
 0x37d   : > { %v2958_v23 = vadd.f32 %v14281_v28, %v2866_v30  ;;  %14283 = vst [vmem:[#allocation122_spill] sm:$0xff] %v10926_v61  ;;  %v1029_v41 = vadd.f32 %v10761_v6, %v993_v32  ;;  %v2793_v6 = vmul.f32 %v10938_v37, %v14234_v26  ;;  %v10947_v30 = vld [vmem:[#allocation4 + $0xd0] sm:$0xff]  ;;  %v10958_v33 = vmul.f32 %v14201_v14, %v10543_v5  ;;  %v14297_v5 = vld [vmem:[#allocation156_spill] sm:$0xff] }
 0x37e   : > { %v4429_v52 = vadd.f32 %v10701_v50, %v4337_v62  ;;  %v1027_v54 = vadd.f32 %v1011_v38, %v991_v11  ;;  %v10942_v50 = vpop.xlane.xlu0 %4643  ;;  %v14288_v62 = vld [vmem:[#allocation163_spill] sm:$0xff]  ;;  %v2885_v22 = vmul.f32 %v10947_v30, %v14236_v19  ;;  %v14296_v1 = vrot.slane %v14295_v49, 1 }
 0x37f   : > { %v3050_v21 = vadd.f32 %v14282_v25, %v2958_v23  ;;  %v1122_v28 = vadd.f32 %v14285_v17, %v1029_v41  ;;  %v14286_v23 = vld [vmem:[#allocation112_spill] sm:$0xff]  ;;  %14287 = vst [vmem:[#allocation172_spill] sm:$0xff] %v10942_v50  ;;  %v14289_v38 = vrot.slane %v14288_v62, 1  ;;  %14292 = vst [vmem:[#allocation164_spill] sm:$0xff] %v10958_v33  ;;  %v14298_v44 = vrot.slane %v14297_v5, 4 }
 0x380   : > { %v2701_v25 = vmul.f32 %v14286_v23, %v14232_v9  ;;  %v4521_v32 = vadd.f32 %v10706_v51, %v4429_v52  ;;  %v14293_v51 = vld [vmem:[#allocation125_spill] sm:$0xff]  ;;  %v14301_v50 = vld [vmem:[#allocation120_spill] sm:$0xff]  ;;  %v2923_v7 = vrot.slane %v2885_v22, 4  ;;  %v14305_v35 = vrot.slane %v10827_v48, 5 }
 0x381   : > { %v3142_v13 = vadd.f32 %v14284_v4, %v3050_v21  ;;  %v1120_v11 = vadd.f32 %v14289_v38, %v1027_v54  ;;  %v14290_v21 = vld [vmem:[#allocation95_spill] sm:$0xff]  ;;  %v14291_v4 = vrot.slane %v10807_v34, 4  ;;  %v14294_v52 = vrot.slane %v14293_v51, 1  ;;  %v10963_v38 = vld [vmem:[#allocation4 + $0x130] sm:$0xff]  ;;  %v14306_v5 = vld [vmem:[#allocation132_spill] sm:$0xff] }
 0x382   : > { %v2977_v41 = vmul.f32 %v14290_v21, %v14238_v8  ;;  %v4613_v62 = vadd.f32 %v10727_v63, %v4521_v32  ;;  %v14299_v51 = vld [vmem:[#allocation153_spill] sm:$0xff]  ;;  %v2739_v63 = vrot.slane %v2701_v25, 4  ;;  %v2831_v32 = vrot.slane %v2793_v6, 4  ;;  %v10989_v6 = vpop.xlane.xlu0 %4725 }
 0x383   : > { %v3234_v17 = vadd.f32 %v14291_v4, %v3142_v13  ;;  %v1214_v54 = vadd.f32 %v14294_v52, %v1122_v28  ;;  %v1212_v60 = vadd.f32 %v14296_v1, %v1120_v11  ;;  %v3069_v13 = vmul.f32 %v10967_v3, %v14241_v39  ;;  %v14303_v1 = vld [vmem:[#allocation168_spill] sm:$0xff]  ;;  %14309 = vst [vmem:[#allocation152_spill] sm:$0xff] %v10989_v6  ;;  %v14318_v6 = vld [vmem:[#allocation110_spill] sm:$0xff] }
 0x384   : > { %v3161_v4 = vmul.f32 %v14244_v2, %v10288_v58  ;;  %v14300_v28 = vrot.slane %v14299_v51, 1  ;;  %v10978_v34 = vadd.f32 %v14301_v50, %v4613_v62  ;;  %v14304_v49 = vrot.slane %v14303_v1, 1  ;;  %v14310_v51 = vld [vmem:[#allocation55_spill] sm:$0xff] }
 0x385   : > { %v3326_v12 = vadd.f32 %v14298_v44, %v3234_v17  ;;  %v3015_v24 = vrot.slane %v2977_v41, 4  ;;  %v14307_v44 = vrot.slane %v14306_v5, 1  ;;  %v3107_v41 = vrot.slane %v3069_v13, 4  ;;  %v14313_v1 = vld [vmem:[#allocation171_spill] sm:$0xff] }
 0x386   : > { %v1306_v52 = vadd.f32 %v14300_v28, %v1214_v54  ;;  %14302 = vst [vmem:[#allocation25_spill] sm:$0xff] %v10978_v34  ;;  %v1304_v11 = vadd.f32 %v14304_v49, %v1212_v60  ;;  %v14308_v54 = vld [vmem:[#allocation84_spill] sm:$0xff]  ;;  %v4676_v62 = vsel %vm4645_vm8, %v10978_v34, 0.0  ;;  %v14311_v60 = vrot.slane %v14310_v51, 1 }
 0x387   : > { %v3419_v39 = vadd.f32 %v14305_v35, %v3326_v12  ;;  %v3253_v25 = vmul.f32 %v14308_v54, %v10963_v38  ;;  %v3199_v28 = vrot.slane %v3161_v4, 4  ;;  %4677 = vadd.xlane.f32.xlu1 %v4676_v62  ;;  %v14312_v35 = vrot.slane %v10831_v15, 5  ;;  %v14315_v49 = vld [vmem:[#allocation124_spill] sm:$0xff]  ;;  %v14323_v62 = vld [vmem:[#allocation103_spill] sm:$0xff] }
 0x388   : > { %v1398_v17 = vadd.f32 %v14307_v44, %v1306_v52  ;;  %v1396_v22 = vadd.f32 %v14311_v60, %v1304_v11  ;;  %v14314_v5 = vrot.slane %v14313_v1, 1  ;;  %v14316_v44 = vrot.slane %v14315_v49, 4  ;;  %v14321_v11 = vld [vmem:[#allocation104_spill] sm:$0xff]  ;;  %v14326_v60 = vld [vmem:[#allocation35_spill] sm:$0xff]  ;;  %v14333_v49 = vld [vmem:[#allocation9_spill] sm:$0xff] }
 0x389   : > { %v3511_v12 = vadd.f32 %v14312_v35, %v3419_v39  ;;  %v14319_v48 = vrot.slane %v14318_v6, 4  ;;  %v14322_v13 = vrot.slane %v14321_v11, 1  ;;  %v14324_v51 = vrot.slane %v14323_v62, 4  ;;  %v14331_v6 = vld [vmem:[#allocation167_spill] sm:$0xff]  ;;  %v14336_v62 = vld [vmem:[#allocation46_spill] sm:$0xff] }
 0x38a   : > { %v1490_v52 = vadd.f32 %v14314_v5, %v1398_v17  ;;  %v11002_v45 = vsel %vm506_vm0, %v14316_v44, %v2739_v63  ;;  %v14327_v17 = vrot.slane %v14326_v60, 4  ;;  %v11023_v63 = vmul.f32 %v14244_v2, %v10963_v38  ;;  %v14334_v44 = vld [vmem:[#allocation82_spill] sm:$0xff]  ;;  %v14339_v2 = vld [vmem:[#allocation108_spill] sm:$0xff] }
 0x38b   : > { %14317 = vst [vmem:[#allocation102_spill] sm:$0xff] %v11002_v45  ;;  %v11007_v34 = vsel %vm506_vm0, %v14319_v48, %v2831_v32  ;;  %v1488_v4 = vadd.f32 %v14322_v13, %v1396_v22  ;;  %v11014_v39 = vsel %vm506_vm0, %v14324_v51, %v2923_v7  ;;  %v14330_v48 = vrot.slane %v10838_v27, 5  ;;  %v14358_v45 = vld [vmem:[#allocation184_spill] sm:$0xff] }
 0x38c   : > { %14320 = vst [vmem:[#allocation26_spill] sm:$0xff] %v11007_v34  ;;  %14325 = vst [vmem:[#allocation155_spill] sm:$0xff] %v11014_v39  ;;  %v11019_v35 = vsel %vm506_vm0, %v14327_v17, %v3015_v24  ;;  %v14332_v1 = vrot.slane %v14331_v6, 1  ;;  %v3291_v5 = vrot.slane %v3253_v25, 4  ;;  %v3345_v7 = vmul.f32 %v14286_v23, %v14333_v49  ;;  %v14343_v25 = vld [vmem:[#allocation118_spill] sm:$0xff] }
 0x38d   : > { %14328 = vst [vmem:[#allocation131_spill] sm:$0xff] %v11019_v35  ;;  %14329 = vst [vmem:[#allocation111_spill] sm:$0xff] %v11023_v63  ;;  %v3603_v32 = vadd.f32 %v14330_v48, %v3511_v12  ;;  %v14335_v11 = vrot.slane %v14334_v44, 1  ;;  %v14337_v24 = vrot.slane %v14336_v62, 4  ;;  %v14340_v60 = vrot.slane %v14339_v2, 4  ;;  %v14342_v12 = vld [vmem:[#allocation10_spill] sm:$0xff]  ;;  %4752 = vadd.xlane.f32.xlu1 %v14343_v25  ;;  %v11054_v2 = vpop.xlane.xlu0 %4656 }
 0x38e   : > { %v1582_v22 = vadd.f32 %v14332_v1, %v1490_v52  ;;  %v3438_v52 = vmul.f32 %v10938_v37, %v14342_v12  ;;  %v14344_v48 = vrot.slane %v10844_v46, 5  ;;  %v14345_v1 = vld [vmem:[#allocation123_spill] sm:$0xff]  ;;  %v14348_v62 = vld [vmem:[#allocation12_spill] sm:$0xff]  ;;  %14349 = vst [vmem:[#allocation33_spill] sm:$0xff] %v11054_v2  ;;  %v3990_v2 = vmul.f32 %v14286_v23, %v14272_v40 }
 0x38f   : > { %v1580_v13 = vadd.f32 %v14335_v11, %v1488_v4  ;;  %v11036_v51 = vsel %vm506_vm0, %v14337_v24, %v3107_v41  ;;  %v11041_v17 = vsel %vm506_vm0, %v14340_v60, %v3199_v28  ;;  %v14346_v4 = vrot.slane %v14345_v1, 1  ;;  %v14347_v11 = vld [vmem:[#allocation11_spill] sm:$0xff] }
 0x390   : > { %14338 = vst [vmem:[#allocation134_spill] sm:$0xff] %v11036_v51  ;;  %14341 = vst [vmem:[#allocation29_spill] sm:$0xff] %v11041_v17  ;;  %v3695_v6 = vadd.f32 %v14344_v48, %v3603_v32  ;;  %v3530_v41 = vmul.f32 %v10947_v30, %v14347_v11  ;;  %v3622_v24 = vmul.f32 %v14290_v21, %v14348_v62  ;;  %v14350_v28 = vld [vmem:[#allocation91_spill] sm:$0xff]  ;;  %v14352_v51 = vld [vmem:[#allocation13_spill] sm:$0xff]  ;;  %v14353_v48 = vrot.slane %v10848_v42, 5 }
 0x391   : > { %v1674_v44 = vadd.f32 %v14346_v4, %v1582_v22  ;;  %v14351_v60 = vrot.slane %v14350_v28, 1  ;;  %v3714_v25 = vmul.f32 %v10967_v3, %v14352_v51  ;;  %v3806_v32 = vmul.f32 %v14266_v31, %v10288_v58  ;;  %v14354_v4 = vld [vmem:[#allocation147_spill] sm:$0xff]  ;;  %v14356_v28 = vld [vmem:[#allocation128_spill] sm:$0xff] }
 0x392   : > { %v3898_v22 = vmul.f32 %v14269_v43, %v10963_v38  ;;  %v3787_v1 = vadd.f32 %v14353_v48, %v3695_v6  ;;  %v14355_v35 = vrot.slane %v14354_v4, 2  ;;  %v14359_v46 = vrot.slane %v14358_v45, 4  ;;  %v14364_v43 = vld [vmem:[#allocation114_spill] sm:$0xff] }
 0x393   : > { %v1672_v17 = vadd.f32 %v14351_v60, %v1580_v13  ;;  %v4083_v13 = vmul.f32 %v10938_v37, %v14273_v57  ;;  %v14357_v60 = vrot.slane %v14356_v28, 2  ;;  %v3384_v15 = vrot.slane %v3345_v7, 5 }
 0x394   : > { %v1767_v39 = vadd.f32 %v14355_v35, %v1674_v44  ;;  %v11077_v27 = vsel %vm506_vm0, %v14359_v46, %v3291_v5  ;;  %v3476_v42 = vrot.slane %v3438_v52, 5  ;;  %v14361_v6 = vrot.slane %v10867_v53, 5  ;;  %v14362_v35 = vld [vmem:[#allocation92_spill] sm:$0xff]  ;;  %v14367_v5 = vld [vmem:[#allocation27_spill] sm:$0xff] }
 0x395   : > { %v1765_v34 = vadd.f32 %v14357_v60, %v1672_v17  ;;  %14360 = vst [vmem:[#allocation49_spill] sm:$0xff] %v11077_v27  ;;  %v14363_v44 = vrot.slane %v14362_v35, 2  ;;  %v3568_v23 = vrot.slane %v3530_v41, 5  ;;  %v3660_v40 = vrot.slane %v3622_v24, 5  ;;  %v14371_v24 = vld [vmem:[#allocation85_spill] sm:$0xff] }
 0x396   : > { %v3879_v48 = vadd.f32 %v14361_v6, %v3787_v1  ;;  %v14365_v57 = vrot.slane %v14364_v43, 2  ;;  %v3752_v28 = vrot.slane %v3714_v25, 5  ;;  %v3844_v17 = vrot.slane %v3806_v32, 5  ;;  %v11089_v1 = vpop.xlane.xlu0 %4731  ;;  %v14369_v6 = vld [vmem:[#allocation187_spill] sm:$0xff] }
 0x397   : > { %v1859_v4 = vadd.f32 %v14363_v44, %v1767_v39  ;;  %v3936_v60 = vrot.slane %v3898_v22, 5  ;;  %v14366_v45 = vrot.slane %v10874_v0, 5  ;;  %v14368_v7 = vrot.slane %v14367_v5, 2 }
 0x398   : > { %v1857_v63 = vadd.f32 %v14365_v57, %v1765_v34  ;;  %v4029_v27 = vrot.slane %v3990_v2, 6  ;;  %v4121_v53 = vrot.slane %v4083_v13, 6  ;;  %v14370_v39 = vrot.slane %v14369_v6, 2  ;;  %v14373_v57 = vld [vmem:[#allocation65_spill] sm:$0xff]  ;;  %v14376_v13 = vld [vmem:[#allocation151_spill] sm:$0xff]  ;;  %v14382_v6 = vld [vmem:[#allocation188_spill] sm:$0xff] }
 0x399   : > { %v3971_v46 = vadd.f32 %v14366_v45, %v3879_v48  ;;  %v1951_v52 = vadd.f32 %v14368_v7, %v1859_v4  ;;  %v14372_v35 = vrot.slane %v14371_v24, 5  ;;  %v14374_v43 = vrot.slane %v14373_v57, 5 }
 0x39a   : > { %v1949_v41 = vadd.f32 %v14370_v39, %v1857_v63  ;;  %v4175_v32 = vmul.f32 %v10947_v30, %v14275_v20  ;;  %v14375_v2 = vrot.slane %v10885_v10, 6  ;;  %v14377_v48 = vrot.slane %v14376_v13, 2  ;;  %v14378_v63 = vld [vmem:[#allocation74_spill] sm:$0xff] }
 0x39b   : > { %v11096_v34 = vsel %vm3364_vm6, %v14372_v35, %v3384_v15  ;;  %v11101_v25 = vsel %vm3364_vm6, %v14374_v43, %v3476_v42  ;;  %v14379_v4 = vrot.slane %v14378_v63, 5  ;;  %v14380_v15 = vld [vmem:[#allocation185_spill] sm:$0xff]  ;;  %v11119_v42 = vpop.xlane.xlu1 %4650  ;;  %v14383_v39 = vrot.slane %v14382_v6, 2  ;;  %v14384_v35 = vld [vmem:[#allocation115_spill] sm:$0xff] }
 0x39c   : > { %v4064_v22 = vadd.f32 %v14375_v2, %v3971_v46  ;;  %v2043_v44 = vadd.f32 %v14377_v48, %v1951_v52  ;;  %v14381_v5 = vrot.slane %v14380_v15, 5  ;;  %v14385_v46 = vrot.slane %v14384_v35, 5  ;;  %v14386_v52 = vld [vmem:[#allocation86_spill] sm:$0xff]  ;;  %v14389_v2 = vld [vmem:[#allocation45_spill] sm:$0xff] }
 0x39d   : > { %v11112_v45 = vsel %vm3364_vm6, %v14379_v4, %v3568_v23  ;;  %v2041_v24 = vadd.f32 %v14383_v39, %v1949_v41  ;;  %v14387_v43 = vrot.slane %v14386_v52, 5  ;;  %v14390_v13 = vrot.slane %v14389_v2, 5  ;;  %v14393_v4 = vld [vmem:[#allocation30_spill] sm:$0xff] }
 0x39e   : > { %v11117_v7 = vsel %vm3364_vm6, %v14381_v5, %v3660_v40  ;;  %v11126_v57 = vsel %vm3364_vm6, %v14385_v46, %v3752_v28  ;;  %v14392_v48 = vrot.slane %v10888_v55, 6  ;;  %v14394_v41 = vrot.slane %v14393_v4, 2  ;;  %v14395_v5 = vld [vmem:[#allocation101_spill] sm:$0xff]  ;;  %v14398_v39 = vld [vmem:[#allocation62_spill] sm:$0xff] }
 0x39f   : > { %v11131_v23 = vsel %vm3364_vm6, %v14387_v43, %v3844_v17  ;;  %v11136_v40 = vsel %vm3364_vm6, %v14390_v13, %v3936_v60  ;;  %v14396_v6 = vrot.slane %v14395_v5, 6  ;;  %v14399_v35 = vrot.slane %v14398_v39, 6  ;;  %v14401_v46 = vld [vmem:[#allocation98_spill] sm:$0xff] }
 0x3a0   : > { %14388 = vst [vmem:[#allocation36_spill] sm:$0xff] %v11131_v23  ;;  %14391 = vst [vmem:[#allocation96_spill] sm:$0xff] %v11136_v40  ;;  %v4156_v63 = vadd.f32 %v14392_v48, %v4064_v22  ;;  %v2135_v15 = vadd.f32 %v14394_v41, %v2043_v44  ;;  %v14402_v52 = vrot.slane %v14401_v46, 2  ;;  %v4213_v43 = vrot.slane %v4175_v32, 6  ;;  %v11168_v32 = vpop.xlane.xlu1 %4653  ;;  %v11170_v41 = vpop.xlane.xlu0 %4662 }
 0x3a1   : > { %v11145_v28 = vsel %vm4009_vm7, %v14396_v6, %v4029_v27  ;;  %v11150_v17 = vsel %vm4009_vm7, %v14399_v35, %v4121_v53  ;;  %v2703_v22 = vmul.f32 %v10938_v37, %v14232_v9  ;;  %v2795_v44 = vmul.f32 %v10947_v30, %v14234_v26  ;;  %v14404_v27 = vld [vmem:[#allocation109_spill] sm:$0xff]  ;;  %v14406_v9 = vld [vmem:[#allocation180_spill] sm:$0xff]  ;;  %v14412_v35 = vld [vmem:[#allocation66_spill] sm:$0xff] }
 0x3a2   : > { %14397 = vst [vmem:[#allocation38_spill] sm:$0xff] %v11145_v28  ;;  %14400 = vst [vmem:[#allocation142_spill] sm:$0xff] %v11150_v17  ;;  %v2133_v60 = vadd.f32 %v14402_v52, %v2041_v24  ;;  %v14403_v2 = vrot.slane %v10900_v29, 6  ;;  %v14405_v48 = vrot.slane %v14404_v27, 2  ;;  %v11164_v53 = vmul.f32 %v14290_v21, %v14277_v56  ;;  %v14417_v29 = vld [vmem:[#allocation37_spill] sm:$0xff] }
 0x3a3   : > { %v2887_v24 = vmul.f32 %v14290_v21, %v14236_v19  ;;  %v14407_v5 = vrot.slane %v14406_v9, 2  ;;  %v11184_v6 = vmul.f32 %v14201_v14, %v10963_v38  ;;  %v14411_v19 = vrot.slane %v10904_v47, 6 }
 0x3a4   : > { %v4248_v13 = vadd.f32 %v14403_v2, %v4156_v63  ;;  %v2227_v4 = vadd.f32 %v14405_v48, %v2135_v15  ;;  %v11176_v63 = vmul.f32 %v10967_v3, %v14279_v36  ;;  %v11180_v15 = vmul.f32 %v14190_v16, %v10288_v58  ;;  %v14414_v2 = vld [vmem:[#allocation105_spill] sm:$0xff]  ;;  %v14415_v48 = vld [vmem:[#allocation179_spill] sm:$0xff] }
 0x3a5   : > { %v2225_v26 = vadd.f32 %v14407_v5, %v2133_v60  ;;  %14410 = vst [vmem:[#allocation39_spill] sm:$0xff] %v11184_v6  ;;  %v14413_v46 = vrot.slane %v14412_v35, 2  ;;  %v4720_v60 = vmul.f32 %v14414_v2, %v14414_v2  ;;  %v2979_v27 = vmul.f32 %v10967_v3, %v14238_v8  ;;  %v14422_v8 = vld [vmem:[#allocation68_spill] sm:$0xff]  ;;  %v14437_v6 = vld [vmem:[#allocation43_spill] sm:$0xff] }
 0x3a6   : > { %14408 = vst [vmem:[#allocation41_spill] sm:$0xff] %v11176_v63  ;;  %14409 = vst [vmem:[#allocation89_spill] sm:$0xff] %v11180_v15  ;;  %v4340_v39 = vadd.f32 %v14411_v19, %v4248_v13  ;;  %v14416_v9 = vrot.slane %v14415_v48, 2  ;;  %v14418_v17 = vrot.slane %v14417_v29, 6  ;;  %v2742_v28 = vrot.slane %v2703_v22, 4  ;;  %v14457_v15 = vld [vmem:[#allocation145_spill] sm:$0xff] }
 0x3a7   : > { %v2319_v52 = vadd.f32 %v14413_v46, %v2227_v4  ;;  %v2834_v47 = vrot.slane %v2795_v44, 4  ;;  %v14419_v13 = vrot.slane %v10910_v18, 6  ;;  %v14420_v4 = vld [vmem:[#allocation93_spill] sm:$0xff]  ;;  %v2926_v40 = vrot.slane %v2887_v24, 4  ;;  %v14459_v18 = vld [vmem:[#allocation16_spill] sm:$0xff] }
 0x3a8   : > { %v2317_v5 = vadd.f32 %v14416_v9, %v2225_v26  ;;  %v11199_v14 = vsel %vm4009_vm7, %v14418_v17, %v4213_v43  ;;  %v14421_v35 = vrot.slane %v14420_v4, 3  ;;  %v14423_v23 = vrot.slane %v14422_v8, 3  ;;  %v11211_v43 = vld [vmem:[#allocation4 + $0x148] sm:$0xff]  ;;  %v11218_v4 = vpop.xlane.xlu1 %4728 }
 0x3a9   : > { %v4432_v19 = vadd.f32 %v14419_v13, %v4340_v39  ;;  %14424 = vst [vmem:[#allocation166_spill] sm:$0xff] %v11211_v43  ;;  %v14425_v22 = vrot.slane %v10926_v61, 6  ;;  %v14426_v39 = vld [vmem:[#allocation31_spill] sm:$0xff]  ;;  %v4760_v13 = vsel %vm4641_vm5, %v4720_v60, 0.0  ;;  %v3018_v24 = vrot.slane %v2979_v27, 4  ;;  %v14431_v26 = vld [vmem:[#allocation176_spill] sm:$0xff] }
 0x3aa   : > { %v2371_v46 = vadd.f32 %v14421_v35, %v2319_v52  ;;  %v2369_v48 = vadd.f32 %v14423_v23, %v2317_v5  ;;  %v14427_v9 = vrot.slane %v14426_v39, 3  ;;  %v11220_v23 = vpop.xlane.xlu0 %4737  ;;  %v14428_v5 = vld [vmem:[#allocation81_spill] sm:$0xff]  ;;  %v14430_v17 = vrot.slane %v10780_v59, 4  ;;  %v14435_v39 = vld [vmem:[#allocation34_spill] sm:$0xff] }
 0x3ab   : > { %v4524_v44 = vadd.f32 %v14425_v22, %v4432_v19  ;;  %v14429_v35 = vrot.slane %v14428_v5, 3  ;;  %v14432_v2 = vrot.slane %v14431_v26, 4  ;;  %v14434_v60 = vrot.slane %v10958_v33, 6 }
 0x3ac   : > { %v2423_v52 = vadd.f32 %v14427_v9, %v2371_v46  ;;  %v2743_v29 = vsel %vm506_vm0, %v14430_v17, %v2742_v28  ;;  %v14433_v46 = vld [vmem:[#allocation80_spill] sm:$0xff]  ;;  %v14436_v9 = vrot.slane %v14435_v39, 3  ;;  %v14438_v5 = vrot.slane %v14437_v6, 4  ;;  %v14441_v6 = vld [vmem:[#allocation181_spill] sm:$0xff] }
 0x3ad   : > { %v2421_v8 = vadd.f32 %v14429_v35, %v2369_v48  ;;  %v2835_v19 = vsel %vm506_vm0, %v14432_v2, %v2834_v47  ;;  %v3071_v22 = vmul.f32 %v14433_v46, %v10288_v58  ;;  %v4616_v27 = vadd.f32 %v14434_v60, %v4524_v44  ;;  %v14439_v28 = vld [vmem:[#allocation44_spill] sm:$0xff] }
 0x3ae   : > { %v2475_v61 = vadd.f32 %v14436_v9, %v2423_v52  ;;  %v2927_v48 = vsel %vm506_vm0, %v14438_v5, %v2926_v40  ;;  %v3255_v59 = vmul.f32 %v14308_v54, %v11211_v43  ;;  %v14440_v26 = vrot.slane %v14439_v28, 3  ;;  %v14443_v46 = vld [vmem:[#allocation100_spill] sm:$0xff]  ;;  %v14449_v5 = vld [vmem:[#allocation111_spill] sm:$0xff] }
 0x3af   : > { %v3347_v47 = vmul.f32 %v10938_v37, %v14333_v49  ;;  %v3440_v2 = vmul.f32 %v10947_v30, %v14342_v12  ;;  %v3532_v44 = vmul.f32 %v14290_v21, %v14347_v11  ;;  %v11250_v52 = vadd.f32 %v14301_v50, %v4616_v27  ;;  %v14445_v39 = vld [vmem:[#allocation140_spill] sm:$0xff]  ;;  %v14447_v11 = vld [vmem:[#allocation161_spill] sm:$0xff] }
 0x3b0   : > { %v2473_v17 = vadd.f32 %v14440_v26, %v2421_v8  ;;  %v14442_v40 = vrot.slane %v14441_v6, 3  ;;  %v3624_v54 = vmul.f32 %v10967_v3, %v14348_v62  ;;  %v3716_v8 = vmul.f32 %v14352_v51, %v10288_v58  ;;  %v14450_v58 = vld [vmem:[#allocation15_spill] sm:$0xff]  ;;  %v11272_v26 = vpop.xlane.xlu1 %4659 }
 0x3b1   : > { %v14444_v49 = vrot.slane %v14443_v46, 3  ;;  %v14446_v12 = vrot.slane %v14445_v39, 4  ;;  %v3110_v21 = vrot.slane %v3071_v22, 4  ;;  %v3808_v50 = vmul.f32 %v14266_v31, %v10963_v38 }
 0x3b2   : > { %v2527_v35 = vadd.f32 %v14442_v40, %v2475_v61  ;;  %v4685_v61 = vsel %vm4641_vm5, %v11250_v52, 0.0  ;;  %v14448_v27 = vrot.slane %v14447_v11, 3  ;;  %v3202_v28 = vrot.slane %v14449_v5, 4  ;;  %v14455_v5 = vld [vmem:[#allocation182_spill] sm:$0xff] }
 0x3b3   : > { %v2525_v60 = vadd.f32 %v14444_v49, %v2473_v17  ;;  %v3019_v9 = vsel %vm506_vm0, %v14446_v12, %v3018_v24  ;;  %v3900_v51 = vmul.f32 %v14450_v58, %v11211_v43  ;;  %v11274_v17 = vpop.xlane.xlu0 %4743  ;;  %4686 = vadd.xlane.f32.xlu0 %v4685_v61  ;;  %v14451_v24 = vld [vmem:[#allocation121_spill] sm:$0xff]  ;;  %v3294_v31 = vrot.slane %v3255_v59, 4  ;;  %v14453_v49 = vld [vmem:[#allocation186_spill] sm:$0xff]  ;;  %v14460_v59 = vld [vmem:[#allocation159_spill] sm:$0xff] }
 0x3b4   : > { %v2579_v62 = vadd.f32 %v14448_v27, %v2527_v35  ;;  %v14452_v22 = vrot.slane %v14451_v24, 3  ;;  %v3387_v40 = vrot.slane %v3347_v47, 5  ;;  %v3479_v46 = vrot.slane %v3440_v2, 5 }
 0x3b5   : > { %v14454_v39 = vrot.slane %v14453_v49, 3  ;;  %v3571_v35 = vrot.slane %v3532_v44, 5  ;;  %v3663_v11 = vrot.slane %v3624_v54, 5  ;;  %v3755_v27 = vrot.slane %v3716_v8, 5  ;;  %v14462_v44 = vld [vmem:[#allocation60_spill] sm:$0xff]  ;;  %v14470_v49 = vld [vmem:[#allocation94_spill] sm:$0xff] }
 0x3b6   : > { %v2577_v6 = vadd.f32 %v14452_v22, %v2525_v60  ;;  %v14456_v33 = vrot.slane %v14455_v5, 3  ;;  %v14458_v63 = vrot.slane %v14457_v15, 4  ;;  %v3847_v61 = vrot.slane %v3808_v50, 5 }
 0x3b7   : > { %v2631_v12 = vadd.f32 %v14454_v39, %v2579_v62  ;;  %v3992_v60 = vmul.f32 %v10938_v37, %v14459_v18  ;;  %v14461_v47 = vrot.slane %v14460_v59, 3  ;;  %v4722_v62 = vmul.f32 %v11250_v52, %v11250_v52  ;;  %4761 = vadd.xlane.f32.xlu0 %v4760_v13  ;;  %v14468_v18 = vld [vmem:[#allocation146_spill] sm:$0xff]  ;;  %v14474_v13 = vld [vmem:[#allocation107_spill] sm:$0xff] }
 0x3b8   : > { %v2629_v58 = vadd.f32 %v14456_v33, %v2577_v6  ;;  %v3111_v43 = vsel %vm506_vm0, %v14458_v63, %v3110_v21  ;;  %v14463_v54 = vrot.slane %v14462_v44, 4  ;;  %v3939_v24 = vrot.slane %v3900_v51, 5  ;;  %v14464_v33 = vld [vmem:[#allocation183_spill] sm:$0xff]  ;;  %v14466_v63 = vld [vmem:[#allocation156_spill] sm:$0xff] }
 0x3b9   : > { %v2683_v2 = vadd.f32 %v14461_v47, %v2631_v12  ;;  %v14465_v22 = vrot.slane %v14464_v33, 3  ;;  %v14467_v21 = vrot.slane %v14466_v63, 4  ;;  %v14469_v37 = vrot.slane %v14468_v18, 5  ;;  %v14472_v51 = vld [vmem:[#allocation87_spill] sm:$0xff]  ;;  %v11324_v33 = vpop.xlane.xlu0 %4668 }
 0x3ba   : > { %v3203_v8 = vsel %vm506_vm0, %v14463_v54, %v3202_v28  ;;  %v14471_v39 = vrot.slane %v14470_v49, 5  ;;  %v14473_v5 = vrot.slane %v14472_v51, 5  ;;  %v14475_v59 = vrot.slane %v14474_v13, 5  ;;  %v14476_v47 = vld [vmem:[#allocation99_spill] sm:$0xff]  ;;  %v4735_v54 = vpop.xlane.xlu1 %4734  ;;  %v14484_v51 = vld [vmem:[#allocation26_spill] sm:$0xff] }
 0x3bb   : > { %v2681_v15 = vadd.f32 %v14465_v22, %v2629_v58  ;;  %v3295_v50 = vsel %vm506_vm0, %v14467_v21, %v3294_v31  ;;  %v11302_v6 = vsel %vm3364_vm6, %v14469_v37, %v3387_v40  ;;  %v2775_v28 = vadd.f32 %v2743_v29, %v2683_v2  ;;  %v14479_v2 = vld [vmem:[#allocation23_spill] sm:$0xff]  ;;  %v14481_v21 = vld [vmem:[#allocation17_spill] sm:$0xff] }
 0x3bc   : > { %v11307_v12 = vsel %vm3364_vm6, %v14471_v39, %v3479_v46  ;;  %v11312_v58 = vsel %vm3364_vm6, %v14473_v5, %v3571_v35  ;;  %v11317_v31 = vsel %vm3364_vm6, %v14475_v59, %v3663_v11  ;;  %v14477_v44 = vrot.slane %v14476_v47, 5  ;;  %v14478_v46 = vld [vmem:[#allocation102_spill] sm:$0xff]  ;;  %v14483_v39 = vld [vmem:[#allocation172_spill] sm:$0xff]  ;;  %v14486_v47 = vld [vmem:[#allocation155_spill] sm:$0xff] }
 0x3bd   : > { %v2773_v29 = vadd.f32 %v14478_v46, %v2681_v15  ;;  %v14480_v22 = vrot.slane %v14479_v2, 5  ;;  %v4032_v63 = vrot.slane %v3992_v60, 6  ;;  %v11334_v11 = vmul.f32 %v10947_v30, %v14481_v21  ;;  %v14488_v46 = vld [vmem:[#allocation33_spill] sm:$0xff]  ;;  %v11375_v21 = vpop.xlane.xlu0 %4674 }
 0x3be   : > { %v11322_v40 = vsel %vm3364_vm6, %v14477_v44, %v3755_v27  ;;  %v4766_v18 = vsel %vm4641_vm5, %v4722_v62, 0.0  ;;  %v2867_v37 = vadd.f32 %v2835_v19, %v2775_v28  ;;  %v14482_v27 = vrot.slane %v10874_v0, 5  ;;  %v14485_v62 = vld [vmem:[#allocation152_spill] sm:$0xff] }
 0x3bf   : > { %v11330_v35 = vsel %vm3364_vm6, %v14480_v22, %v3847_v61  ;;  %v11343_v15 = vmul.f32 0.03125, %v14483_v39  ;;  %v2865_v5 = vadd.f32 %v14484_v51, %v2773_v29  ;;  %4767 = vadd.xlane.f32.xlu0 %v4766_v18  ;;  %v5623_v61 = vld [vmem:[#allocation4 + $0xe8] sm:$0xff]  ;;  %v11350_v30 = vmul.f32 0.03125, %v11119_v42  ;;  %v4666_v22 = vpop.xlane.xlu1 %4665  ;;  %v14489_v18 = vld [vmem:[#allocation131_spill] sm:$0xff]  ;;  %v14490_v51 = vld [vmem:[#allocation134_spill] sm:$0xff] }
 0x3c0   : > { %v11340_v49 = vsel %vm3364_vm6, %v14482_v27, %v3939_v24  ;;  %v11347_v60 = vmul.f32 %v5623_v61, %v14275_v20  ;;  %v4772_v19 = vmul.f32 0.03125, %v14485_v62  ;;  %v2959_v28 = vadd.f32 %v2927_v48, %v2867_v37  ;;  %v5624_v24 = vld [vmem:[#allocation4 + $0x118] sm:$0xff] }
 0x3c1   : > { %v11355_v0 = vmul.f32 %v10967_v3, %v14277_v56  ;;  %v11358_v13 = vmul.f32 %v5624_v24, %v14279_v36  ;;  %v4788_v59 = vmul.f32 %v11343_v15, %v11343_v15  ;;  %v2957_v20 = vadd.f32 %v14486_v47, %v2865_v5 }
 0x3c2   : > { %v14487_v44 = vrot.slane %v10885_v10, 6  ;;  %v4124_v48 = vrot.slane %v11334_v11, 6  ;;  %v11370_v29 = vmul.f32 0.03125, %v14488_v46  ;;  %v3051_v56 = vadd.f32 %v3019_v9, %v2959_v28 }
 0x3c3   : > { %v4790_v36 = vmul.f32 %v11350_v30, %v11350_v30  ;;  %v4804_v3 = vsub.f32 %v4772_v19, %v4788_v59  ;;  %v4774_v2 = vmul.f32 0.03125, %v11089_v1  ;;  %v3049_v10 = vadd.f32 %v14489_v18, %v2957_v20  ;;  %v4741_v46 = vpop.xlane.xlu1 %4740 }
 0x3c4   : > { %v11366_v42 = vsel %vm4009_vm7, %v14487_v44, %v4032_v63  ;;  %v11380_v63 = vmul.f32 %v14190_v16, %v10963_v38  ;;  %v11383_v11 = vmul.f32 0.03125, %v11168_v32  ;;  %v11386_v9 = vmul.f32 0.03125, %v11170_v41 }
 0x3c5   : > { %v3143_v37 = vadd.f32 %v3111_v43, %v3051_v56  ;;  %v4820_v27 = vmax.f32 %v4804_v3, 0.0  ;;  %v4806_v39 = vsub.f32 %v4774_v2, %v4790_v36  ;;  %v4776_v1 = vmul.f32 0.03125, %v11220_v23  ;;  %v14491_v43 = vld [vmem:[#allocation29_spill] sm:$0xff]  ;;  %v4750_v56 = vpop.xlane.xlu0 %4749 }
 0x3c6   : > { %v3141_v5 = vadd.f32 %v14490_v51, %v3049_v10  ;;  %v4216_v61 = vrot.slane %v11347_v60, 6  ;;  %v4308_v62 = vrot.slane %v11355_v0, 6  ;;  %v4792_v16 = vmul.f32 %v11370_v29, %v11370_v29 }
 0x3c7   : > { %v3235_v38 = vadd.f32 %v3203_v8, %v3143_v37  ;;  %v4852_v32 = vadd.f32 1e-05, %v4820_v27  ;;  %v4822_v19 = vmax.f32 %v4806_v39, 0.0  ;;  %v4791_v41 = vmul.f32 %v11383_v11, %v11383_v11  ;;  %v14492_v8 = vld [vmem:[#allocation49_spill] sm:$0xff] }
 0x3c8   : > { %v3233_v28 = vadd.f32 %v14491_v43, %v3141_v5  ;;  %v4794_v23 = vmul.f32 %v11386_v9, %v11386_v9  ;;  %v4808_v24 = vsub.f32 %v4776_v1, %v4792_v16  ;;  %v4778_v59 = vmul.f32 0.03125, %v11274_v17 }
 0x3c9   : > { %v3327_v47 = vadd.f32 %v3295_v50, %v3235_v38  ;;  %5525 = vrsqrt.f32 %v4852_v32  ;;  %v4854_v20 = vadd.f32 1e-05, %v4822_v19  ;;  %v4775_v44 = vmul.f32 0.03125, %v4735_v54  ;;  %v14494_v38 = vld [vmem:[#allocation61_spill] sm:$0xff]  ;;  %v4648_v43 = vpop.xlane.xlu0 %4647 }
 0x3ca   : > { %v3325_v36 = vadd.f32 %v14492_v8, %v3233_v28  ;;  %v4400_v3 = vrot.slane %v11358_v13, 6  ;;  %v4824_v2 = vmax.f32 %v4808_v24, 0.0  ;;  %v11403_v18 = vmul.f32 0.03125, %v11272_v26  ;;  %v14495_v32 = vld [vmem:[#allocation129_spill] sm:$0xff] }
 0x3cb   : > { %v3420_v10 = vadd.f32 %v11302_v6, %v3327_v47  ;;  %5527 = vrsqrt.f32 %v4854_v20  ;;  %v4810_v37 = vsub.f32 %v4778_v59, %v4794_v23  ;;  %v4807_v27 = vsub.f32 %v4775_v44, %v4791_v41  ;;  %v11441_v44 = vld [vmem:[%s11673_s6] ss:$0 sm:$0xff] }
 0x3cc   : > { %v3418_v17 = vadd.f32 %v11096_v34, %v3325_v36  ;;  %v4856_v50 = vadd.f32 1e-05, %v4824_v2  ;;  %v11408_v54 = vmul.f32 0.03125, %v11324_v33  ;;  %v11410_v39 = vmul.f32 0.03125, %v4666_v22 }
 0x3cd   : > { %v3512_v1 = vadd.f32 %v11307_v12, %v3420_v10  ;;  %v14493_v51 = vrot.slane %v10888_v55, 6  ;;  %v4826_v5 = vmax.f32 %v4810_v37, 0.0  ;;  %v4823_v6 = vmax.f32 %v4807_v27, 0.0  ;;  %v14496_v12 = vld [vmem:[#allocation51_spill] sm:$0xff]  ;;  %v14497_v27 = vld [vmem:[#allocation173_spill] sm:$0xff] }
 0x3ce   : > { %v3510_v16 = vadd.f32 %v11101_v25, %v3418_v17  ;;  %v4836_v34 = vsub.f32 %v14494_v38, %v11343_v15  ;;  %v4838_v33 = vsub.f32 %v14495_v32, %v11350_v30  ;;  %5529 = vrsqrt.f32 %v4856_v50 }
 0x3cf   : > { %v11416_v26 = vsel %vm4009_vm7, %v14493_v51, %v4124_v48  ;;  %v3604_v22 = vadd.f32 %v11312_v58, %v3512_v1  ;;  %v4840_v19 = vsub.f32 %v14496_v12, %v11370_v29  ;;  %v4858_v55 = vadd.f32 1e-05, %v4826_v5  ;;  %v4747_v48 = vpop.xlane.xlu1 %4746  ;;  %v14498_v1 = vld [vmem:[#allocation36_spill] sm:$0xff] }
 0x3d0   : > { %v4855_v41 = vadd.f32 1e-05, %v4823_v6  ;;  %v3602_v28 = vadd.f32 %v11112_v45, %v3510_v16  ;;  %v4793_v25 = vmul.f32 %v11403_v18, %v11403_v18  ;;  %v4796_v15 = vmul.f32 %v11408_v54, %v11408_v54 }
 0x3d1   : > { %v4795_v30 = vmul.f32 %v11410_v39, %v11410_v39  ;;  %v3696_v58 = vadd.f32 %v11317_v31, %v3604_v22  ;;  %5531 = vrsqrt.f32 %v4858_v55  ;;  %v4777_v23 = vmul.f32 0.03125, %v4741_v46  ;;  %v14499_v22 = vld [vmem:[#allocation96_spill] sm:$0xff] }
 0x3d2   : > { %v4780_v29 = vmul.f32 0.03125, %v4750_v56  ;;  %v3694_v24 = vadd.f32 %v11117_v7, %v3602_v28  ;;  %5533 = vrsqrt.f32 %v4855_v41  ;;  %v4779_v59 = vmul.f32 0.03125, %v4747_v48 }
 0x3d3   : > { %v11435_v47 = vmul.f32 0.03125, %v4648_v43  ;;  %v5526_v45 = vpop.eup %5525  ;;  %v3788_v20 = vadd.f32 %v11322_v40, %v3696_v58  ;;  %v4773_v8 = vmul.f32 0.03125, %v11218_v4  ;;  %v4809_v31 = vsub.f32 %v4777_v23, %v4793_v25  ;;  %v11451_v40 = vld [vmem:[%s11674_s7] ss:$0 sm:$0xff] }
 0x3d4   : > { %v4812_v36 = vsub.f32 %v4780_v29, %v4796_v15  ;;  %v3786_v46 = vadd.f32 %v11126_v57, %v3694_v24  ;;  %v4884_v56 = vmul.f32 %v5526_v45, %v4836_v34  ;;  %v4811_v7 = vsub.f32 %v4779_v59, %v4795_v30  ;;  %v14501_v15 = vld [vmem:[#allocation64_spill] sm:$0xff]  ;;  %v14502_v24 = vld [vmem:[#allocation142_spill] sm:$0xff] }
 0x3d5   : > { %v4789_v2 = vmul.f32 %v11435_v47, %v11435_v47  ;;  %v5528_v10 = vpop.eup %5527  ;;  %v3880_v37 = vadd.f32 %v11330_v35, %v3788_v20  ;;  %v4839_v4 = vsub.f32 %v14497_v27, %v11383_v11  ;;  %v4825_v17 = vmax.f32 %v4809_v31, 0.0  ;;  %v14504_v20 = vld [vmem:[#allocation88_spill] sm:$0xff] }
 0x3d6   : > { %v4828_v50 = vmax.f32 %v4812_v36, 0.0  ;;  %v3878_v57 = vadd.f32 %v14498_v1, %v3786_v46  ;;  %v4907_v51 = vmul.f32 %v11441_v44, %v4884_v56  ;;  %v4886_v5 = vmul.f32 %v5528_v10, %v4838_v33  ;;  %v14500_v33 = vld [vmem:[#allocation38_spill] sm:$0xff] }
 0x3d7   : > { %v4827_v6 = vmax.f32 %v4811_v7, 0.0  ;;  %v3972_v16 = vadd.f32 %v11340_v49, %v3880_v37  ;;  %v4857_v38 = vadd.f32 1e-05, %v4825_v17  ;;  %v4805_v34 = vsub.f32 %v4773_v8, %v4789_v2  ;;  %v14508_v10 = vld [vmem:[#allocation42_spill] sm:$0xff] }
 0x3d8   : > { %v4860_v35 = vadd.f32 1e-05, %v4828_v50  ;;  %v5530_v32 = vpop.eup %5529  ;;  %v3970_v12 = vadd.f32 %v14499_v22, %v3878_v57  ;;  %v4930_v55 = vadd.f32 %v11451_v40, %v4907_v51  ;;  %v4909_v11 = vmul.f32 %v11441_v44, %v4886_v5  ;;  %v14510_v50 = vld [vmem:[#allocation63_spill] sm:$0xff]  ;;  %v14512_v57 = vld [vmem:[#allocation166_spill] sm:$0xff] }
 0x3d9   : > { %v4859_v41 = vadd.f32 1e-05, %v4827_v6  ;;  %v4065_v48 = vadd.f32 %v11366_v42, %v3972_v16  ;;  %v4888_v43 = vmul.f32 %v5530_v32, %v4840_v19  ;;  %5535 = vrsqrt.f32 %v4857_v38  ;;  %v14513_v51 = vld [vmem:[#allocation22_spill] sm:$0xff]  ;;  %v14516_v16 = vld [vmem:[#allocation56_spill] sm:$0xff] }
 0x3da   : > { %v4821_v28 = vmax.f32 %v4805_v34, 0.0  ;;  %v4063_v25 = vadd.f32 %v14500_v33, %v3970_v12  ;;  %4946 = vst.msk [vmem:[#allocation5 - $0x5] sm:$0xe0] %vm4641_vm5, %v4930_v55  ;;  %v4932_v49 = vadd.f32 %v11451_v40, %v4909_v11  ;;  %v4842_v30 = vsub.f32 %v14501_v15, %v11386_v9  ;;  %v14506_v9 = vld [vmem:[#allocation154_spill] sm:$0xff] }
 0x3db   : > { %5537 = vrsqrt.f32 %v4860_v35  ;;  %v5532_v58 = vpop.eup %5531  ;;  %v4157_v23 = vadd.f32 %v11416_v26, %v4065_v48  ;;  %v4911_v29 = vmul.f32 %v11441_v44, %v4888_v43  ;;  %v14503_v45 = vrot.slane %v11164_v53, 6  ;;  %v14518_v35 = vld [vmem:[#allocation89_spill] sm:$0xff]  ;;  %v14520_v32 = vld [vmem:[#allocation158_spill] sm:$0xff] }
 0x3dc   : > { %5539 = vrsqrt.f32 %v4859_v41  ;;  %v4853_v42 = vadd.f32 1e-05, %v4821_v28  ;;  %v5534_v19 = vpop.eup %5533  ;;  %v4155_v59 = vadd.f32 %v14502_v24, %v4063_v25  ;;  %v14505_v8 = vrot.slane %v14504_v20, 6  ;;  %4948 = vst.msk [vmem:[#allocation5 + $0x3] sm:$0xe0] %vm4641_vm5, %v4932_v49  ;;  %v14522_v41 = vld [vmem:[#allocation130_spill] sm:$0xff] }
 0x3dd   : > { %v14507_v36 = vrot.slane %v14506_v9, 6  ;;  %v4890_v26 = vmul.f32 %v5532_v58, %v4842_v30  ;;  %v4934_v7 = vadd.f32 %v11451_v40, %v4911_v29  ;;  %v4887_v2 = vmul.f32 %v5534_v19, %v4839_v4  ;;  %v14523_v28 = vld [vmem:[#allocation39_spill] sm:$0xff]  ;;  %v14527_v30 = vld [vmem:[#allocation122_spill] sm:$0xff] }
 0x3de   : > { %v4306_v31 = vsel %vm4009_vm7, %v14505_v8, %v14503_v45  ;;  %5541 = vrsqrt.f32 %v4853_v42  ;;  %v4247_v53 = vadd.f32 %v11199_v14, %v4155_v59  ;;  %v14509_v37 = vrot.slane %v14508_v10, 6  ;;  %v14525_v25 = vld [vmem:[#allocation119_spill] sm:$0xff]  ;;  %v14529_v42 = vld [vmem:[#allocation48_spill] sm:$0xff]  ;;  %v14531_v9 = vld [vmem:[#allocation174_spill] sm:$0xff] }
 0x3df   : > { %v4217_v46 = vsel %vm4009_vm7, %v14507_v36, %v4216_v61  ;;  %v4492_v27 = vrot.slane %v11380_v63, 6  ;;  %v4913_v61 = vmul.f32 %v11441_v44, %v4890_v26  ;;  %v14511_v1 = vrot.slane %v14510_v50, 6  ;;  %4950 = vst.msk [vmem:[#allocation5 + $0xb] sm:$0xe0] %vm4641_vm5, %v4934_v7  ;;  %v14514_v63 = vld [vmem:[#allocation41_spill] sm:$0xff]  ;;  %v14530_v59 = vld [vmem:[#allocation175_spill] sm:$0xff] }
 0x3e0   : > { %v4249_v56 = vadd.f32 %v4217_v46, %v4157_v23  ;;  %v4309_v60 = vsel %vm4009_vm7, %v14509_v37, %v4308_v62  ;;  %v4545_v14 = vmul.f32 %v14513_v51, %v14512_v57  ;;  %v4910_v0 = vmul.f32 %v11441_v44, %v4887_v2 }
 0x3e1   : > { %v4401_v4 = vsel %vm4009_vm7, %v14511_v1, %v4400_v3  ;;  %v4339_v5 = vadd.f32 %v4306_v31, %v4247_v53  ;;  %v4936_v62 = vadd.f32 %v11451_v40, %v4913_v61  ;;  %v14515_v6 = vrot.slane %v14514_v63, 6  ;;  %v14532_v53 = vld [vmem:[#allocation164_spill] sm:$0xff] }
 0x3e2   : > { %v4341_v17 = vadd.f32 %v4309_v60, %v4249_v56  ;;  %v14517_v38 = vrot.slane %v14516_v16, 6  ;;  %v14519_v34 = vrot.slane %v14518_v35, 6  ;;  %v14521_v3 = vrot.slane %v14520_v32, 6 }
 0x3e3   : > { %v4933_v12 = vadd.f32 %v11451_v40, %v4910_v0  ;;  %v4841_v48 = vsub.f32 %v14522_v41, %v11403_v18  ;;  %4952 = vst.msk [vmem:[#allocation5 + $0x13] sm:$0xe0] %vm4641_vm5, %v4936_v62  ;;  %v5536_v43 = vpop.eup %5535  ;;  %v14524_v33 = vrot.slane %v14523_v28, 6  ;;  %v14526_v49 = vrot.slane %v14525_v25, 6  ;;  %v14535_v41 = vld [vmem:[#allocation126_spill] sm:$0xff] }
 0x3e4   : > { %v4398_v13 = vsel %vm4009_vm7, %v14517_v38, %v14515_v6  ;;  %v4490_v22 = vsel %vm4009_vm7, %v14521_v3, %v14519_v34  ;;  %v4433_v11 = vadd.f32 %v4401_v4, %v4341_v17  ;;  %v14528_v58 = vrot.slane %v14527_v30, 6  ;;  %v14534_v17 = vld [vmem:[#allocation25_spill] sm:$0xff] }
 0x3e5   : > { %v4431_v55 = vadd.f32 %v4398_v13, %v4339_v5  ;;  %v4582_v15 = vsel %vm4009_vm7, %v14526_v49, %v14524_v33  ;;  %v4584_v29 = vrot.slane %v4545_v14, 6  ;;  %4949 = vst.msk [vmem:[#allocation5 + $0xb] sm:$0x1f] %vm4645_vm8, %v4933_v12  ;;  %v4844_v19 = vsub.f32 %v14529_v42, %v11408_v54  ;;  %v5538_v18 = vpop.eup %5537  ;;  %v4681_v13 = vpop.xlane.xlu0 %4680  ;;  %v5515_v49 = vld [vmem:[%s11675_s8] sm:$0xff]  }
 0x3e6   : > { %v4493_v23 = vsel %vm4009_vm7, %v14528_v58, %v4492_v27  ;;  %v4843_v45 = vsub.f32 %v14530_v59, %v11410_v39  ;;  %v4889_v20 = vmul.f32 %v5536_v43, %v4841_v48  ;;  %v5540_v8 = vpop.eup %5539  ;;  %v4837_v36 = vsub.f32 %v14531_v9, %v11435_v47  ;;  %v5625_v39 = vld [vmem:[%s11672_s5] ss:$0 sm:$0xff]  ;;  %5427 = vmatprep.subr.bf16.mxu0 %v5515_v49 }
 0x3e7   : > { %v4523_v24 = vadd.f32 %v4490_v22, %v4431_v55  ;;  %v4892_v31 = vmul.f32 %v5538_v18, %v4844_v19  ;;  %v4525_v26 = vadd.f32 %v4493_v23, %v4433_v11  ;;  %v14533_v10 = vrot.slane %v14532_v53, 6  ;;  %5428 = vmatpush3.bf16.msra.mxu0 %v5515_v49 }
 0x3e8   : > { %v4912_v56 = vmul.f32 %v11441_v44, %v4889_v20  ;;  %v4891_v7 = vmul.f32 %v5540_v8, %v4843_v45  ;;  %v5542_v2 = vpop.eup %5541  ;;  %v4719_v50 = vmul.f32 %v14534_v17, %v14534_v17  ;;  %v4702_v35 = vmul.f32 0.03125, %v11375_v21  ;;  %v4672_v21 = vpop.xlane.xlu1 %4671  ;;  %v5517_v45 = vld [vmem:[%s11677_s10] sm:$0xff]   ;;  %v5518_v20 = vld [vmem:[%s11677_s10 + $0x8] sm:$0xff]  }
 0x3e9   : > { %v4615_v46 = vadd.f32 %v4582_v15, %v4523_v24  ;;  %v4585_v54 = vsel %vm4009_vm7, %v14533_v10, %v4584_v29  ;;  %v4915_v37 = vmul.f32 %v11441_v44, %v4892_v31  ;;  %v4885_v61 = vmul.f32 %v5542_v2, %v4837_v36  ;;  %v4756_v32 = vpop.xlane.xlu0 %4755  ;;  %v5516_v15 = vld [vmem:[%s11675_s8 + $0x8] sm:$0xff]   ;;  %5439 = vmatprep.subr.bf16.mxu1 %v5517_v45 }
 0x3ea   : > { %v4935_v47 = vadd.f32 %v11451_v40, %v4912_v56  ;;  %v4914_v27 = vmul.f32 %v11441_v44, %v4891_v7  ;;  %v4617_v57 = vadd.f32 %v4585_v54, %v4525_v26  ;;  %v4757_v5 = vsel %vm4645_vm8, %v4719_v50, 0.0  ;;  %5429 = vmatprep.subr.bf16.mxu0 %v5516_v15  ;;  %5440 = vmatpush3.bf16.msra.mxu1 %v5517_v45  ;;  %v14536_v26 = vld [vmem:[#allocation178_spill] sm:$0xff] }
 0x3eb   : > { %v11537_v60 = vadd.f32 %v5625_v39, %v4615_v46  ;;  %v4938_v1 = vadd.f32 %v11451_v40, %v4915_v37  ;;  %v4908_v14 = vmul.f32 %v11441_v44, %v4885_v61  ;;  %v4798_v3 = vmul.f32 %v4702_v35, %v4702_v35  ;;  %5430 = vmatpush3.bf16.msra.mxu0 %v5516_v15 }
 0x3ec   : > { %4951 = vst.msk [vmem:[#allocation5 + $0x13] sm:$0x1f] %vm4645_vm8, %v4935_v47  ;;  %v4937_v51 = vadd.f32 %v11451_v40, %v4914_v27  ;;  %v11553_v62 = vadd.f32 %v5625_v39, %v4617_v57  ;;  %v4782_v22 = vmul.f32 0.03125, %v4756_v32  ;;  %v4846_v48 = vsub.f32 %v14535_v41, %v4702_v35  ;;  %v4963_v58 = vld [vmem:[#allocation5 + $0x8] sm:$0xff]  ;;  %5441 = vmatprep.subr.bf16.mxu1 %v5518_v20 }
 0x3ed   : > { %v4682_v4 = vsel %vm4645_vm8, %v11537_v60, 0.0  ;;  %4954 = vst.msk [vmem:[#allocation5 + $0x1b] sm:$0xe0] %vm4641_vm5, %v4938_v1  ;;  %v4931_v0 = vadd.f32 %v11451_v40, %v4908_v14  ;;  %v4721_v6 = vmul.f32 %v11537_v60, %v11537_v60  ;;  %v4701_v19 = vmul.f32 0.03125, %v4672_v21 }
 0x3ee   : > { %4683 = vadd.xlane.f32.xlu1 %v4682_v4  ;;  %4953 = vst.msk [vmem:[#allocation5 + $0x1b] sm:$0x1f] %vm4645_vm8, %v4937_v51  ;;  %v4688_v63 = vsel %vm4645_vm8, %v11553_v62, 0.0  ;;  %v4723_v38 = vmul.f32 %v11553_v62, %v11553_v62  ;;  %v4814_v12 = vsub.f32 %v4782_v22, %v4798_v3  ;;  %5442 = vmatpush3.bf16.msra.mxu1 %v5518_v20  ;;  %v4704_v37 = vmul.f32 0.03125, %v4681_v13 }
 0x3ef   : > { %4947 = vst.msk [vmem:[#allocation5 + $0x3] sm:$0x1f] %vm4645_vm8, %v4931_v0  ;;  %v4763_v16 = vsel %vm4645_vm8, %v4721_v6, 0.0  ;;  %v4797_v8 = vmul.f32 %v4701_v19, %v4701_v19  ;;  %v4845_v56 = vsub.f32 %v14536_v26, %v4701_v19  ;;  %v14537_v6 = vld [vmem:[#allocation105_spill] sm:$0xff] }
 0x3f0   : > { %v4769_v34 = vsel %vm4645_vm8, %v4723_v38, 0.0  ;;  %v4830_v55 = vmax.f32 %v4814_v12, 0.0  ;;  %v4800_v47 = vmul.f32 %v4704_v37, %v4704_v37  ;;  %v5519_v26 = vld [vmem:[%s11677_s10 + $0x10] sm:$0xff]  }
 0x3f1   : > { %5443 = vmatprep.subr.bf16.mxu1 %v5519_v26 }
 0x3f2   : > { %4758 = vadd.xlane.f32.xlu1 %v4757_v5  ;;  %v4862_v11 = vadd.f32 1e-05, %v4830_v55  ;;  %5444 = vmatpush3.bf16.msra.mxu1 %v5519_v26 }
 0x3f3   : > { %v4964_v18 = vld [vmem:[#allocation5 + $0x10] sm:$0xff] }
 0x3f4   : > { %5543 = vrsqrt.f32 %v4862_v11 }
 0x3f5   : > { %v4965_v29 = vld [vmem:[#allocation5 + $0x18] sm:$0xff] }
 0x3f6   : > { %4689 = vadd.xlane.f32.xlu1 %v4688_v63  ;;  %v4962_v30 = vld [vmem:[#allocation5] sm:$0xff]  ;;  %v4971_v24 = vpack.c.bf16 %v4965_v29, %v4964_v18 }
 0x3f7   : > { %v4970_v23 = vpack.c.bf16 %v4963_v58, %v4962_v30 }
 0x3f9   : > { %5431 = vmatprep.mubr.msk.bf16.mxu0 %vm670_vm2, %v4970_v23 }
 0x3fa   : > { %4764 = vadd.xlane.f32.xlu1 %v4763_v16  ;;  %5432 = vmatmul.mubr.msk.bf16.vlgmr.msra.gmra.mrb[8].mxu0 %vm670_vm2, %v4971_v24  ;;  %v4848_v16 = vsub.f32 %v14537_v6, %v4704_v37 }
 0x3fe   : > { %4770 = vadd.xlane.f32.xlu1 %v4769_v34  ;;  %v5544_v43 = vpop.eup %5543 }
 0x3ff   : > { %v4894_v28 = vmul.f32 %v5544_v43, %v4846_v48 }
 0x401   : > { %v4917_v33 = vmul.f32 %v11441_v44, %v4894_v28 }
 0x403   : > { %v4940_v25 = vadd.f32 %v11451_v40, %v4917_v33 }
 0x405   : > { %4956 = vst.msk [vmem:[#allocation5 + $0x23] sm:$0xe0] %vm4641_vm5, %v4940_v25 }
 0x414   : > { %v4678_v42 = vpop.xlane.xlu1 %4677 }
 0x415   : > { %v4703_v41 = vmul.f32 0.03125, %v4678_v42 }
 0x417   : > { %v4799_v43 = vmul.f32 %v4703_v41, %v4703_v41 }
 0x41a   : > { %v4753_v59 = vpop.xlane.xlu1 %4752 }
 0x41b   : > { %v4781_v31 = vmul.f32 0.03125, %v4753_v59 }
 0x41d   : > { %v4813_v9 = vsub.f32 %v4781_v31, %v4797_v8  ;;  %v4847_v8 = vsub.f32 %v14534_v17, %v4703_v41 }
 0x41f   : > { %v4829_v36 = vmax.f32 %v4813_v9, 0.0 }
 0x421   : > { %v4861_v46 = vadd.f32 1e-05, %v4829_v36 }
 0x423   : > { %5545 = vrsqrt.f32 %v4861_v46 }
 0x42d   : > { %v5546_v7 = vpop.eup %5545 }
 0x42e   : > { %v4893_v2 = vmul.f32 %v5546_v7, %v4845_v56  ;;  %v5520_v56 = vld [vmem:[%s11677_s10 + $0x18] sm:$0xff]  }
 0x42f   : > { %5445 = vmatprep.subr.bf16.mxu1 %v5520_v56 }
 0x430   : > { %v4916_v53 = vmul.f32 %v11441_v44, %v4893_v2  ;;  %5446 = vmatpush3.bf16.msra.mxu1 %v5520_v56 }
 0x432   : > { %v4939_v10 = vadd.f32 %v11451_v40, %v4916_v53  ;;  %v5521_v53 = vld [vmem:[%s11677_s10 + $0x20] sm:$0xff]  }
 0x433   : > { %5447 = vmatprep.subr.bf16.mxu1 %v5521_v53 }
 0x434   : > { %4955 = vst.msk [vmem:[#allocation5 + $0x23] sm:$0x1f] %vm4645_vm8, %v4939_v10  ;;  %5448 = vmatpush3.bf16.msra.mxu1 %v5521_v53 }
 0x440   : > { %v4687_v54 = vpop.xlane.xlu0 %4686 }
 0x441   : > { %v4706_v27 = vmul.f32 0.03125, %v4687_v54 }
 0x443   : > { %v4802_v4 = vmul.f32 %v4706_v27, %v4706_v27  ;;  %v4850_v35 = vsub.f32 %v11250_v52, %v4706_v27 }
 0x444   : > { %v4762_v39 = vpop.xlane.xlu0 %4761 }
 0x445   : > { %v4784_v61 = vmul.f32 0.03125, %v4762_v39 }
 0x447   : > { %v4816_v50 = vsub.f32 %v4784_v61, %v4800_v47  ;;  %v4966_v61 = vld [vmem:[#allocation5 + $0x20] sm:$0xff] }
 0x449   : > { %v4832_v57 = vmax.f32 %v4816_v50, 0.0 }
 0x44b   : > { %v4864_v14 = vadd.f32 1e-05, %v4832_v57 }
 0x44c   : > { %v4768_v1 = vpop.xlane.xlu0 %4767 }
 0x44d   : > { %v4786_v51 = vmul.f32 0.03125, %v4768_v1  ;;  %5547 = vrsqrt.f32 %v4864_v14 }
 0x44f   : > { %v4818_v0 = vsub.f32 %v4786_v51, %v4802_v4  ;;  %v5524_v51 = vld [vmem:[%s11677_s10 + $0x38] sm:$0xff]  }
 0x451   : > { %v4834_v5 = vmax.f32 %v4818_v0, 0.0 }
 0x453   : > { %v4866_v63 = vadd.f32 1e-05, %v4834_v5 }
 0x455   : > { %5549 = vrsqrt.f32 %v4866_v63 }
 0x457   : > { %v5548_v38 = vpop.eup %5547 }
 0x458   : > { %v4896_v13 = vmul.f32 %v5548_v38, %v4848_v16 }
 0x45a   : > { %v4919_v34 = vmul.f32 %v11441_v44, %v4896_v13 }
 0x45c   : > { %v4942_v3 = vadd.f32 %v11451_v40, %v4919_v34 }
 0x45e   : > { %4958 = vst.msk [vmem:[#allocation5 + $0x2b] sm:$0xe0] %vm4641_vm5, %v4942_v3 }
 0x45f   : > { %v5550_v32 = vpop.eup %5549 }
 0x460   : > { %v4898_v22 = vmul.f32 %v5550_v32, %v4850_v35 }
 0x462   : > { %v4921_v12 = vmul.f32 %v11441_v44, %v4898_v22 }
 0x464   : > { %v4944_v55 = vadd.f32 %v11451_v40, %v4921_v12 }
 0x466   : > { %4960 = vst.msk [vmem:[#allocation5 + $0x33] sm:$0xe0] %vm4641_vm5, %v4944_v55 }
 0x47b   : > { %v4684_v11 = vpop.xlane.xlu1 %4683 }
 0x47c   : > { %v4705_v25 = vmul.f32 0.03125, %v4684_v11 }
 0x47e   : > { %v4801_v30 = vmul.f32 %v4705_v25, %v4705_v25  ;;  %v4849_v2 = vsub.f32 %v11537_v60, %v4705_v25  ;;  %v5522_v60 = vld [vmem:[%s11677_s10 + $0x28] sm:$0xff]  }
 0x47f   : > { %v4759_v48 = vpop.xlane.xlu1 %4758  ;;  %5449 = vmatprep.subr.bf16.mxu1 %v5522_v60 }
 0x480   : > { %v4783_v28 = vmul.f32 0.03125, %v4759_v48  ;;  %5450 = vmatpush3.bf16.msra.mxu1 %v5522_v60 }
 0x482   : > { %v4815_v52 = vsub.f32 %v4783_v28, %v4799_v43 }
 0x483   : > { %v4690_v33 = vpop.xlane.xlu1 %4689 }
 0x484   : > { %v4831_v21 = vmax.f32 %v4815_v52, 0.0  ;;  %v4707_v58 = vmul.f32 0.03125, %v4690_v33 }
 0x486   : > { %v4863_v49 = vadd.f32 1e-05, %v4831_v21  ;;  %v4803_v18 = vmul.f32 %v4707_v58, %v4707_v58  ;;  %v4851_v54 = vsub.f32 %v11553_v62, %v4707_v58  ;;  %v5523_v62 = vld [vmem:[%s11677_s10 + $0x30] sm:$0xff]  }
 0x487   : > { %v4765_v15 = vpop.xlane.xlu1 %4764  ;;  %5451 = vmatprep.subr.bf16.mxu1 %v5523_v62 }
 0x488   : > { %5551 = vrsqrt.f32 %v4863_v49  ;;  %v4785_v23 = vmul.f32 0.03125, %v4765_v15  ;;  %5452 = vmatpush3.bf16.msra.mxu1 %v5523_v62 }
 0x489   : > { %5453 = vmatprep.subr.bf16.mxu1 %v5524_v51 }
 0x48a   : > { %v4817_v29 = vsub.f32 %v4785_v23, %v4801_v30 }
 0x48b   : > { %v4771_v19 = vpop.xlane.xlu1 %4770 }
 0x48c   : > { %v4833_v24 = vmax.f32 %v4817_v29, 0.0  ;;  %v4787_v59 = vmul.f32 0.03125, %v4771_v19  ;;  %5454 = vmatpush3.bf16.msra.mxu1 %v5524_v51 }
 0x48e   : > { %v4865_v45 = vadd.f32 1e-05, %v4833_v24  ;;  %v4819_v42 = vsub.f32 %v4787_v59, %v4803_v18 }
 0x490   : > { %5553 = vrsqrt.f32 %v4865_v45  ;;  %v4835_v20 = vmax.f32 %v4819_v42, 0.0 }
 0x492   : > { %v5552_v31 = vpop.eup %5551  ;;  %v4867_v9 = vadd.f32 1e-05, %v4835_v20 }
 0x493   : > { %v4895_v36 = vmul.f32 %v5552_v31, %v4847_v8 }
 0x494   : > { %5555 = vrsqrt.f32 %v4867_v9 }
 0x495   : > { %v4918_v46 = vmul.f32 %v11441_v44, %v4895_v36 }
 0x497   : > { %v4941_v7 = vadd.f32 %v11451_v40, %v4918_v46 }
 0x499   : > { %4957 = vst.msk [vmem:[#allocation5 + $0x2b] sm:$0x1f] %vm4645_vm8, %v4941_v7 }
 0x49a   : > { %v5554_v17 = vpop.eup %5553 }
 0x49b   : > { %v4897_v10 = vmul.f32 %v5554_v17, %v4849_v2 }
 0x49d   : > { %v4920_v37 = vmul.f32 %v11441_v44, %v4897_v10 }
 0x49e   : > { %v5556_v39 = vpop.eup %5555 }
 0x49f   : > { %v4943_v47 = vadd.f32 %v11451_v40, %v4920_v37  ;;  %v4899_v27 = vmul.f32 %v5556_v39, %v4851_v54 }
 0x4a0   : > { %v4967_v50 = vld [vmem:[#allocation5 + $0x28] sm:$0xff] }
 0x4a1   : > { %4959 = vst.msk [vmem:[#allocation5 + $0x33] sm:$0x1f] %vm4645_vm8, %v4943_v47  ;;  %v4922_v1 = vmul.f32 %v11441_v44, %v4899_v27  ;;  %v4972_v4 = vpack.c.bf16 %v4967_v50, %v4966_v61 }
 0x4a3   : > { %v4945_v57 = vadd.f32 %v11451_v40, %v4922_v1  ;;  %5435 = vmatprep.mubr.msk.bf16.mxu0 %vm670_vm2, %v4972_v4  ;;  %v5359_v40 = vld [vmem:[%s11676_s9] ss:$0 sm:$0xff] }
 0x4a5   : > { %4961 = vst.msk [vmem:[#allocation5 + $0x3b] sm:$0x1f] %vm4645_vm8, %v4945_v57 }
 0x4a8   : > { %v4968_v44 = vld [vmem:[#allocation5 + $0x30] sm:$0xff] }
 0x4ac   : > { %v4969_v14 = vld [vmem:[#allocation5 + $0x38] sm:$0xff] }
 0x4ad   : > { %v4973_v0 = vpack.c.bf16 %v4969_v14, %v4968_v44  ;;  %v5366_v44 = vld [vmem:[%s11678_s11] ss:$0 sm:$0xff] }
 0x4af   : > { %5436 = vmatmul.mubr.msk.bf16.gmra.mrb[12].mxu0 %vm670_vm2, %v4973_v0 }
 0x4cd   : > { %v5433_v5 = vpop.f32.mrb[8].mxu0 }
 0x4ce   : > { %v5052_v63 = vadd.f32 %v5433_v5, %v5359_v40  ;;  %v5043_v6 = vpop.f32.mrb[9].mxu0 }
 0x4cf   : > { %v5044_v16 = vadd.f32 %v5359_v40, %v5043_v6  ;;  %v5434_v38 = vpop.f32.mrb[10].mxu0  ;;  %v14538_v6 = vld [vmem:[#allocation138_spill] sm:$0xff] }
 0x4d0   : > { %v5084_v13 = vmul.f32 0.70710677, %v5052_v63  ;;  %v5055_v35 = vadd.f32 %v5434_v38, %v5359_v40  ;;  %v5046_v34 = vpop.f32.mrb[11].mxu0  ;;  %v5076_v52 = vmul.f32 0.5, %v5052_v63 }
 0x4d1   : > { %v5082_v32 = vmul.f32 0.70710677, %v5044_v16  ;;  %v5047_v3 = vadd.f32 %v5359_v40, %v5046_v34  ;;  %v5074_v21 = vmul.f32 0.5, %v5044_v16 }
 0x4d2   : > { %5557 = verf.f32 %v5084_v13  ;;  %v5085_v22 = vmul.f32 0.70710677, %v5055_v35  ;;  %v5077_v33 = vmul.f32 0.5, %v5055_v35  ;;  %v14539_v35 = vld [vmem:[#allocation141_spill] sm:$0xff] }
 0x4d3   : > { %5559 = verf.f32 %v5082_v32  ;;  %v5083_v12 = vmul.f32 0.70710677, %v5047_v3  ;;  %v5075_v49 = vmul.f32 0.5, %v5047_v3  ;;  %v14540_v3 = vld [vmem:[#allocation144_spill] sm:$0xff] }
 0x4d4   : > { %5561 = verf.f32 %v5085_v22 }
 0x4d5   : > { %5563 = verf.f32 %v5083_v12  ;;  %v14541_v12 = vld [vmem:[#allocation148_spill] sm:$0xff] }
 0x4dc   : > { %v5558_v55 = vpop.eup %5557 }
 0x4dd   : > { %v5560_v11 = vpop.eup %5559  ;;  %v5100_v41 = vadd.f32 1.0, %v5558_v55 }
 0x4de   : > { %v5562_v48 = vpop.eup %5561  ;;  %v5098_v43 = vadd.f32 1.0, %v5560_v11 }
 0x4df   : > { %v5564_v28 = vpop.eup %5563  ;;  %v5101_v25 = vadd.f32 1.0, %v5562_v48  ;;  %v5108_v30 = vmul.f32 %v5100_v41, %v5076_v52  ;;  %v14542_v52 = vld [vmem:[#allocation157_spill] sm:$0xff] }
 0x4e0   : > { %v5099_v15 = vadd.f32 1.0, %v5564_v28  ;;  %v5106_v23 = vmul.f32 %v5098_v43, %v5074_v21 }
 0x4e1   : > { %v5109_v58 = vmul.f32 %v5101_v25, %v5077_v33 }
 0x4e2   : > { %v5107_v29 = vmul.f32 %v5099_v15, %v5075_v49  ;;  %v14543_v49 = vld [vmem:[#allocation160_spill] sm:$0xff] }
 0x4e3   : > { %v5115_v19 = vpack.c.bf16 %v5109_v58, %v5108_v30  ;;  %v14544_v58 = vld [vmem:[#allocation162_spill] sm:$0xff] }
 0x4e4   : > { %v5114_v18 = vpack.c.bf16 %v5107_v29, %v5106_v23  ;;  %v14545_v29 = vld [vmem:[#allocation165_spill] sm:$0xff] }
 0x4e6   : > { %5455 = vmatprep.mubr.bf16.mxu1 %v5114_v18 }
 0x4e7   : > { %5456 = vmatmul.mubr.bf16.vlgmr.msra.gmra.mrb[0].mxu1 %v5115_v19 }
 0x582   : > { %v5437_v24 = vpop.f32.mrb[12].mxu0 }
 0x583   : > { %v5068_v59 = vadd.f32 %v5437_v24, %v5359_v40  ;;  %v5059_v45 = vpop.f32.mrb[13].mxu0 }
 0x584   : > { %v5060_v42 = vadd.f32 %v5359_v40, %v5059_v45  ;;  %v5438_v20 = vpop.f32.mrb[14].mxu0 }
 0x585   : > { %v5088_v8 = vmul.f32 0.70710677, %v5068_v59  ;;  %v5071_v31 = vadd.f32 %v5438_v20, %v5359_v40  ;;  %v5062_v9 = vpop.f32.mrb[15].mxu0  ;;  %v5080_v37 = vmul.f32 0.5, %v5068_v59 }
 0x586   : > { %v5086_v36 = vmul.f32 0.70710677, %v5060_v42  ;;  %v5063_v46 = vadd.f32 %v5359_v40, %v5062_v9  ;;  %v5078_v47 = vmul.f32 0.5, %v5060_v42 }
 0x587   : > { %5565 = verf.f32 %v5088_v8  ;;  %v5089_v26 = vmul.f32 0.70710677, %v5071_v31  ;;  %v5081_v39 = vmul.f32 0.5, %v5071_v31 }
 0x588   : > { %5567 = verf.f32 %v5086_v36  ;;  %v5087_v56 = vmul.f32 0.70710677, %v5063_v46  ;;  %v5079_v27 = vmul.f32 0.5, %v5063_v46 }
 0x589   : > { %5569 = verf.f32 %v5089_v26 }
 0x58a   : > { %5571 = verf.f32 %v5087_v56 }
 0x591   : > { %v5566_v7 = vpop.eup %5565 }
 0x592   : > { %v5568_v2 = vpop.eup %5567  ;;  %v5104_v17 = vadd.f32 1.0, %v5566_v7 }
 0x593   : > { %v5570_v53 = vpop.eup %5569  ;;  %v5102_v10 = vadd.f32 1.0, %v5568_v2 }
 0x594   : > { %v5572_v54 = vpop.eup %5571  ;;  %v5105_v60 = vadd.f32 1.0, %v5570_v53  ;;  %v5112_v50 = vmul.f32 %v5104_v17, %v5080_v37 }
 0x595   : > { %v5103_v61 = vadd.f32 1.0, %v5572_v54  ;;  %v5110_v4 = vmul.f32 %v5102_v10, %v5078_v47 }
 0x596   : > { %v5113_v1 = vmul.f32 %v5105_v60, %v5081_v39 }
 0x597   : > { %v5111_v62 = vmul.f32 %v5103_v61, %v5079_v27 }
 0x598   : > { %v5117_v57 = vpack.c.bf16 %v5113_v1, %v5112_v50 }
 0x599   : > { %v5116_v51 = vpack.c.bf16 %v5111_v62, %v5110_v4 }
 0x59b   : > { %5459 = vmatprep.mubr.bf16.mxu1 %v5116_v51 }
 0x59c   : > { %5460 = vmatmul.mubr.bf16.gmra.mrb[4].mxu1 %v5117_v57 }
 0x5ba   : > { %v5457_v14 = vpop.f32.mrb[0].mxu1 }
 0x5bb   : > { %v5232_v0 = vadd.f32 %v5457_v14, %v5366_v44  ;;  %v5223_v40 = vpop.f32.mrb[1].mxu1 }
 0x5bc   : > { %v5224_v5 = vadd.f32 %v5366_v44, %v5223_v40  ;;  %v5458_v63 = vpop.f32.mrb[2].mxu1 }
 0x5bd   : > { %v5256_v16 = vadd.f32 %v5232_v0, %v14538_v6  ;;  %v5235_v38 = vadd.f32 %v5458_v63, %v5366_v44  ;;  %v5226_v13 = vpop.f32.mrb[3].mxu1 }
 0x5be   : > { %v5254_v34 = vadd.f32 %v5224_v5, %v14539_v35  ;;  %v5227_v32 = vadd.f32 %v5366_v44, %v5226_v13 }
 0x5bf   : > { %5264 = vst.msk [vmem:[%s433_s28 + $0x10] sm:$0xff] %vm670_vm2, %v5256_v16  ;;  %v5257_v22 = vadd.f32 %v5235_v38, %v14540_v3 }
 0x5c0   : > { %5262 = vst.msk [vmem:[%s433_s28] sm:$0xff] %vm670_vm2, %v5254_v34  ;;  %v5255_v55 = vadd.f32 %v5227_v32, %v14541_v12 }
 0x5c1   : > { %5265 = vst.msk [vmem:[%s433_s28 + $0x18] sm:$0xff] %vm670_vm2, %v5257_v22 }
 0x5c2   : > { %5263 = vst.msk [vmem:[%s433_s28 + $0x8] sm:$0xff] %vm670_vm2, %v5255_v55 }
 0x66f   : > { %v5461_v11 = vpop.f32.mrb[4].mxu1 }
 0x670   : > { %v5248_v41 = vadd.f32 %v5461_v11, %v5366_v44  ;;  %v5239_v48 = vpop.f32.mrb[5].mxu1 }
 0x671   : > { %v5240_v43 = vadd.f32 %v5366_v44, %v5239_v48  ;;  %v5462_v28 = vpop.f32.mrb[6].mxu1 }
 0x672   : > { %v5260_v33 = vadd.f32 %v5248_v41, %v14542_v52  ;;  %v5251_v25 = vadd.f32 %v5462_v28, %v5366_v44  ;;  %v5242_v21 = vpop.f32.mrb[7].mxu1 }
 0x673   : > { %v5258_v15 = vadd.f32 %v5240_v43, %v14543_v49  ;;  %v5243_v30 = vadd.f32 %v5366_v44, %v5242_v21 }
 0x674   : > { %5268 = vst.msk [vmem:[%s433_s28 + $0x30] sm:$0xff] %vm670_vm2, %v5260_v33  ;;  %v5261_v23 = vadd.f32 %v5251_v25, %v14544_v58 }
 0x675   : > { %5266 = vst.msk [vmem:[%s433_s28 + $0x20] sm:$0xff] %vm670_vm2, %v5258_v15  ;;  %v5259_v19 = vadd.f32 %v5243_v30, %v14545_v29 }
 0x676   : > { %5269 = vst.msk [vmem:[%s433_s28 + $0x38] sm:$0xff] %vm670_vm2, %v5261_v23 }
 0x677   : > { %5267 = vst.msk [vmem:[%s433_s28 + $0x28] sm:$0xff] %vm670_vm2, %v5259_v19 }
 0x678 PF: > { %p22_p8 = scmp.ge.s32.totalorder %s5783_s26, 4   ;;  %s14546_s21 = smov %s5682_s22 }
 0x679   : > { %s14547_s22 = smov %s5686_s23  ;;  %s14548_s23 = smov %s5793_s29 }
 0x67a   : > { %s14549_s24 = smov %s5783_s26  ;;  %24 = sbr.rel (!%p22_p8) target bundleno = 3 (0x3), region = 116 }
 0x681   :  { %5291 = vsyncpa [#allocation7], 1 }
 0x682   :  { %5293 = vsyncpa [#allocation7 + $0x1], 1 }

</bundles_post_ra>
